<compile_context>
chip_gen: v7x
topology: tpu7x:2x2x1
jax: 0.10.0
libtpu: 0.0.40
codegen_flags: <defaults>
</compile_context>

<pallas_src>
import jax
import jax.numpy as jnp
from jax.experimental import pallas as pl
from jax.experimental.pallas import tpu as pltpu

NEG_SLOPE = 0.1
BN_EPS = 1e-5
LANE = 128


def _leaky_relu(x):
    return jnp.where(x >= 0, x, NEG_SLOPE * x)


# --------------------------------------------------------------------------
# Parameter construction (deterministic, synthetic) — mirrors the PyTorch
# module: Conv2d(bias=False) + eval-mode BatchNorm2d + LeakyReLU(0.1).
# --------------------------------------------------------------------------
def make_conv_params(key, cin, cout, ksize):
    kw_, kg, kb, km, kv = jax.random.split(key, 5)
    fan_in = ksize * ksize * cin
    w = jax.random.normal(kw_, (ksize, ksize, cin, cout), jnp.float32) / (fan_in ** 0.5)
    gamma = 1.0 + 0.1 * jax.random.normal(kg, (cout,), jnp.float32)
    beta = 0.1 * jax.random.normal(kb, (cout,), jnp.float32)
    run_mean = 0.1 * jax.random.normal(km, (cout,), jnp.float32)
    run_var = jnp.abs(jax.random.normal(kv, (cout,), jnp.float32)) + 0.5
    # Fold eval-mode BatchNorm into an affine scale/bias applied post-conv.
    scale = gamma / jnp.sqrt(run_var + BN_EPS)
    bias = beta - run_mean * scale
    return (ksize, w, scale, bias)


def make_block_params(key, in_channels, mid_channels, out_channels, repeat=5):
    keys = jax.random.split(key, repeat)
    params = [make_conv_params(keys[0], in_channels, out_channels, 1)]
    for i in range(repeat - 1):
        if i % 2 == 0:
            params.append(make_conv_params(keys[i + 1], out_channels, mid_channels, 3))
        else:
            params.append(make_conv_params(keys[i + 1], mid_channels, out_channels, 1))
    return params


# --------------------------------------------------------------------------
# Kernel-side parameter prep (done once, outside the kernel): fold BN scale
# into the weights, pad channel dims to the 128-lane width with exact zeros
# (padded lanes stay zero through the chained layers since leaky(0)=0),
# keep 3x3 weights as 9 (C, C) slices, cast weights to matmul_dtype.
# Biases stay f32 (the epilogue is f32).
# --------------------------------------------------------------------------
def prepare_fused_params(params, cpad, matmul_dtype=jnp.float32):
    prepared = []
    for li, (ksize, w, scale, bias) in enumerate(params):
        wf = (w * scale[None, None, None, :]).astype(jnp.float32)   # fold BN scale
        _, _, cin, cout = wf.shape
        cin_p = cin if li == 0 else cpad     # layer 0 reads the real input channels
        wp = jnp.zeros((ksize, ksize, cin_p, cpad), jnp.float32)
        wp = wp.at[:, :, :cin, :cout].set(wf)
        bp = jnp.zeros((1, cpad), jnp.float32).at[0, :cout].set(bias)
        if ksize == 1:
            wk = wp[0, 0]                                   # (cin_p, cpad)
        else:
            wk = wp.reshape(ksize * ksize, cin_p, cpad)     # (9, cpad, cpad)
        prepared.append((ksize, wk.astype(matmul_dtype), bp))
    return prepared


# --------------------------------------------------------------------------
# Fused kernel: all `repeat` conv+BN+LeakyReLU layers for one batch element,
# entirely in the flattened padded-W row layout (NROWS = H*(W+2) rows).
# --------------------------------------------------------------------------
def _make_fused_kernel(ksizes, H, W, C, NPAD, matmul_dtype):
    WP = W + 2                      # W real columns + 2 zero gutter columns
    NROWS = H * WP                  # working row count of every layer
    HEAD = WP + 1                   # padded row 0 + left halo of padded row 1
    TAIL_START = (H + 1) * WP + 1   # rest of bottom halo row + tap-overrun rows
    TAIL_LEN = NPAD - TAIL_START
    STORE_OFF = WP + 1              # flat offset of padded position (1, 1)
    L = len(ksizes)

    def kernel(*refs):
        x_ref = refs[0]                      # (1, NROWS, Cin_real)
        wb_refs = refs[1:1 + 2 * L]          # (w, b) per layer (VMEM residents)
        o_ref = refs[1 + 2 * L]              # (1, NROWS, C)   lane-dense output
        pf_ref = refs[2 + 2 * L]             # (NPAD, C) flattened zero-haloed map

        sdtype = pf_ref.dtype

        # Re-zero only the tiny head/tail halo regions (not the whole scratch).
        # The halo columns inside [STORE_OFF, STORE_OFF+NROWS) are rewritten as
        # exact zeros by the masked store below on every 3x3 layer.
        pf_ref[pl.ds(0, HEAD), :] = jnp.zeros((HEAD, C), sdtype)
        pf_ref[pl.ds(TAIL_START, TAIL_LEN), :] = jnp.zeros((TAIL_LEN, C), sdtype)

        # Rows with (i % WP) >= W are out-of-image gutter rows; they carry
        # garbage between layers and are zeroed right before they become the
        # halo columns of the 3x3 zero padding.
        col = jax.lax.broadcasted_iota(jnp.int32, (NROWS, 1), 0) % WP
        in_image = col < W                   # (NROWS, 1)

        def conv1x1(a, w_ref, b_ref):
            y = jnp.dot(a.astype(matmul_dtype), w_ref[...],
                        preferred_element_type=jnp.float32)
            return _leaky_relu(y + b_ref[...])              # f32 epilogue

        def conv3x3(a, w_ref, b_ref):
            # One contiguous masked store re-establishes the zero-haloed padded
            # map: gutter rows land exactly on the halo columns -> stored as 0.
            pf_ref[pl.ds(STORE_OFF, NROWS), :] = jnp.where(
                in_image, a, 0.0).astype(sdtype)
            # Nine accumulating K=C matmuls; each tap is one contiguous slice.
            acc = None
            for kh in range(3):
                for kw in range(3):
                    tap = pf_ref[pl.ds(kh * WP + kw, NROWS), :]   # (NROWS, C)
                    part = jnp.dot(tap, w_ref[kh * 3 + kw],
                                   preferred_element_type=jnp.float32)
                    acc = part if acc is None else acc + part
            return _leaky_relu(acc + b_ref[...])            # f32 epilogue

        a = x_ref[0]                                        # (NROWS, Cin_real)
        for li, k in enumerate(ksizes):
            w_ref, b_ref = wb_refs[2 * li], wb_refs[2 * li + 1]
            a = conv1x1(a, w_ref, b_ref) if k == 1 else conv3x3(a, w_ref, b_ref)
        o_ref[0] = a.astype(o_ref.dtype)

    return kernel


def convolutional_block(x_nchw, params, matmul_dtype=jnp.float32,
                        vmem_limit_bytes=32 * 1024 * 1024):
    """Fused Pallas forward pass of the whole ConvolutionalBlock (NCHW in/out)."""
    N, Cin, H, W = x_nchw.shape
    WP = W + 2
    NROWS = H * WP
    NPAD = (((H + 3) * WP) + 7) // 8 * 8        # flattened haloed scratch rows

    ksizes = [p[0] for p in params]
    assert ksizes[0] == 1, "block starts with a 1x1 Convolutional layer"
    max_c = max(max(p[1].shape[2], p[1].shape[3]) for p in params)
    cpad = ((max_c + LANE - 1) // LANE) * LANE  # lane-dense channel width
    prep = prepare_fused_params(params, cpad, matmul_dtype)

    # NCHW -> NHWC with the W axis padded once to W+2 (two gutter columns per
    # row make every in-kernel 3x3 tap / padded-map store contiguous).  XLA
    # fuses the pad into the transpose copy it already performs.
    x = jnp.transpose(x_nchw, (0, 2, 3, 1))                   # (N,H,W,Cin)
    x = jnp.pad(x, ((0, 0), (0, 0), (0, 2), (0, 0))).reshape(N, NROWS, Cin)

    args = [x]
    in_specs = [pl.BlockSpec((1, NROWS, Cin), lambda n: (n, 0, 0))]
    # Grid-invariant weights/biases: whole-array VMEM residents (single copy,
    # no per-step double-buffering), already cast to matmul_dtype.
    for (_, wk, bp) in prep:
        args.extend([wk, bp])
        in_specs.append(pl.BlockSpec(memory_space=pltpu.MemorySpace.VMEM))
        in_specs.append(pl.BlockSpec(memory_space=pltpu.MemorySpace.VMEM))

    kernel = _make_fused_kernel(ksizes, H, W, cpad, NPAD, matmul_dtype)

    out = pl.pallas_call(
        kernel,
        out_shape=jax.ShapeDtypeStruct((N, NROWS, cpad), jnp.float32),
        grid=(N,),
        in_specs=in_specs,
        out_specs=pl.BlockSpec((1, NROWS, cpad), lambda n: (n, 0, 0)),
        scratch_shapes=[pltpu.VMEM((NPAD, cpad), matmul_dtype)],
        compiler_params=pltpu.CompilerParams(
            dimension_semantics=("parallel",),   # megacore: batch split over TCs
            vmem_limit_bytes=vmem_limit_bytes),
    )(*args)

    # Epilogue: drop gutter columns + padded lanes and return NCHW to match the
    # PyTorch module.  (If the consumer accepts NHWC, skip this HBM pass.)
    cout = params[-1][1].shape[-1]
    out = out.reshape(N, H, WP, cpad)[:, :, :W, :cout]
    return jnp.transpose(out, (0, 3, 1, 2))


# --------------------------------------------------------------------------
# Pure-JAX reference (for numerical sanity check).
# --------------------------------------------------------------------------
def reference_block(x_nchw, params):
    x = jnp.transpose(x_nchw, (0, 2, 3, 1))
    for (ksize, w, scale, bias) in params:
        pad = ksize // 2
        y = jax.lax.conv_general_dilated(
            x, w, window_strides=(1, 1),
            padding=((pad, pad), (pad, pad)),
            dimension_numbers=("NHWC", "HWIO", "NHWC"))
        y = y * scale[None, None, None, :] + bias[None, None, None, :]
        x = jnp.where(y >= 0, y, NEG_SLOPE * y)
    return jnp.transpose(x, (0, 3, 1, 2))


if __name__ == "__main__":
    key = jax.random.PRNGKey(0)
    k_x, k_p = jax.random.split(key)

    # Small shapes: batch=2, in_channels=4, mid_channels=32, out_channels=16, 16x16 spatial.
    N, C_in, H, W = 2, 4, 16, 16
    C_mid, C_out = 32, 16

    x = jax.random.normal(k_x, (N, C_in, H, W), jnp.float32)
    params = make_block_params(k_p, C_in, C_mid, C_out, repeat=5)

    # Default matmul_dtype=f32 keeps the check tight; switch to jnp.bfloat16 on
    # v5e/v6e/v7x production shapes (f32 accumulation + f32 epilogue preserved;
    # loosen the tolerance when doing so).
    out = convolutional_block(x, params)
    out = jax.block_until_ready(out)

    assert out.shape == (N, C_out, H, W), out.shape

    ref = jax.block_until_ready(reference_block(x, params))
    max_err = float(jnp.max(jnp.abs(out - ref)))
    assert max_err < 1e-3, f"max abs error vs reference = {max_err}"

    print("KERNEL_OK")
</pallas_src>

<mosaic_0001>
module attributes {stable_mosaic.version = 11 : i64} {
  func.func @kernel(%arg0: i32, %arg1: memref<1x288x4xf32, #tpu.memory_space<vmem>>, %arg2: memref<4x128xf32, #tpu.memory_space<vmem>>, %arg3: memref<1x128xf32, #tpu.memory_space<vmem>>, %arg4: memref<9x128x128xf32, #tpu.memory_space<vmem>>, %arg5: memref<1x128xf32, #tpu.memory_space<vmem>>, %arg6: memref<128x128xf32, #tpu.memory_space<vmem>>, %arg7: memref<1x128xf32, #tpu.memory_space<vmem>>, %arg8: memref<9x128x128xf32, #tpu.memory_space<vmem>>, %arg9: memref<1x128xf32, #tpu.memory_space<vmem>>, %arg10: memref<128x128xf32, #tpu.memory_space<vmem>>, %arg11: memref<1x128xf32, #tpu.memory_space<vmem>>, %arg12: memref<1x288x128xf32, #tpu.memory_space<vmem>>, %arg13: memref<344x128xf32, #tpu.memory_space<vmem>>) attributes {dimension_semantics = [#tpu.dimension_semantics<parallel>], iteration_bounds = array<i64: 2>, scalar_prefetch = 0 : i64, scratch_operands = 1 : i64, tpu.core_type = #tpu.core_type<tc>, window_params = [{transform_indices = @transform_0, window_bounds = array<i64: 1, 288, 4>}, {pipeline_mode = #tpu.pipeline_mode<synchronous>, transform_indices = @transform_1, window_bounds = array<i64: 4, 128>}, {pipeline_mode = #tpu.pipeline_mode<synchronous>, transform_indices = @transform_2, window_bounds = array<i64: 1, 128>}, {pipeline_mode = #tpu.pipeline_mode<synchronous>, transform_indices = @transform_3, window_bounds = array<i64: 9, 128, 128>}, {pipeline_mode = #tpu.pipeline_mode<synchronous>, transform_indices = @transform_4, window_bounds = array<i64: 1, 128>}, {pipeline_mode = #tpu.pipeline_mode<synchronous>, transform_indices = @transform_5, window_bounds = array<i64: 128, 128>}, {pipeline_mode = #tpu.pipeline_mode<synchronous>, transform_indices = @transform_6, window_bounds = array<i64: 1, 128>}, {pipeline_mode = #tpu.pipeline_mode<synchronous>, transform_indices = @transform_7, window_bounds = array<i64: 9, 128, 128>}, {pipeline_mode = #tpu.pipeline_mode<synchronous>, transform_indices = @transform_8, window_bounds = array<i64: 1, 128>}, {pipeline_mode = #tpu.pipeline_mode<synchronous>, transform_indices = @transform_9, window_bounds = array<i64: 128, 128>}, {pipeline_mode = #tpu.pipeline_mode<synchronous>, transform_indices = @transform_10, window_bounds = array<i64: 1, 128>}, {transform_indices = @transform_11, window_bounds = array<i64: 1, 288, 128>}]} {
    %cst = arith.constant 0.000000e+00 : f32
    %0 = vector.broadcast %cst : f32 to vector<19x128xf32>
    %c0 = arith.constant 0 : index
    %c0_0 = arith.constant 0 : index
    %1 = vector.load %arg13[%c0, %c0_0] : memref<344x128xf32, #tpu.memory_space<vmem>>, vector<19x128xf32>
    tpu.vector_store %arg13[%c0, %c0_0], %0 {strides = array<i32>} : memref<344x128xf32, #tpu.memory_space<vmem>>, vector<19x128xf32>,
    %cst_1 = arith.constant 0.000000e+00 : f32
    %2 = vector.broadcast %cst_1 : f32 to vector<37x128xf32>
    %c307 = arith.constant 307 : index
    %c0_2 = arith.constant 0 : index
    %3 = vector.load %arg13[%c307, %c0_2] : memref<344x128xf32, #tpu.memory_space<vmem>>, vector<37x128xf32>
    tpu.vector_store %arg13[%c307, %c0_2], %2 {strides = array<i32>} : memref<344x128xf32, #tpu.memory_space<vmem>>, vector<37x128xf32>,
    %4 = tpu.iota {dimensions = array<i32: 0>} : vector<288x1xi32>
    %c18_i32 = arith.constant 18 : i32
    %c0_i32 = arith.constant 0 : i32
    %5 = arith.cmpi eq, %c18_i32, %c0_i32 : i32
    %c1_i32 = arith.constant 1 : i32
    %6 = arith.select %5, %c1_i32, %c18_i32 : i32
    %7 = vector.broadcast %6 : i32 to vector<288x1xi32>
    %8 = arith.remsi %4, %7 : vector<288x1xi32>
    %c0_i32_3 = arith.constant 0 : i32
    %9 = vector.broadcast %c0_i32_3 : i32 to vector<288x1xi32>
    %10 = arith.cmpi ne, %8, %9 : vector<288x1xi32>
    %c0_i32_4 = arith.constant 0 : i32
    %11 = vector.broadcast %c0_i32_4 : i32 to vector<288x1xi32>
    %12 = arith.cmpi slt, %8, %11 : vector<288x1xi32>
    %c0_i32_5 = arith.constant 0 : i32
    %13 = arith.cmpi slt, %6, %c0_i32_5 : i32
    %14 = vector.broadcast %13 : i1 to vector<288x1xi1>
    %15 = vector.broadcast %14 : vector<288x1xi1> to vector<288x1xi1>
    %16 = arith.xori %12, %15 : vector<288x1xi1>
    %17 = arith.andi %16, %10 : vector<288x1xi1>
    %18 = vector.broadcast %6 : i32 to vector<288x1xi32>
    %19 = arith.addi %8, %18 : vector<288x1xi32>
    %20 = arith.select %17, %19, %8 : vector<288x1xi1>, vector<288x1xi32>
    %c16_i32 = arith.constant 16 : i32
    %21 = vector.broadcast %c16_i32 : i32 to vector<288x1xi32>
    %22 = arith.cmpi slt, %20, %21 : vector<288x1xi32>
    %c0_6 = arith.constant 0 : index
    %c0_7 = arith.constant 0 : index
    %c0_8 = arith.constant 0 : index
    %23 = vector.load %arg1[%c0_6, %c0_7, %c0_8] : memref<1x288x4xf32, #tpu.memory_space<vmem>>, vector<1x288x4xf32>
    %24 = vector.shape_cast %23 : vector<1x288x4xf32> to vector<288x4xf32>
    %c0_9 = arith.constant 0 : index
    %c0_10 = arith.constant 0 : index
    %25 = vector.load %arg2[%c0_9, %c0_10] : memref<4x128xf32, #tpu.memory_space<vmem>>, vector<4x128xf32>
    %cst_11 = arith.constant dense<0.000000e+00> : vector<288x128xf32>
    %26 = tpu.matmul %24, %25, %cst_11 {dimension_numbers = #tpu.dot_dimension_numbers<[1], [0], [0], [1], [0, 0, 1, 1], [], []>} : vector<288x4xf32>, vector<4x128xf32>, vector<288x128xf32> -> vector<288x128xf32>
    %c0_12 = arith.constant 0 : index
    %c0_13 = arith.constant 0 : index
    %27 = vector.load %arg3[%c0_12, %c0_13] : memref<1x128xf32, #tpu.memory_space<vmem>>, vector<1x128xf32>
    %28 = vector.broadcast %27 : vector<1x128xf32> to vector<288x128xf32>
    %29 = arith.addf %26, %28 : vector<288x128xf32>
    %cst_14 = arith.constant 0.000000e+00 : f32
    %30 = vector.broadcast %cst_14 : f32 to vector<288x128xf32>
    %31 = arith.cmpf oge, %29, %30 : vector<288x128xf32>
    %cst_15 = arith.constant 1.000000e-01 : f32
    %32 = vector.broadcast %cst_15 : f32 to vector<288x128xf32>
    %33 = arith.mulf %32, %29 : vector<288x128xf32>
    %34 = arith.select %31, %29, %33 : vector<288x128xi1>, vector<288x128xf32>
    %cst_16 = arith.constant 0.000000e+00 : f32
    %35 = vector.shape_cast %22 : vector<288x1xi1> to vector<288x1xi1>
    %36 = vector.broadcast %35 : vector<288x1xi1> to vector<288x128xi1>
    %37 = vector.broadcast %cst_16 : f32 to vector<288x128xf32>
    %38 = arith.select %36, %34, %37 : vector<288x128xi1>, vector<288x128xf32>
    %c19 = arith.constant 19 : index
    %c0_17 = arith.constant 0 : index
    %39 = vector.load %arg13[%c19, %c0_17] : memref<344x128xf32, #tpu.memory_space<vmem>>, vector<288x128xf32>
    tpu.vector_store %arg13[%c19, %c0_17], %38 {strides = array<i32>} : memref<344x128xf32, #tpu.memory_space<vmem>>, vector<288x128xf32>,
    %c0_18 = arith.constant 0 : index
    %c0_19 = arith.constant 0 : index
    %40 = vector.load %arg13[%c0_18, %c0_19] : memref<344x128xf32, #tpu.memory_space<vmem>>, vector<288x128xf32>
    %c0_20 = arith.constant 0 : index
    %c0_21 = arith.constant 0 : index
    %c0_22 = arith.constant 0 : index
    %41 = vector.load %arg4[%c0_20, %c0_21, %c0_22] : memref<9x128x128xf32, #tpu.memory_space<vmem>>, vector<1x128x128xf32>
    %42 = vector.shape_cast %41 : vector<1x128x128xf32> to vector<128x128xf32>
    %cst_23 = arith.constant dense<0.000000e+00> : vector<288x128xf32>
    %43 = tpu.matmul %40, %42, %cst_23 {dimension_numbers = #tpu.dot_dimension_numbers<[1], [0], [0], [1], [0, 0, 1, 1], [], []>} : vector<288x128xf32>, vector<128x128xf32>, vector<288x128xf32> -> vector<288x128xf32>
    %c1 = arith.constant 1 : index
    %c0_24 = arith.constant 0 : index
    %44 = vector.load %arg13[%c1, %c0_24] : memref<344x128xf32, #tpu.memory_space<vmem>>, vector<288x128xf32>
    %c1_25 = arith.constant 1 : index
    %c0_26 = arith.constant 0 : index
    %c0_27 = arith.constant 0 : index
    %45 = vector.load %arg4[%c1_25, %c0_26, %c0_27] : memref<9x128x128xf32, #tpu.memory_space<vmem>>, vector<1x128x128xf32>
    %46 = vector.shape_cast %45 : vector<1x128x128xf32> to vector<128x128xf32>
    %cst_28 = arith.constant dense<0.000000e+00> : vector<288x128xf32>
    %47 = tpu.matmul %44, %46, %cst_28 {dimension_numbers = #tpu.dot_dimension_numbers<[1], [0], [0], [1], [0, 0, 1, 1], [], []>} : vector<288x128xf32>, vector<128x128xf32>, vector<288x128xf32> -> vector<288x128xf32>
    %48 = arith.addf %43, %47 : vector<288x128xf32>
    %c2 = arith.constant 2 : index
    %c0_29 = arith.constant 0 : index
    %49 = vector.load %arg13[%c2, %c0_29] : memref<344x128xf32, #tpu.memory_space<vmem>>, vector<288x128xf32>
    %c2_30 = arith.constant 2 : index
    %c0_31 = arith.constant 0 : index
    %c0_32 = arith.constant 0 : index
    %50 = vector.load %arg4[%c2_30, %c0_31, %c0_32] : memref<9x128x128xf32, #tpu.memory_space<vmem>>, vector<1x128x128xf32>
    %51 = vector.shape_cast %50 : vector<1x128x128xf32> to vector<128x128xf32>
    %cst_33 = arith.constant dense<0.000000e+00> : vector<288x128xf32>
    %52 = tpu.matmul %49, %51, %cst_33 {dimension_numbers = #tpu.dot_dimension_numbers<[1], [0], [0], [1], [0, 0, 1, 1], [], []>} : vector<288x128xf32>, vector<128x128xf32>, vector<288x128xf32> -> vector<288x128xf32>
    %53 = arith.addf %48, %52 : vector<288x128xf32>
    %c18 = arith.constant 18 : index
    %c0_34 = arith.constant 0 : index
    %54 = vector.load %arg13[%c18, %c0_34] : memref<344x128xf32, #tpu.memory_space<vmem>>, vector<288x128xf32>
    %c3 = arith.constant 3 : index
    %c0_35 = arith.constant 0 : index
    %c0_36 = arith.constant 0 : index
    %55 = vector.load %arg4[%c3, %c0_35, %c0_36] : memref<9x128x128xf32, #tpu.memory_space<vmem>>, vector<1x128x128xf32>
    %56 = vector.shape_cast %55 : vector<1x128x128xf32> to vector<128x128xf32>
    %cst_37 = arith.constant dense<0.000000e+00> : vector<288x128xf32>
    %57 = tpu.matmul %54, %56, %cst_37 {dimension_numbers = #tpu.dot_dimension_numbers<[1], [0], [0], [1], [0, 0, 1, 1], [], []>} : vector<288x128xf32>, vector<128x128xf32>, vector<288x128xf32> -> vector<288x128xf32>
    %58 = arith.addf %53, %57 : vector<288x128xf32>
    %c19_38 = arith.constant 19 : index
    %c0_39 = arith.constant 0 : index
    %59 = vector.load %arg13[%c19_38, %c0_39] : memref<344x128xf32, #tpu.memory_space<vmem>>, vector<288x128xf32>
    %c4 = arith.constant 4 : index
    %c0_40 = arith.constant 0 : index
    %c0_41 = arith.constant 0 : index
    %60 = vector.load %arg4[%c4, %c0_40, %c0_41] : memref<9x128x128xf32, #tpu.memory_space<vmem>>, vector<1x128x128xf32>
    %61 = vector.shape_cast %60 : vector<1x128x128xf32> to vector<128x128xf32>
    %cst_42 = arith.constant dense<0.000000e+00> : vector<288x128xf32>
    %62 = tpu.matmul %59, %61, %cst_42 {dimension_numbers = #tpu.dot_dimension_numbers<[1], [0], [0], [1], [0, 0, 1, 1], [], []>} : vector<288x128xf32>, vector<128x128xf32>, vector<288x128xf32> -> vector<288x128xf32>
    %63 = arith.addf %58, %62 : vector<288x128xf32>
    %c20 = arith.constant 20 : index
    %c0_43 = arith.constant 0 : index
    %64 = vector.load %arg13[%c20, %c0_43] : memref<344x128xf32, #tpu.memory_space<vmem>>, vector<288x128xf32>
    %c5 = arith.constant 5 : index
    %c0_44 = arith.constant 0 : index
    %c0_45 = arith.constant 0 : index
    %65 = vector.load %arg4[%c5, %c0_44, %c0_45] : memref<9x128x128xf32, #tpu.memory_space<vmem>>, vector<1x128x128xf32>
    %66 = vector.shape_cast %65 : vector<1x128x128xf32> to vector<128x128xf32>
    %cst_46 = arith.constant dense<0.000000e+00> : vector<288x128xf32>
    %67 = tpu.matmul %64, %66, %cst_46 {dimension_numbers = #tpu.dot_dimension_numbers<[1], [0], [0], [1], [0, 0, 1, 1], [], []>} : vector<288x128xf32>, vector<128x128xf32>, vector<288x128xf32> -> vector<288x128xf32>
    %68 = arith.addf %63, %67 : vector<288x128xf32>
    %c36 = arith.constant 36 : index
    %c0_47 = arith.constant 0 : index
    %69 = vector.load %arg13[%c36, %c0_47] : memref<344x128xf32, #tpu.memory_space<vmem>>, vector<288x128xf32>
    %c6 = arith.constant 6 : index
    %c0_48 = arith.constant 0 : index
    %c0_49 = arith.constant 0 : index
    %70 = vector.load %arg4[%c6, %c0_48, %c0_49] : memref<9x128x128xf32, #tpu.memory_space<vmem>>, vector<1x128x128xf32>
    %71 = vector.shape_cast %70 : vector<1x128x128xf32> to vector<128x128xf32>
    %cst_50 = arith.constant dense<0.000000e+00> : vector<288x128xf32>
    %72 = tpu.matmul %69, %71, %cst_50 {dimension_numbers = #tpu.dot_dimension_numbers<[1], [0], [0], [1], [0, 0, 1, 1], [], []>} : vector<288x128xf32>, vector<128x128xf32>, vector<288x128xf32> -> vector<288x128xf32>
    %73 = arith.addf %68, %72 : vector<288x128xf32>
    %c37 = arith.constant 37 : index
    %c0_51 = arith.constant 0 : index
    %74 = vector.load %arg13[%c37, %c0_51] : memref<344x128xf32, #tpu.memory_space<vmem>>, vector<288x128xf32>
    %c7 = arith.constant 7 : index
    %c0_52 = arith.constant 0 : index
    %c0_53 = arith.constant 0 : index
    %75 = vector.load %arg4[%c7, %c0_52, %c0_53] : memref<9x128x128xf32, #tpu.memory_space<vmem>>, vector<1x128x128xf32>
    %76 = vector.shape_cast %75 : vector<1x128x128xf32> to vector<128x128xf32>
    %cst_54 = arith.constant dense<0.000000e+00> : vector<288x128xf32>
    %77 = tpu.matmul %74, %76, %cst_54 {dimension_numbers = #tpu.dot_dimension_numbers<[1], [0], [0], [1], [0, 0, 1, 1], [], []>} : vector<288x128xf32>, vector<128x128xf32>, vector<288x128xf32> -> vector<288x128xf32>
    %78 = arith.addf %73, %77 : vector<288x128xf32>
    %c38 = arith.constant 38 : index
    %c0_55 = arith.constant 0 : index
    %79 = vector.load %arg13[%c38, %c0_55] : memref<344x128xf32, #tpu.memory_space<vmem>>, vector<288x128xf32>
    %c8 = arith.constant 8 : index
    %c0_56 = arith.constant 0 : index
    %c0_57 = arith.constant 0 : index
    %80 = vector.load %arg4[%c8, %c0_56, %c0_57] : memref<9x128x128xf32, #tpu.memory_space<vmem>>, vector<1x128x128xf32>
    %81 = vector.shape_cast %80 : vector<1x128x128xf32> to vector<128x128xf32>
    %cst_58 = arith.constant dense<0.000000e+00> : vector<288x128xf32>
    %82 = tpu.matmul %79, %81, %cst_58 {dimension_numbers = #tpu.dot_dimension_numbers<[1], [0], [0], [1], [0, 0, 1, 1], [], []>} : vector<288x128xf32>, vector<128x128xf32>, vector<288x128xf32> -> vector<288x128xf32>
    %83 = arith.addf %78, %82 : vector<288x128xf32>
    %c0_59 = arith.constant 0 : index
    %c0_60 = arith.constant 0 : index
    %84 = vector.load %arg5[%c0_59, %c0_60] : memref<1x128xf32, #tpu.memory_space<vmem>>, vector<1x128xf32>
    %85 = vector.broadcast %84 : vector<1x128xf32> to vector<288x128xf32>
    %86 = arith.addf %83, %85 : vector<288x128xf32>
    %cst_61 = arith.constant 0.000000e+00 : f32
    %87 = vector.broadcast %cst_61 : f32 to vector<288x128xf32>
    %88 = arith.cmpf oge, %86, %87 : vector<288x128xf32>
    %cst_62 = arith.constant 1.000000e-01 : f32
    %89 = vector.broadcast %cst_62 : f32 to vector<288x128xf32>
    %90 = arith.mulf %89, %86 : vector<288x128xf32>
    %91 = arith.select %88, %86, %90 : vector<288x128xi1>, vector<288x128xf32>
    %c0_63 = arith.constant 0 : index
    %c0_64 = arith.constant 0 : index
    %92 = vector.load %arg6[%c0_63, %c0_64] : memref<128x128xf32, #tpu.memory_space<vmem>>, vector<128x128xf32>
    %cst_65 = arith.constant dense<0.000000e+00> : vector<288x128xf32>
    %93 = tpu.matmul %91, %92, %cst_65 {dimension_numbers = #tpu.dot_dimension_numbers<[1], [0], [0], [1], [0, 0, 1, 1], [], []>} : vector<288x128xf32>, vector<128x128xf32>, vector<288x128xf32> -> vector<288x128xf32>
    %c0_66 = arith.constant 0 : index
    %c0_67 = arith.constant 0 : index
    %94 = vector.load %arg7[%c0_66, %c0_67] : memref<1x128xf32, #tpu.memory_space<vmem>>, vector<1x128xf32>
    %95 = vector.broadcast %94 : vector<1x128xf32> to vector<288x128xf32>
    %96 = arith.addf %93, %95 : vector<288x128xf32>
    %cst_68 = arith.constant 0.000000e+00 : f32
    %97 = vector.broadcast %cst_68 : f32 to vector<288x128xf32>
    %98 = arith.cmpf oge, %96, %97 : vector<288x128xf32>
    %cst_69 = arith.constant 1.000000e-01 : f32
    %99 = vector.broadcast %cst_69 : f32 to vector<288x128xf32>
    %100 = arith.mulf %99, %96 : vector<288x128xf32>
    %101 = arith.select %98, %96, %100 : vector<288x128xi1>, vector<288x128xf32>
    %cst_70 = arith.constant 0.000000e+00 : f32
    %102 = vector.shape_cast %22 : vector<288x1xi1> to vector<288x1xi1>
    %103 = vector.broadcast %102 : vector<288x1xi1> to vector<288x128xi1>
    %104 = vector.broadcast %cst_70 : f32 to vector<288x128xf32>
    %105 = arith.select %103, %101, %104 : vector<288x128xi1>, vector<288x128xf32>
    %c19_71 = arith.constant 19 : index
    %c0_72 = arith.constant 0 : index
    %106 = vector.load %arg13[%c19_71, %c0_72] : memref<344x128xf32, #tpu.memory_space<vmem>>, vector<288x128xf32>
    tpu.vector_store %arg13[%c19_71, %c0_72], %105 {strides = array<i32>} : memref<344x128xf32, #tpu.memory_space<vmem>>, vector<288x128xf32>,
    %c0_73 = arith.constant 0 : index
    %c0_74 = arith.constant 0 : index
    %107 = vector.load %arg13[%c0_73, %c0_74] : memref<344x128xf32, #tpu.memory_space<vmem>>, vector<288x128xf32>
    %c0_75 = arith.constant 0 : index
    %c0_76 = arith.constant 0 : index
    %c0_77 = arith.constant 0 : index
    %108 = vector.load %arg8[%c0_75, %c0_76, %c0_77] : memref<9x128x128xf32, #tpu.memory_space<vmem>>, vector<1x128x128xf32>
    %109 = vector.shape_cast %108 : vector<1x128x128xf32> to vector<128x128xf32>
    %cst_78 = arith.constant dense<0.000000e+00> : vector<288x128xf32>
    %110 = tpu.matmul %107, %109, %cst_78 {dimension_numbers = #tpu.dot_dimension_numbers<[1], [0], [0], [1], [0, 0, 1, 1], [], []>} : vector<288x128xf32>, vector<128x128xf32>, vector<288x128xf32> -> vector<288x128xf32>
    %c1_79 = arith.constant 1 : index
    %c0_80 = arith.constant 0 : index
    %111 = vector.load %arg13[%c1_79, %c0_80] : memref<344x128xf32, #tpu.memory_space<vmem>>, vector<288x128xf32>
    %c1_81 = arith.constant 1 : index
    %c0_82 = arith.constant 0 : index
    %c0_83 = arith.constant 0 : index
    %112 = vector.load %arg8[%c1_81, %c0_82, %c0_83] : memref<9x128x128xf32, #tpu.memory_space<vmem>>, vector<1x128x128xf32>
    %113 = vector.shape_cast %112 : vector<1x128x128xf32> to vector<128x128xf32>
    %cst_84 = arith.constant dense<0.000000e+00> : vector<288x128xf32>
    %114 = tpu.matmul %111, %113, %cst_84 {dimension_numbers = #tpu.dot_dimension_numbers<[1], [0], [0], [1], [0, 0, 1, 1], [], []>} : vector<288x128xf32>, vector<128x128xf32>, vector<288x128xf32> -> vector<288x128xf32>
    %115 = arith.addf %110, %114 : vector<288x128xf32>
    %c2_85 = arith.constant 2 : index
    %c0_86 = arith.constant 0 : index
    %116 = vector.load %arg13[%c2_85, %c0_86] : memref<344x128xf32, #tpu.memory_space<vmem>>, vector<288x128xf32>
    %c2_87 = arith.constant 2 : index
    %c0_88 = arith.constant 0 : index
    %c0_89 = arith.constant 0 : index
    %117 = vector.load %arg8[%c2_87, %c0_88, %c0_89] : memref<9x128x128xf32, #tpu.memory_space<vmem>>, vector<1x128x128xf32>
    %118 = vector.shape_cast %117 : vector<1x128x128xf32> to vector<128x128xf32>
    %cst_90 = arith.constant dense<0.000000e+00> : vector<288x128xf32>
    %119 = tpu.matmul %116, %118, %cst_90 {dimension_numbers = #tpu.dot_dimension_numbers<[1], [0], [0], [1], [0, 0, 1, 1], [], []>} : vector<288x128xf32>, vector<128x128xf32>, vector<288x128xf32> -> vector<288x128xf32>
    %120 = arith.addf %115, %119 : vector<288x128xf32>
    %c18_91 = arith.constant 18 : index
    %c0_92 = arith.constant 0 : index
    %121 = vector.load %arg13[%c18_91, %c0_92] : memref<344x128xf32, #tpu.memory_space<vmem>>, vector<288x128xf32>
    %c3_93 = arith.constant 3 : index
    %c0_94 = arith.constant 0 : index
    %c0_95 = arith.constant 0 : index
    %122 = vector.load %arg8[%c3_93, %c0_94, %c0_95] : memref<9x128x128xf32, #tpu.memory_space<vmem>>, vector<1x128x128xf32>
    %123 = vector.shape_cast %122 : vector<1x128x128xf32> to vector<128x128xf32>
    %cst_96 = arith.constant dense<0.000000e+00> : vector<288x128xf32>
    %124 = tpu.matmul %121, %123, %cst_96 {dimension_numbers = #tpu.dot_dimension_numbers<[1], [0], [0], [1], [0, 0, 1, 1], [], []>} : vector<288x128xf32>, vector<128x128xf32>, vector<288x128xf32> -> vector<288x128xf32>
    %125 = arith.addf %120, %124 : vector<288x128xf32>
    %c19_97 = arith.constant 19 : index
    %c0_98 = arith.constant 0 : index
    %126 = vector.load %arg13[%c19_97, %c0_98] : memref<344x128xf32, #tpu.memory_space<vmem>>, vector<288x128xf32>
    %c4_99 = arith.constant 4 : index
    %c0_100 = arith.constant 0 : index
    %c0_101 = arith.constant 0 : index
    %127 = vector.load %arg8[%c4_99, %c0_100, %c0_101] : memref<9x128x128xf32, #tpu.memory_space<vmem>>, vector<1x128x128xf32>
    %128 = vector.shape_cast %127 : vector<1x128x128xf32> to vector<128x128xf32>
    %cst_102 = arith.constant dense<0.000000e+00> : vector<288x128xf32>
    %129 = tpu.matmul %126, %128, %cst_102 {dimension_numbers = #tpu.dot_dimension_numbers<[1], [0], [0], [1], [0, 0, 1, 1], [], []>} : vector<288x128xf32>, vector<128x128xf32>, vector<288x128xf32> -> vector<288x128xf32>
    %130 = arith.addf %125, %129 : vector<288x128xf32>
    %c20_103 = arith.constant 20 : index
    %c0_104 = arith.constant 0 : index
    %131 = vector.load %arg13[%c20_103, %c0_104] : memref<344x128xf32, #tpu.memory_space<vmem>>, vector<288x128xf32>
    %c5_105 = arith.constant 5 : index
    %c0_106 = arith.constant 0 : index
    %c0_107 = arith.constant 0 : index
    %132 = vector.load %arg8[%c5_105, %c0_106, %c0_107] : memref<9x128x128xf32, #tpu.memory_space<vmem>>, vector<1x128x128xf32>
    %133 = vector.shape_cast %132 : vector<1x128x128xf32> to vector<128x128xf32>
    %cst_108 = arith.constant dense<0.000000e+00> : vector<288x128xf32>
    %134 = tpu.matmul %131, %133, %cst_108 {dimension_numbers = #tpu.dot_dimension_numbers<[1], [0], [0], [1], [0, 0, 1, 1], [], []>} : vector<288x128xf32>, vector<128x128xf32>, vector<288x128xf32> -> vector<288x128xf32>
    %135 = arith.addf %130, %134 : vector<288x128xf32>
    %c36_109 = arith.constant 36 : index
    %c0_110 = arith.constant 0 : index
    %136 = vector.load %arg13[%c36_109, %c0_110] : memref<344x128xf32, #tpu.memory_space<vmem>>, vector<288x128xf32>
    %c6_111 = arith.constant 6 : index
    %c0_112 = arith.constant 0 : index
    %c0_113 = arith.constant 0 : index
    %137 = vector.load %arg8[%c6_111, %c0_112, %c0_113] : memref<9x128x128xf32, #tpu.memory_space<vmem>>, vector<1x128x128xf32>
    %138 = vector.shape_cast %137 : vector<1x128x128xf32> to vector<128x128xf32>
    %cst_114 = arith.constant dense<0.000000e+00> : vector<288x128xf32>
    %139 = tpu.matmul %136, %138, %cst_114 {dimension_numbers = #tpu.dot_dimension_numbers<[1], [0], [0], [1], [0, 0, 1, 1], [], []>} : vector<288x128xf32>, vector<128x128xf32>, vector<288x128xf32> -> vector<288x128xf32>
    %140 = arith.addf %135, %139 : vector<288x128xf32>
    %c37_115 = arith.constant 37 : index
    %c0_116 = arith.constant 0 : index
    %141 = vector.load %arg13[%c37_115, %c0_116] : memref<344x128xf32, #tpu.memory_space<vmem>>, vector<288x128xf32>
    %c7_117 = arith.constant 7 : index
    %c0_118 = arith.constant 0 : index
    %c0_119 = arith.constant 0 : index
    %142 = vector.load %arg8[%c7_117, %c0_118, %c0_119] : memref<9x128x128xf32, #tpu.memory_space<vmem>>, vector<1x128x128xf32>
    %143 = vector.shape_cast %142 : vector<1x128x128xf32> to vector<128x128xf32>
    %cst_120 = arith.constant dense<0.000000e+00> : vector<288x128xf32>
    %144 = tpu.matmul %141, %143, %cst_120 {dimension_numbers = #tpu.dot_dimension_numbers<[1], [0], [0], [1], [0, 0, 1, 1], [], []>} : vector<288x128xf32>, vector<128x128xf32>, vector<288x128xf32> -> vector<288x128xf32>
    %145 = arith.addf %140, %144 : vector<288x128xf32>
    %c38_121 = arith.constant 38 : index
    %c0_122 = arith.constant 0 : index
    %146 = vector.load %arg13[%c38_121, %c0_122] : memref<344x128xf32, #tpu.memory_space<vmem>>, vector<288x128xf32>
    %c8_123 = arith.constant 8 : index
    %c0_124 = arith.constant 0 : index
    %c0_125 = arith.constant 0 : index
    %147 = vector.load %arg8[%c8_123, %c0_124, %c0_125] : memref<9x128x128xf32, #tpu.memory_space<vmem>>, vector<1x128x128xf32>
    %148 = vector.shape_cast %147 : vector<1x128x128xf32> to vector<128x128xf32>
    %cst_126 = arith.constant dense<0.000000e+00> : vector<288x128xf32>
    %149 = tpu.matmul %146, %148, %cst_126 {dimension_numbers = #tpu.dot_dimension_numbers<[1], [0], [0], [1], [0, 0, 1, 1], [], []>} : vector<288x128xf32>, vector<128x128xf32>, vector<288x128xf32> -> vector<288x128xf32>
    %150 = arith.addf %145, %149 : vector<288x128xf32>
    %c0_127 = arith.constant 0 : index
    %c0_128 = arith.constant 0 : index
    %151 = vector.load %arg9[%c0_127, %c0_128] : memref<1x128xf32, #tpu.memory_space<vmem>>, vector<1x128xf32>
    %152 = vector.broadcast %151 : vector<1x128xf32> to vector<288x128xf32>
    %153 = arith.addf %150, %152 : vector<288x128xf32>
    %cst_129 = arith.constant 0.000000e+00 : f32
    %154 = vector.broadcast %cst_129 : f32 to vector<288x128xf32>
    %155 = arith.cmpf oge, %153, %154 : vector<288x128xf32>
    %cst_130 = arith.constant 1.000000e-01 : f32
    %156 = vector.broadcast %cst_130 : f32 to vector<288x128xf32>
    %157 = arith.mulf %156, %153 : vector<288x128xf32>
    %158 = arith.select %155, %153, %157 : vector<288x128xi1>, vector<288x128xf32>
    %c0_131 = arith.constant 0 : index
    %c0_132 = arith.constant 0 : index
    %159 = vector.load %arg10[%c0_131, %c0_132] : memref<128x128xf32, #tpu.memory_space<vmem>>, vector<128x128xf32>
    %cst_133 = arith.constant dense<0.000000e+00> : vector<288x128xf32>
    %160 = tpu.matmul %158, %159, %cst_133 {dimension_numbers = #tpu.dot_dimension_numbers<[1], [0], [0], [1], [0, 0, 1, 1], [], []>} : vector<288x128xf32>, vector<128x128xf32>, vector<288x128xf32> -> vector<288x128xf32>
    %c0_134 = arith.constant 0 : index
    %c0_135 = arith.constant 0 : index
    %161 = vector.load %arg11[%c0_134, %c0_135] : memref<1x128xf32, #tpu.memory_space<vmem>>, vector<1x128xf32>
    %162 = vector.broadcast %161 : vector<1x128xf32> to vector<288x128xf32>
    %163 = arith.addf %160, %162 : vector<288x128xf32>
    %cst_136 = arith.constant 0.000000e+00 : f32
    %164 = vector.broadcast %cst_136 : f32 to vector<288x128xf32>
    %165 = arith.cmpf oge, %163, %164 : vector<288x128xf32>
    %cst_137 = arith.constant 1.000000e-01 : f32
    %166 = vector.broadcast %cst_137 : f32 to vector<288x128xf32>
    %167 = arith.mulf %166, %163 : vector<288x128xf32>
    %168 = arith.select %165, %163, %167 : vector<288x128xi1>, vector<288x128xf32>
    %c0_138 = arith.constant 0 : index
    %c0_139 = arith.constant 0 : index
    %c0_140 = arith.constant 0 : index
    %169 = vector.load %arg12[%c0_138, %c0_139, %c0_140] : memref<1x288x128xf32, #tpu.memory_space<vmem>>, vector<1x288x128xf32>
    %170 = vector.shape_cast %169 : vector<1x288x128xf32> to vector<288x128xf32>
    %171 = vector.shape_cast %168 : vector<288x128xf32> to vector<1x288x128xf32>
    tpu.vector_store %arg12[%c0_138, %c0_139, %c0_140], %171 {strides = array<i32>} : memref<1x288x128xf32, #tpu.memory_space<vmem>>, vector<1x288x128xf32>,
    return
  }
  func.func @transform_0(%arg0: i32) -> (i32, i32, i32) {
    %c0_i32 = arith.constant 0 : i32
    %c0_i32_0 = arith.constant 0 : i32
    %c0_i32_1 = arith.constant 0 : i32
    return %arg0, %c0_i32, %c0_i32_0 : i32, i32, i32
  }
  func.func @transform_1(%arg0: i32) -> (i32, i32) {
    %c0_i32 = arith.constant 0 : i32
    %c0_i32_0 = arith.constant 0 : i32
    %c0_i32_1 = arith.constant 0 : i32
    return %c0_i32, %c0_i32_0 : i32, i32
  }
  func.func @transform_2(%arg0: i32) -> (i32, i32) {
    %c0_i32 = arith.constant 0 : i32
    %c0_i32_0 = arith.constant 0 : i32
    %c0_i32_1 = arith.constant 0 : i32
    return %c0_i32, %c0_i32_0 : i32, i32
  }
  func.func @transform_3(%arg0: i32) -> (i32, i32, i32) {
    %c0_i32 = arith.constant 0 : i32
    %c0_i32_0 = arith.constant 0 : i32
    %c0_i32_1 = arith.constant 0 : i32
    %c0_i32_2 = arith.constant 0 : i32
    return %c0_i32, %c0_i32_0, %c0_i32_1 : i32, i32, i32
  }
  func.func @transform_4(%arg0: i32) -> (i32, i32) {
    %c0_i32 = arith.constant 0 : i32
    %c0_i32_0 = arith.constant 0 : i32
    %c0_i32_1 = arith.constant 0 : i32
    return %c0_i32, %c0_i32_0 : i32, i32
  }
  func.func @transform_5(%arg0: i32) -> (i32, i32) {
    %c0_i32 = arith.constant 0 : i32
    %c0_i32_0 = arith.constant 0 : i32
    %c0_i32_1 = arith.constant 0 : i32
    return %c0_i32, %c0_i32_0 : i32, i32
  }
  func.func @transform_6(%arg0: i32) -> (i32, i32) {
    %c0_i32 = arith.constant 0 : i32
    %c0_i32_0 = arith.constant 0 : i32
    %c0_i32_1 = arith.constant 0 : i32
    return %c0_i32, %c0_i32_0 : i32, i32
  }
  func.func @transform_7(%arg0: i32) -> (i32, i32, i32) {
    %c0_i32 = arith.constant 0 : i32
    %c0_i32_0 = arith.constant 0 : i32
    %c0_i32_1 = arith.constant 0 : i32
    %c0_i32_2 = arith.constant 0 : i32
    return %c0_i32, %c0_i32_0, %c0_i32_1 : i32, i32, i32
  }
  func.func @transform_8(%arg0: i32) -> (i32, i32) {
    %c0_i32 = arith.constant 0 : i32
    %c0_i32_0 = arith.constant 0 : i32
    %c0_i32_1 = arith.constant 0 : i32
    return %c0_i32, %c0_i32_0 : i32, i32
  }
  func.func @transform_9(%arg0: i32) -> (i32, i32) {
    %c0_i32 = arith.constant 0 : i32
    %c0_i32_0 = arith.constant 0 : i32
    %c0_i32_1 = arith.constant 0 : i32
    return %c0_i32, %c0_i32_0 : i32, i32
  }
  func.func @transform_10(%arg0: i32) -> (i32, i32) {
    %c0_i32 = arith.constant 0 : i32
    %c0_i32_0 = arith.constant 0 : i32
    %c0_i32_1 = arith.constant 0 : i32
    return %c0_i32, %c0_i32_0 : i32, i32
  }
  func.func @transform_11(%arg0: i32) -> (i32, i32, i32) {
    %c0_i32 = arith.constant 0 : i32
    %c0_i32_0 = arith.constant 0 : i32
    %c0_i32_1 = arith.constant 0 : i32
    return %arg0, %c0_i32, %c0_i32_0 : i32, i32, i32
  }
}

</mosaic_0001>

<bundles_post_ra>
// kernel: tpu_custom_call.1
= control target key start
LH: loop header
LB: loop body
LE: loop exit
PB: predicated region body
PF: predicated region fallthrough
CT: control target
= control target key end

     0   :  { %16 = vsyncpa [#allocation4], 0  ;;  %s16009_s0 = inlined_call_operand.vmem [shape: f32[2,288,4], index: 0, kind: input, shape index: {}]   ;;  %s16010_s1 = inlined_call_operand.vmem [shape: f32[4,128], index: 1, kind: input, shape index: {}]   ;;  %s16011_s2 = inlined_call_operand.vmem [shape: f32[1,128], index: 2, kind: input, shape index: {}]   ;;  %s16012_s3 = inlined_call_operand.hbm [shape: f32[9,128,128], index: 3, kind: input, shape index: {}]   ;;  %s16013_s4 = inlined_call_operand.vmem [shape: f32[1,128], index: 4, kind: input, shape index: {}]   ;;  %s16014_s5 = inlined_call_operand.vmem [shape: f32[128,128], index: 5, kind: input, shape index: {}]   ;;  %s16015_s6 = inlined_call_operand.vmem [shape: f32[1,128], index: 6, kind: input, shape index: {}]   ;;  %s16016_s7 = inlined_call_operand.hbm [shape: f32[9,128,128], index: 7, kind: input, shape index: {}]   ;;  %s16017_s8 = inlined_call_operand.vmem [shape: f32[1,128], index: 8, kind: input, shape index: {}]   ;;  %s16018_s9 = inlined_call_operand.vmem [shape: f32[128,128], index: 9, kind: input, shape index: {}]   ;;  %s16019_s10 = inlined_call_operand.vmem [shape: f32[1,128], index: 10, kind: input, shape index: {}]   ;;  %s16020_s11 = inlined_call_operand.hbm [shape: f32[2,288,128], index: 11, kind: output, shape index: {}]  }
   0x1   :  { %17 = vsyncpa [#allocation7], 0 }
   0x2   :  { %18 = vsyncpa [#allocation5], 0 }
   0x3   :  { %20 = vsyncpa [#allocation5 + $0x1], 0  ;;  %s13325_s17 = smov 0   ;;  %s13327_s18 = smov 0  }
   0x4   :  { %s13329_s19 = smov 0   ;;  %s13331_s20 = smov 0  }
   0x5 LB: > { %16163 = sst [smem:[#allocation12_spill]] %s13243_s17  ;;  %s13346_s21 = sadd.s32 4294967295, %s13255_s20   ;;  %s13255_s20 = sphi %s13331_s20, %s16606_s20   ;;  %s13251_s19 = sphi %s13329_s19, %s16608_s19   ;;  %s13247_s18 = sphi %s13327_s18, %s16610_s18   ;;  %s13243_s17 = sphi %s13325_s17, %s16609_s17  }
   0x6   : > { %16164 = sst [smem:[#allocation13_spill]] %s13251_s19  ;;  %s8852_s22 = sadd.s32 4294967294, %s13255_s20  }
   0x7   : > { %s13350_s23 = sadd.s32 1, %s13255_s20   ;;  %s269_s24 = sadd.s32 1, %s13251_s19 }
   0x8   : > { %16165 = sst [smem:[#allocation14_spill]] %s13350_s23  ;;  %s266_s25 = ssub.s32 %s13255_s20, %s13350_s23 }
   0x9   : > { %p279_p0 = scmp.ne.s32.totalorder %s13251_s19, %s13247_s18  ;;  %p267_p1 = scmp.eq.s32.totalorder %s266_s25, 0 }
   0xa   : > { %p280_p2 = scmp.eq.s32.totalorder %s13346_s21, 1  ;;  %p285_p3 = scmp.ne.s32.totalorder %s13247_s18, %s13243_s17 }
   0xb   : > { %p286_p4 = scmp.eq.s32.totalorder %s8852_s22, 1  ;;  %p8853_p7 = scmp.ge.s32.totalorder %s13255_s20, 1 }
   0xc   : > { %s13361_s26 = scalar_select %p267_p1, %s13251_s19, %s269_s24  }
   0xd   : > { %p13363_p5 = por %p280_p2, %p279_p0  ;;  %p13367_p6 = por %p286_p4, %p285_p3 }
   0xe   : > { %16166 = sst [smem:[#allocation15_spill]] %s13361_s26  ;;  %p293_p8 = scmp.lt.s32.totalorder %s13255_s20, 3 }
   0xf   : > { %s16167_s27 = scalar_select %p13363_p5, 1, 0 }
  0x10   : > { %s16168_s28 = scalar_select %p13367_p6, 1, 0 }
  0x11   : > { %p16022_p9 = scmp.eq.s32.totalorder %s13346_s21, 0  ;;  %p13374_p10 = pnand %p8853_p7, %p293_p8 }
  0x12   : > { %16169 = sst [smem:[#allocation16_spill]] %s16168_s28  ;;  %s13257_s30 = smov [#allocation3]  }
  0x13   : > { %s16170_s29 = scalar_select %p13374_p10, 1, 0 }
  0x14   : > { %s311_s12 = sshll.u32 %s13257_s30, 4  ;;  %p13062_p11 = pneg %p13374_p10  ;;  %s312_s12 = int_to_ptr.vmem [resolvable:$true] %s311_s12 }
  0x15   : > { %s13258_s14 = smov [#allocation6]   ;;  %s13129_s24 = scalar_lea.hbm %s16012_s3, 18432 }
  0x16   : > { %p13382_p12 = pnand %p16022_p9, %p13062_p11  ;;  %s333_s15 = sshll.u32 %s13258_s14, 4  ;;  %s13386_s15 = int_to_ptr.vmem [resolvable:$true] %s333_s15 }
  0x17   : > { %p13130_p13 = scmp.ne.s32.totalorder %s16012_s3, %s13129_s24  ;;  %p13136_p3 = scmp.lt.u32.totalorder %s13129_s24, %s16012_s3 }
  0x18   : > { %p13131_p0 = pneg %p13382_p12 }
  0x1a   : > { %p13132_p1 = pnand %p13131_p0, %p13130_p13 }
  0x1c   : > { %p13133_p2 = pneg %p13132_p1 }
  0x1e   : > { %p13138_p4 = pnand %p13136_p3, %p13133_p2 }
  0x20   : > { %13141 = shalt.err (!%p13138_p4)
}
  0x21   : > { %s13142_s14 = scalar_lea.vmem %s312_s12, 18432  ;;  %p13150_p9 = scmp.lt.s32.totalorder %s312_s12, %s312_s12 }
  0x22   : > { %p13143_p7 = scmp.ne.s32.totalorder %s312_s12, %s13142_s14  ;;  %p13151_p6 = scmp.lt.s32.totalorder %s13142_s14, %s13142_s14 }
  0x24   : > { %p13145_p8 = pnand %p13143_p7, %p13131_p0  ;;  %p13152_p5 = por %p13151_p6, %p13150_p9 }
  0x26   : > { %p13146_p11 = pneg %p13145_p8 }
  0x28   : > { %p13153_p10 = pnand %p13152_p5, %p13146_p11 }
  0x2a   : > { %13156 = shalt.err (!%p13153_p10)
}
  0x2b   : > { %s13259_s16 = smov 128   ;;  %s13260_s22 = smov 8  }
  0x2c   : > { %13065 = dma.hbm_to_vmem [thread:$0]  (!%p13382_p12), %s16012_s3, 18432, %s312_s12, [#allocation4], %s13259_s16, %s13259_s16, %s13260_s22  }
  0x2d   : > { %s13157_s30 = scalar_lea.hbm %s16016_s7, 18432 }
  0x2e   : > { %p13158_p13 = scmp.ne.s32.totalorder %s16016_s7, %s13157_s30  ;;  %p13164_p9 = scmp.lt.u32.totalorder %s13157_s30, %s16016_s7 }
  0x30   : > { %p13160_p5 = pnand %p13158_p13, %p13131_p0 }
  0x32   : > { %p13161_p6 = pneg %p13160_p5 }
  0x34   : > { %p13166_p10 = pnand %p13164_p9, %p13161_p6 }
  0x36   : > { %13169 = shalt.err (!%p13166_p10)
}
  0x37   : > { %s13170_s12 = scalar_lea.vmem %s13386_s15, 18432  ;;  %p13178_p4 = scmp.lt.s32.totalorder %s13386_s15, %s13386_s15 }
  0x38   : > { %p13171_p1 = scmp.ne.s32.totalorder %s13386_s15, %s13170_s12  ;;  %p13179_p7 = scmp.lt.s32.totalorder %s13170_s12, %s13170_s12 }
  0x3a   : > { %p13173_p2 = pnand %p13171_p1, %p13131_p0  ;;  %p13180_p8 = por %p13179_p7, %p13178_p4 }
  0x3c   : > { %p13174_p3 = pneg %p13173_p2 }
  0x3e   : > { %p13181_p11 = pnand %p13180_p8, %p13174_p3 }
  0x40   : > { %13184 = shalt.err (!%p13181_p11)
}
  0x41   : > { %13068 = dma.hbm_to_vmem [thread:$0]  (!%p13382_p12), %s16016_s7, 18432, %s13386_s15, [#allocation7], %s13259_s16, %s13259_s16, %s13260_s22  }
  0x42   : > { %p16172_p13 = scmp.ne.s32.totalorder %s16170_s29, 0 }
  0x44   : > { %366 = sbr.rel (%p16172_p13) target bundleno = 2458 (0x99a), region = 64 }
  0x4b   : > { %p16173_p5 = scmp.eq.s32.totalorder %s13346_s21, 0 }
  0x4d   : > { %13230 = dma.done.wait (%p16173_p5), [#allocation4], 18432   ;;  %p16174_p0 = pmov %p16173_p5 }
  0x4f   : > { %13232 = vsyncadd (%p16174_p0), [#allocation4], 4294948864  ;;  %p16175_p6 = pmov %p16174_p0 }
  0x50   : > { %p16176_p9 = pmov %p16174_p0 }
  0x51   : > { %13234 = dma.done.wait (%p16175_p6), [#allocation7], 18432  }
  0x52   : > { %13236 = vsyncadd (%p16176_p9), [#allocation7], 4294948864  ;;  %p410_p10 = scmp.lt.s32.totalorder %s13346_s21, 1  ;;  %vm1225_vm0 = vcmask 1043456   ;;  %vm1116_vm1 = vcmask 31744   ;;  %v1815_v15 = vld [vmem:[#allocation3 + $0x80] sm:$0xff] }
  0x53   : > { %v1108_v0 = vld [vmem:[%s16010_s1] sm:$0xf]  ;;  %v1817_v20 = vld [vmem:[#allocation3 + $0x90] sm:$0xff]  ;;  %v1818_v21 = vld [vmem:[#allocation3 + $0x98] sm:$0xff]  ;;  %v13261_v58 = vmov 0.0   ;;  %s13051_s25 = smul.u32 4608, %s13346_s21 }
  0x54   : > { %s411_s28 = scalar_select %p410_p10, %s13346_s21, 1  ;;  %9983 = vmatprep.subr.msk.mxu0 %vm1225_vm0, %v1108_v0  ;;  %12399 = vmatprep.subr.msk.mxu1 %vm1225_vm0, %v1108_v0  ;;  %v1816_v16 = vld [vmem:[#allocation3 + $0x88] sm:$0xff]  ;;  %v11763_v26 = vpack.c.bf16 %v1818_v21, %v1817_v20  ;;  %v1819_v27 = vld [vmem:[#allocation3 + $0xa0] sm:$0xff]  ;;  %v1821_v34 = vld [vmem:[#allocation3 + $0xb0] sm:$0xff]  ;;  %415 = vst [vmem:[#allocation2] sm:$0xff] %v13261_v58 }
  0x55   : > { %9984 = vmatpush3.msk.msra.mxu0 %vm1225_vm0, %v1108_v0  ;;  %12400 = vmatpush3.msk.msra.mxu1 %vm1225_vm0, %v1108_v0  ;;  %v11759_v19 = vpack.c.bf16 %v1816_v16, %v1815_v15  ;;  %v1820_v28 = vld [vmem:[#allocation3 + $0xa8] sm:$0xff]  ;;  %v1822_v35 = vld [vmem:[#allocation3 + $0xb8] sm:$0xff]  ;;  %v1823_v41 = vld [vmem:[#allocation3 + $0xc0] sm:$0xff]  ;;  %416 = vst [vmem:[#allocation2 + $0x8] sm:$0xff] %v13261_v58  ;;  %v423_v0 = vlaneseq  ;;  %s15960_s12 = scalar_lea.hbm %s16020_s11, %s13051_s25  ;;  %p16602_p1 = scmp.ne.s32.totalorder %s16167_s27, 0 }
  0x56   : > { %s12978_s13 = smul.u32 288, %s411_s28  ;;  %v11767_v33 = vpack.c.bf16 %v1820_v28, %v1819_v27  ;;  %v11771_v40 = vpack.c.bf16 %v1822_v35, %v1821_v34  ;;  %v1824_v42 = vld [vmem:[#allocation3 + $0xc8] sm:$0xff]  ;;  %v1825_v48 = vld [vmem:[#allocation3 + $0xd0] sm:$0xff]  ;;  %v1826_v49 = vld [vmem:[#allocation3 + $0xd8] sm:$0xff]  ;;  %417 = vst [vmem:[#allocation2 + $0x10] sm:$0x7] %v13261_v58 }
  0x57   : > { %11760 = vmatprep.subr.bf16.mxu1 %v11759_v19  ;;  %v11775_v47 = vpack.c.bf16 %v1824_v42, %v1823_v41  ;;  %v11779_v52 = vpack.c.bf16 %v1826_v49, %v1825_v48  ;;  %v1827_v55 = vld [vmem:[#allocation3 + $0xe0] sm:$0xff]  ;;  %v1828_v56 = vld [vmem:[#allocation3 + $0xe8] sm:$0xff]  ;;  %418 = vst [vmem:[#allocation2 + $0x133] sm:$0xff] %v13261_v58  ;;  %419 = vst [vmem:[#allocation2 + $0x13b] sm:$0xff] %v13261_v58  ;;  %s13262_s28 = smov [#allocation8]  }
  0x58   : > { %s13450_s16 = scalar_lea.vmem %s16009_s0, %s12978_s13  ;;  %v11783_v57 = vpack.c.bf16 %v1828_v56, %v1827_v55  ;;  %420 = vst [vmem:[#allocation2 + $0x143] sm:$0xff] %v13261_v58  ;;  %v1829_v59 = vld [vmem:[#allocation3 + $0xf0] sm:$0xff]  ;;  %v1830_v60 = vld [vmem:[#allocation3 + $0xf8] sm:$0xff]  ;;  %v1766_v21 = vld [vmem:[#allocation3 + $0x20] sm:$0xff]  ;;  %s13189_s13 = sshll.u32 %s13262_s28, 4  ;;  %s13190_s13 = int_to_ptr.vmem [resolvable:$false] %s13189_s13 }
  0x59   : > { %v1072_v1 = vld [vmem:[%s13450_s16] sm:$0xff]  ;;  %v1073_v2 = vld [vmem:[%s13450_s16 + $0x8] sm:$0xff]  ;;  %v1074_v3 = vld [vmem:[%s13450_s16 + $0x10] sm:$0xff]  ;;  %v11787_v61 = vpack.c.bf16 %v1830_v60, %v1829_v59  ;;  %s13191_s29 = scalar_lea.vmem %s13190_s13, 9216 }
  0x5a   : > { %9985 = vmatprep.mubr.msk.f32.mxu0 %vm1116_vm1, %v1072_v1  ;;  %v1075_v4 = vld [vmem:[%s13450_s16 + $0x18] sm:$0xff]  ;;  %v1076_v5 = vld [vmem:[%s13450_s16 + $0x20] sm:$0xff]  ;;  %v1090_v6 = vld [vmem:[%s13450_s16 + $0x90] sm:$0xff]  ;;  %v13527_v1 = vshrl.u32 %v423_v0, 7 }
  0x5b   : > { %9986 = vmatmul.mubr.msk.f32.vlgmr.msra.gmra.mrb[0].mxu0 %vm1116_vm1, %v1073_v2  ;;  %10012 = vmatprep.mubr.msk.f32.mxu1 %vm1116_vm1, %v1090_v6  ;;  %v1091_v7 = vld [vmem:[%s13450_s16 + $0x98] sm:$0xff]  ;;  %v1092_v8 = vld [vmem:[%s13450_s16 + $0xa0] sm:$0xff]  ;;  %v1077_v9 = vld [vmem:[%s13450_s16 + $0x28] sm:$0xff] }
  0x5c   : > { %9988 = vmatprep.mubr.msk.f32.mxu0 %vm1116_vm1, %v1074_v3  ;;  %10013 = vmatmul.mubr.msk.f32.vlgmr.msra.gmra.mrb[0].mxu1 %vm1116_vm1, %v1091_v7  ;;  %v1093_v10 = vld [vmem:[%s13450_s16 + $0xa8] sm:$0xff]  ;;  %v1078_v11 = vld [vmem:[%s13450_s16 + $0x30] sm:$0xff]  ;;  %v1079_v13 = vld [vmem:[%s13450_s16 + $0x38] sm:$0xff]  ;;  %v13554_v28 = vadd.s32 56, %v13527_v1  ;;  %v13587_v49 = vadd.s32 72, %v13527_v1  ;;  %v13612_v0 = vadd.s32 88, %v13527_v1 }
  0x5d   : > { %10015 = vmatprep.mubr.msk.f32.mxu1 %vm1116_vm1, %v1092_v8  ;;  %v1094_v12 = vld [vmem:[%s13450_s16 + $0xb0] sm:$0xff]  ;;  %v1095_v14 = vld [vmem:[%s13450_s16 + $0xb8] sm:$0xff]  ;;  %v1080_v17 = vld [vmem:[%s13450_s16 + $0x40] sm:$0xff]  ;;  %11762 = vmatpush3.bf16.msra.mxu1 %v11759_v19  ;;  %v13958_v55 = vadd.s32 200, %v13527_v1 }
  0x5e   : > { %v1096_v18 = vld [vmem:[%s13450_s16 + $0xc0] sm:$0xff]  ;;  %v1081_v22 = vld [vmem:[%s13450_s16 + $0x48] sm:$0xff]  ;;  %v1082_v24 = vld [vmem:[%s13450_s16 + $0x50] sm:$0xff]  ;;  %11764 = vmatprep.subr.bf16.mxu1 %v11763_v26 }
  0x5f   : > { %9989 = vmatmul.mubr.msk.f32.gmra.mrb[2].mxu0 %vm1116_vm1, %v1075_v4  ;;  %v1097_v23 = vld [vmem:[%s13450_s16 + $0xc8] sm:$0xff]  ;;  %v1098_v25 = vld [vmem:[%s13450_s16 + $0xd0] sm:$0xff]  ;;  %v1083_v29 = vld [vmem:[%s13450_s16 + $0x58] sm:$0xff] }
  0x60   : > { %9991 = vmatprep.mubr.msk.f32.mxu0 %vm1116_vm1, %v1076_v5  ;;  %10016 = vmatmul.mubr.msk.f32.gmra.mrb[2].mxu1 %vm1116_vm1, %v1093_v10  ;;  %v1099_v30 = vld [vmem:[%s13450_s16 + $0xd8] sm:$0xff]  ;;  %v1084_v31 = vld [vmem:[%s13450_s16 + $0x60] sm:$0xff]  ;;  %v1085_v36 = vld [vmem:[%s13450_s16 + $0x68] sm:$0xff]  ;;  %v425_v5 = vadd.s32 8, %v13527_v1 }
  0x61   : > { %10018 = vmatprep.mubr.msk.f32.mxu1 %vm1116_vm1, %v1094_v12  ;;  %v1100_v32 = vld [vmem:[%s13450_s16 + $0xe0] sm:$0xff]  ;;  %11766 = vmatpush3.bf16.msra.mxu1 %v11763_v26  ;;  %v1101_v37 = vld [vmem:[%s13450_s16 + $0xe8] sm:$0xff]  ;;  %v1086_v38 = vld [vmem:[%s13450_s16 + $0x70] sm:$0xff]  ;;  %v426_v12 = vadd.s32 16, %v13527_v1 }
  0x62   : > { %v1102_v39 = vld [vmem:[%s13450_s16 + $0xf0] sm:$0xff]  ;;  %11768 = vmatprep.subr.bf16.mxu1 %v11767_v33  ;;  %v1087_v43 = vld [vmem:[%s13450_s16 + $0x78] sm:$0xff]  ;;  %v1088_v44 = vld [vmem:[%s13450_s16 + $0x80] sm:$0xff]  ;;  %v13530_v6 = vmul.u32.u64.low 3817748708, %v425_v5  ;;  %v13531_v7 = vmul.u32.u64.high 3817748708, %v425_v5, %v13530_v6 }
  0x63   : > { %9992 = vmatmul.mubr.msk.f32.gmra.mrb[4].mxu0 %vm1116_vm1, %v1077_v9  ;;  %v1103_v45 = vld [vmem:[%s13450_s16 + $0xf8] sm:$0xff]  ;;  %v1104_v46 = vld [vmem:[%s13450_s16 + $0x100] sm:$0xff]  ;;  %v1089_v50 = vld [vmem:[%s13450_s16 + $0x88] sm:$0xff]  ;;  %v13544_v19 = vmul.u32.u64.low 3817748708, %v426_v12  ;;  %v13545_v20 = vmul.u32.u64.high 3817748708, %v426_v12, %v13544_v19 }
  0x64   : > { %9994 = vmatprep.mubr.msk.f32.mxu0 %vm1116_vm1, %v1078_v11  ;;  %10019 = vmatmul.mubr.msk.f32.gmra.mrb[4].mxu1 %vm1116_vm1, %v1095_v14  ;;  %v1105_v51 = vld [vmem:[%s13450_s16 + $0x108] sm:$0xff]  ;;  %v1106_v53 = vld [vmem:[%s13450_s16 + $0x110] sm:$0xff]  ;;  %v1107_v54 = vld [vmem:[%s13450_s16 + $0x118] sm:$0xff]  ;;  %v427_v11 = vadd.s32 24, %v13527_v1  ;;  %v13537_v14 = vmul.u32.u64.low 3817748708, %v13527_v1  ;;  %v13538_v15 = vmul.u32.u64.high 3817748708, %v13527_v1, %v13537_v14 }
  0x65   : > { %10021 = vmatprep.mubr.msk.f32.mxu1 %vm1116_vm1, %v1096_v18  ;;  %11770 = vmatpush3.bf16.msra.mxu1 %v11767_v33  ;;  %v1778_v62 = vld [vmem:[#allocation2 + $0x1] sm:$0xff]  ;;  %v1779_v63 = vld [vmem:[#allocation2 + $0x9] sm:$0xff]  ;;  %v1762_v2 = vld [vmem:[#allocation3] sm:$0xff]  ;;  %v429_v18 = vadd.s32 40, %v13527_v1  ;;  %v13641_v14 = vadd.s32 104, %v13527_v1  ;;  %s407_s16 = sand.u32 1, %s13247_s18  }
  0x66   : > { %11772 = vmatprep.subr.bf16.mxu1 %v11771_v40  ;;  %v1763_v3 = vld [vmem:[#allocation3 + $0x8] sm:$0xff]  ;;  %v1764_v8 = vld [vmem:[#allocation3 + $0x10] sm:$0xff]  ;;  %v1765_v9 = vld [vmem:[#allocation3 + $0x18] sm:$0xff]  ;;  %v466_v33 = vshrl.u32 %v13538_v15, 4  ;;  %s12977_s26 = smul.u32 288, %s407_s16  ;;  %s15968_s17 = scalar_lea.sflag [#allocation5], %s407_s16 }
  0x67   : > { %9995 = vmatmul.mubr.msk.f32.gmra.mrb[6].mxu0 %vm1116_vm1, %v1079_v13  ;;  %v11791_v4 = vpack.c.bf16 %v1763_v3, %v1762_v2  ;;  %v11795_v10 = vpack.c.bf16 %v1765_v9, %v1764_v8  ;;  %v477_v13 = vshrl.u32 %v13531_v7, 4 }
  0x68   : > { %9997 = vmatprep.mubr.msk.f32.mxu0 %vm1116_vm1, %v1080_v17  ;;  %10022 = vmatmul.mubr.msk.f32.gmra.mrb[6].mxu1 %vm1116_vm1, %v1097_v23  ;;  %v13540_v16 = vmul.u32.u64.low 3817748708, %v427_v11  ;;  %v13541_v17 = vmul.u32.u64.high 3817748708, %v427_v11, %v13540_v16  ;;  %v13550_v26 = vmul.u32.u64.low 3817748708, %v429_v18  ;;  %v13551_v27 = vmul.u32.u64.high 3817748708, %v429_v18, %v13550_v26  ;;  %s15886_s24 = scalar_lea.vmem [#allocation8], %s12977_s26 }
  0x69   : > { %10024 = vmatprep.mubr.msk.f32.mxu1 %vm1116_vm1, %v1098_v25  ;;  %11774 = vmatpush3.bf16.msra.mxu1 %v11771_v40  ;;  %v478_v23 = vmul.u32 18, %v477_v13  ;;  %v488_v40 = vshrl.u32 %v13545_v20, 4  ;;  %v13659_v20 = vadd.s32 120, %v13527_v1  ;;  %v13675_v26 = vadd.s32 112, %v13527_v1  ;;  %s8768_s30 = sshll.u32 %s15886_s24, 4  ;;  %s15962_s30 = int_to_ptr.vmem [resolvable:$true] %s8768_s30 }
  0x6a   : > { %11776 = vmatprep.subr.bf16.mxu1 %v11775_v47  ;;  %s13185_s23 = scalar_lea.vmem %s15962_s30, 4608  ;;  %p13192_p4 = scmp.lt.s32.totalorder %s15962_s30, %s13190_s13 }
  0x6b   : > { %9998 = vmatmul.mubr.msk.f32.gmra.mrb[8].mxu0 %vm1116_vm1, %v1081_v22  ;;  %v1767_v22 = vld [vmem:[#allocation3 + $0x28] sm:$0xff]  ;;  %v489_v48 = vmul.u32 18, %v488_v40  ;;  %p13186_p12 = scmp.ne.s32.totalorder %s15962_s30, %s13185_s23  ;;  %p13193_p7 = scmp.lt.s32.totalorder %s13191_s29, %s13185_s23 }
  0x6c   : > { %10000 = vmatprep.mubr.msk.f32.mxu0 %vm1116_vm1, %v1082_v24  ;;  %10025 = vmatmul.mubr.msk.f32.gmra.mrb[8].mxu1 %vm1116_vm1, %v1099_v30  ;;  %v13548_v24 = vadd.s32 32, %v13527_v1  ;;  %v11799_v25 = vpack.c.bf16 %v1767_v22, %v1766_v21  ;;  %v1768_v30 = vld [vmem:[#allocation3 + $0x30] sm:$0xff] }
  0x6d   : > { %10027 = vmatprep.mubr.msk.f32.mxu1 %vm1116_vm1, %v1100_v32  ;;  %11778 = vmatpush3.bf16.msra.mxu1 %v11775_v47  ;;  %v13559_v32 = vsub.s32 %v425_v5, %v478_v23  ;;  %v13603_v59 = vsub.s32 %v426_v12, %v489_v48  ;;  %v13620_v5 = vadd.s32 80, %v13527_v1  ;;  %p13187_p2 = pnand %p13186_p12, %p16602_p1  ;;  %p13194_p8 = por %p13193_p7, %p13192_p4 }
  0x6e   : > { %11780 = vmatprep.subr.bf16.mxu1 %v11779_v52  ;;  %v13563_v34 = vmul.u32.u64.low 3817748708, %v13548_v24  ;;  %v13564_v35 = vmul.u32.u64.high 3817748708, %v13548_v24, %v13563_v34  ;;  %v13637_v12 = vmul.u32.u64.low 3817748708, %v13612_v0  ;;  %v13638_v13 = vmul.u32.u64.high 3817748708, %v13612_v0, %v13637_v12 }
  0x6f   : > { %10001 = vmatmul.mubr.msk.f32.gmra.mrb[10].mxu0 %vm1116_vm1, %v1083_v29  ;;  %v13557_v29 = vadd.s32 48, %v13527_v1  ;;  %vm857_vm2 = vcmp.ne.s32.totalorder %v13559_v32, 0  ;;  %vm893_vm3 = vcmp.lt.s32.totalorder %v13559_v32, 0  ;;  %vm858_vm9 = vcmp.ne.s32.totalorder %v13603_v59, 0  ;;  %p13188_p3 = pneg %p13187_p2 }
  0x70   : > { %10003 = vmatprep.mubr.msk.f32.mxu0 %vm1116_vm1, %v1084_v31  ;;  %10028 = vmatmul.mubr.msk.f32.gmra.mrb[10].mxu1 %vm1116_vm1, %v1101_v37  ;;  %v1769_v31 = vld [vmem:[#allocation3 + $0x38] sm:$0xff]  ;;  %vm13582_vm4 = vmand %vm893_vm3, %vm857_vm2  ;;  %vm894_vm10 = vcmp.lt.s32.totalorder %v13603_v59, 0  ;;  %v13645_v15 = vmul.u32.u64.low 3817748708, %v13620_v5  ;;  %v13646_v16 = vmul.u32.u64.high 3817748708, %v13620_v5, %v13645_v15 }
  0x71   : > { %10030 = vmatprep.mubr.msk.f32.mxu1 %vm1116_vm1, %v1102_v39  ;;  %11782 = vmatpush3.bf16.msra.mxu1 %v11779_v52  ;;  %v11803_v39 = vpack.c.bf16 %v1769_v31, %v1768_v30  ;;  %v13573_v41 = vmul.u32.u64.low 3817748708, %v13557_v29  ;;  %v13574_v42 = vmul.u32.u64.high 3817748708, %v13557_v29, %v13573_v41  ;;  %v13594_v52 = vadd.s32 64, %v13527_v1  ;;  %p13195_p11 = pnand %p13194_p8, %p13188_p3 }
  0x72   : > { %11784 = vmatprep.subr.bf16.mxu1 %v11783_v57  ;;  %v13723_v40 = vmul.u32.u64.low 3817748708, %v13675_v26  ;;  %v13724_v41 = vmul.u32.u64.high 3817748708, %v13675_v26, %v13723_v40 }
  0x73   : > { %10004 = vmatmul.mubr.msk.f32.gmra.mrb[12].mxu0 %vm1116_vm1, %v1085_v36  ;;  %v499_v36 = vshrl.u32 %v13541_v17, 4  ;;  %v532_v60 = vshrl.u32 %v13574_v42, 4  ;;  %v13649_v17 = vadd.s32 96, %v13527_v1  ;;  %v16190_v42 = vmov 0 }
  0x74   : > { %10006 = vmatprep.mubr.msk.f32.mxu0 %vm1116_vm1, %v1086_v38  ;;  %10031 = vmatmul.mubr.msk.f32.gmra.mrb[12].mxu1 %vm1116_vm1, %v1103_v45  ;;  %v13568_v37 = vmul.u32.u64.low 3817748708, %v13554_v28  ;;  %v13569_v38 = vmul.u32.u64.high 3817748708, %v13554_v28, %v13568_v37  ;;  %v620_v40 = vshrl.u32 %v13724_v41, 4 }
  0x75   : > { %10033 = vmatprep.mubr.msk.f32.mxu1 %vm1116_vm1, %v1104_v46  ;;  %11786 = vmatpush3.bf16.msra.mxu1 %v11783_v57  ;;  %v500_v45 = vmul.u32 18, %v499_v36  ;;  %v521_v46 = vshrl.u32 %v13551_v27, 4  ;;  %v13710_v37 = vadd.s32 136, %v13527_v1 }
  0x76   : > { %11788 = vmatprep.subr.bf16.mxu1 %v11787_v61  ;;  %v543_v58 = vshrl.u32 %v13569_v38, 4  ;;  %v16188_v38 = vmov 0 }
  0x77   : > { %10007 = vmatmul.mubr.msk.f32.gmra.mrb[14].mxu0 %vm1116_vm1, %v1087_v43  ;;  %v467_v43 = vmul.u32 18, %v466_v33  ;;  %v13600_v56 = vsub.s32 %v427_v11, %v500_v45  ;;  %v522_v57 = vmul.u32 18, %v521_v46  ;;  %v576_v45 = vshrl.u32 %v13646_v16, 4 }
  0x78   : > { %10009 = vmatprep.mubr.msk.f32.mxu0 %vm1116_vm1, %v1088_v44  ;;  %10034 = vmatmul.mubr.msk.f32.gmra.mrb[14].mxu1 %vm1116_vm1, %v1105_v51  ;;  %v13579_v44 = vadd.s32 18, %v13559_v32  ;;  %v510_v51 = vshrl.u32 %v13564_v35, 4  ;;  %v544_v8 = vmul.u32 18, %v543_v58  ;;  %v16186_v35 = vmov 0 }
  0x79   : > { %10036 = vmatprep.mubr.msk.f32.mxu1 %vm1116_vm1, %v1106_v53  ;;  %11790 = vmatpush3.bf16.msra.mxu1 %v11787_v61  ;;  %v1770_v53 = vld [vmem:[#allocation3 + $0x40] sm:$0xff]  ;;  %vm859_vm7 = vcmp.ne.s32.totalorder %v13600_v56, 0  ;;  %v13626_v7 = vsub.s32 %v429_v18, %v522_v57  ;;  %vm895_vm8 = vcmp.lt.s32.totalorder %v13600_v56, 0  ;;  %v13630_v9 = vadd.s32 18, %v13600_v56 }
  0x7a   : > { %11792 = vmatprep.subr.bf16.mxu1 %v11791_v4  ;;  %v13652_v18 = vadd.s32 18, %v13603_v59  ;;  %v13656_v19 = vsub.s32 %v13554_v28, %v544_v8  ;;  %v13679_v28 = vmul.u32.u64.low 3817748708, %v13649_v17  ;;  %v13680_v30 = vmul.u32.u64.high 3817748708, %v13649_v17, %v13679_v28  ;;  %v1776_v8 = vld [vmem:[#allocation3 + $0x70] sm:$0xff] }
  0x7b   : > { %10010 = vmatmul.mubr.msk.f32.gmra.mrb[16].mxu0 %vm1116_vm1, %v1089_v50  ;;  %v13590_v50 = vsub.s32 %v13527_v1, %v467_v43  ;;  %16179 = vst [vmem:[#allocation17_spill] sm:$0xff] %v13626_v7  ;;  %vm861_vm11 = vcmp.ne.s32.totalorder %v13626_v7, 0  ;;  %vm897_vm12 = vcmp.lt.s32.totalorder %v13626_v7, 0  ;;  %v13663_v21 = vadd.s32 18, %v13626_v7 }
  0x7c   : > { %10037 = vmatmul.mubr.msk.f32.gmra.mrb[16].mxu1 %vm1116_vm1, %v1107_v54  ;;  %v1771_v54 = vld [vmem:[#allocation3 + $0x48] sm:$0xff]  ;;  %16181 = vst [vmem:[#allocation19_spill] sm:$0xff] %v13656_v19  ;;  %vm863_vm0 = vcmp.ne.s32.totalorder %v13656_v19, 0  ;;  %v13696_v33 = vmul.u32.u64.low 3817748708, %v13659_v20  ;;  %v13697_v34 = vmul.u32.u64.high 3817748708, %v13659_v20, %v13696_v33  ;;  %vm13703_vm1 = vmand %vm895_vm8, %vm859_vm7  ;;  %vm899_vm2 = vcmp.lt.s32.totalorder %v13656_v19, 0 }
  0x7d   : > { %10071 = vmatprep.mubr.f32.mxu1 %v1778_v62  ;;  %v13607_v61 = vmul.u32.u64.low 3817748708, %v13587_v49  ;;  %v13608_v62 = vmul.u32.u64.high 3817748708, %v13587_v49, %v13607_v61  ;;  %vm856_vm5 = vcmp.ne.s32.totalorder %v13590_v50, 0  ;;  %v11807_v2 = vpack.c.bf16 %v1771_v54, %v1770_v53  ;;  %16182 = vst [vmem:[#allocation20_spill] sm:$0xff] %v13663_v21  ;;  %vm13730_vm7 = vmand %vm897_vm12, %vm861_vm11  ;;  %v1777_v53 = vld [vmem:[#allocation3 + $0x78] sm:$0xff] }
  0x7e   : > { %vm892_vm6 = vcmp.lt.s32.totalorder %v13590_v50, 0  ;;  %v13623_v6 = vadd.s32 18, %v13590_v50  ;;  %v16187_v35 = vsel %vm13703_vm1, 4294967295, %v16186_v35  ;;  %v16191_v42 = vsel %vm13730_vm7, 4294967295, %v16190_v42  ;;  %v1773_v61 = vld [vmem:[#allocation3 + $0x58] sm:$0xff] }
  0x7f   : > { %v565_v23 = vshrl.u32 %v13608_v62, 4  ;;  %vm13689_vm14 = vmand %vm892_vm6, %vm856_vm5  ;;  %v16192_v54 = vmov 0  ;;  %v13759_v58 = vadd.s32 18, %v13656_v19  ;;  %v16197_v62 = vmov 0 }
  0x80   : > { %10072 = vmatmul.mubr.f32.vlgmr.msra.gmra.mrb[18].mxu1 %v1779_v63  ;;  %v511_v63 = vmul.u32 18, %v510_v51  ;;  %vm13716_vm5 = vmand %vm894_vm10, %vm858_vm9  ;;  %v577_v16 = vmul.u32 18, %v576_v45  ;;  %v631_v33 = vshrl.u32 %v13697_v34, 4  ;;  %v11819_v19 = vpack.c.bf16 %v1777_v53, %v1776_v8 }
  0x81   : > { %11794 = vmatpush3.bf16.msra.mxu1 %v11791_v4  ;;  %v13616_v3 = vmul.u32.u64.low 3817748708, %v13594_v52  ;;  %v13617_v4 = vmul.u32.u64.high 3817748708, %v13594_v52, %v13616_v3  ;;  %v566_v36 = vmul.u32 18, %v565_v23  ;;  %v16189_v38 = vsel %vm13716_vm5, 4294967295, %v16188_v38  ;;  %16196 = vst [vmem:[#allocation24_spill] sm:$0xff] %v13759_v58  ;;  %vm13765_vm9 = vmand %vm899_vm2, %vm863_vm0 }
  0x82   : > { %11796 = vmatprep.subr.bf16.mxu1 %v11795_v10  ;;  %v13634_v11 = vsub.s32 %v13548_v24, %v511_v63  ;;  %v16198_v62 = vsel %vm13765_vm9, 4294967295, %v16197_v62  ;;  %v598_v23 = vshrl.u32 %v13680_v30, 4  ;;  %v13819_v30 = vadd.s32 128, %v13527_v1 }
  0x83   : > { %v554_v27 = vshrl.u32 %v13617_v4, 4  ;;  %16199 = vst [vmem:[#allocation25_spill] sm:$0xff] %v16198_v62  ;;  %v13776_v3 = vmul.u32.u64.low 3817748708, %v13710_v37  ;;  %v13777_v4 = vmul.u32.u64.high 3817748708, %v13710_v37, %v13776_v3  ;;  %v16245_v58 = vmov 0 }
  0x84   : > { %16180 = vst [vmem:[#allocation18_spill] sm:$0xff] %v13634_v11  ;;  %vm860_vm13 = vcmp.ne.s32.totalorder %v13634_v11, 0  ;;  %vm896_vm15 = vcmp.lt.s32.totalorder %v13634_v11, 0  ;;  %v13756_v57 = vadd.s32 18, %v13634_v11  ;;  %v599_v45 = vmul.u32 18, %v598_v23 }
  0x85   : > { %11798 = vmatpush3.bf16.msra.mxu1 %v11795_v10  ;;  %v533_v10 = vmul.u32 18, %v532_v60  ;;  %v555_v43 = vmul.u32 18, %v554_v27  ;;  %vm13751_vm8 = vmand %vm896_vm15, %vm860_vm13  ;;  %v1772_v60 = vld [vmem:[#allocation3 + $0x50] sm:$0xff]  ;;  %v653_v41 = vshrl.u32 %v13777_v4, 4  ;;  %v16250_v53 = vmov 0 }
  0x86   : > { %11800 = vmatprep.subr.bf16.mxu1 %v11799_v25  ;;  %v16193_v54 = vsel %vm13751_vm8, 4294967295, %v16192_v54  ;;  %16195 = vst [vmem:[#allocation23_spill] sm:$0xff] %v13756_v57  ;;  %v13858_v4 = vsub.s32 %v13649_v17, %v599_v45  ;;  %v16215_v45 = vmov 0 }
  0x87   : > { %v13666_v22 = vsub.s32 %v13557_v29, %v533_v10  ;;  %v13683_v29 = vadd.s32 152, %v13527_v1  ;;  %16194 = vst [vmem:[#allocation22_spill] sm:$0xff] %v16193_v54  ;;  %v13797_v15 = vsub.s32 %v13594_v52, %v555_v43  ;;  %v13830_v43 = vsub.s32 %v13620_v5, %v577_v16 }
  0x88   : > { %v621_v16 = vmul.u32 18, %v620_v40  ;;  %16210 = vst [vmem:[#allocation34_spill] sm:$0xff] %v13858_v4  ;;  %v13873_v40 = vadd.s32 160, %v13527_v1  ;;  %vm16239_vm8 = vcmp.lt.s32.totalorder %v13858_v4, 0 }
  0x89   : > { %11802 = vmatpush3.bf16.msra.mxu1 %v11799_v25  ;;  %16183 = vst [vmem:[#allocation21_spill] sm:$0xff] %v13666_v22  ;;  %v13671_v24 = vmul.u32.u64.low 3817748708, %v13641_v14  ;;  %v13672_v25 = vmul.u32.u64.high 3817748708, %v13641_v14, %v13671_v24  ;;  %vm862_vm3 = vcmp.ne.s32.totalorder %v13666_v22, 0  ;;  %vm898_vm6 = vcmp.lt.s32.totalorder %v13666_v22, 0  ;;  %16204 = vst [vmem:[#allocation28_spill] sm:$0xff] %v13797_v15 }
  0x8a   : > { %11804 = vmatprep.subr.bf16.mxu1 %v11803_v39  ;;  %v13736_v46 = vmul.u32.u64.low 3817748708, %v13683_v29  ;;  %v13737_v48 = vmul.u32.u64.high 3817748708, %v13683_v29, %v13736_v46  ;;  %v13770_v63 = vadd.s32 18, %v13666_v22  ;;  %vm13791_vm10 = vmand %vm898_vm6, %vm862_vm3  ;;  %v11811_v24 = vpack.c.bf16 %v1773_v61, %v1772_v60  ;;  %16206 = vst [vmem:[#allocation30_spill] sm:$0xff] %v13830_v43  ;;  %v2358_v22 = vld [vmem:[#allocation3 + $0x100] sm:$0xff] }
  0x8b   : > { %vm864_vm13 = vcmp.ne.s32.totalorder %v13797_v15, 0  ;;  %v632_v60 = vmul.u32 18, %v631_v33  ;;  %vm900_vm15 = vcmp.lt.s32.totalorder %v13797_v15, 0  ;;  %v13847_v5 = vadd.s32 18, %v13797_v15 }
  0x8c   : > { %16200 = vst [vmem:[#allocation26_spill] sm:$0xff] %v13770_v63  ;;  %v675_v46 = vshrl.u32 %v13737_v48, 4  ;;  %v13926_v27 = vmul.u32.u64.low 3817748708, %v13873_v40  ;;  %v13927_v10 = vmul.u32.u64.high 3817748708, %v13873_v40, %v13926_v27 }
  0x8d   : > { %11806 = vmatpush3.bf16.msra.mxu1 %v11803_v39  ;;  %v587_v39 = vshrl.u32 %v13638_v13, 4  ;;  %v609_v13 = vshrl.u32 %v13672_v25, 4  ;;  %v13810_v25 = vadd.s32 144, %v13527_v1  ;;  %16207 = vst [vmem:[#allocation31_spill] sm:$0xff] %v13847_v5  ;;  %v13862_v33 = vsub.s32 %v13659_v20, %v632_v60 }
  0x8e   : > { %11808 = vmatprep.subr.bf16.mxu1 %v11807_v2  ;;  %v13881_v20 = vsub.s32 %v13675_v26, %v621_v16  ;;  %v1774_v26 = vld [vmem:[#allocation3 + $0x60] sm:$0xff]  ;;  %v16218_v16 = vmov 0  ;;  %v16234_v27 = vmov 0  ;;  %v686_v5 = vshrl.u32 %v13927_v10, 4 }
  0x8f   : > { %v588_v12 = vmul.u32 18, %v587_v39  ;;  %v610_v39 = vmul.u32 18, %v609_v13  ;;  %16211 = vst [vmem:[#allocation35_spill] sm:$0xff] %v13862_v33 }
  0x90   : > { %v13834_v61 = vmul.u32.u64.low 3817748708, %v13810_v25  ;;  %v13835_v3 = vmul.u32.u64.high 3817748708, %v13810_v25, %v13834_v61  ;;  %16214 = vst [vmem:[#allocation38_spill] sm:$0xff] %v13881_v20  ;;  %v13954_v51 = vadd.s32 18, %v13881_v20  ;;  %vm16249_vm5 = vcmp.lt.s32.totalorder %v13881_v20, 0 }
  0x91   : > { %11810 = vmatpush3.bf16.msra.mxu1 %v11807_v2  ;;  %v13773_v2 = vsub.s32 %v13587_v49, %v566_v36  ;;  %v16201_v49 = vmov 0  ;;  %v13825_v34 = vsub.s32 %v13612_v0, %v588_v12  ;;  %v13838_v0 = vadd.s32 168, %v13527_v1 }
  0x92   : > { %v16202_v49 = vsel %vm13791_vm10, 4294967295, %v16201_v49  ;;  %11812 = vmatprep.subr.bf16.mxu1 %v11811_v24  ;;  %v13843_v12 = vmul.u32.u64.low 3817748708, %v13819_v30  ;;  %v13844_v13 = vmul.u32.u64.high 3817748708, %v13819_v30, %v13843_v12  ;;  %v13851_v48 = vsub.s32 %v13641_v14, %v610_v39  ;;  %16237 = vst [vmem:[#allocation45_spill] sm:$0xff] %v13954_v51 }
  0x93   : > { %16203 = vst [vmem:[#allocation27_spill] sm:$0xff] %v16202_v49  ;;  %vm865_vm11 = vcmp.ne.s32.totalorder %v13773_v2, 0  ;;  %vm901_vm12 = vcmp.lt.s32.totalorder %v13773_v2, 0  ;;  %v13822_v36 = vadd.s32 18, %v13773_v2  ;;  %16205 = vst [vmem:[#allocation29_spill] sm:$0xff] %v13825_v34  ;;  %v13855_v23 = vadd.s32 18, %v13825_v34 }
  0x94   : > { %16208 = vst [vmem:[#allocation32_spill] sm:$0xff] %v13851_v48  ;;  %v13865_v61 = vmul.u32.u64.low 3817748708, %v13838_v0  ;;  %v13866_v12 = vmul.u32.u64.high 3817748708, %v13838_v0, %v13865_v61  ;;  %v13870_v14 = vadd.s32 18, %v13830_v43  ;;  %v654_v39 = vmul.u32 18, %v653_v41  ;;  %vm13887_vm6 = vmand %vm901_vm12, %vm865_vm11  ;;  %v1775_v41 = vld [vmem:[#allocation3 + $0x68] sm:$0xff] }
  0x95   : > { %11814 = vmatpush3.bf16.msra.mxu1 %v11811_v24  ;;  %16209 = vst [vmem:[#allocation33_spill] sm:$0xff] %v13855_v23  ;;  %v676_v24 = vmul.u32 18, %v675_v46  ;;  %v13878_v17 = vadd.s32 18, %v13851_v48  ;;  %v16216_v45 = vsel %vm13887_vm6, 4294967295, %v16215_v45  ;;  %v13894_v46 = vadd.s32 18, %v13858_v4  ;;  %vm13903_vm11 = vmand %vm900_vm15, %vm864_vm13 }
  0x96   : > { %16212 = vst [vmem:[#allocation36_spill] sm:$0xff] %v13870_v14  ;;  %v16219_v16 = vsel %vm13903_vm11, 4294967295, %v16218_v16  ;;  %v13910_v61 = vadd.s32 18, %v13862_v33  ;;  %vm16221_vm0 = vcmp.ne.s32.totalorder %v13825_v34, 0  ;;  %vm16222_vm3 = vcmp.lt.s32.totalorder %v13825_v34, 0 }
  0x97   : > { %16213 = vst [vmem:[#allocation37_spill] sm:$0xff] %v13878_v17  ;;  %16217 = vst [vmem:[#allocation39_spill] sm:$0xff] %v13894_v46  ;;  %v13897_v60 = vsub.s32 %v13683_v29, %v676_v24  ;;  %v664_v29 = vshrl.u32 %v13835_v3, 4  ;;  %v16223_v24 = vmov 0  ;;  %v13922_v52 = vsub.s32 %v13710_v37, %v654_v39 }
  0x98   : > { %16220 = vst [vmem:[#allocation40_spill] sm:$0xff] %v13910_v61  ;;  %vm13917_vm10 = vmand %vm16222_vm3, %vm16221_vm0  ;;  %v642_v28 = vshrl.u32 %v13844_v13, 4  ;;  %vm16227_vm13 = vcmp.ne.s32.totalorder %v13830_v43, 0  ;;  %vm16228_vm15 = vcmp.lt.s32.totalorder %v13830_v43, 0  ;;  %v16229_v3 = vmov 0 }
  0x99   : > { %v16224_v24 = vsel %vm13917_vm10, 4294967295, %v16223_v24  ;;  %16226 = vst [vmem:[#allocation42_spill] sm:$0xff] %v13922_v52  ;;  %vm13933_vm2 = vmand %vm16228_vm15, %vm16227_vm13  ;;  %v13939_v37 = vadd.s32 184, %v13527_v1  ;;  %v13942_v13 = vadd.s32 176, %v13527_v1  ;;  %v11815_v39 = vpack.c.bf16 %v1775_v41, %v1774_v26  ;;  %v2359_v26 = vld [vmem:[#allocation3 + $0x108] sm:$0xff] }
  0x9a   : > { %16225 = vst [vmem:[#allocation41_spill] sm:$0xff] %v16224_v24  ;;  %v16230_v3 = vsel %vm13933_vm2, 4294967295, %v16229_v3  ;;  %vm16232_vm3 = vcmp.ne.s32.totalorder %v13851_v48, 0  ;;  %vm16233_vm12 = vcmp.lt.s32.totalorder %v13851_v48, 0  ;;  %vm16238_vm0 = vcmp.ne.s32.totalorder %v13858_v4, 0 }
  0x9b   : > { %16231 = vst [vmem:[#allocation43_spill] sm:$0xff] %v16230_v3  ;;  %vm13948_vm9 = vmand %vm16233_vm12, %vm16232_vm3  ;;  %v16240_v41 = vmov 0  ;;  %v665_v63 = vmul.u32 18, %v664_v29  ;;  %v697_v49 = vshrl.u32 %v13866_v12, 4  ;;  %11816 = vmatprep.subr.bf16.mxu1 %v11815_v39  ;;  %vm16243_vm15 = vcmp.ne.s32.totalorder %v13862_v33, 0 }
  0x9c   : > { %v16235_v27 = vsel %vm13948_vm9, 4294967295, %v16234_v27  ;;  %vm13964_vm12 = vmand %vm16239_vm8, %vm16238_vm0  ;;  %vm16244_vm13 = vcmp.lt.s32.totalorder %v13862_v33, 0  ;;  %v13979_v62 = vadd.s32 18, %v13897_v60  ;;  %vm909_vm0 = vcmp.lt.s32.totalorder %v13922_v52, 0  ;;  %11818 = vmatpush3.bf16.msra.mxu1 %v11815_v39 }
  0x9d   : > { %16236 = vst [vmem:[#allocation44_spill] sm:$0xff] %v16235_v27  ;;  %v16241_v41 = vsel %vm13964_vm12, 4294967295, %v16240_v41  ;;  %vm13974_vm7 = vmand %vm16244_vm13, %vm16243_vm15  ;;  %v643_v29 = vmul.u32 18, %v642_v28  ;;  %vm16248_vm3 = vcmp.ne.s32.totalorder %v13881_v20, 0  ;;  %v13992_v8 = vadd.s32 18, %v13922_v52  ;;  %11820 = vmatprep.subr.bf16.mxu1 %v11819_v19 }
  0x9e   : > { %16242 = vst [vmem:[#allocation46_spill] sm:$0xff] %v16241_v41  ;;  %v16246_v58 = vsel %vm13974_vm7, 4294967295, %v16245_v58  ;;  %vm13987_vm1 = vmand %vm16249_vm5, %vm16248_vm3  ;;  %v13995_v12 = vmul.u32.u64.low 3817748708, %v13939_v37  ;;  %v13996_v11 = vmul.u32.u64.high 3817748708, %v13939_v37, %v13995_v12  ;;  %v13998_v57 = vpack.c.bf16 %v2359_v26, %v2358_v22 }
  0x9f   : > { %16247 = vst [vmem:[#allocation47_spill] sm:$0xff] %v16246_v58  ;;  %v16251_v53 = vsel %vm13987_vm1, 4294967295, %v16250_v53  ;;  %16253 = vst [vmem:[#allocation49_spill] sm:$0xff] %v13992_v8  ;;  %vm16255_vm13 = vcmp.ne.s32.totalorder %v13897_v60, 0  ;;  %vm16256_vm15 = vcmp.lt.s32.totalorder %v13897_v60, 0  ;;  %vm16259_vm5 = vcmp.ne.s32.totalorder %v13922_v52, 0 }
  0xa0   : > { %16252 = vst [vmem:[#allocation48_spill] sm:$0xff] %v16251_v53  ;;  %16254 = vst [vmem:[#allocation50_spill] sm:$0xff] %v13998_v57  ;;  %v14009_v39 = vmul.u32.u64.low 3817748708, %v13942_v13  ;;  %v14010_v54 = vmul.u32.u64.high 3817748708, %v13942_v13, %v14009_v39  ;;  %v14013_v7 = vmul.u32.u64.low 3817748708, %v13958_v55  ;;  %v14014_v21 = vmul.u32.u64.high 3817748708, %v13958_v55, %v14013_v7  ;;  %11822 = vmatpush3.bf16.msra.mxu1 %v11819_v19 }
  0xa1   : > { %vm14004_vm8 = vmand %vm16256_vm15, %vm16255_vm13  ;;  %v16260_v12 = vmov 0  ;;  %v14031_v39 = vsub.s32 %v13810_v25, %v665_v63  ;;  %v698_v7 = vmul.u32 18, %v697_v49  ;;  %v14042_v15 = vsub.s32 %v13819_v30, %v643_v29  ;;  %11824 = vmatprep.subr.bf16.mxu1 %v13998_v57 }
  0xa2   : > { %vm14026_vm3 = vmand %vm909_vm0, %vm16259_vm5  ;;  %v14058_v30 = vadd.s32 192, %v13527_v1  ;;  %v14074_v25 = vadd.s32 216, %v13527_v1  ;;  %v14082_v19 = vadd.s32 208, %v13527_v1  ;;  %v687_v29 = vmul.u32 18, %v686_v5 }
  0xa3   : > { %v16261_v12 = vsel %vm14026_vm3, 4294967295, %v16260_v12  ;;  %16263 = vst [vmem:[#allocation52_spill] sm:$0xff] %v14042_v15  ;;  %vm874_vm0 = vcmp.ne.s32.totalorder %v14031_v39, 0  ;;  %vm910_vm13 = vcmp.lt.s32.totalorder %v14031_v39, 0  ;;  %v14079_v49 = vsub.s32 %v13838_v0, %v698_v7 }
  0xa4   : > { %16262 = vst [vmem:[#allocation51_spill] sm:$0xff] %v16261_v12  ;;  %v14085_v63 = vadd.s32 18, %v14031_v39  ;;  %v719_v26 = vshrl.u32 %v13996_v11, 4  ;;  %v14091_v22 = vmul.u32.u64.low 3817748708, %v14058_v30  ;;  %v14092_v10 = vmul.u32.u64.high 3817748708, %v14058_v30, %v14091_v22  ;;  %vm14154_vm5 = vmand %vm910_vm13, %vm874_vm0 }
  0xa5   : > { %v14095_v0 = vadd.s32 232, %v13527_v1  ;;  %v14098_v7 = vadd.s32 18, %v14042_v15  ;;  %v708_v57 = vshrl.u32 %v14010_v54, 4  ;;  %v741_v52 = vshrl.u32 %v14014_v21, 4 }
  0xa6   : > { %v14103_v8 = vadd.s32 224, %v13527_v1  ;;  %v14107_v11 = vmul.u32.u64.low 3817748708, %v14074_v25  ;;  %v14108_v5 = vmul.u32.u64.high 3817748708, %v14074_v25, %v14107_v11  ;;  %v14111_v22 = vadd.s32 248, %v13527_v1 }
  0xa7   : > { %16264 = vst [vmem:[#allocation53_spill] sm:$0xff] %v14098_v7  ;;  %v14114_v12 = vsub.s32 %v13873_v40, %v687_v29  ;;  %v14117_v20 = vmul.u32.u64.low 3817748708, %v14082_v19  ;;  %v14118_v54 = vmul.u32.u64.high 3817748708, %v14082_v19, %v14117_v20  ;;  %v14121_v21 = vadd.s32 240, %v13527_v1 }
  0xa8   : > { %v720_v51 = vmul.u32 18, %v719_v26  ;;  %v14124_v53 = vmul.u32.u64.low 3817748708, %v14095_v0  ;;  %v14125_v33 = vmul.u32.u64.high 3817748708, %v14095_v0, %v14124_v53  ;;  %v14128_v11 = vadd.s32 264, %v13527_v1 }
  0xa9   : > { %v14132_v40 = vmul.u32.u64.low 3817748708, %v14103_v8  ;;  %v14133_v29 = vmul.u32.u64.high 3817748708, %v14103_v8, %v14132_v40  ;;  %v14136_v61 = vadd.s32 256, %v13527_v1  ;;  %v709_v20 = vmul.u32 18, %v708_v57  ;;  %v16356_v57 = vld [vmem:[#allocation17_spill] sm:$0xff] }
  0xaa   : > { %v14139_v58 = vmul.u32.u64.low 3817748708, %v14111_v22  ;;  %v14140_v26 = vmul.u32.u64.high 3817748708, %v14111_v22, %v14139_v58  ;;  %v14143_v4 = vadd.s32 280, %v13527_v1  ;;  %v742_v53 = vmul.u32 18, %v741_v52 }
  0xab   : > { %v14147_v46 = vmul.u32.u64.low 3817748708, %v14121_v21  ;;  %v14148_v41 = vmul.u32.u64.high 3817748708, %v14121_v21, %v14147_v46  ;;  %v14159_v58 = vsub.s32 %v13939_v37, %v720_v51  ;;  %v730_v40 = vshrl.u32 %v14092_v10, 4 }
  0xac   : > { %v14163_v48 = vmul.u32.u64.low 3817748708, %v14128_v11  ;;  %v14164_v52 = vmul.u32.u64.high 3817748708, %v14128_v11, %v14163_v48  ;;  %v14168_v46 = vmul.u32.u64.low 3817748708, %v14136_v61  ;;  %v14169_v17 = vmul.u32.u64.high 3817748708, %v14136_v61, %v14168_v46 }
  0xad   : > { %v14172_v27 = vadd.s32 272, %v13527_v1  ;;  %vm16267_vm0 = vcmp.ne.s32.totalorder %v14042_v15, 0  ;;  %vm16268_vm13 = vcmp.lt.s32.totalorder %v14042_v15, 0  ;;  %v16269_v51 = vmov 0 }
  0xae   : > { %vm14178_vm3 = vmand %vm16268_vm13, %vm16267_vm0  ;;  %v14183_v37 = vadd.s32 18, %v14079_v49  ;;  %v763_v48 = vshrl.u32 %v14108_v5, 4  ;;  %v14187_v10 = vmul.u32.u64.low 3817748708, %v14143_v4  ;;  %v14188_v43 = vmul.u32.u64.high 3817748708, %v14143_v4, %v14187_v10 }
  0xaf   : > { %v16270_v51 = vsel %vm14178_vm3, 4294967295, %v16269_v51  ;;  %vm16272_vm15 = vcmp.ne.s32.totalorder %v14079_v49, 0  ;;  %vm16273_vm0 = vcmp.lt.s32.totalorder %v14079_v49, 0  ;;  %v16274_v46 = vmov 0 }
  0xb0   : > { %16271 = vst [vmem:[#allocation54_spill] sm:$0xff] %v16270_v51  ;;  %vm14198_vm13 = vmand %vm16273_vm0, %vm16272_vm15  ;;  %v14203_v14 = vadd.s32 18, %v14114_v12  ;;  %v14206_v5 = vsub.s32 %v13942_v13, %v709_v20  ;;  %v752_v10 = vshrl.u32 %v14118_v54, 4  ;;  %vm16276_vm1 = vcmp.ne.s32.totalorder %v14114_v12, 0 }
  0xb1   : > { %v16275_v46 = vsel %vm14198_vm13, 4294967295, %v16274_v46  ;;  %vm16277_vm7 = vcmp.lt.s32.totalorder %v14114_v12, 0  ;;  %v16278_v1 = vmov 0  ;;  %vm879_vm15 = vcmp.ne.s32.totalorder %v14159_v58, 0 }
  0xb2   : > { %vm14213_vm12 = vmand %vm16277_vm7, %vm16276_vm1  ;;  %v14219_v3 = vsub.s32 %v13958_v55, %v742_v53  ;;  %v731_v34 = vmul.u32 18, %v730_v40  ;;  %v785_v23 = vshrl.u32 %v14125_v33, 4  ;;  %vm915_vm0 = vcmp.lt.s32.totalorder %v14159_v58, 0 }
  0xb3   : > { %v16279_v1 = vsel %vm14213_vm12, 4294967295, %v16278_v1  ;;  %v774_v13 = vshrl.u32 %v14133_v29, 4  ;;  %v14225_v54 = vmul.u32.u64.low 3817748708, %v14172_v27  ;;  %v14226_v20 = vmul.u32.u64.high 3817748708, %v14172_v27, %v14225_v54  ;;  %vm14247_vm1 = vmand %vm915_vm0, %vm879_vm15 }
  0xb4   : > { %16280 = vst [vmem:[#allocation55_spill] sm:$0xff] %v14219_v3  ;;  %v764_v53 = vmul.u32 18, %v763_v48  ;;  %v807_v33 = vshrl.u32 %v14140_v26, 4  ;;  %v14242_v40 = vadd.s32 18, %v14159_v58  ;;  %v753_v54 = vmul.u32 18, %v752_v10 }
  0xb5   : > { %v796_v51 = vshrl.u32 %v14148_v41, 4  ;;  %v16281_v24 = vmov 0  ;;  %vm878_vm7 = vcmp.ne.s32.totalorder %v14206_v5, 0  ;;  %v14253_v26 = vsub.s32 %v14058_v30, %v731_v34 }
  0xb6   : > { %v16282_v24 = vsel %vm14247_vm1, 4294967295, %v16281_v24  ;;  %v786_v48 = vmul.u32 18, %v785_v23  ;;  %v829_v29 = vshrl.u32 %v14164_v52, 4  ;;  %vm914_vm3 = vcmp.lt.s32.totalorder %v14206_v5, 0 }
  0xb7   : > { %v775_v10 = vmul.u32 18, %v774_v13  ;;  %v818_v41 = vshrl.u32 %v14169_v17, 4  ;;  %vm917_vm15 = vcmp.lt.s32.totalorder %v14219_v3, 0  ;;  %v14261_v55 = vsub.s32 %v14074_v25, %v764_v53  ;;  %vm14276_vm0 = vmand %vm914_vm3, %vm878_vm7 }
  0xb8   : > { %v808_v15 = vmul.u32 18, %v807_v33  ;;  %v851_v7 = vshrl.u32 %v14188_v43, 4  ;;  %v14269_v23 = vadd.s32 18, %v14206_v5  ;;  %v14272_v30 = vsub.s32 %v14082_v19, %v753_v54 }
  0xb9   : > { %v797_v17 = vmul.u32 18, %v796_v51  ;;  %v16283_v25 = vmov 0  ;;  %v14281_v43 = vadd.s32 18, %v14219_v3  ;;  %v14285_v52 = vsub.s32 %v14095_v0, %v786_v48 }
  0xba   : > { %v16284_v25 = vsel %vm14276_vm0, 4294967295, %v16283_v25  ;;  %v830_v13 = vmul.u32 18, %v829_v29  ;;  %vm16285_vm2 = vcmp.ne.s32.totalorder %v14219_v3, 0  ;;  %v16286_v19 = vmov 0 }
  0xbb   : > { %vm14289_vm10 = vmand %vm917_vm15, %vm16285_vm2  ;;  %vm916_vm3 = vcmp.lt.s32.totalorder %v14253_v26, 0  ;;  %v14295_v51 = vsub.s32 %v14103_v8, %v775_v10  ;;  %v819_v53 = vmul.u32 18, %v818_v41  ;;  %v840_v33 = vshrl.u32 %v14226_v20, 4 }
  0xbc   : > { %v16287_v19 = vsel %vm14289_vm10, 4294967295, %v16286_v19  ;;  %vm883_vm7 = vcmp.ne.s32.totalorder %v14261_v55, 0  ;;  %vm919_vm9 = vcmp.lt.s32.totalorder %v14261_v55, 0  ;;  %v14301_v0 = vsub.s32 %v14111_v22, %v808_v15  ;;  %v16461_v15 = vld [vmem:[#allocation40_spill] sm:$0xff] }
  0xbd   : > { %16288 = vst [vmem:[#allocation56_spill] sm:$0xff] %v14295_v51  ;;  %v852_v29 = vmul.u32 18, %v851_v7  ;;  %vm918_vm15 = vcmp.lt.s32.totalorder %v14272_v30, 0  ;;  %v14310_v8 = vsub.s32 %v14121_v21, %v797_v17  ;;  %vm16290_vm1 = vcmp.ne.s32.totalorder %v14253_v26, 0  ;;  %vm14327_vm6 = vmand %vm919_vm9, %vm883_vm7 }
  0xbe   : > { %16289 = vst [vmem:[#allocation57_spill] sm:$0xff] %v14301_v0  ;;  %vm14318_vm11 = vmand %vm916_vm3, %vm16290_vm1  ;;  %vm885_vm0 = vcmp.ne.s32.totalorder %v14285_v52, 0  ;;  %vm921_vm2 = vcmp.lt.s32.totalorder %v14285_v52, 0  ;;  %v14325_v7 = vsub.s32 %v14128_v11, %v830_v13  ;;  %v16294_v22 = vmov 0 }
  0xbf   : > { %v16295_v22 = vsel %vm14327_vm6, 4294967295, %v16294_v22  ;;  %vm884_vm12 = vcmp.ne.s32.totalorder %v14295_v51, 0  ;;  %v14334_v21 = vsub.s32 %v14136_v61, %v819_v53  ;;  %v841_v48 = vmul.u32 18, %v840_v33  ;;  %v14403_v53 = vld [vmem:[%s16011_s2] ss:$0 sm:$0xff] }
  0xc0   : > { %16293 = vst [vmem:[#allocation58_spill] sm:$0xff] %v14325_v7  ;;  %v16297_v10 = vsel %vm13582_vm4, %v13579_v44, %v13559_v32  ;;  %v16298_v11 = vmov 0  ;;  %v14346_v41 = vadd.s32 18, %v14253_v26  ;;  %vm16300_vm9 = vcmp.ne.s32.totalorder %v14272_v30, 0 }
  0xc1   : > { %16296 = vst [vmem:[#allocation59_spill] sm:$0xff] %v14334_v21  ;;  %vm14341_vm1 = vcmp.lt.s32.totalorder %v16297_v10, 16  ;;  %vm14350_vm3 = vmand %vm918_vm15, %vm16300_vm9  ;;  %v16301_v17 = vmov 0  ;;  %vm923_vm10 = vcmp.lt.s32.totalorder %v14301_v0, 0  ;;  %v14357_v47 = vsub.s32 %v14143_v4, %v852_v29 }
  0xc2   : > { %v16299_v11 = vsel %vm14341_vm1, 4294967295, %v16298_v11  ;;  %v16302_v17 = vsel %vm14350_vm3, 4294967295, %v16301_v17  ;;  %v16304_v32 = vsel %vm13689_vm14, %v13623_v6, %v13590_v50  ;;  %v16305_v44 = vmov 0  ;;  %vm14378_vm15 = vmand %vm921_vm2, %vm885_vm0 }
  0xc3   : > { %16303 = vst [vmem:[#allocation60_spill] sm:$0xff] %v14357_v47  ;;  %vm14364_vm4 = vcmp.lt.s32.totalorder %v16304_v32, 16  ;;  %v14369_v61 = vadd.s32 18, %v14261_v55  ;;  %v14372_v13 = vadd.s32 18, %v14272_v30  ;;  %v16308_v4 = vmov 0 }
  0xc4   : > { %v16306_v44 = vsel %vm14364_vm4, 4294967295, %v16305_v44  ;;  %v16309_v4 = vsel %vm14378_vm15, 4294967295, %v16308_v4  ;;  %vm886_vm14 = vcmp.ne.s32.totalorder %v14310_v8, 0  ;;  %vm922_vm9 = vcmp.lt.s32.totalorder %v14310_v8, 0 }
  0xc5   : > { %16307 = vst [vmem:[#allocation61_spill] sm:$0xff] %v16306_v44  ;;  %v14385_v50 = vadd.s32 18, %v14285_v52  ;;  %vm16310_vm7 = vcmp.lt.s32.totalorder %v14295_v51, 0  ;;  %v16311_v6 = vmov 0  ;;  %v14396_v31 = vadd.s32 18, %v14295_v51  ;;  %v16360_v51 = vld [vmem:[#allocation22_spill] sm:$0xff] }
  0xc6   : > { %vm14391_vm13 = vmand %vm16310_vm7, %vm884_vm12  ;;  %vm16315_vm4 = vcmp.ne.s32.totalorder %v14301_v0, 0  ;;  %v16316_v33 = vmov 0  ;;  %v14412_v29 = vadd.s32 18, %v14301_v0  ;;  %vm888_vm12 = vcmp.ne.s32.totalorder %v14334_v21, 0 }
  0xc7   : > { %v16312_v6 = vsel %vm14391_vm13, 4294967295, %v16311_v6  ;;  %16314 = vst [vmem:[#allocation63_spill] sm:$0xff] %v14396_v31  ;;  %vm14407_vm1 = vmand %vm923_vm10, %vm16315_vm4  ;;  %v14417_v10 = vsub.s32 %v14172_v27, %v841_v48  ;;  %vm16320_vm2 = vnez %v16187_v35  ;;  %v16322_v20 = vmov 0 }
  0xc8   : > { %16313 = vst [vmem:[#allocation62_spill] sm:$0xff] %v16312_v6  ;;  %v16317_v33 = vsel %vm14407_vm1, 4294967295, %v16316_v33  ;;  %16319 = vst [vmem:[#allocation65_spill] sm:$0xff] %v14412_v29  ;;  %v16321_v32 = vsel %vm16320_vm2, %v13630_v9, %v13600_v56  ;;  %v16324_v54 = vmov 0  ;;  %v14433_v34 = vadd.s32 18, %v14310_v8 }
  0xc9   : > { %16318 = vst [vmem:[#allocation64_spill] sm:$0xff] %v16317_v33  ;;  %vm14424_vm0 = vcmp.lt.s32.totalorder %v16321_v32, 16  ;;  %vm14428_vm10 = vmand %vm922_vm9, %vm886_vm14  ;;  %v14436_v3 = vadd.s32 18, %v14325_v7  ;;  %vm16327_vm2 = vnez %v16189_v38  ;;  %v16329_v9 = vmov 0 }
  0xca   : > { %v16323_v20 = vsel %vm14424_vm0, 4294967295, %v16322_v20  ;;  %v16325_v54 = vsel %vm14428_vm10, 4294967295, %v16324_v54  ;;  %v16328_v56 = vsel %vm16327_vm2, %v13652_v18, %v13603_v59  ;;  %v16331_v27 = vsel %vm14004_vm8, %v13979_v62, %v13897_v60 }
  0xcb   : > { %16326 = vst [vmem:[#allocation66_spill] sm:$0xff] %v14436_v3  ;;  %vm14445_vm14 = vcmp.lt.s32.totalorder %v16328_v56, 16  ;;  %vm14454_vm9 = vcmp.lt.s32.totalorder %v16331_v27, 16  ;;  %v16332_v48 = vmov 0  ;;  %vm16335_vm8 = vcmp.ne.s32.totalorder %v14325_v7, 0 }
  0xcc   : > { %v16330_v9 = vsel %vm14445_vm14, 4294967295, %v16329_v9  ;;  %v16333_v48 = vsel %vm14454_vm9, 4294967295, %v16332_v48  ;;  %vm16336_vm2 = vcmp.lt.s32.totalorder %v14325_v7, 0  ;;  %v16337_v62 = vmov 0 }
  0xcd   : > { %16334 = vst [vmem:[#allocation67_spill] sm:$0xff] %v16333_v48  ;;  %vm14474_vm7 = vmand %vm16336_vm2, %vm16335_vm8  ;;  %v14479_v60 = vadd.s32 18, %v14334_v21  ;;  %vm16341_vm8 = vcmp.lt.s32.totalorder %v14334_v21, 0  ;;  %v16342_v18 = vmov 0  ;;  %v16345_v56 = vsel %vm14154_vm5, %v14085_v63, %v14031_v39  ;;  %v16355_v63 = vld [vmem:[#allocation20_spill] sm:$0xff] }
  0xce   : > { %v16338_v62 = vsel %vm14474_vm7, 4294967295, %v16337_v62  ;;  %vm14494_vm2 = vmand %vm16341_vm8, %vm888_vm12  ;;  %vm14507_vm4 = vcmp.lt.s32.totalorder %v16345_v56, 16  ;;  %v16346_v27 = vmov 0  ;;  %vm16349_vm12 = vcmp.ne.s32.totalorder %v14357_v47, 0 }
  0xcf   : > { %16339 = vst [vmem:[#allocation68_spill] sm:$0xff] %v16338_v62  ;;  %16340 = vst [vmem:[#allocation69_spill] sm:$0xff] %v14479_v60  ;;  %v16343_v18 = vsel %vm14494_vm2, 4294967295, %v16342_v18  ;;  %v16347_v27 = vsel %vm14507_vm4, 4294967295, %v16346_v27  ;;  %vm16350_vm8 = vcmp.lt.s32.totalorder %v14357_v47, 0  ;;  %vm890_vm15 = vcmp.ne.s32.totalorder %v14417_v10, 0 }
  0xd0   : > { %16348 = vst [vmem:[#allocation71_spill] sm:$0xff] %v16347_v27  ;;  %vm14519_vm13 = vmand %vm16350_vm8, %vm16349_vm12  ;;  %vm926_vm5 = vcmp.lt.s32.totalorder %v14417_v10, 0  ;;  %vm16354_vm6 = vnez %v16191_v42  ;;  %v16358_v38 = vmov 0  ;;  %vm16361_vm8 = vnez %v16360_v51  ;;  %v3031_v27 = vld [vmem:[#allocation3 + $0x228] sm:$0xff] }
  0xd1   : > { %v16357_v56 = vsel %vm16354_vm6, %v16355_v63, %v16356_v57  ;;  %v16362_v63 = vld [vmem:[#allocation23_spill] sm:$0xff]  ;;  %v16363_v57 = vld [vmem:[#allocation18_spill] sm:$0xff]  ;;  %v16365_v31 = vmov 0  ;;  %v14556_v29 = vadd.s32 18, %v14417_v10  ;;  %vm16370_vm2 = vnez %v16306_v44 }
  0xd2   : > { %vm14530_vm1 = vcmp.lt.s32.totalorder %v16357_v56, 16  ;;  %v16364_v56 = vsel %vm16361_vm8, %v16362_v63, %v16363_v57  ;;  %vm14568_vm8 = vmand %vm926_vm5, %vm890_vm15  ;;  %v16376_v60 = vmov 0  ;;  %vm16385_vm5 = vnez %v16275_v46 }
  0xd3   : > { %v16359_v38 = vsel %vm14530_vm1, 4294967295, %v16358_v38  ;;  %vm14547_vm6 = vcmp.lt.s32.totalorder %v16364_v56, 16  ;;  %v16367_v56 = vmov 0  ;;  %vm16390_vm10 = vnez %v16279_v1 }
  0xd4   : > { %v16366_v31 = vsel %vm14547_vm6, 4294967295, %v16365_v31  ;;  %v16368_v56 = vsel %vm14568_vm8, 4294967295, %v16367_v56 }
 0x12e   : > { %v9987_v35 = vpop.f32.mrb[0].mxu0 }
 0x12f   : > { %v1301_v28 = vadd.f32 %v9987_v35, %v14403_v53  ;;  %v1295_v32 = vpop.f32.mrb[1].mxu0  ;;  %v14499_v35 = vadd.s32 18, %v14357_v47  ;;  %v10014_v6 = vpop.f32.mrb[0].mxu1  ;;  %v16371_v47 = vld [vmem:[#allocation25_spill] sm:$0xff] }
 0x130   : > { %v1296_v59 = vadd.f32 %v14403_v53, %v1295_v32  ;;  %v16351_v32 = vmov 0  ;;  %v1391_v62 = vadd.f32 %v10014_v6, %v14403_v53  ;;  %v1385_v63 = vpop.f32.mrb[1].mxu1  ;;  %vm16372_vm7 = vnez %v16371_v47 }
 0x131   : > { %16344 = vst [vmem:[#allocation70_spill] sm:$0xff] %v14499_v35  ;;  %v16352_v32 = vsel %vm14519_vm13, 4294967295, %v16351_v32  ;;  %vm1475_vm3 = vcmp.ge.f32.partialorder %v1301_v28, 0.0  ;;  %v1511_v39 = vmul.f32 0.1, %v1301_v28  ;;  %v16373_v35 = vld [vmem:[#allocation24_spill] sm:$0xff] }
 0x132   : > { %16353 = vst [vmem:[#allocation72_spill] sm:$0xff] %v16352_v32  ;;  %vm1474_vm12 = vcmp.ge.f32.partialorder %v1296_v59, 0.0  ;;  %v1510_v33 = vmul.f32 0.1, %v1296_v59  ;;  %v9990_v42 = vpop.f32.mrb[2].mxu0  ;;  %v16374_v32 = vld [vmem:[#allocation19_spill] sm:$0xff] }
 0x133   : > { %v1547_v7 = vsel %vm1475_vm3, %v1301_v28, %v1511_v39  ;;  %v1311_v3 = vadd.f32 %v9990_v42, %v14403_v53  ;;  %v1305_v51 = vpop.f32.mrb[3].mxu0  ;;  %vm16369_vm3 = vnez %v16299_v11  ;;  %v1386_v42 = vadd.f32 %v14403_v53, %v1385_v63  ;;  %v16381_v63 = vld [vmem:[#allocation21_spill] sm:$0xff] }
 0x134   : > { %v1655_v28 = vsel %vm16369_vm3, %v1547_v7, 0.0  ;;  %v1546_v39 = vsel %vm1474_vm12, %v1296_v59, %v1510_v33  ;;  %v1306_v6 = vadd.f32 %v14403_v53, %v1305_v51  ;;  %v16375_v21 = vsel %vm16372_vm7, %v16373_v35, %v16374_v32  ;;  %v16378_v59 = vld [vmem:[#allocation27_spill] sm:$0xff]  ;;  %v16380_v51 = vld [vmem:[#allocation26_spill] sm:$0xff] }
 0x135   : > { %1691 = vst [vmem:[#allocation2 + $0x1b] sm:$0xff] %v1655_v28  ;;  %v1654_v57 = vsel %vm16370_vm2, %v1546_v39, 0.0  ;;  %vm1477_vm13 = vcmp.ge.f32.partialorder %v1311_v3, 0.0  ;;  %v1513_v0 = vmul.f32 0.1, %v1311_v3  ;;  %vm14583_vm15 = vcmp.lt.s32.totalorder %v16375_v21, 16 }
 0x136   : > { %v16377_v60 = vsel %vm14583_vm15, 4294967295, %v16376_v60  ;;  %1690 = vst [vmem:[#allocation2 + $0x13] sm:$0xff] %v1654_v57  ;;  %vm1476_vm12 = vcmp.ge.f32.partialorder %v1306_v6, 0.0  ;;  %v1512_v7 = vmul.f32 0.1, %v1306_v6  ;;  %v9993_v33 = vpop.f32.mrb[4].mxu0  ;;  %vm16379_vm3 = vnez %v16378_v59 }
 0x137   : > { %v16382_v28 = vsel %vm16379_vm3, %v16380_v51, %v16381_v63  ;;  %v16383_v39 = vmov 0  ;;  %v1529_v47 = vmul.f32 0.1, %v1391_v62  ;;  %v1549_v35 = vsel %vm1477_vm13, %v1311_v3, %v1513_v0  ;;  %v1315_v57 = vpop.f32.mrb[5].mxu0  ;;  %v10017_v63 = vpop.f32.mrb[2].mxu1 }
 0x138   : > { %vm14592_vm2 = vcmp.lt.s32.totalorder %v16382_v28, 16  ;;  %v1321_v32 = vadd.f32 %v9993_v33, %v14403_v53  ;;  %v1528_v44 = vmul.f32 0.1, %v1386_v42  ;;  %v16386_v59 = vsel %vm16385_vm5, %v14183_v37, %v14079_v49  ;;  %v1395_v28 = vpop.f32.mrb[3].mxu1 }
 0x139   : > { %v16384_v39 = vsel %vm14592_vm2, 4294967295, %v16383_v39  ;;  %vm14606_vm3 = vcmp.lt.s32.totalorder %v16386_v59, 16  ;;  %v16387_v51 = vmov 0  ;;  %v16391_v3 = vsel %vm16390_vm10, %v14203_v14, %v14114_v12 }
 0x13a   : > { %v16388_v51 = vsel %vm14606_vm3, 4294967295, %v16387_v51  ;;  %vm14615_vm13 = vcmp.lt.s32.totalorder %v16391_v3, 16  ;;  %v16392_v0 = vmov 0  ;;  %v1657_v46 = vsel %vm14424_vm0, %v1549_v35, 0.0  ;;  %v16402_v35 = vld [vmem:[#allocation28_spill] sm:$0xff]  ;;  %v10020_v3 = vpop.f32.mrb[4].mxu1 }
 0x13b   : > { %16389 = vst [vmem:[#allocation20_spill] sm:$0xff] %v16388_v51  ;;  %v16393_v0 = vsel %vm14615_vm13, 4294967295, %v16392_v0  ;;  %v1548_v33 = vsel %vm1476_vm12, %v1306_v6, %v1512_v7  ;;  %v1316_v49 = vadd.f32 %v14403_v53, %v1315_v57  ;;  %vm16395_vm5 = vcmp.ge.f32.partialorder %v1391_v62, 0.0  ;;  %1693 = vst [vmem:[#allocation2 + $0x2b] sm:$0xff] %v1657_v46  ;;  %v9996_v7 = vpop.f32.mrb[6].mxu0  ;;  %v3030_v51 = vld [vmem:[#allocation3 + $0x220] sm:$0xff] }
 0x13c   : > { %16394 = vst [vmem:[#allocation17_spill] sm:$0xff] %v16393_v0  ;;  %v1565_v37 = vsel %vm16395_vm5, %v1391_v62, %v1529_v47  ;;  %v1656_v1 = vsel %vm14445_vm14, %v1548_v33, 0.0  ;;  %vm1479_vm7 = vcmp.ge.f32.partialorder %v1321_v32, 0.0  ;;  %v1515_v59 = vmul.f32 0.1, %v1321_v32  ;;  %v16401_v47 = vld [vmem:[#allocation31_spill] sm:$0xff] }
 0x13d   : > { %vm16396_vm10 = vnez %v16216_v45  ;;  %v1673_v6 = vsel %vm14454_vm9, %v1565_v37, 0.0  ;;  %1692 = vst [vmem:[#allocation2 + $0x23] sm:$0xff] %v1656_v1  ;;  %v1514_v62 = vmul.f32 0.1, %v1316_v49  ;;  %vm16400_vm5 = vnez %v16219_v16  ;;  %v1325_v37 = vpop.f32.mrb[7].mxu0 }
 0x13e   : > { %v16397_v14 = vsel %vm16396_vm10, %v13822_v36, %v13773_v2  ;;  %v16403_v57 = vsel %vm16400_vm5, %v16401_v47, %v16402_v35  ;;  %v16404_v45 = vmov 0  ;;  %1709 = vst [vmem:[#allocation2 + $0xab] sm:$0xff] %v1673_v6  ;;  %vm16406_vm10 = vcmp.ge.f32.partialorder %v1386_v42, 0.0  ;;  %v16416_v47 = vld [vmem:[#allocation29_spill] sm:$0xff] }
 0x13f   : > { %vm14630_vm8 = vcmp.lt.s32.totalorder %v16397_v14, 16  ;;  %vm14641_vm14 = vcmp.lt.s32.totalorder %v16403_v57, 16  ;;  %v1564_v2 = vsel %vm16406_vm10, %v1386_v42, %v1528_v44  ;;  %v1401_v36 = vadd.f32 %v10017_v63, %v14403_v53  ;;  %v1405_v44 = vpop.f32.mrb[5].mxu1 }
 0x140   : > { %v16405_v45 = vsel %vm14641_vm14, 4294967295, %v16404_v45  ;;  %v1551_v46 = vsel %vm1479_vm7, %v1321_v32, %v1515_v59  ;;  %v1331_v33 = vadd.f32 %v9996_v7, %v14403_v53  ;;  %v1672_v16 = vsel %vm14507_vm4, %v1564_v2, 0.0  ;;  %v16413_v59 = vld [vmem:[#allocation41_spill] sm:$0xff]  ;;  %v9999_v2 = vpop.f32.mrb[8].mxu0 }
 0x141   : > { %v1396_v1 = vadd.f32 %v14403_v53, %v1395_v28  ;;  %vm16407_vm5 = vnez %v16282_v24  ;;  %v16409_v6 = vmov 0  ;;  %v1659_v42 = vsel %vm14530_vm1, %v1551_v46, 0.0  ;;  %1708 = vst [vmem:[#allocation2 + $0xa3] sm:$0xff] %v1672_v16  ;;  %v1781_v28 = vld [vmem:[#allocation2 + $0x19] sm:$0xff]  ;;  %v16420_v46 = vld [vmem:[#allocation43_spill] sm:$0xff] }
 0x142   : > { %v16408_v14 = vsel %vm16407_vm5, %v14242_v40, %v14159_v58  ;;  %vm16412_vm7 = vcmp.ge.f32.partialorder %v1316_v49, 0.0  ;;  %v1326_v63 = vadd.f32 %v14403_v53, %v1325_v37  ;;  %1695 = vst [vmem:[#allocation2 + $0x3b] sm:$0xff] %v1659_v42  ;;  %vm1481_vm4 = vcmp.ge.f32.partialorder %v1331_v33, 0.0  ;;  %v1780_v40 = vld [vmem:[#allocation2 + $0x11] sm:$0xff]  ;;  %v16423_v16 = vld [vmem:[#allocation30_spill] sm:$0xff] }
 0x143   : > { %vm14656_vm12 = vcmp.lt.s32.totalorder %v16408_v14, 16  ;;  %v1550_v32 = vsel %vm16412_vm7, %v1316_v49, %v1514_v62  ;;  %v1517_v58 = vmul.f32 0.1, %v1331_v33  ;;  %vm16414_vm5 = vnez %v16413_v59  ;;  %v16415_v7 = vld [vmem:[#allocation33_spill] sm:$0xff]  ;;  %10074 = vmatprep.mubr.f32.mxu1 %v1780_v40  ;;  %v16422_v37 = vld [vmem:[#allocation36_spill] sm:$0xff] }
 0x144   : > { %v16410_v6 = vsel %vm14656_vm12, 4294967295, %v16409_v6  ;;  %v1658_v24 = vsel %vm14547_vm6, %v1550_v32, 0.0  ;;  %v16417_v35 = vsel %vm16414_vm5, %v16415_v7, %v16416_v47  ;;  %v16418_v57 = vmov 0  ;;  %10075 = vmatmul.mubr.f32.gmra.mrb[20].mxu1 %v1781_v28 }
 0x145   : > { %16411 = vst [vmem:[#allocation22_spill] sm:$0xff] %v16410_v6  ;;  %vm14671_vm9 = vcmp.lt.s32.totalorder %v16417_v35, 16  ;;  %v1411_v49 = vadd.f32 %v10020_v3, %v14403_v53  ;;  %1694 = vst [vmem:[#allocation2 + $0x33] sm:$0xff] %v1658_v24  ;;  %v1516_v62 = vmul.f32 0.1, %v1326_v63  ;;  %vm16421_vm10 = vnez %v16420_v46  ;;  %v1335_v24 = vpop.f32.mrb[9].mxu0 }
 0x146   : > { %v16419_v57 = vsel %vm14671_vm9, 4294967295, %v16418_v57  ;;  %v16424_v14 = vsel %vm16421_vm10, %v16422_v37, %v16423_v16  ;;  %v16425_v42 = vmov 0  ;;  %v1531_v32 = vmul.f32 0.1, %v1401_v36  ;;  %v10023_v46 = vpop.f32.mrb[6].mxu1  ;;  %v1783_v37 = vld [vmem:[#allocation2 + $0x29] sm:$0xff] }
 0x147   : > { %vm14681_vm6 = vcmp.lt.s32.totalorder %v16424_v14, 16  ;;  %v14686_v59 = vadd.f32 %v14403_v53, %v1405_v44  ;;  %v1553_v7 = vsel %vm1481_vm4, %v1331_v33, %v1517_v58  ;;  %v1341_v3 = vadd.f32 %v9999_v2, %v14403_v53  ;;  %v1415_v2 = vpop.f32.mrb[7].mxu1  ;;  %v16434_v16 = vld [vmem:[#allocation44_spill] sm:$0xff]  ;;  %v16436_v14 = vld [vmem:[#allocation37_spill] sm:$0xff] }
 0x148   : > { %v16426_v42 = vsel %vm14681_vm6, 4294967295, %v16425_v42  ;;  %v1530_v40 = vmul.f32 0.1, %v1396_v1  ;;  %vm16427_vm7 = vnez %v16284_v25  ;;  %v16429_v35 = vmov 0  ;;  %v3029_v6 = vld [vmem:[#allocation3 + $0x218] sm:$0xff] }
 0x149   : > { %v16428_v47 = vsel %vm16427_vm7, %v14269_v23, %v14206_v5  ;;  %v1661_v44 = vsel %vm14583_vm15, %v1553_v7, 0.0  ;;  %vm16432_vm4 = vcmp.ge.f32.partialorder %v1326_v63, 0.0  ;;  %v1336_v58 = vadd.f32 %v14403_v53, %v1335_v24  ;;  %v1782_v23 = vld [vmem:[#allocation2 + $0x21] sm:$0xff] }
 0x14a   : > { %vm14694_vm10 = vcmp.lt.s32.totalorder %v16428_v47, 16  ;;  %v1552_v33 = vsel %vm16432_vm4, %v1326_v63, %v1516_v62  ;;  %vm16433_vm1 = vcmp.ge.f32.partialorder %v1401_v36, 0.0  ;;  %1697 = vst [vmem:[#allocation2 + $0x4b] sm:$0xff] %v1661_v44  ;;  %vm1483_vm7 = vcmp.ge.f32.partialorder %v1341_v3, 0.0  ;;  %v16437_v47 = vld [vmem:[#allocation32_spill] sm:$0xff]  ;;  %10077 = vmatprep.mubr.f32.mxu1 %v1782_v23  ;;  %v16442_v24 = vld [vmem:[#allocation46_spill] sm:$0xff] }
 0x14b   : > { %v16430_v35 = vsel %vm14694_vm10, 4294967295, %v16429_v35  ;;  %v1567_v28 = vsel %vm16433_vm1, %v1401_v36, %v1531_v32  ;;  %v1660_v25 = vsel %vm14592_vm2, %v1552_v33, 0.0  ;;  %v1519_v5 = vmul.f32 0.1, %v1341_v3  ;;  %v10002_v32 = vpop.f32.mrb[10].mxu0  ;;  %v16444_v44 = vld [vmem:[#allocation39_spill] sm:$0xff]  ;;  %10078 = vmatmul.mubr.f32.gmra.mrb[22].mxu1 %v1783_v37 }
 0x14c   : > { %16431 = vst [vmem:[#allocation23_spill] sm:$0xff] %v16430_v35  ;;  %vm16435_vm5 = vnez %v16434_v16  ;;  %vm16441_vm4 = vcmp.ge.f32.partialorder %v1396_v1, 0.0  ;;  %1696 = vst [vmem:[#allocation2 + $0x43] sm:$0xff] %v1660_v25  ;;  %vm1482_vm1 = vcmp.ge.f32.partialorder %v1336_v58, 0.0  ;;  %v1518_v62 = vmul.f32 0.1, %v1336_v58 }
 0x14d   : > { %v16438_v7 = vsel %vm16435_vm5, %v16436_v14, %v16437_v47  ;;  %v1566_v36 = vsel %vm16441_vm4, %v1396_v1, %v1530_v40  ;;  %vm16443_vm2 = vnez %v16442_v24  ;;  %v16445_v33 = vld [vmem:[#allocation34_spill] sm:$0xff]  ;;  %v16447_v16 = vmov 0  ;;  %v1345_v47 = vpop.f32.mrb[11].mxu0  ;;  %v3028_v35 = vld [vmem:[#allocation3 + $0x210] sm:$0xff] }
 0x14e   : > { %vm14710_vm15 = vcmp.lt.s32.totalorder %v16438_v7, 16  ;;  %v16446_v21 = vsel %vm16443_vm2, %v16444_v44, %v16445_v33  ;;  %v1675_v14 = vsel %vm14606_vm3, %v1567_v28, 0.0  ;;  %v1674_v1 = vsel %vm14615_vm13, %v1566_v36, 0.0  ;;  %v14738_v28 = vpop.f32.mrb[8].mxu1  ;;  %v1785_v44 = vld [vmem:[#allocation2 + $0x39] sm:$0xff]  ;;  %v16459_v33 = vld [vmem:[#allocation47_spill] sm:$0xff] }
 0x14f   : > { %vm14720_vm0 = vcmp.lt.s32.totalorder %v16446_v21, 16  ;;  %v1555_v40 = vsel %vm1483_vm7, %v1341_v3, %v1519_v5  ;;  %v1351_v25 = vadd.f32 %v10002_v32, %v14403_v53  ;;  %1711 = vst [vmem:[#allocation2 + $0xbb] sm:$0xff] %v1675_v14  ;;  %1710 = vst [vmem:[#allocation2 + $0xb3] sm:$0xff] %v1674_v1  ;;  %vm1497_vm5 = vcmp.ge.f32.partialorder %v1411_v49, 0.0  ;;  %v16450_v21 = vld [vmem:[#allocation55_spill] sm:$0xff]  ;;  %v14754_v36 = vpop.f32.mrb[9].mxu1 }
 0x150   : > { %v16448_v16 = vsel %vm14720_vm0, 4294967295, %v16447_v16  ;;  %v1533_v23 = vmul.f32 0.1, %v1411_v49  ;;  %vm16449_vm2 = vnez %v16287_v19  ;;  %v16452_v24 = vmov 0  ;;  %v16462_v14 = vld [vmem:[#allocation35_spill] sm:$0xff] }
 0x151   : > { %v16451_v7 = vsel %vm16449_vm2, %v14281_v43, %v16450_v21  ;;  %v1663_v3 = vsel %vm14630_vm8, %v1555_v40, 0.0  ;;  %v1554_v5 = vsel %vm1482_vm1, %v1336_v58, %v1518_v62  ;;  %v1346_v37 = vadd.f32 %v14403_v53, %v1345_v47  ;;  %v1784_v62 = vld [vmem:[#allocation2 + $0x31] sm:$0xff]  ;;  %v10005_v47 = vpop.f32.mrb[12].mxu0 }
 0x152   : > { %vm14734_vm4 = vcmp.lt.s32.totalorder %v16451_v7, 16  ;;  %v16455_v43 = vsel %vm14318_vm11, %v14346_v41, %v14253_v26  ;;  %v16456_v19 = vmov 0  ;;  %1699 = vst [vmem:[#allocation2 + $0x5b] sm:$0xff] %v1663_v3  ;;  %v1662_v32 = vsel %vm14641_vm14, %v1554_v5, 0.0  ;;  %10080 = vmatprep.mubr.f32.mxu1 %v1784_v62  ;;  %v16466_v21 = vld [vmem:[#allocation48_spill] sm:$0xff]  ;;  %v16468_v7 = vld [vmem:[#allocation45_spill] sm:$0xff] }
 0x153   : > { %v16453_v24 = vsel %vm14734_vm4, 4294967295, %v16452_v24  ;;  %vm14750_vm2 = vcmp.lt.s32.totalorder %v16455_v43, 16  ;;  %vm1485_vm1 = vcmp.ge.f32.partialorder %v1351_v25, 0.0  ;;  %v1521_v58 = vmul.f32 0.1, %v1351_v25  ;;  %1698 = vst [vmem:[#allocation2 + $0x53] sm:$0xff] %v1662_v32  ;;  %10081 = vmatmul.mubr.f32.gmra.mrb[24].mxu1 %v1785_v44 }
 0x154   : > { %16454 = vst [vmem:[#allocation18_spill] sm:$0xff] %v16453_v24  ;;  %v16457_v19 = vsel %vm14750_vm2, 4294967295, %v16456_v19  ;;  %vm16460_vm7 = vnez %v16459_v33  ;;  %v16464_v26 = vmov 0  ;;  %v1569_v41 = vsel %vm1497_vm5, %v1411_v49, %v1533_v23  ;;  %v16469_v3 = vld [vmem:[#allocation38_spill] sm:$0xff]  ;;  %v14780_v49 = vpop.f32.mrb[10].mxu1  ;;  %v1355_v62 = vpop.f32.mrb[13].mxu0 }
 0x155   : > { %16458 = vst [vmem:[#allocation25_spill] sm:$0xff] %v16457_v19  ;;  %v16463_v1 = vsel %vm16460_vm7, %v16461_v15, %v16462_v14  ;;  %vm1484_vm13 = vcmp.ge.f32.partialorder %v1346_v37, 0.0  ;;  %v1520_v40 = vmul.f32 0.1, %v1346_v37  ;;  %vm16467_vm3 = vnez %v16466_v21  ;;  %v14785_v21 = vpop.f32.mrb[11].mxu1 }
 0x156   : > { %vm14763_vm11 = vcmp.lt.s32.totalorder %v16463_v1, 16  ;;  %v16470_v5 = vsel %vm16467_vm3, %v16468_v7, %v16469_v3  ;;  %v16471_v43 = vmov 0  ;;  %v1677_v33 = vsel %vm14656_vm12, %v1569_v41, 0.0  ;;  %v16481_v3 = vld [vmem:[#allocation49_spill] sm:$0xff] }
 0x157   : > { %v16465_v26 = vsel %vm14763_vm11, 4294967295, %v16464_v26  ;;  %vm14773_vm14 = vcmp.lt.s32.totalorder %v16470_v5, 16  ;;  %v1421_v15 = vadd.f32 %v10023_v46, %v14403_v53  ;;  %v1557_v23 = vsel %vm1485_vm1, %v1351_v25, %v1521_v58  ;;  %1713 = vst [vmem:[#allocation2 + $0xcb] sm:$0xff] %v1677_v33  ;;  %v16482_v5 = vld [vmem:[#allocation42_spill] sm:$0xff] }
 0x158   : > { %v16472_v43 = vsel %vm14773_vm14, 4294967295, %v16471_v43  ;;  %v1361_v32 = vadd.f32 %v10005_v47, %v14403_v53  ;;  %v1532_v14 = vmul.f32 0.1, %v14686_v59  ;;  %v1416_v1 = vadd.f32 %v14403_v53, %v1415_v2  ;;  %v1786_v47 = vld [vmem:[#allocation2 + $0x41] sm:$0xff] }
 0x159   : > { %16473 = vst [vmem:[#allocation24_spill] sm:$0xff] %v16472_v43  ;;  %v1665_v7 = vsel %vm14671_vm9, %v1557_v23, 0.0  ;;  %v1556_v41 = vsel %vm1484_vm13, %v1346_v37, %v1520_v40  ;;  %v1356_v46 = vadd.f32 %v14403_v53, %v1355_v62  ;;  %vm16474_vm5 = vnez %v16295_v22  ;;  %v1787_v37 = vld [vmem:[#allocation2 + $0x49] sm:$0xff]  ;;  %v10008_v23 = vpop.f32.mrb[14].mxu0  ;;  %10083 = vmatprep.mubr.f32.mxu1 %v1786_v47  ;;  %v16488_v62 = vld [vmem:[#allocation54_spill] sm:$0xff] }
 0x15a   : > { %v16475_v25 = vsel %vm16474_vm5, %v14369_v61, %v14261_v55  ;;  %v16476_v58 = vmov 0  ;;  %1701 = vst [vmem:[#allocation2 + $0x6b] sm:$0xff] %v1665_v7  ;;  %v1664_v2 = vsel %vm14681_vm6, %v1556_v41, 0.0  ;;  %vm1487_vm1 = vcmp.ge.f32.partialorder %v1361_v32, 0.0  ;;  %v16479_v40 = vld [vmem:[#allocation51_spill] sm:$0xff]  ;;  %v16490_v7 = vld [vmem:[#allocation53_spill] sm:$0xff]  ;;  %10084 = vmatmul.mubr.f32.gmra.mrb[26].mxu1 %v1787_v37 }
 0x15b   : > { %vm14796_vm7 = vcmp.lt.s32.totalorder %v16475_v25, 16  ;;  %v1523_v44 = vmul.f32 0.1, %v1361_v32  ;;  %vm16480_vm13 = vnez %v16479_v40  ;;  %v16484_v33 = vmov 0  ;;  %1700 = vst [vmem:[#allocation2 + $0x63] sm:$0xff] %v1664_v2  ;;  %v16491_v41 = vld [vmem:[#allocation52_spill] sm:$0xff] }
 0x15c   : > { %v16477_v58 = vsel %vm14796_vm7, 4294967295, %v16476_v58  ;;  %v16483_v22 = vsel %vm16480_vm13, %v16481_v3, %v16482_v5  ;;  %vm16487_vm5 = vcmp.ge.f32.partialorder %v14686_v59, 0.0  ;;  %vm1486_vm12 = vcmp.ge.f32.partialorder %v1356_v46, 0.0 }
 0x15d   : > { %16478 = vst [vmem:[#allocation19_spill] sm:$0xff] %v16477_v58  ;;  %vm14807_vm3 = vcmp.lt.s32.totalorder %v16483_v22, 16  ;;  %v1568_v55 = vsel %vm16487_vm5, %v14686_v59, %v1532_v14  ;;  %v1522_v61 = vmul.f32 0.1, %v1356_v46  ;;  %vm16489_vm6 = vnez %v16488_v62  ;;  %v1365_v14 = vpop.f32.mrb[15].mxu0 }
 0x15e   : > { %v16485_v33 = vsel %vm14807_vm3, 4294967295, %v16484_v33  ;;  %v16492_v25 = vsel %vm16489_vm6, %v16490_v7, %v16491_v41  ;;  %v16493_v40 = vmov 0  ;;  %v1676_v3 = vsel %vm14694_vm10, %v1568_v55, 0.0  ;;  %v14835_v7 = vpop.f32.mrb[12].mxu1  ;;  %v1789_v41 = vld [vmem:[#allocation2 + $0x59] sm:$0xff] }
 0x15f   : > { %16486 = vst [vmem:[#allocation27_spill] sm:$0xff] %v16485_v33  ;;  %vm14819_vm9 = vcmp.lt.s32.totalorder %v16492_v25, 16  ;;  %v1559_v5 = vsel %vm1487_vm1, %v1361_v32, %v1523_v44  ;;  %v1371_v59 = vadd.f32 %v10008_v23, %v14403_v53  ;;  %1712 = vst [vmem:[#allocation2 + $0xc3] sm:$0xff] %v1676_v3  ;;  %v1535_v2 = vmul.f32 0.1, %v1421_v15  ;;  %v1788_v23 = vld [vmem:[#allocation2 + $0x51] sm:$0xff] }
 0x160   : > { %v16494_v40 = vsel %vm14819_vm9, 4294967295, %v16493_v40  ;;  %v1534_v47 = vmul.f32 0.1, %v1416_v1  ;;  %vm16496_vm5 = vnez %v16302_v17  ;;  %v16498_v62 = vmov 0  ;;  %10086 = vmatprep.mubr.f32.mxu1 %v1788_v23  ;;  %v3033_v33 = vld [vmem:[#allocation3 + $0x238] sm:$0xff] }
 0x161   : > { %16495 = vst [vmem:[#allocation26_spill] sm:$0xff] %v16494_v40  ;;  %v16497_v22 = vsel %vm16496_vm5, %v14372_v13, %v14272_v30  ;;  %v1667_v32 = vsel %vm14710_vm15, %v1559_v5, 0.0  ;;  %v1558_v44 = vsel %vm1486_vm12, %v1356_v46, %v1522_v61  ;;  %v1366_v37 = vadd.f32 %v14403_v53, %v1365_v14  ;;  %v14852_v13 = vpop.f32.mrb[13].mxu1  ;;  %10087 = vmatmul.mubr.f32.gmra.mrb[28].mxu1 %v1789_v41  ;;  %v16517_v41 = vld [vmem:[#allocation64_spill] sm:$0xff]  ;;  %v3032_v40 = vld [vmem:[#allocation3 + $0x230] sm:$0xff] }
 0x162   : > { %vm14831_vm6 = vcmp.lt.s32.totalorder %v16497_v22, 16  ;;  %v1431_v55 = vadd.f32 %v14738_v28, %v14403_v53  ;;  %vm16501_vm1 = vnez %v16309_v4  ;;  %v16503_v17 = vmov 0  ;;  %1703 = vst [vmem:[#allocation2 + $0x7b] sm:$0xff] %v1667_v32  ;;  %v10035_v3 = vpop.f32.mrb[14].mxu1  ;;  %v16510_v32 = vld [vmem:[#allocation63_spill] sm:$0xff] }
 0x163   : > { %v16499_v62 = vsel %vm14831_vm6, 4294967295, %v16498_v62  ;;  %v16502_v30 = vsel %vm16501_vm1, %v14385_v50, %v14285_v52  ;;  %v1666_v46 = vsel %vm14720_vm0, %v1558_v44, 0.0  ;;  %vm1489_vm12 = vcmp.ge.f32.partialorder %v1371_v59, 0.0  ;;  %v10011_v52 = vpop.f32.mrb[16].mxu0  ;;  %v16511_v44 = vld [vmem:[#allocation56_spill] sm:$0xff] }
 0x164   : > { %16500 = vst [vmem:[#allocation21_spill] sm:$0xff] %v16499_v62  ;;  %vm14848_vm5 = vcmp.lt.s32.totalorder %v16502_v30, 16  ;;  %v1525_v61 = vmul.f32 0.1, %v1371_v59  ;;  %vm16506_vm13 = vcmp.ge.f32.partialorder %v1421_v15, 0.0  ;;  %1702 = vst [vmem:[#allocation2 + $0x73] sm:$0xff] %v1666_v46  ;;  %v1381_v14 = vadd.f32 %v10011_v52, %v14403_v53 }
 0x165   : > { %v16504_v17 = vsel %vm14848_vm5, 4294967295, %v16503_v17  ;;  %v1571_v28 = vsel %vm16506_vm13, %v1421_v15, %v1535_v2  ;;  %v1524_v4 = vmul.f32 0.1, %v1366_v37  ;;  %vm16507_vm1 = vcmp.ge.f32.partialorder %v1416_v1, 0.0  ;;  %v1375_v22 = vpop.f32.mrb[17].mxu0  ;;  %v16508_v2 = vld [vmem:[#allocation62_spill] sm:$0xff] }
 0x166   : > { %16505 = vst [vmem:[#allocation31_spill] sm:$0xff] %v16504_v17  ;;  %v1679_v50 = vsel %vm14734_vm4, %v1571_v28, 0.0  ;;  %v1570_v25 = vsel %vm16507_vm1, %v1416_v1, %v1534_v47  ;;  %v1561_v5 = vsel %vm1489_vm12, %v1371_v59, %v1525_v61  ;;  %vm16509_vm10 = vnez %v16508_v2  ;;  %v14872_v1 = vpop.f32.mrb[15].mxu1  ;;  %v16519_v28 = vld [vmem:[#allocation65_spill] sm:$0xff]  ;;  %v1791_v2 = vld [vmem:[#allocation2 + $0x69] sm:$0xff] }
 0x167   : > { %1715 = vst [vmem:[#allocation2 + $0xdb] sm:$0xff] %v1679_v50  ;;  %v1678_v15 = vsel %vm14750_vm2, %v1570_v25, 0.0  ;;  %v16512_v30 = vsel %vm16509_vm10, %v16510_v32, %v16511_v44  ;;  %v16513_v46 = vmov 0  ;;  %v1669_v59 = vsel %vm14763_vm11, %v1561_v5, 0.0  ;;  %v16520_v52 = vld [vmem:[#allocation57_spill] sm:$0xff]  ;;  %v16530_v44 = vld [vmem:[#allocation68_spill] sm:$0xff] }
 0x168   : > { %vm14868_vm0 = vcmp.lt.s32.totalorder %v16512_v30, 16  ;;  %vm16516_vm12 = vcmp.ge.f32.partialorder %v1366_v37, 0.0  ;;  %v1376_v61 = vadd.f32 %v14403_v53, %v1375_v22  ;;  %1714 = vst [vmem:[#allocation2 + $0xd3] sm:$0xff] %v1678_v15  ;;  %v1537_v23 = vmul.f32 0.1, %v1431_v55  ;;  %1705 = vst [vmem:[#allocation2 + $0x8b] sm:$0xff] %v1669_v59 }
 0x169   : > { %v16514_v46 = vsel %vm14868_vm0, 4294967295, %v16513_v46  ;;  %v1560_v47 = vsel %vm16516_vm12, %v1366_v37, %v1524_v4  ;;  %vm16518_vm1 = vnez %v16517_v41  ;;  %v16522_v25 = vmov 0  ;;  %v1790_v15 = vld [vmem:[#allocation2 + $0x61] sm:$0xff] }
 0x16a   : > { %16515 = vst [vmem:[#allocation28_spill] sm:$0xff] %v16514_v46  ;;  %v16521_v50 = vsel %vm16518_vm1, %v16519_v28, %v16520_v52  ;;  %vm16525_vm13 = vnez %v16325_v54  ;;  %v16527_v37 = vmov 0  ;;  %v1668_v4 = vsel %vm14773_vm14, %v1560_v47, 0.0  ;;  %v16532_v54 = vld [vmem:[#allocation66_spill] sm:$0xff]  ;;  %10089 = vmatprep.mubr.f32.mxu1 %v1790_v15  ;;  %v10038_v28 = vpop.f32.mrb[16].mxu1 }
 0x16b   : > { %vm14883_vm10 = vcmp.lt.s32.totalorder %v16521_v50, 16  ;;  %v16526_v5 = vsel %vm16525_vm13, %v14433_v34, %v14310_v8  ;;  %vm1491_vm12 = vcmp.ge.f32.partialorder %v1381_v14, 0.0  ;;  %v1527_v22 = vmul.f32 0.1, %v1381_v14  ;;  %v16533_v30 = vld [vmem:[#allocation58_spill] sm:$0xff]  ;;  %1704 = vst [vmem:[#allocation2 + $0x83] sm:$0xff] %v1668_v4  ;;  %10090 = vmatmul.mubr.f32.gmra.mrb[30].mxu1 %v1791_v2 }
 0x16c   : > { %v16523_v25 = vsel %vm14883_vm10, 4294967295, %v16522_v25  ;;  %vm14892_vm2 = vcmp.lt.s32.totalorder %v16526_v5, 16  ;;  %v1426_v32 = vadd.f32 %v14403_v53, %v14754_v36  ;;  %vm16531_vm1 = vnez %v16530_v44  ;;  %v1465_v5 = vpop.f32.mrb[17].mxu1  ;;  %v1792_v2 = vld [vmem:[#allocation2 + $0x71] sm:$0xff] }
 0x16d   : > { %16524 = vst [vmem:[#allocation41_spill] sm:$0xff] %v16523_v25  ;;  %v16528_v37 = vsel %vm14892_vm2, 4294967295, %v16527_v37  ;;  %v16534_v34 = vsel %vm16531_vm1, %v16532_v54, %v16533_v30  ;;  %v16535_v8 = vmov 0  ;;  %vm1490_vm4 = vcmp.ge.f32.partialorder %v1376_v61, 0.0  ;;  %v1793_v54 = vld [vmem:[#allocation2 + $0x79] sm:$0xff]  ;;  %10092 = vmatprep.mubr.f32.mxu1 %v1792_v2 }
 0x16e   : > { %16529 = vst [vmem:[#allocation33_spill] sm:$0xff] %v16528_v37  ;;  %vm14905_vm13 = vcmp.lt.s32.totalorder %v16534_v34, 16  ;;  %v1526_v59 = vmul.f32 0.1, %v1376_v61  ;;  %vm16538_vm14 = vcmp.ge.f32.partialorder %v1431_v55, 0.0  ;;  %v1441_v41 = vadd.f32 %v14780_v49, %v14403_v53  ;;  %v16541_v49 = vld [vmem:[#allocation59_spill] sm:$0xff] }
 0x16f   : > { %v16536_v8 = vsel %vm14905_vm13, 4294967295, %v16535_v8  ;;  %v1573_v47 = vsel %vm16538_vm14, %v1431_v55, %v1537_v23  ;;  %v1563_v36 = vsel %vm1491_vm12, %v1381_v14, %v1527_v22  ;;  %vm1500_vm1 = vcmp.ge.f32.partialorder %v1426_v32, 0.0  ;;  %v16540_v55 = vld [vmem:[#allocation69_spill] sm:$0xff]  ;;  %v16545_v34 = vld [vmem:[#allocation72_spill] sm:$0xff]  ;;  %10093 = vmatmul.mubr.f32.gmra.mrb[32].mxu1 %v1793_v54 }
 0x170   : > { %16537 = vst [vmem:[#allocation29_spill] sm:$0xff] %v16536_v8  ;;  %v1681_v52 = vsel %vm14796_vm7, %v1573_v47, 0.0  ;;  %v1536_v50 = vmul.f32 0.1, %v1426_v32  ;;  %v1671_v4 = vsel %vm14807_vm3, %v1563_v36, 0.0  ;;  %v1562_v44 = vsel %vm1490_vm4, %v1376_v61, %v1526_v59  ;;  %v16547_v59 = vld [vmem:[#allocation70_spill] sm:$0xff] }
 0x171   : > { %1717 = vst [vmem:[#allocation2 + $0xeb] sm:$0xff] %v1681_v52  ;;  %vm1503_vm11 = vcmp.ge.f32.partialorder %v1441_v41, 0.0  ;;  %v1539_v15 = vmul.f32 0.1, %v1441_v41  ;;  %vm16539_vm14 = vnez %v16343_v18  ;;  %1707 = vst [vmem:[#allocation2 + $0x9b] sm:$0xff] %v1671_v4  ;;  %v1670_v22 = vsel %vm14819_vm9, %v1562_v44, 0.0 }
 0x172   : > { %v16542_v23 = vsel %vm16539_vm14, %v16540_v55, %v16541_v49  ;;  %v1572_v30 = vsel %vm1500_vm1, %v1426_v32, %v1536_v50  ;;  %v1436_v61 = vadd.f32 %v14403_v53, %v14785_v21  ;;  %v1451_v18 = vadd.f32 %v14835_v7, %v14403_v53  ;;  %v16548_v47 = vld [vmem:[#allocation60_spill] sm:$0xff]  ;;  %1706 = vst [vmem:[#allocation2 + $0x93] sm:$0xff] %v1670_v22  ;;  %v1794_v49 = vld [vmem:[#allocation2 + $0x81] sm:$0xff]  ;;  %v7230_v14 = vld [vmem:[#allocation6 + $0x320] sm:$0xff] }
 0x173   : > { %vm14921_vm12 = vcmp.lt.s32.totalorder %v16542_v23, 16  ;;  %vm16546_vm4 = vnez %v16545_v34  ;;  %vm16552_vm7 = vnez %v16368_v56  ;;  %v16554_v50 = vmov 0  ;;  %10095 = vmatprep.mubr.f32.mxu1 %v1794_v49  ;;  %v1802_v49 = vld [vmem:[#allocation2 + $0xc1] sm:$0xff] }
 0x174   : > { %v16549_v36 = vsel %vm16546_vm4, %v16547_v59, %v16548_v47  ;;  %v16553_v32 = vsel %vm16552_vm7, %v14556_v29, %v14417_v10  ;;  %v1680_v21 = vsel %vm14831_vm6, %v1572_v30, 0.0  ;;  %v1575_v7 = vsel %vm1503_vm11, %v1441_v41, %v1539_v15  ;;  %v1795_v41 = vld [vmem:[#allocation2 + $0x89] sm:$0xff]  ;;  %v15060_v8 = vld [vmem:[#allocation2 + $0xda] sm:$0xff] }
 0x175   : > { %vm14936_vm14 = vcmp.lt.s32.totalorder %v16549_v36, 16  ;;  %vm14945_vm1 = vcmp.lt.s32.totalorder %v16553_v32, 16  ;;  %v1446_v4 = vadd.f32 %v14403_v53, %v14852_v13  ;;  %v1461_v44 = vadd.f32 %v10035_v3, %v14403_v53  ;;  %1716 = vst [vmem:[#allocation2 + $0xe3] sm:$0xff] %v1680_v21  ;;  %10096 = vmatmul.mubr.f32.gmra.mrb[34].mxu1 %v1795_v41  ;;  %v1803_v41 = vld [vmem:[#allocation2 + $0xc9] sm:$0xff] }
 0x176   : > { %v16555_v50 = vsel %vm14945_vm1, 4294967295, %v16554_v50  ;;  %v1683_v29 = vsel %vm14848_vm5, %v1575_v7, 0.0  ;;  %vm1502_vm7 = vcmp.ge.f32.partialorder %v1436_v61, 0.0  ;;  %v1538_v10 = vmul.f32 0.1, %v1436_v61 }
 0x177   : > { %vm1505_vm4 = vcmp.ge.f32.partialorder %v1451_v18, 0.0  ;;  %1719 = vst [vmem:[#allocation2 + $0xfb] sm:$0xff] %v1683_v29  ;;  %v1541_v56 = vmul.f32 0.1, %v1451_v18  ;;  %vm1504_vm9 = vcmp.ge.f32.partialorder %v1446_v4, 0.0  ;;  %vm1507_vm3 = vcmp.ge.f32.partialorder %v1461_v44, 0.0 }
 0x178   : > { %v1540_v55 = vmul.f32 0.1, %v1446_v4  ;;  %v1574_v15 = vsel %vm1502_vm7, %v1436_v61, %v1538_v10  ;;  %v1543_v23 = vmul.f32 0.1, %v1461_v44  ;;  %v1456_v13 = vadd.f32 %v14403_v53, %v14872_v1  ;;  %v1798_v32 = vld [vmem:[#allocation2 + $0xa1] sm:$0xff]  ;;  %v1799_v10 = vld [vmem:[#allocation2 + $0xa9] sm:$0xff] }
 0x179   : > { %v1471_v3 = vadd.f32 %v10038_v28, %v14403_v53  ;;  %v1682_v22 = vsel %vm14868_vm0, %v1574_v15, 0.0  ;;  %v1577_v2 = vsel %vm1505_vm4, %v1451_v18, %v1541_v56  ;;  %v1466_v30 = vadd.f32 %v14403_v53, %v1465_v5  ;;  %v1796_v53 = vld [vmem:[#allocation2 + $0x91] sm:$0xff]  ;;  %v1797_v5 = vld [vmem:[#allocation2 + $0x99] sm:$0xff] }
 0x17a   : > { %v1576_v54 = vsel %vm1504_vm9, %v1446_v4, %v1540_v55  ;;  %1718 = vst [vmem:[#allocation2 + $0xf3] sm:$0xff] %v1682_v22  ;;  %v1685_v34 = vsel %vm14883_vm10, %v1577_v2, 0.0  ;;  %v1579_v1 = vsel %vm1507_vm3, %v1461_v44, %v1543_v23  ;;  %vm1506_vm11 = vcmp.ge.f32.partialorder %v1456_v13, 0.0  ;;  %10098 = vmatprep.mubr.f32.mxu1 %v1796_v53  ;;  %v1800_v56 = vld [vmem:[#allocation2 + $0xb1] sm:$0xff]  ;;  %v1801_v55 = vld [vmem:[#allocation2 + $0xb9] sm:$0xff] }
 0x17b   : > { %v1684_v61 = vsel %vm14892_vm2, %v1576_v54, 0.0  ;;  %1721 = vst [vmem:[#allocation2 + $0x10b] sm:$0xff] %v1685_v34  ;;  %v1687_v28 = vsel %vm14905_vm13, %v1579_v1, 0.0  ;;  %v1542_v18 = vmul.f32 0.1, %v1456_v13  ;;  %vm1509_vm9 = vcmp.ge.f32.partialorder %v1471_v3, 0.0  ;;  %10099 = vmatmul.mubr.f32.gmra.mrb[36].mxu1 %v1797_v5 }
 0x17c   : > { %1720 = vst [vmem:[#allocation2 + $0x103] sm:$0xff] %v1684_v61  ;;  %vm1508_vm7 = vcmp.ge.f32.partialorder %v1466_v30, 0.0  ;;  %1723 = vst [vmem:[#allocation2 + $0x11b] sm:$0xff] %v1687_v28  ;;  %v1545_v59 = vmul.f32 0.1, %v1471_v3  ;;  %10101 = vmatprep.mubr.f32.mxu1 %v1798_v32  ;;  %v1804_v15 = vld [vmem:[#allocation2 + $0xd1] sm:$0xff]  ;;  %v11891_v0 = vpack.c.bf16 %v3029_v6, %v3028_v35  ;;  %v11895_v48 = vpack.c.bf16 %v3031_v27, %v3030_v51 }
 0x17d   : > { %v1544_v47 = vmul.f32 0.1, %v1466_v30  ;;  %v14969_v36 = vsel %vm1506_vm11, %v1456_v13, %v1542_v18  ;;  %v1805_v23 = vld [vmem:[#allocation2 + $0xd9] sm:$0xff]  ;;  %v1806_v13 = vld [vmem:[#allocation2 + $0xe1] sm:$0xff]  ;;  %v2361_v28 = vld [vmem:[#allocation3 + $0x118] sm:$0xff]  ;;  %v11899_v43 = vpack.c.bf16 %v3033_v33, %v3032_v40 }
 0x17e   : > { %v1686_v21 = vsel %vm14921_vm12, %v14969_v36, 0.0  ;;  %v14974_v7 = vsel %vm1509_vm9, %v1471_v3, %v1545_v59  ;;  %v1807_v3 = vld [vmem:[#allocation2 + $0xe9] sm:$0xff]  ;;  %v13117_v18 = vld [vmem:[#allocation2] sm:$0xff]  ;;  %v2362_v5 = vld [vmem:[#allocation3 + $0x120] sm:$0xff] }
 0x17f   : > { %v14976_v4 = vsel %vm1508_vm7, %v1466_v30, %v1544_v47  ;;  %1722 = vst [vmem:[#allocation2 + $0x113] sm:$0xff] %v1686_v21  ;;  %v1689_v44 = vsel %vm14936_vm14, %v14974_v7, 0.0  ;;  %10102 = vmatmul.mubr.f32.gmra.mrb[38].mxu1 %v1799_v10  ;;  %v2360_v1 = vld [vmem:[#allocation3 + $0x110] sm:$0xff]  ;;  %v2363_v59 = vld [vmem:[#allocation3 + $0x128] sm:$0xff]  ;;  %v1728_v47 = vld [vmem:[#allocation2 + $0x10] sm:$0xff] }
 0x180   : > { %v1688_v29 = vsel %vm14945_vm1, %v14976_v4, 0.0  ;;  %1725 = vst [vmem:[#allocation2 + $0x12b] sm:$0xff] %v1689_v44  ;;  %10104 = vmatprep.mubr.f32.mxu1 %v1800_v56  ;;  %v11827_v53 = vpack.c.bf16 %v2361_v28, %v2360_v1  ;;  %v16556_v32 = vld [vmem:[#allocation50_spill] sm:$0xff]  ;;  %v11831_v21 = vpack.c.bf16 %v2363_v59, %v2362_v5  ;;  %v1729_v44 = vld [vmem:[#allocation2 + $0x18] sm:$0xff]  ;;  %v2365_v10 = vld [vmem:[#allocation3 + $0x138] sm:$0xff] }
 0x181   : > { %1724 = vst [vmem:[#allocation2 + $0x123] sm:$0xff] %v1688_v29  ;;  %v1808_v22 = vld [vmem:[#allocation2 + $0xf1] sm:$0xff]  ;;  %v1809_v2 = vld [vmem:[#allocation2 + $0xf9] sm:$0xff]  ;;  %v2364_v29 = vld [vmem:[#allocation3 + $0x130] sm:$0xff] }
 0x182   : > { %v1730_v56 = vld [vmem:[#allocation2 + $0x20] sm:$0xff]  ;;  %v1736_v28 = vld [vmem:[#allocation2 + $0x50] sm:$0xff]  ;;  %v2372_v5 = vld [vmem:[#allocation3 + $0x170] sm:$0xff] }
 0x183   : > { %10105 = vmatmul.mubr.f32.gmra.mrb[40].mxu1 %v1801_v55  ;;  %v1810_v54 = vld [vmem:[#allocation2 + $0x101] sm:$0xff]  ;;  %v1811_v30 = vld [vmem:[#allocation2 + $0x109] sm:$0xff]  ;;  %v11835_v55 = vpack.c.bf16 %v2365_v10, %v2364_v29  ;;  %v15069_v46 = vld [vmem:[#allocation2 + $0xf2] sm:$0xff] }
 0x184   : > { %10107 = vmatprep.mubr.f32.mxu1 %v1802_v49  ;;  %v1731_v49 = vld [vmem:[#allocation2 + $0x28] sm:$0xff]  ;;  %v2371_v1 = vld [vmem:[#allocation3 + $0x168] sm:$0xff]  ;;  %v2373_v59 = vld [vmem:[#allocation3 + $0x178] sm:$0xff] }
 0x185   : > { %v2693_v29 = vld [vmem:[#allocation3 + $0x188] sm:$0xff]  ;;  %v1740_v10 = vld [vmem:[#allocation2 + $0x70] sm:$0xff]  ;;  %v3040_v40 = vld [vmem:[#allocation3 + $0x270] sm:$0xff] }
 0x186   : > { %v1812_v34 = vld [vmem:[#allocation2 + $0x111] sm:$0xff]  ;;  %v1813_v61 = vld [vmem:[#allocation2 + $0x119] sm:$0xff]  ;;  %v15063_v37 = vld [vmem:[#allocation2 + $0xe2] sm:$0xff] }
 0x187   : > { %10108 = vmatmul.mubr.f32.gmra.mrb[42].mxu1 %v1803_v41  ;;  %v2366_v41 = vld [vmem:[#allocation3 + $0x140] sm:$0xff]  ;;  %v15066_v25 = vld [vmem:[#allocation2 + $0xea] sm:$0xff]  ;;  %v15075_v62 = vld [vmem:[#allocation2 + $0x102] sm:$0xff] }
 0x188   : > { %10110 = vmatprep.mubr.f32.mxu1 %v1804_v15  ;;  %v2367_v15 = vld [vmem:[#allocation3 + $0x148] sm:$0xff]  ;;  %v15078_v58 = vld [vmem:[#allocation2 + $0x10a] sm:$0xff]  ;;  %v15081_v19 = vld [vmem:[#allocation2 + $0x112] sm:$0xff] }
 0x189   : > { %v15072_v17 = vld [vmem:[#allocation2 + $0xfa] sm:$0xff]  ;;  %v3037_v27 = vld [vmem:[#allocation3 + $0x258] sm:$0xff] }
 0x18a   : > { %v15084_v24 = vld [vmem:[#allocation2 + $0x11a] sm:$0xff] }
 0x18b   : > { %10111 = vmatmul.mubr.f32.gmra.mrb[44].mxu1 %v1805_v23  ;;  %v1732_v23 = vld [vmem:[#allocation2 + $0x30] sm:$0xff]  ;;  %v3035_v6 = vld [vmem:[#allocation3 + $0x248] sm:$0xff] }
 0x18c   : > { %10113 = vmatprep.mubr.f32.mxu1 %v1806_v13  ;;  %v11839_v13 = vpack.c.bf16 %v2367_v15, %v2366_v41  ;;  %v1743_v41 = vld [vmem:[#allocation2 + $0x88] sm:$0xff]  ;;  %v1744_v15 = vld [vmem:[#allocation2 + $0x90] sm:$0xff]  ;;  %v3039_v33 = vld [vmem:[#allocation3 + $0x268] sm:$0xff] }
 0x18f   : > { %10114 = vmatmul.mubr.f32.gmra.mrb[46].mxu1 %v1807_v3  ;;  %v1733_v3 = vld [vmem:[#allocation2 + $0x38] sm:$0xff] }
 0x190   : > { %10116 = vmatprep.mubr.f32.mxu1 %v1808_v22  ;;  %v2368_v22 = vld [vmem:[#allocation3 + $0x150] sm:$0xff] }
 0x193   : > { %10117 = vmatmul.mubr.f32.gmra.mrb[48].mxu1 %v1809_v2  ;;  %v2369_v2 = vld [vmem:[#allocation3 + $0x158] sm:$0xff] }
 0x194   : > { %10119 = vmatprep.mubr.f32.mxu1 %v1810_v54  ;;  %v1734_v54 = vld [vmem:[#allocation2 + $0x40] sm:$0xff] }
 0x197   : > { %10120 = vmatmul.mubr.f32.gmra.mrb[50].mxu1 %v1811_v30  ;;  %v11843_v30 = vpack.c.bf16 %v2369_v2, %v2368_v22  ;;  %v1748_v22 = vld [vmem:[#allocation2 + $0xb0] sm:$0xff]  ;;  %v1749_v2 = vld [vmem:[#allocation2 + $0xb8] sm:$0xff] }
 0x198   : > { %10122 = vmatprep.mubr.f32.mxu1 %v1812_v34  ;;  %v1735_v34 = vld [vmem:[#allocation2 + $0x48] sm:$0xff] }
 0x19b   : > { %10123 = vmatmul.mubr.f32.gmra.mrb[52].mxu1 %v1813_v61  ;;  %v2370_v61 = vld [vmem:[#allocation3 + $0x160] sm:$0xff] }
 0x19c   : > { %10157 = vmatprep.mubr.f32.mxu1 %v13117_v18 }
 0x19f   : > { %10158 = vmatmul.mubr.f32.vlgmr.msra.gmra.mrb[18].mxu1 %v13117_v18  ;;  %v11847_v18 = vpack.c.bf16 %v2371_v1, %v2370_v61  ;;  %v1753_v61 = vld [vmem:[#allocation2 + $0xd8] sm:$0xff]  ;;  %v1754_v1 = vld [vmem:[#allocation2 + $0xe0] sm:$0xff] }
 0x1a0   : > { %11826 = vmatpush3.bf16.msra.mxu1 %v16556_v32  ;;  %10160 = vmatprep.mubr.f32.mxu1 %v1728_v47  ;;  %v1738_v47 = vld [vmem:[#allocation2 + $0x60] sm:$0xff]  ;;  %v11851_v32 = vpack.c.bf16 %v2373_v59, %v2372_v5  ;;  %v1759_v59 = vld [vmem:[#allocation2 + $0x108] sm:$0xff] }
 0x1a1   : > { %11828 = vmatprep.subr.bf16.mxu1 %v11827_v53  ;;  %v1758_v5 = vld [vmem:[#allocation2 + $0x100] sm:$0xff] }
 0x1a3   : > { %10161 = vmatmul.mubr.f32.gmra.mrb[20].mxu1 %v1729_v44  ;;  %v2692_v44 = vld [vmem:[#allocation3 + $0x180] sm:$0xff] }
 0x1a4   : > { %10163 = vmatprep.mubr.f32.mxu1 %v1730_v56  ;;  %11830 = vmatpush3.bf16.msra.mxu1 %v11827_v53  ;;  %v1737_v53 = vld [vmem:[#allocation2 + $0x58] sm:$0xff]  ;;  %v11855_v56 = vpack.c.bf16 %v2693_v29, %v2692_v44  ;;  %v2694_v44 = vld [vmem:[#allocation3 + $0x190] sm:$0xff]  ;;  %v2695_v29 = vld [vmem:[#allocation3 + $0x198] sm:$0xff] }
 0x1a5   : > { %11832 = vmatprep.subr.bf16.mxu1 %v11831_v21 }
 0x1a7   : > { %10164 = vmatmul.mubr.f32.gmra.mrb[22].mxu1 %v1731_v49  ;;  %v1742_v49 = vld [vmem:[#allocation2 + $0x80] sm:$0xff] }
 0x1a8   : > { %10166 = vmatprep.mubr.f32.mxu1 %v1732_v23  ;;  %11834 = vmatpush3.bf16.msra.mxu1 %v11831_v21  ;;  %v1739_v21 = vld [vmem:[#allocation2 + $0x68] sm:$0xff]  ;;  %v1745_v23 = vld [vmem:[#allocation2 + $0x98] sm:$0xff] }
 0x1a9   : > { %11836 = vmatprep.subr.bf16.mxu1 %v11835_v55 }
 0x1ab   : > { %10167 = vmatmul.mubr.f32.gmra.mrb[24].mxu1 %v1733_v3  ;;  %v1747_v3 = vld [vmem:[#allocation2 + $0xa8] sm:$0xff] }
 0x1ac   : > { %10169 = vmatprep.mubr.f32.mxu1 %v1734_v54  ;;  %11838 = vmatpush3.bf16.msra.mxu1 %v11835_v55  ;;  %v1741_v55 = vld [vmem:[#allocation2 + $0x78] sm:$0xff]  ;;  %v1750_v54 = vld [vmem:[#allocation2 + $0xc0] sm:$0xff] }
 0x1ad   : > { %11840 = vmatprep.subr.bf16.mxu1 %v11839_v13 }
 0x1af   : > { %10170 = vmatmul.mubr.f32.gmra.mrb[26].mxu1 %v1735_v34  ;;  %v1752_v34 = vld [vmem:[#allocation2 + $0xd0] sm:$0xff] }
 0x1b0   : > { %10172 = vmatprep.mubr.f32.mxu1 %v1736_v28  ;;  %11842 = vmatpush3.bf16.msra.mxu1 %v11839_v13  ;;  %v1746_v13 = vld [vmem:[#allocation2 + $0xa0] sm:$0xff]  ;;  %v1755_v28 = vld [vmem:[#allocation2 + $0xe8] sm:$0xff] }
 0x1b1   : > { %11844 = vmatprep.subr.bf16.mxu1 %v11843_v30 }
 0x1b3   : > { %10173 = vmatmul.mubr.f32.gmra.mrb[28].mxu1 %v1737_v53  ;;  %v1757_v53 = vld [vmem:[#allocation2 + $0xf8] sm:$0xff] }
 0x1b4   : > { %10175 = vmatprep.mubr.f32.mxu1 %v1738_v47  ;;  %11846 = vmatpush3.bf16.msra.mxu1 %v11843_v30  ;;  %v1751_v30 = vld [vmem:[#allocation2 + $0xc8] sm:$0xff]  ;;  %v1760_v47 = vld [vmem:[#allocation2 + $0x110] sm:$0xff] }
 0x1b5   : > { %11848 = vmatprep.subr.bf16.mxu1 %v11847_v18 }
 0x1b7   : > { %10176 = vmatmul.mubr.f32.gmra.mrb[30].mxu1 %v1739_v21  ;;  %v1761_v21 = vld [vmem:[#allocation2 + $0x118] sm:$0xff] }
 0x1b8   : > { %10178 = vmatprep.mubr.f32.mxu1 %v1740_v10  ;;  %11850 = vmatpush3.bf16.msra.mxu1 %v11847_v18  ;;  %v1756_v18 = vld [vmem:[#allocation2 + $0xf0] sm:$0xff] }
 0x1b9   : > { %11852 = vmatprep.subr.bf16.mxu1 %v11851_v32  ;;  %v2322_v10 = vld [vmem:[#allocation2 + $0xa] sm:$0xff] }
 0x1bb   : > { %10179 = vmatmul.mubr.f32.gmra.mrb[32].mxu1 %v1741_v55  ;;  %v11859_v55 = vpack.c.bf16 %v2695_v29, %v2694_v44  ;;  %v15009_v44 = vld [vmem:[#allocation2 + $0x52] sm:$0xff] }
 0x1bc   : > { %10181 = vmatprep.mubr.f32.mxu1 %v1742_v49  ;;  %11854 = vmatpush3.bf16.msra.mxu1 %v11851_v32  ;;  %v2321_v32 = vld [vmem:[#allocation2 + $0x2] sm:$0xff]  ;;  %v2696_v49 = vld [vmem:[#allocation3 + $0x1a0] sm:$0xff] }
 0x1bd   : > { %11856 = vmatprep.subr.bf16.mxu1 %v11855_v56 }
 0x1bf   : > { %10182 = vmatmul.mubr.f32.gmra.mrb[34].mxu1 %v1743_v41  ;;  %v2697_v41 = vld [vmem:[#allocation3 + $0x1a8] sm:$0xff] }
 0x1c0   : > { %10184 = vmatprep.mubr.f32.mxu1 %v1744_v15  ;;  %v14985_v15 = vld [vmem:[#allocation2 + $0x12] sm:$0xff] }
 0x1c3   : > { %10185 = vmatmul.mubr.f32.gmra.mrb[36].mxu1 %v1745_v23  ;;  %v11863_v23 = vpack.c.bf16 %v2697_v41, %v2696_v49  ;;  %v2707_v49 = vld [vmem:[#allocation3 + $0x1f8] sm:$0xff]  ;;  %v15015_v41 = vld [vmem:[#allocation2 + $0x62] sm:$0xff] }
 0x1c4   : > { %10187 = vmatprep.mubr.f32.mxu1 %v1746_v13  ;;  %v14988_v13 = vld [vmem:[#allocation2 + $0x1a] sm:$0xff] }
 0x1c7   : > { %10188 = vmatmul.mubr.f32.gmra.mrb[38].mxu1 %v1747_v3  ;;  %v2698_v3 = vld [vmem:[#allocation3 + $0x1b0] sm:$0xff] }
 0x1c8   : > { %10190 = vmatprep.mubr.f32.mxu1 %v1748_v22  ;;  %v2699_v22 = vld [vmem:[#allocation3 + $0x1b8] sm:$0xff] }
 0x1cb   : > { %10191 = vmatmul.mubr.f32.gmra.mrb[40].mxu1 %v1749_v2  ;;  %v14991_v2 = vld [vmem:[#allocation2 + $0x22] sm:$0xff] }
 0x1cc   : > { %10193 = vmatprep.mubr.f32.mxu1 %v1750_v54  ;;  %v11867_v54 = vpack.c.bf16 %v2699_v22, %v2698_v3  ;;  %v15018_v3 = vld [vmem:[#allocation2 + $0x6a] sm:$0xff]  ;;  %v3026_v22 = vld [vmem:[#allocation3 + $0x200] sm:$0xff] }
 0x1cf   : > { %10194 = vmatmul.mubr.f32.gmra.mrb[42].mxu1 %v1751_v30  ;;  %v14994_v30 = vld [vmem:[#allocation2 + $0x2a] sm:$0xff] }
 0x1d0   : > { %10196 = vmatprep.mubr.f32.mxu1 %v1752_v34  ;;  %v2701_v34 = vld [vmem:[#allocation3 + $0x1c8] sm:$0xff] }
 0x1d3   : > { %10197 = vmatmul.mubr.f32.gmra.mrb[44].mxu1 %v1753_v61  ;;  %v14997_v61 = vld [vmem:[#allocation2 + $0x32] sm:$0xff] }
 0x1d4   : > { %10199 = vmatprep.mubr.f32.mxu1 %v1754_v1 }
 0x1d7   : > { %10200 = vmatmul.mubr.f32.gmra.mrb[46].mxu1 %v1755_v28  ;;  %v15000_v28 = vld [vmem:[#allocation2 + $0x3a] sm:$0xff] }
 0x1d8   : > { %10202 = vmatprep.mubr.f32.mxu1 %v1756_v18  ;;  %v2702_v18 = vld [vmem:[#allocation3 + $0x1d0] sm:$0xff] }
 0x1db   : > { %10203 = vmatmul.mubr.f32.gmra.mrb[48].mxu1 %v1757_v53  ;;  %v2703_v53 = vld [vmem:[#allocation3 + $0x1d8] sm:$0xff] }
 0x1dc   : > { %10205 = vmatprep.mubr.f32.mxu1 %v1758_v5  ;;  %v15003_v5 = vld [vmem:[#allocation2 + $0x42] sm:$0xff] }
 0x1df   : > { %10206 = vmatmul.mubr.f32.gmra.mrb[50].mxu1 %v1759_v59  ;;  %v11875_v59 = vpack.c.bf16 %v2703_v53, %v2702_v18  ;;  %v15027_v18 = vld [vmem:[#allocation2 + $0x82] sm:$0xff]  ;;  %v15030_v53 = vld [vmem:[#allocation2 + $0x8a] sm:$0xff] }
 0x1e0   : > { %10208 = vmatprep.mubr.f32.mxu1 %v1760_v47  ;;  %v15006_v47 = vld [vmem:[#allocation2 + $0x4a] sm:$0xff] }
 0x1e3   : > { %10209 = vmatmul.mubr.f32.gmra.mrb[52].mxu1 %v1761_v21  ;;  %v2705_v21 = vld [vmem:[#allocation3 + $0x1e8] sm:$0xff] }
 0x1e4   : > { %10243 = vmatprep.mubr.f32.mxu1 %v2321_v32  ;;  %v2704_v32 = vld [vmem:[#allocation3 + $0x1e0] sm:$0xff] }
 0x1e5   : > { %v11879_v29 = vpack.c.bf16 %v2705_v21, %v2704_v32  ;;  %v15036_v32 = vld [vmem:[#allocation2 + $0x9a] sm:$0xff]  ;;  %v15039_v21 = vld [vmem:[#allocation2 + $0xa2] sm:$0xff] }
 0x1e7   : > { %10244 = vmatmul.mubr.f32.vlgmr.msra.gmra.mrb[18].mxu1 %v2322_v10  ;;  %v15012_v10 = vld [vmem:[#allocation2 + $0x5a] sm:$0xff] }
 0x1e8   : > { %11858 = vmatpush3.bf16.msra.mxu1 %v11855_v56  ;;  %10246 = vmatprep.mubr.f32.mxu1 %v14985_v15  ;;  %v2700_v56 = vld [vmem:[#allocation3 + $0x1c0] sm:$0xff] }
 0x1e9   : > { %11860 = vmatprep.subr.bf16.mxu1 %v11859_v55  ;;  %v11871_v1 = vpack.c.bf16 %v2701_v34, %v2700_v56  ;;  %v15021_v56 = vld [vmem:[#allocation2 + $0x72] sm:$0xff] }
 0x1eb   : > { %10247 = vmatmul.mubr.f32.gmra.mrb[20].mxu1 %v14988_v13 }
 0x1ec   : > { %10249 = vmatprep.mubr.f32.mxu1 %v14991_v2  ;;  %11862 = vmatpush3.bf16.msra.mxu1 %v11859_v55  ;;  %v2706_v55 = vld [vmem:[#allocation3 + $0x1f0] sm:$0xff] }
 0x1ed   : > { %11864 = vmatprep.subr.bf16.mxu1 %v11863_v23 }
 0x1ef   : > { %10250 = vmatmul.mubr.f32.gmra.mrb[22].mxu1 %v14994_v30 }
 0x1f0   : > { %10252 = vmatprep.mubr.f32.mxu1 %v14997_v61  ;;  %11866 = vmatpush3.bf16.msra.mxu1 %v11863_v23  ;;  %v11883_v23 = vpack.c.bf16 %v2707_v49, %v2706_v55  ;;  %v15045_v55 = vld [vmem:[#allocation2 + $0xb2] sm:$0xff]  ;;  %v15048_v49 = vld [vmem:[#allocation2 + $0xba] sm:$0xff] }
 0x1f1   : > { %11868 = vmatprep.subr.bf16.mxu1 %v11867_v54 }
 0x1f3   : > { %10253 = vmatmul.mubr.f32.gmra.mrb[24].mxu1 %v15000_v28 }
 0x1f4   : > { %10255 = vmatprep.mubr.f32.mxu1 %v15003_v5  ;;  %11870 = vmatpush3.bf16.msra.mxu1 %v11867_v54  ;;  %v3027_v54 = vld [vmem:[#allocation3 + $0x208] sm:$0xff] }
 0x1f5   : > { %11872 = vmatprep.subr.bf16.mxu1 %v11871_v1  ;;  %v11887_v34 = vpack.c.bf16 %v3027_v54, %v3026_v22  ;;  %v15054_v22 = vld [vmem:[#allocation2 + $0xca] sm:$0xff]  ;;  %v15057_v54 = vld [vmem:[#allocation2 + $0xd2] sm:$0xff] }
 0x1f7   : > { %10256 = vmatmul.mubr.f32.gmra.mrb[26].mxu1 %v15006_v47 }
 0x1f8   : > { %10258 = vmatprep.mubr.f32.mxu1 %v15009_v44  ;;  %11874 = vmatpush3.bf16.msra.mxu1 %v11871_v1  ;;  %v15024_v1 = vld [vmem:[#allocation2 + $0x7a] sm:$0xff] }
 0x1f9   : > { %11876 = vmatprep.subr.bf16.mxu1 %v11875_v59 }
 0x1fb   : > { %10259 = vmatmul.mubr.f32.gmra.mrb[28].mxu1 %v15012_v10 }
 0x1fc   : > { %10261 = vmatprep.mubr.f32.mxu1 %v15015_v41  ;;  %11878 = vmatpush3.bf16.msra.mxu1 %v11875_v59  ;;  %v15033_v59 = vld [vmem:[#allocation2 + $0x92] sm:$0xff] }
 0x1fd   : > { %11880 = vmatprep.subr.bf16.mxu1 %v11879_v29 }
 0x1ff   : > { %10262 = vmatmul.mubr.f32.gmra.mrb[30].mxu1 %v15018_v3 }
 0x200   : > { %10264 = vmatprep.mubr.f32.mxu1 %v15021_v56  ;;  %11882 = vmatpush3.bf16.msra.mxu1 %v11879_v29  ;;  %v15042_v29 = vld [vmem:[#allocation2 + $0xaa] sm:$0xff] }
 0x201   : > { %11884 = vmatprep.subr.bf16.mxu1 %v11883_v23 }
 0x203   : > { %10265 = vmatmul.mubr.f32.gmra.mrb[32].mxu1 %v15024_v1 }
 0x204   : > { %10267 = vmatprep.mubr.f32.mxu1 %v15027_v18  ;;  %11886 = vmatpush3.bf16.msra.mxu1 %v11883_v23  ;;  %v15051_v23 = vld [vmem:[#allocation2 + $0xc2] sm:$0xff] }
 0x205   : > { %11888 = vmatprep.subr.bf16.mxu1 %v11887_v34 }
 0x207   : > { %10268 = vmatmul.mubr.f32.gmra.mrb[34].mxu1 %v15030_v53 }
 0x208   : > { %10270 = vmatprep.mubr.f32.mxu1 %v15033_v59 }
 0x20b   : > { %10271 = vmatmul.mubr.f32.gmra.mrb[36].mxu1 %v15036_v32 }
 0x20c   : > { %10273 = vmatprep.mubr.f32.mxu1 %v15039_v21 }
 0x20f   : > { %10274 = vmatmul.mubr.f32.gmra.mrb[38].mxu1 %v15042_v29 }
 0x210   : > { %10276 = vmatprep.mubr.f32.mxu1 %v15045_v55 }
 0x213   : > { %10277 = vmatmul.mubr.f32.gmra.mrb[40].mxu1 %v15048_v49 }
 0x214   : > { %10279 = vmatprep.mubr.f32.mxu1 %v15051_v23 }
 0x217   : > { %10280 = vmatmul.mubr.f32.gmra.mrb[42].mxu1 %v15054_v22 }
 0x218   : > { %10282 = vmatprep.mubr.f32.mxu1 %v15057_v54 }
 0x21b   : > { %10283 = vmatmul.mubr.f32.gmra.mrb[44].mxu1 %v15060_v8 }
 0x21c   : > { %10285 = vmatprep.mubr.f32.mxu1 %v15063_v37 }
 0x21f   : > { %10286 = vmatmul.mubr.f32.gmra.mrb[46].mxu1 %v15066_v25 }
 0x220   : > { %10288 = vmatprep.mubr.f32.mxu1 %v15069_v46 }
 0x223   : > { %10289 = vmatmul.mubr.f32.gmra.mrb[48].mxu1 %v15072_v17 }
 0x224   : > { %10291 = vmatprep.mubr.f32.mxu1 %v15075_v62 }
 0x227   : > { %10292 = vmatmul.mubr.f32.gmra.mrb[50].mxu1 %v15078_v58 }
 0x228   : > { %10294 = vmatprep.mubr.f32.mxu1 %v15081_v19 }
 0x22b   : > { %10295 = vmatmul.mubr.f32.gmra.mrb[52].mxu1 %v15084_v24 }
 0x22c   : > { %10329 = vmatprep.mubr.f32.mxu1 %v14985_v15  ;;  %v3034_v15 = vld [vmem:[#allocation3 + $0x240] sm:$0xff] }
 0x22d   : > { %v11903_v35 = vpack.c.bf16 %v3035_v6, %v3034_v15  ;;  %v2999_v15 = vld [vmem:[#allocation2 + $0x63] sm:$0xff] }
 0x22f   : > { %10330 = vmatmul.mubr.f32.vlgmr.msra.gmra.mrb[18].mxu1 %v14988_v13  ;;  %v3036_v13 = vld [vmem:[#allocation3 + $0x250] sm:$0xff] }
 0x230   : > { %11890 = vmatpush3.bf16.msra.mxu1 %v11887_v34  ;;  %10332 = vmatprep.mubr.f32.mxu1 %v14991_v2  ;;  %v11907_v51 = vpack.c.bf16 %v3037_v27, %v3036_v13  ;;  %v3041_v2 = vld [vmem:[#allocation3 + $0x278] sm:$0xff]  ;;  %v2994_v34 = vld [vmem:[#allocation2 + $0x3b] sm:$0xff]  ;;  %v3374_v13 = vld [vmem:[#allocation3 + $0x2f0] sm:$0xff] }
 0x231   : > { %11892 = vmatprep.subr.bf16.mxu1 %v11891_v0  ;;  %v3375_v27 = vld [vmem:[#allocation3 + $0x2f8] sm:$0xff] }
 0x233   : > { %10333 = vmatmul.mubr.f32.gmra.mrb[20].mxu1 %v14994_v30  ;;  %v3360_v30 = vld [vmem:[#allocation3 + $0x280] sm:$0xff] }
 0x234   : > { %10335 = vmatprep.mubr.f32.mxu1 %v14997_v61  ;;  %11894 = vmatpush3.bf16.msra.mxu1 %v11891_v0  ;;  %v3038_v0 = vld [vmem:[#allocation3 + $0x260] sm:$0xff]  ;;  %v3361_v61 = vld [vmem:[#allocation3 + $0x288] sm:$0xff] }
 0x235   : > { %11896 = vmatprep.subr.bf16.mxu1 %v11895_v48 }
 0x237   : > { %10336 = vmatmul.mubr.f32.gmra.mrb[22].mxu1 %v15000_v28  ;;  %v11919_v28 = vpack.c.bf16 %v3361_v61, %v3360_v30  ;;  %v3004_v30 = vld [vmem:[#allocation2 + $0x8b] sm:$0xff]  ;;  %v3005_v61 = vld [vmem:[#allocation2 + $0x93] sm:$0xff] }
 0x238   : > { %10338 = vmatprep.mubr.f32.mxu1 %v15003_v5  ;;  %11898 = vmatpush3.bf16.msra.mxu1 %v11895_v48  ;;  %v11911_v48 = vpack.c.bf16 %v3039_v33, %v3038_v0  ;;  %v2689_v5 = vld [vmem:[#allocation2 + $0x122] sm:$0xff]  ;;  %v11947_v0 = vpack.c.bf16 %v3375_v27, %v3374_v13  ;;  %v3705_v27 = vld [vmem:[#allocation3 + $0x358] sm:$0xff] }
 0x239   : > { %11900 = vmatprep.subr.bf16.mxu1 %v11899_v43  ;;  %v3002_v33 = vld [vmem:[#allocation2 + $0x7b] sm:$0xff]  ;;  %v3704_v13 = vld [vmem:[#allocation3 + $0x350] sm:$0xff] }
 0x23b   : > { %10339 = vmatmul.mubr.f32.gmra.mrb[24].mxu1 %v15006_v47  ;;  %v2690_v47 = vld [vmem:[#allocation2 + $0x12a] sm:$0xff] }
 0x23c   : > { %10341 = vmatprep.mubr.f32.mxu1 %v15009_v44  ;;  %11902 = vmatpush3.bf16.msra.mxu1 %v11899_v43  ;;  %v11915_v43 = vpack.c.bf16 %v3041_v2, %v3040_v40  ;;  %v3363_v44 = vld [vmem:[#allocation3 + $0x298] sm:$0xff]  ;;  %v3695_v40 = vld [vmem:[#allocation3 + $0x308] sm:$0xff] }
 0x23d   : > { %11904 = vmatprep.subr.bf16.mxu1 %v11903_v35  ;;  %v3003_v2 = vld [vmem:[#allocation2 + $0x83] sm:$0xff] }
 0x23f   : > { %10342 = vmatmul.mubr.f32.gmra.mrb[26].mxu1 %v15012_v10  ;;  %v3364_v10 = vld [vmem:[#allocation3 + $0x2a0] sm:$0xff] }
 0x240   : > { %10344 = vmatprep.mubr.f32.mxu1 %v15015_v41  ;;  %11906 = vmatpush3.bf16.msra.mxu1 %v11903_v35  ;;  %v3367_v41 = vld [vmem:[#allocation3 + $0x2b8] sm:$0xff] }
 0x241   : > { %11908 = vmatprep.subr.bf16.mxu1 %v11907_v51  ;;  %v3000_v35 = vld [vmem:[#allocation2 + $0x6b] sm:$0xff] }
 0x243   : > { %10345 = vmatmul.mubr.f32.gmra.mrb[28].mxu1 %v15018_v3  ;;  %v2993_v3 = vld [vmem:[#allocation2 + $0x33] sm:$0xff] }
 0x244   : > { %10347 = vmatprep.mubr.f32.mxu1 %v15021_v56  ;;  %11910 = vmatpush3.bf16.msra.mxu1 %v11907_v51  ;;  %v3001_v51 = vld [vmem:[#allocation2 + $0x73] sm:$0xff] }
 0x245   : > { %11912 = vmatprep.subr.bf16.mxu1 %v11911_v48 }
 0x247   : > { %10348 = vmatmul.mubr.f32.gmra.mrb[30].mxu1 %v15024_v1  ;;  %v3368_v1 = vld [vmem:[#allocation3 + $0x2c0] sm:$0xff] }
 0x248   : > { %10350 = vmatprep.mubr.f32.mxu1 %v15027_v18  ;;  %11914 = vmatpush3.bf16.msra.mxu1 %v11911_v48  ;;  %v3369_v18 = vld [vmem:[#allocation3 + $0x2c8] sm:$0xff]  ;;  %v3694_v48 = vld [vmem:[#allocation3 + $0x300] sm:$0xff] }
 0x249   : > { %11916 = vmatprep.subr.bf16.mxu1 %v11915_v43 }
 0x24b   : > { %10351 = vmatmul.mubr.f32.gmra.mrb[32].mxu1 %v15030_v53  ;;  %v2995_v53 = vld [vmem:[#allocation2 + $0x43] sm:$0xff] }
 0x24c   : > { %10353 = vmatprep.mubr.f32.mxu1 %v15033_v59  ;;  %11918 = vmatpush3.bf16.msra.mxu1 %v11915_v43  ;;  %v11935_v59 = vpack.c.bf16 %v3369_v18, %v3368_v1  ;;  %v11951_v43 = vpack.c.bf16 %v3695_v40, %v3694_v48  ;;  %v3323_v1 = vld [vmem:[#allocation2 + $0x14] sm:$0xff]  ;;  %v3707_v40 = vld [vmem:[#allocation3 + $0x368] sm:$0xff] }
 0x24d   : > { %11920 = vmatprep.subr.bf16.mxu1 %v11919_v28  ;;  %v3706_v48 = vld [vmem:[#allocation3 + $0x360] sm:$0xff] }
 0x24f   : > { %10354 = vmatmul.mubr.f32.gmra.mrb[34].mxu1 %v15036_v32  ;;  %v2996_v32 = vld [vmem:[#allocation2 + $0x4b] sm:$0xff] }
 0x250   : > { %10356 = vmatprep.mubr.f32.mxu1 %v15039_v21  ;;  %v3370_v21 = vld [vmem:[#allocation3 + $0x2d0] sm:$0xff] }
 0x253   : > { %10357 = vmatmul.mubr.f32.gmra.mrb[36].mxu1 %v15042_v29  ;;  %v3371_v29 = vld [vmem:[#allocation3 + $0x2d8] sm:$0xff] }
 0x254   : > { %10359 = vmatprep.mubr.f32.mxu1 %v15045_v55  ;;  %v2997_v55 = vld [vmem:[#allocation2 + $0x53] sm:$0xff] }
 0x257   : > { %10360 = vmatmul.mubr.f32.gmra.mrb[38].mxu1 %v15048_v49  ;;  %v11939_v49 = vpack.c.bf16 %v3371_v29, %v3370_v21  ;;  %v15133_v21 = vld [vmem:[#allocation2 + $0x2c] sm:$0xff] }
 0x258   : > { %10362 = vmatprep.mubr.f32.mxu1 %v15051_v23  ;;  %v2998_v23 = vld [vmem:[#allocation2 + $0x5b] sm:$0xff]  ;;  %v3700_v29 = vld [vmem:[#allocation3 + $0x330] sm:$0xff] }
 0x25b   : > { %10363 = vmatmul.mubr.f32.gmra.mrb[40].mxu1 %v15054_v22  ;;  %v3372_v22 = vld [vmem:[#allocation3 + $0x2e0] sm:$0xff] }
 0x25c   : > { %10365 = vmatprep.mubr.f32.mxu1 %v15057_v54  ;;  %v3373_v54 = vld [vmem:[#allocation3 + $0x2e8] sm:$0xff] }
 0x25d   : > { %v11943_v6 = vpack.c.bf16 %v3373_v54, %v3372_v22  ;;  %v3702_v22 = vld [vmem:[#allocation3 + $0x340] sm:$0xff]  ;;  %v3703_v54 = vld [vmem:[#allocation3 + $0x348] sm:$0xff] }
 0x25f   : > { %10366 = vmatmul.mubr.f32.gmra.mrb[42].mxu1 %v15060_v8  ;;  %v3362_v8 = vld [vmem:[#allocation3 + $0x290] sm:$0xff] }
 0x260   : > { %10368 = vmatprep.mubr.f32.mxu1 %v15063_v37  ;;  %v2989_v37 = vld [vmem:[#allocation2 + $0x13] sm:$0xff] }
 0x263   : > { %10369 = vmatmul.mubr.f32.gmra.mrb[44].mxu1 %v15066_v25  ;;  %v11923_v25 = vpack.c.bf16 %v3363_v44, %v3362_v8  ;;  %v3009_v8 = vld [vmem:[#allocation2 + $0xb3] sm:$0xff]  ;;  %v3010_v44 = vld [vmem:[#allocation2 + $0xbb] sm:$0xff] }
 0x264   : > { %10371 = vmatprep.mubr.f32.mxu1 %v15069_v46  ;;  %v2990_v46 = vld [vmem:[#allocation2 + $0x1b] sm:$0xff] }
 0x267   : > { %10372 = vmatmul.mubr.f32.gmra.mrb[46].mxu1 %v15072_v17  ;;  %v3365_v17 = vld [vmem:[#allocation3 + $0x2a8] sm:$0xff] }
 0x268   : > { %10374 = vmatprep.mubr.f32.mxu1 %v15075_v62  ;;  %v2991_v62 = vld [vmem:[#allocation2 + $0x23] sm:$0xff] }
 0x26b   : > { %10375 = vmatmul.mubr.f32.gmra.mrb[48].mxu1 %v15078_v58  ;;  %v2992_v58 = vld [vmem:[#allocation2 + $0x2b] sm:$0xff] }
 0x26c   : > { %10377 = vmatprep.mubr.f32.mxu1 %v15081_v19  ;;  %v11927_v19 = vpack.c.bf16 %v3365_v17, %v3364_v10  ;;  %v3014_v10 = vld [vmem:[#allocation2 + $0xdb] sm:$0xff]  ;;  %v3015_v17 = vld [vmem:[#allocation2 + $0xe3] sm:$0xff] }
 0x26f   : > { %10378 = vmatmul.mubr.f32.gmra.mrb[50].mxu1 %v15084_v24  ;;  %v3366_v24 = vld [vmem:[#allocation3 + $0x2b0] sm:$0xff] }
 0x270   : > { %10380 = vmatprep.mubr.f32.mxu1 %v2689_v5  ;;  %v11931_v56 = vpack.c.bf16 %v3367_v41, %v3366_v24  ;;  %v3007_v5 = vld [vmem:[#allocation2 + $0xa3] sm:$0xff]  ;;  %v3020_v41 = vld [vmem:[#allocation2 + $0x10b] sm:$0xff] }
 0x271   : > { %v3019_v24 = vld [vmem:[#allocation2 + $0x103] sm:$0xff] }
 0x273   : > { %10381 = vmatmul.mubr.f32.gmra.mrb[52].mxu1 %v2690_v47  ;;  %v3008_v47 = vld [vmem:[#allocation2 + $0xab] sm:$0xff] }
 0x274   : > { %10415 = vmatprep.mubr.f32.mxu1 %v2989_v37  ;;  %v3011_v37 = vld [vmem:[#allocation2 + $0xc3] sm:$0xff] }
 0x277   : > { %10416 = vmatmul.mubr.f32.vlgmr.msra.gmra.mrb[18].mxu1 %v2990_v46  ;;  %v3013_v46 = vld [vmem:[#allocation2 + $0xd3] sm:$0xff] }
 0x278   : > { %11922 = vmatpush3.bf16.msra.mxu1 %v11919_v28  ;;  %10418 = vmatprep.mubr.f32.mxu1 %v2991_v62  ;;  %v3006_v28 = vld [vmem:[#allocation2 + $0x9b] sm:$0xff]  ;;  %v3016_v62 = vld [vmem:[#allocation2 + $0xeb] sm:$0xff] }
 0x279   : > { %11924 = vmatprep.subr.bf16.mxu1 %v11923_v25 }
 0x27b   : > { %10419 = vmatmul.mubr.f32.gmra.mrb[20].mxu1 %v2992_v58  ;;  %v3018_v58 = vld [vmem:[#allocation2 + $0xfb] sm:$0xff] }
 0x27c   : > { %10421 = vmatprep.mubr.f32.mxu1 %v2993_v3  ;;  %11926 = vmatpush3.bf16.msra.mxu1 %v11923_v25  ;;  %v3012_v25 = vld [vmem:[#allocation2 + $0xcb] sm:$0xff]  ;;  %v3022_v3 = vld [vmem:[#allocation2 + $0x11b] sm:$0xff] }
 0x27d   : > { %11928 = vmatprep.subr.bf16.mxu1 %v11927_v19 }
 0x27f   : > { %10422 = vmatmul.mubr.f32.gmra.mrb[22].mxu1 %v2994_v34  ;;  %v3697_v34 = vld [vmem:[#allocation3 + $0x318] sm:$0xff] }
 0x280   : > { %10424 = vmatprep.mubr.f32.mxu1 %v2995_v53  ;;  %11930 = vmatpush3.bf16.msra.mxu1 %v11927_v19  ;;  %v3017_v19 = vld [vmem:[#allocation2 + $0xf3] sm:$0xff]  ;;  %v3324_v53 = vld [vmem:[#allocation2 + $0x1c] sm:$0xff] }
 0x281   : > { %11932 = vmatprep.subr.bf16.mxu1 %v11931_v56 }
 0x283   : > { %10425 = vmatmul.mubr.f32.gmra.mrb[24].mxu1 %v2996_v32  ;;  %v3699_v32 = vld [vmem:[#allocation3 + $0x328] sm:$0xff] }
 0x284   : > { %10427 = vmatprep.mubr.f32.mxu1 %v2997_v55  ;;  %11934 = vmatpush3.bf16.msra.mxu1 %v11931_v56  ;;  %v3696_v56 = vld [vmem:[#allocation3 + $0x310] sm:$0xff]  ;;  %v3701_v55 = vld [vmem:[#allocation3 + $0x338] sm:$0xff] }
 0x285   : > { %11936 = vmatprep.subr.bf16.mxu1 %v11935_v59  ;;  %v11955_v18 = vpack.c.bf16 %v3697_v34, %v3696_v56  ;;  %v15193_v56 = vld [vmem:[#allocation2 + $0xcc] sm:$0xff]  ;;  %v15196_v34 = vld [vmem:[#allocation2 + $0xd4] sm:$0xff] }
 0x287   : > { %10428 = vmatmul.mubr.f32.gmra.mrb[26].mxu1 %v2998_v23  ;;  %v15139_v23 = vld [vmem:[#allocation2 + $0x3c] sm:$0xff] }
 0x288   : > { %10430 = vmatprep.mubr.f32.mxu1 %v2999_v15  ;;  %11938 = vmatpush3.bf16.msra.mxu1 %v11935_v59  ;;  %v3698_v59 = vld [vmem:[#allocation3 + $0x320] sm:$0xff]  ;;  %v15142_v15 = vld [vmem:[#allocation2 + $0x44] sm:$0xff] }
 0x289   : > { %11940 = vmatprep.subr.bf16.mxu1 %v11939_v49 }
 0x28b   : > { %10431 = vmatmul.mubr.f32.gmra.mrb[28].mxu1 %v3000_v35  ;;  %v15145_v35 = vld [vmem:[#allocation2 + $0x4c] sm:$0xff] }
 0x28c   : > { %10433 = vmatprep.mubr.f32.mxu1 %v3001_v51  ;;  %11942 = vmatpush3.bf16.msra.mxu1 %v11939_v49  ;;  %v11963_v49 = vpack.c.bf16 %v3701_v55, %v3700_v29  ;;  %v15148_v51 = vld [vmem:[#allocation2 + $0x54] sm:$0xff]  ;;  %v15217_v29 = vld [vmem:[#allocation2 + $0x10c] sm:$0xff] }
 0x28d   : > { %11944 = vmatprep.subr.bf16.mxu1 %v11943_v6  ;;  %v15220_v55 = vld [vmem:[#allocation2 + $0x114] sm:$0xff] }
 0x28f   : > { %10434 = vmatmul.mubr.f32.gmra.mrb[30].mxu1 %v3002_v33  ;;  %v15151_v33 = vld [vmem:[#allocation2 + $0x5c] sm:$0xff] }
 0x290   : > { %10436 = vmatprep.mubr.f32.mxu1 %v3003_v2  ;;  %11946 = vmatpush3.bf16.msra.mxu1 %v11943_v6  ;;  %v11967_v6 = vpack.c.bf16 %v3703_v54, %v3702_v22  ;;  %v15154_v2 = vld [vmem:[#allocation2 + $0x64] sm:$0xff]  ;;  %v15229_v54 = vld [vmem:[#allocation2 + $0x12c] sm:$0xff] }
 0x291   : > { %11948 = vmatprep.subr.bf16.mxu1 %v11947_v0  ;;  %v15226_v22 = vld [vmem:[#allocation2 + $0x124] sm:$0xff] }
 0x293   : > { %10437 = vmatmul.mubr.f32.gmra.mrb[32].mxu1 %v3004_v30  ;;  %v15157_v30 = vld [vmem:[#allocation2 + $0x6c] sm:$0xff] }
 0x294   : > { %10439 = vmatprep.mubr.f32.mxu1 %v3005_v61  ;;  %11950 = vmatpush3.bf16.msra.mxu1 %v11947_v0  ;;  %v11971_v0 = vpack.c.bf16 %v3705_v27, %v3704_v13  ;;  %v3708_v61 = vld [vmem:[#allocation3 + $0x370] sm:$0xff]  ;;  %v4031_v13 = vld [vmem:[#allocation3 + $0x398] sm:$0xff] }
 0x295   : > { %11952 = vmatprep.subr.bf16.mxu1 %v11951_v43 }
 0x297   : > { %10440 = vmatmul.mubr.f32.gmra.mrb[34].mxu1 %v3006_v28  ;;  %v3709_v28 = vld [vmem:[#allocation3 + $0x378] sm:$0xff] }
 0x298   : > { %10442 = vmatprep.mubr.f32.mxu1 %v3007_v5  ;;  %v15160_v5 = vld [vmem:[#allocation2 + $0x74] sm:$0xff] }
 0x29b   : > { %10443 = vmatmul.mubr.f32.gmra.mrb[36].mxu1 %v3008_v47  ;;  %v11979_v47 = vpack.c.bf16 %v3709_v28, %v3708_v61  ;;  %v4035_v61 = vld [vmem:[#allocation3 + $0x3b8] sm:$0xff] }
 0x29c   : > { %10445 = vmatprep.mubr.f32.mxu1 %v3009_v8  ;;  %v15163_v8 = vld [vmem:[#allocation2 + $0x7c] sm:$0xff] }
 0x29f   : > { %10446 = vmatmul.mubr.f32.gmra.mrb[38].mxu1 %v3010_v44  ;;  %v4028_v44 = vld [vmem:[#allocation3 + $0x380] sm:$0xff] }
 0x2a0   : > { %10448 = vmatprep.mubr.f32.mxu1 %v3011_v37  ;;  %v4029_v37 = vld [vmem:[#allocation3 + $0x388] sm:$0xff] }
 0x2a3   : > { %10449 = vmatmul.mubr.f32.gmra.mrb[40].mxu1 %v3012_v25  ;;  %v15166_v25 = vld [vmem:[#allocation2 + $0x84] sm:$0xff] }
 0x2a4   : > { %10451 = vmatprep.mubr.f32.mxu1 %v3013_v46  ;;  %v11983_v46 = vpack.c.bf16 %v4029_v37, %v4028_v44  ;;  %v4039_v44 = vld [vmem:[#allocation3 + $0x3d8] sm:$0xff]  ;;  %v4041_v37 = vld [vmem:[#allocation3 + $0x3e8] sm:$0xff] }
 0x2a7   : > { %10452 = vmatmul.mubr.f32.gmra.mrb[42].mxu1 %v3014_v10  ;;  %v15169_v10 = vld [vmem:[#allocation2 + $0x8c] sm:$0xff] }
 0x2a8   : > { %10454 = vmatprep.mubr.f32.mxu1 %v3015_v17  ;;  %v15172_v17 = vld [vmem:[#allocation2 + $0x94] sm:$0xff] }
 0x2ab   : > { %10455 = vmatmul.mubr.f32.gmra.mrb[44].mxu1 %v3016_v62  ;;  %v15175_v62 = vld [vmem:[#allocation2 + $0x9c] sm:$0xff] }
 0x2ac   : > { %10457 = vmatprep.mubr.f32.mxu1 %v3017_v19  ;;  %v15178_v19 = vld [vmem:[#allocation2 + $0xa4] sm:$0xff] }
 0x2af   : > { %10458 = vmatmul.mubr.f32.gmra.mrb[46].mxu1 %v3018_v58  ;;  %v15181_v58 = vld [vmem:[#allocation2 + $0xac] sm:$0xff] }
 0x2b0   : > { %10460 = vmatprep.mubr.f32.mxu1 %v3019_v24  ;;  %v15184_v24 = vld [vmem:[#allocation2 + $0xb4] sm:$0xff] }
 0x2b3   : > { %10461 = vmatmul.mubr.f32.gmra.mrb[48].mxu1 %v3020_v41  ;;  %v15187_v41 = vld [vmem:[#allocation2 + $0xbc] sm:$0xff] }
 0x2b4   : > { %13119 = vmatprep.mubr.msk.f32.mxu1 %vm14921_vm12, %v14969_v36  ;;  %v15130_v36 = vld [vmem:[#allocation2 + $0x24] sm:$0xff] }
 0x2b7   : > { %10464 = vmatmul.mubr.f32.gmra.mrb[50].mxu1 %v3022_v3  ;;  %v15190_v3 = vld [vmem:[#allocation2 + $0xc4] sm:$0xff] }
 0x2b8   : > { %13120 = vmatprep.mubr.msk.f32.mxu1 %vm14945_vm1, %v14976_v4  ;;  %v11959_v4 = vpack.c.bf16 %v3699_v32, %v3698_v59  ;;  %v15208_v59 = vld [vmem:[#allocation2 + $0xf4] sm:$0xff]  ;;  %v15211_v32 = vld [vmem:[#allocation2 + $0xfc] sm:$0xff] }
 0x2bb   : > { %13121 = vmatmul.mubr.msk.f32.gmra.mrb[52].mxu1 %vm14936_vm14, %v14974_v7  ;;  %v15136_v7 = vld [vmem:[#allocation2 + $0x34] sm:$0xff] }
 0x2bc   : > { %10501 = vmatprep.mubr.f32.mxu1 %v3323_v1  ;;  %v15199_v1 = vld [vmem:[#allocation2 + $0xdc] sm:$0xff] }
 0x2bf   : > { %10502 = vmatmul.mubr.f32.vlgmr.msra.gmra.mrb[18].mxu1 %v3324_v53  ;;  %v15205_v53 = vld [vmem:[#allocation2 + $0xec] sm:$0xff] }
 0x2c0   : > { %11954 = vmatpush3.bf16.msra.mxu1 %v11951_v43  ;;  %10504 = vmatprep.mubr.f32.mxu1 %v15130_v36  ;;  %v11975_v43 = vpack.c.bf16 %v3707_v40, %v3706_v48  ;;  %v4033_v48 = vld [vmem:[#allocation3 + $0x3a8] sm:$0xff] }
 0x2c1   : > { %11956 = vmatprep.subr.bf16.mxu1 %v11955_v18 }
 0x2c3   : > { %10505 = vmatmul.mubr.f32.gmra.mrb[20].mxu1 %v15133_v21 }
 0x2c4   : > { %10507 = vmatprep.mubr.f32.mxu1 %v15136_v7  ;;  %11958 = vmatpush3.bf16.msra.mxu1 %v11955_v18  ;;  %v15202_v18 = vld [vmem:[#allocation2 + $0xe4] sm:$0xff] }
 0x2c5   : > { %11960 = vmatprep.subr.bf16.mxu1 %v11959_v4 }
 0x2c7   : > { %10508 = vmatmul.mubr.f32.gmra.mrb[22].mxu1 %v15139_v23 }
 0x2c8   : > { %10510 = vmatprep.mubr.f32.mxu1 %v15142_v15  ;;  %11962 = vmatpush3.bf16.msra.mxu1 %v11959_v4  ;;  %v15214_v4 = vld [vmem:[#allocation2 + $0x104] sm:$0xff] }
 0x2c9   : > { %11964 = vmatprep.subr.bf16.mxu1 %v11963_v49 }
 0x2cb   : > { %10511 = vmatmul.mubr.f32.gmra.mrb[24].mxu1 %v15145_v35 }
 0x2cc   : > { %10513 = vmatprep.mubr.f32.mxu1 %v15148_v51  ;;  %11966 = vmatpush3.bf16.msra.mxu1 %v11963_v49  ;;  %v15223_v49 = vld [vmem:[#allocation2 + $0x11c] sm:$0xff] }
 0x2cd   : > { %11968 = vmatprep.subr.bf16.mxu1 %v11967_v6 }
 0x2cf   : > { %10514 = vmatmul.mubr.f32.gmra.mrb[26].mxu1 %v15151_v33 }
 0x2d0   : > { %10516 = vmatprep.mubr.f32.mxu1 %v15154_v2  ;;  %11970 = vmatpush3.bf16.msra.mxu1 %v11967_v6  ;;  %v4030_v6 = vld [vmem:[#allocation3 + $0x390] sm:$0xff] }
 0x2d1   : > { %11972 = vmatprep.subr.bf16.mxu1 %v11971_v0  ;;  %v11987_v27 = vpack.c.bf16 %v4031_v13, %v4030_v6  ;;  %v4363_v6 = vld [vmem:[#allocation3 + $0x408] sm:$0xff]  ;;  %v4373_v13 = vld [vmem:[#allocation3 + $0x458] sm:$0xff] }
 0x2d3   : > { %10517 = vmatmul.mubr.f32.gmra.mrb[28].mxu1 %v15157_v30 }
 0x2d4   : > { %10519 = vmatprep.mubr.f32.mxu1 %v15160_v5  ;;  %11974 = vmatpush3.bf16.msra.mxu1 %v11971_v0  ;;  %v4032_v0 = vld [vmem:[#allocation3 + $0x3a0] sm:$0xff] }
 0x2d5   : > { %11976 = vmatprep.subr.bf16.mxu1 %v11975_v43  ;;  %v11991_v40 = vpack.c.bf16 %v4033_v48, %v4032_v0  ;;  %v4811_v0 = vld [vmem:[%s16014_s5 + $0x8] sm:$0xff]  ;;  %v4812_v48 = vld [vmem:[%s16014_s5 + $0x10] sm:$0xff] }
 0x2d7   : > { %10520 = vmatmul.mubr.f32.gmra.mrb[30].mxu1 %v15163_v8 }
 0x2d8   : > { %10522 = vmatprep.mubr.f32.mxu1 %v15166_v25  ;;  %11978 = vmatpush3.bf16.msra.mxu1 %v11975_v43  ;;  %v4034_v43 = vld [vmem:[#allocation3 + $0x3b0] sm:$0xff] }
 0x2d9   : > { %11980 = vmatprep.subr.bf16.mxu1 %v11979_v47  ;;  %v11995_v28 = vpack.c.bf16 %v4035_v61, %v4034_v43  ;;  %v4813_v43 = vld [vmem:[%s16014_s5 + $0x18] sm:$0xff]  ;;  %v4000_v61 = vld [vmem:[#allocation2 + $0x6d] sm:$0xff] }
 0x2db   : > { %10523 = vmatmul.mubr.f32.gmra.mrb[32].mxu1 %v15169_v10 }
 0x2dc   : > { %10525 = vmatprep.mubr.f32.mxu1 %v15172_v17  ;;  %11982 = vmatpush3.bf16.msra.mxu1 %v11979_v47  ;;  %v4037_v47 = vld [vmem:[#allocation3 + $0x3c8] sm:$0xff] }
 0x2dd   : > { %11984 = vmatprep.subr.bf16.mxu1 %v11983_v46 }
 0x2df   : > { %10526 = vmatmul.mubr.f32.gmra.mrb[34].mxu1 %v15175_v62 }
 0x2e0   : > { %10528 = vmatprep.mubr.f32.mxu1 %v15178_v19 }
 0x2e3   : > { %10529 = vmatmul.mubr.f32.gmra.mrb[36].mxu1 %v15181_v58 }
 0x2e4   : > { %10531 = vmatprep.mubr.f32.mxu1 %v15184_v24 }
 0x2e7   : > { %10532 = vmatmul.mubr.f32.gmra.mrb[38].mxu1 %v15187_v41 }
 0x2e8   : > { %10534 = vmatprep.mubr.f32.mxu1 %v15190_v3 }
 0x2eb   : > { %10535 = vmatmul.mubr.f32.gmra.mrb[40].mxu1 %v15193_v56 }
 0x2ec   : > { %10537 = vmatprep.mubr.f32.mxu1 %v15196_v34 }
 0x2ef   : > { %10538 = vmatmul.mubr.f32.gmra.mrb[42].mxu1 %v15199_v1 }
 0x2f0   : > { %10540 = vmatprep.mubr.f32.mxu1 %v15202_v18 }
 0x2f3   : > { %10541 = vmatmul.mubr.f32.gmra.mrb[44].mxu1 %v15205_v53 }
 0x2f4   : > { %10543 = vmatprep.mubr.f32.mxu1 %v15208_v59 }
 0x2f7   : > { %10544 = vmatmul.mubr.f32.gmra.mrb[46].mxu1 %v15211_v32 }
 0x2f8   : > { %10546 = vmatprep.mubr.f32.mxu1 %v15214_v4 }
 0x2fb   : > { %10547 = vmatmul.mubr.f32.gmra.mrb[48].mxu1 %v15217_v29 }
 0x2fc   : > { %10549 = vmatprep.mubr.f32.mxu1 %v15220_v55 }
 0x2ff   : > { %10550 = vmatmul.mubr.f32.gmra.mrb[50].mxu1 %v15223_v49 }
 0x300   : > { %10552 = vmatprep.mubr.f32.mxu1 %v15226_v22 }
 0x303   : > { %10553 = vmatmul.mubr.f32.gmra.mrb[52].mxu1 %v15229_v54 }
 0x304   : > { %10587 = vmatprep.mubr.f32.mxu1 %v15130_v36  ;;  %v4036_v36 = vld [vmem:[#allocation3 + $0x3c0] sm:$0xff] }
 0x307   : > { %10588 = vmatmul.mubr.f32.vlgmr.msra.gmra.mrb[18].mxu1 %v15133_v21  ;;  %v11999_v21 = vpack.c.bf16 %v4037_v47, %v4036_v36  ;;  %v4374_v36 = vld [vmem:[#allocation3 + $0x460] sm:$0xff]  ;;  %v12051_v47 = vpack.c.bf16 %v4813_v43, %v4812_v48  ;;  %v4023_v43 = vld [vmem:[#allocation2 + $0x125] sm:$0xff] }
 0x308   : > { %11986 = vmatpush3.bf16.msra.mxu1 %v11983_v46  ;;  %10590 = vmatprep.mubr.f32.mxu1 %v15136_v7  ;;  %v4038_v7 = vld [vmem:[#allocation3 + $0x3d0] sm:$0xff]  ;;  %v4043_v46 = vld [vmem:[#allocation3 + $0x3f8] sm:$0xff] }
 0x309   : > { %11988 = vmatprep.subr.bf16.mxu1 %v11987_v27  ;;  %v4021_v48 = vld [vmem:[#allocation2 + $0x115] sm:$0xff] }
 0x30b   : > { %10591 = vmatmul.mubr.f32.gmra.mrb[20].mxu1 %v15139_v23  ;;  %v12003_v23 = vpack.c.bf16 %v4039_v44, %v4038_v7  ;;  %v4814_v7 = vld [vmem:[%s16014_s5 + $0x20] sm:$0xff]  ;;  %v4815_v44 = vld [vmem:[%s16014_s5 + $0x28] sm:$0xff] }
 0x30c   : > { %10593 = vmatprep.mubr.f32.mxu1 %v15142_v15  ;;  %11990 = vmatpush3.bf16.msra.mxu1 %v11987_v27  ;;  %v4040_v15 = vld [vmem:[#allocation3 + $0x3e0] sm:$0xff]  ;;  %v4810_v27 = vld [vmem:[%s16014_s5] sm:$0xff] }
 0x30d   : > { %11992 = vmatprep.subr.bf16.mxu1 %v11991_v40 }
 0x30f   : > { %10594 = vmatmul.mubr.f32.gmra.mrb[22].mxu1 %v15145_v35  ;;  %v12007_v35 = vpack.c.bf16 %v4041_v37, %v4040_v15  ;;  %v4002_v15 = vld [vmem:[#allocation2 + $0x7d] sm:$0xff] }
 0x310   : > { %10596 = vmatprep.mubr.f32.mxu1 %v15148_v51  ;;  %11994 = vmatpush3.bf16.msra.mxu1 %v11991_v40  ;;  %v4042_v51 = vld [vmem:[#allocation3 + $0x3f0] sm:$0xff]  ;;  %v12047_v40 = vpack.c.bf16 %v4811_v0, %v4810_v27 }
 0x311   : > { %11996 = vmatprep.subr.bf16.mxu1 %v11995_v28  ;;  %v4019_v27 = vld [vmem:[#allocation2 + $0x105] sm:$0xff]  ;;  %v4020_v0 = vld [vmem:[#allocation2 + $0x10d] sm:$0xff] }
 0x312   : > { %12048 = vmatprep.subr.bf16.mxu0 %v12047_v40 }
 0x313   : > { %10597 = vmatmul.mubr.f32.gmra.mrb[24].mxu1 %v15151_v33  ;;  %v12011_v33 = vpack.c.bf16 %v4043_v46, %v4042_v51  ;;  %12050 = vmatpush3.bf16.msra.mxu0 %v12047_v40  ;;  %v12055_v51 = vpack.c.bf16 %v4815_v44, %v4814_v7  ;;  %v4377_v46 = vld [vmem:[#allocation3 + $0x478] sm:$0xff]  ;;  %v4022_v40 = vld [vmem:[#allocation2 + $0x11d] sm:$0xff] }
 0x314   : > { %10599 = vmatprep.mubr.f32.mxu1 %v15154_v2  ;;  %11998 = vmatpush3.bf16.msra.mxu1 %v11995_v28  ;;  %v4362_v2 = vld [vmem:[#allocation3 + $0x400] sm:$0xff] }
 0x315   : > { %12000 = vmatprep.subr.bf16.mxu1 %v11999_v21  ;;  %12052 = vmatprep.subr.bf16.mxu0 %v12051_v47  ;;  %v4327_v7 = vld [vmem:[#allocation2 + $0x36] sm:$0xff]  ;;  %v4328_v44 = vld [vmem:[#allocation2 + $0x3e] sm:$0xff] }
 0x317   : > { %10600 = vmatmul.mubr.f32.gmra.mrb[26].mxu1 %v15157_v30  ;;  %v12015_v30 = vpack.c.bf16 %v4363_v6, %v4362_v2  ;;  %v4817_v2 = vld [vmem:[%s16014_s5 + $0x38] sm:$0xff]  ;;  %v4003_v6 = vld [vmem:[#allocation2 + $0x85] sm:$0xff]  ;;  %12054 = vmatpush3.bf16.msra.mxu0 %v12051_v47 }
 0x318   : > { %10602 = vmatprep.mubr.f32.mxu1 %v15160_v5  ;;  %12002 = vmatpush3.bf16.msra.mxu1 %v11999_v21  ;;  %v3691_v5 = vld [vmem:[#allocation2 + $0x134] sm:$0xff]  ;;  %v4375_v21 = vld [vmem:[#allocation3 + $0x468] sm:$0xff] }
 0x319   : > { %12004 = vmatprep.subr.bf16.mxu1 %v12003_v23  ;;  %v12039_v37 = vpack.c.bf16 %v4375_v21, %v4374_v36  ;;  %12056 = vmatprep.subr.bf16.mxu0 %v12055_v51  ;;  %v4026_v36 = vld [vmem:[#allocation2 + $0x13d] sm:$0xff]  ;;  %v4325_v47 = vld [vmem:[#allocation2 + $0x26] sm:$0xff]  ;;  %v4326_v21 = vld [vmem:[#allocation2 + $0x2e] sm:$0xff] }
 0x31b   : > { %10603 = vmatmul.mubr.f32.gmra.mrb[28].mxu1 %v15163_v8  ;;  %v3692_v8 = vld [vmem:[#allocation2 + $0x13c] sm:$0xff]  ;;  %12058 = vmatpush3.bf16.msra.mxu0 %v12055_v51  ;;  %v4333_v51 = vld [vmem:[#allocation2 + $0x66] sm:$0xff] }
 0x31c   : > { %10605 = vmatprep.mubr.f32.mxu1 %v15166_v25  ;;  %12006 = vmatpush3.bf16.msra.mxu1 %v12003_v23  ;;  %v4364_v25 = vld [vmem:[#allocation3 + $0x410] sm:$0xff]  ;;  %v4001_v23 = vld [vmem:[#allocation2 + $0x75] sm:$0xff] }
 0x31d   : > { %12008 = vmatprep.subr.bf16.mxu1 %v12007_v35 }
 0x31f   : > { %10606 = vmatmul.mubr.f32.gmra.mrb[30].mxu1 %v15169_v10  ;;  %v4365_v10 = vld [vmem:[#allocation3 + $0x418] sm:$0xff] }
 0x320   : > { %10608 = vmatprep.mubr.f32.mxu1 %v15172_v17  ;;  %12010 = vmatpush3.bf16.msra.mxu1 %v12007_v35  ;;  %v3991_v17 = vld [vmem:[#allocation2 + $0x25] sm:$0xff] }
 0x321   : > { %12012 = vmatprep.subr.bf16.mxu1 %v12011_v33  ;;  %v4376_v35 = vld [vmem:[#allocation3 + $0x470] sm:$0xff] }
 0x323   : > { %10609 = vmatmul.mubr.f32.gmra.mrb[32].mxu1 %v15175_v62  ;;  %v12019_v62 = vpack.c.bf16 %v4365_v10, %v4364_v25  ;;  %v4818_v25 = vld [vmem:[%s16014_s5 + $0x40] sm:$0xff]  ;;  %v4819_v10 = vld [vmem:[%s16014_s5 + $0x48] sm:$0xff] }
 0x324   : > { %10611 = vmatprep.mubr.f32.mxu1 %v15178_v19  ;;  %12014 = vmatpush3.bf16.msra.mxu1 %v12011_v33  ;;  %v3992_v19 = vld [vmem:[#allocation2 + $0x2d] sm:$0xff] }
 0x325   : > { %12016 = vmatprep.subr.bf16.mxu1 %v12015_v30  ;;  %v4816_v33 = vld [vmem:[%s16014_s5 + $0x30] sm:$0xff] }
 0x327   : > { %10612 = vmatmul.mubr.f32.gmra.mrb[34].mxu1 %v15181_v58  ;;  %v4366_v58 = vld [vmem:[#allocation3 + $0x420] sm:$0xff] }
 0x328   : > { %10614 = vmatprep.mubr.f32.mxu1 %v15184_v24  ;;  %v4367_v24 = vld [vmem:[#allocation3 + $0x428] sm:$0xff] }
 0x32b   : > { %10615 = vmatmul.mubr.f32.gmra.mrb[36].mxu1 %v15187_v41  ;;  %v3993_v41 = vld [vmem:[#allocation2 + $0x35] sm:$0xff] }
 0x32c   : > { %10617 = vmatprep.mubr.f32.mxu1 %v15190_v3  ;;  %v12023_v3 = vpack.c.bf16 %v4367_v24, %v4366_v58  ;;  %v4821_v58 = vld [vmem:[%s16014_s5 + $0x58] sm:$0xff] }
 0x32d   : > { %v4006_v24 = vld [vmem:[#allocation2 + $0x9d] sm:$0xff] }
 0x32f   : > { %10618 = vmatmul.mubr.f32.gmra.mrb[38].mxu1 %v15193_v56  ;;  %v3994_v56 = vld [vmem:[#allocation2 + $0x3d] sm:$0xff] }
 0x330   : > { %10620 = vmatprep.mubr.f32.mxu1 %v15196_v34  ;;  %v4368_v34 = vld [vmem:[#allocation3 + $0x430] sm:$0xff] }
 0x333   : > { %10621 = vmatmul.mubr.f32.gmra.mrb[40].mxu1 %v15199_v1  ;;  %v4369_v1 = vld [vmem:[#allocation3 + $0x438] sm:$0xff] }
 0x334   : > { %10623 = vmatprep.mubr.f32.mxu1 %v15202_v18  ;;  %v3995_v18 = vld [vmem:[#allocation2 + $0x45] sm:$0xff] }
 0x337   : > { %10624 = vmatmul.mubr.f32.gmra.mrb[42].mxu1 %v15205_v53  ;;  %v12027_v53 = vpack.c.bf16 %v4369_v1, %v4368_v34  ;;  %v4823_v34 = vld [vmem:[%s16014_s5 + $0x68] sm:$0xff] }
 0x338   : > { %10626 = vmatprep.mubr.f32.mxu1 %v15208_v59  ;;  %v3996_v59 = vld [vmem:[#allocation2 + $0x4d] sm:$0xff] }
 0x339   : > { %v4008_v1 = vld [vmem:[#allocation2 + $0xad] sm:$0xff] }
 0x33b   : > { %10627 = vmatmul.mubr.f32.gmra.mrb[44].mxu1 %v15211_v32  ;;  %v4370_v32 = vld [vmem:[#allocation3 + $0x440] sm:$0xff] }
 0x33c   : > { %10629 = vmatprep.mubr.f32.mxu1 %v15214_v4  ;;  %v4371_v4 = vld [vmem:[#allocation3 + $0x448] sm:$0xff] }
 0x33f   : > { %10630 = vmatmul.mubr.f32.gmra.mrb[46].mxu1 %v15217_v29  ;;  %v3997_v29 = vld [vmem:[#allocation2 + $0x55] sm:$0xff] }
 0x340   : > { %10632 = vmatprep.mubr.f32.mxu1 %v15220_v55  ;;  %v3998_v55 = vld [vmem:[#allocation2 + $0x5d] sm:$0xff] }
 0x343   : > { %10633 = vmatmul.mubr.f32.gmra.mrb[48].mxu1 %v15223_v49  ;;  %v12031_v49 = vpack.c.bf16 %v4371_v4, %v4370_v32  ;;  %v4011_v32 = vld [vmem:[#allocation2 + $0xc5] sm:$0xff]  ;;  %v4012_v4 = vld [vmem:[#allocation2 + $0xcd] sm:$0xff] }
 0x344   : > { %10635 = vmatprep.mubr.f32.mxu1 %v15226_v22  ;;  %v3999_v22 = vld [vmem:[#allocation2 + $0x65] sm:$0xff] }
 0x347   : > { %10636 = vmatmul.mubr.f32.gmra.mrb[50].mxu1 %v15229_v54  ;;  %v4372_v54 = vld [vmem:[#allocation3 + $0x450] sm:$0xff] }
 0x348   : > { %10638 = vmatprep.mubr.f32.mxu1 %v3691_v5  ;;  %v12035_v28 = vpack.c.bf16 %v4373_v13, %v4372_v54  ;;  %v12059_v5 = vpack.c.bf16 %v4817_v2, %v4816_v33  ;;  %v4017_v54 = vld [vmem:[#allocation2 + $0xf5] sm:$0xff]  ;;  %v4018_v13 = vld [vmem:[#allocation2 + $0xfd] sm:$0xff] }
 0x349   : > { %v4335_v33 = vld [vmem:[#allocation2 + $0x76] sm:$0xff]  ;;  %v4336_v2 = vld [vmem:[#allocation2 + $0x7e] sm:$0xff] }
 0x34a   : > { %12060 = vmatprep.subr.bf16.mxu0 %v12059_v5 }
 0x34b   : > { %10639 = vmatmul.mubr.f32.gmra.mrb[52].mxu1 %v3692_v8  ;;  %v4004_v8 = vld [vmem:[#allocation2 + $0x8d] sm:$0xff]  ;;  %12062 = vmatpush3.bf16.msra.mxu0 %v12059_v5  ;;  %v4339_v5 = vld [vmem:[#allocation2 + $0x96] sm:$0xff] }
 0x34c   : > { %10673 = vmatprep.mubr.f32.mxu1 %v3991_v17  ;;  %v4005_v17 = vld [vmem:[#allocation2 + $0x95] sm:$0xff] }
 0x34f   : > { %10674 = vmatmul.mubr.f32.vlgmr.msra.gmra.mrb[18].mxu1 %v3992_v19  ;;  %v4820_v19 = vld [vmem:[%s16014_s5 + $0x50] sm:$0xff] }
 0x350   : > { %12018 = vmatpush3.bf16.msra.mxu1 %v12015_v30  ;;  %10676 = vmatprep.mubr.f32.mxu1 %v3993_v41  ;;  %v12043_v30 = vpack.c.bf16 %v4377_v46, %v4376_v35  ;;  %v4007_v41 = vld [vmem:[#allocation2 + $0xa5] sm:$0xff]  ;;  %v4334_v46 = vld [vmem:[#allocation2 + $0x6e] sm:$0xff] }
 0x351   : > { %12020 = vmatprep.subr.bf16.mxu1 %v12019_v62  ;;  %v4332_v35 = vld [vmem:[#allocation2 + $0x5e] sm:$0xff] }
 0x353   : > { %10677 = vmatmul.mubr.f32.gmra.mrb[20].mxu1 %v3994_v56  ;;  %v4822_v56 = vld [vmem:[%s16014_s5 + $0x60] sm:$0xff] }
 0x354   : > { %10679 = vmatprep.mubr.f32.mxu1 %v3995_v18  ;;  %12022 = vmatpush3.bf16.msra.mxu1 %v12019_v62  ;;  %v12063_v62 = vpack.c.bf16 %v4819_v10, %v4818_v25  ;;  %v4009_v18 = vld [vmem:[#allocation2 + $0xb5] sm:$0xff]  ;;  %v4341_v25 = vld [vmem:[#allocation2 + $0xa6] sm:$0xff] }
 0x355   : > { %12024 = vmatprep.subr.bf16.mxu1 %v12023_v3  ;;  %v4342_v10 = vld [vmem:[#allocation2 + $0xae] sm:$0xff] }
 0x356   : > { %12064 = vmatprep.subr.bf16.mxu0 %v12063_v62 }
 0x357   : > { %10680 = vmatmul.mubr.f32.gmra.mrb[22].mxu1 %v3996_v59  ;;  %12066 = vmatpush3.bf16.msra.mxu0 %v12063_v62  ;;  %v4010_v59 = vld [vmem:[#allocation2 + $0xbd] sm:$0xff] }
 0x358   : > { %10682 = vmatprep.mubr.f32.mxu1 %v3997_v29  ;;  %12026 = vmatpush3.bf16.msra.mxu1 %v12023_v3  ;;  %v12067_v3 = vpack.c.bf16 %v4821_v58, %v4820_v19  ;;  %v4013_v29 = vld [vmem:[#allocation2 + $0xd5] sm:$0xff]  ;;  %v4344_v62 = vld [vmem:[#allocation2 + $0xbe] sm:$0xff]  ;;  %v4345_v19 = vld [vmem:[#allocation2 + $0xc6] sm:$0xff] }
 0x359   : > { %12028 = vmatprep.subr.bf16.mxu1 %v12027_v53  ;;  %v4346_v58 = vld [vmem:[#allocation2 + $0xce] sm:$0xff] }
 0x35a   : > { %12068 = vmatprep.subr.bf16.mxu0 %v12067_v3 }
 0x35b   : > { %10683 = vmatmul.mubr.f32.gmra.mrb[24].mxu1 %v3998_v55  ;;  %12070 = vmatpush3.bf16.msra.mxu0 %v12067_v3  ;;  %v4014_v55 = vld [vmem:[#allocation2 + $0xdd] sm:$0xff]  ;;  %v4349_v3 = vld [vmem:[#allocation2 + $0xe6] sm:$0xff] }
 0x35c   : > { %10685 = vmatprep.mubr.f32.mxu1 %v3999_v22  ;;  %12030 = vmatpush3.bf16.msra.mxu1 %v12027_v53  ;;  %v12071_v53 = vpack.c.bf16 %v4823_v34, %v4822_v56  ;;  %v4016_v22 = vld [vmem:[#allocation2 + $0xed] sm:$0xff]  ;;  %v4351_v34 = vld [vmem:[#allocation2 + $0xf6] sm:$0xff] }
 0x35d   : > { %12032 = vmatprep.subr.bf16.mxu1 %v12031_v49  ;;  %v4350_v56 = vld [vmem:[#allocation2 + $0xee] sm:$0xff] }
 0x35e   : > { %12072 = vmatprep.subr.bf16.mxu0 %v12071_v53 }
 0x35f   : > { %10686 = vmatmul.mubr.f32.gmra.mrb[26].mxu1 %v4000_v61  ;;  %12074 = vmatpush3.bf16.msra.mxu0 %v12071_v53  ;;  %v4025_v61 = vld [vmem:[#allocation2 + $0x135] sm:$0xff] }
 0x360   : > { %10688 = vmatprep.mubr.f32.mxu1 %v4001_v23  ;;  %12034 = vmatpush3.bf16.msra.mxu1 %v12031_v49  ;;  %v4015_v49 = vld [vmem:[#allocation2 + $0xe5] sm:$0xff]  ;;  %v4354_v53 = vld [vmem:[#allocation2 + $0x10e] sm:$0xff] }
 0x361   : > { %12036 = vmatprep.subr.bf16.mxu1 %v12035_v28  ;;  %v4329_v23 = vld [vmem:[#allocation2 + $0x46] sm:$0xff] }
 0x363   : > { %10689 = vmatmul.mubr.f32.gmra.mrb[28].mxu1 %v4002_v15  ;;  %v4330_v15 = vld [vmem:[#allocation2 + $0x4e] sm:$0xff] }
 0x364   : > { %10691 = vmatprep.mubr.f32.mxu1 %v4003_v6  ;;  %12038 = vmatpush3.bf16.msra.mxu1 %v12035_v28  ;;  %v4024_v28 = vld [vmem:[#allocation2 + $0x12d] sm:$0xff] }
 0x365   : > { %12040 = vmatprep.subr.bf16.mxu1 %v12039_v37  ;;  %v4337_v6 = vld [vmem:[#allocation2 + $0x86] sm:$0xff] }
 0x367   : > { %10692 = vmatmul.mubr.f32.gmra.mrb[30].mxu1 %v4004_v8  ;;  %v4340_v8 = vld [vmem:[#allocation2 + $0x9e] sm:$0xff] }
 0x368   : > { %10694 = vmatprep.mubr.f32.mxu1 %v4005_v17  ;;  %12042 = vmatpush3.bf16.msra.mxu1 %v12039_v37  ;;  %v4331_v37 = vld [vmem:[#allocation2 + $0x56] sm:$0xff] }
 0x369   : > { %12044 = vmatprep.subr.bf16.mxu1 %v12043_v30  ;;  %v4343_v17 = vld [vmem:[#allocation2 + $0xb6] sm:$0xff] }
 0x36b   : > { %10695 = vmatmul.mubr.f32.gmra.mrb[32].mxu1 %v4006_v24  ;;  %v4347_v24 = vld [vmem:[#allocation2 + $0xd6] sm:$0xff] }
 0x36c   : > { %10697 = vmatprep.mubr.f32.mxu1 %v4007_v41  ;;  %12046 = vmatpush3.bf16.msra.mxu1 %v12043_v30  ;;  %v4338_v30 = vld [vmem:[#allocation2 + $0x8e] sm:$0xff]  ;;  %v4348_v41 = vld [vmem:[#allocation2 + $0xde] sm:$0xff] }
 0x36f   : > { %10698 = vmatmul.mubr.f32.gmra.mrb[34].mxu1 %v4008_v1  ;;  %v4352_v1 = vld [vmem:[#allocation2 + $0xfe] sm:$0xff] }
 0x370   : > { %10700 = vmatprep.mubr.f32.mxu1 %v4009_v18  ;;  %v4353_v18 = vld [vmem:[#allocation2 + $0x106] sm:$0xff] }
 0x373   : > { %10701 = vmatmul.mubr.f32.gmra.mrb[36].mxu1 %v4010_v59  ;;  %v4355_v59 = vld [vmem:[#allocation2 + $0x116] sm:$0xff] }
 0x374   : > { %10703 = vmatprep.mubr.f32.mxu1 %v4011_v32  ;;  %v4356_v32 = vld [vmem:[#allocation2 + $0x11e] sm:$0xff] }
 0x377   : > { %10704 = vmatmul.mubr.f32.gmra.mrb[38].mxu1 %v4012_v4  ;;  %v4357_v4 = vld [vmem:[#allocation2 + $0x126] sm:$0xff] }
 0x378   : > { %10706 = vmatprep.mubr.f32.mxu1 %v4013_v29  ;;  %v4359_v29 = vld [vmem:[#allocation2 + $0x136] sm:$0xff] }
 0x37b   : > { %10707 = vmatmul.mubr.f32.gmra.mrb[40].mxu1 %v4014_v55  ;;  %v4358_v55 = vld [vmem:[#allocation2 + $0x12e] sm:$0xff] }
 0x37c   : > { %10709 = vmatprep.mubr.f32.mxu1 %v4015_v49  ;;  %v4360_v49 = vld [vmem:[#allocation2 + $0x13e] sm:$0xff] }
 0x37f   : > { %10710 = vmatmul.mubr.f32.gmra.mrb[42].mxu1 %v4016_v22  ;;  %v4824_v22 = vld [vmem:[%s16014_s5 + $0x70] sm:$0xff] }
 0x380   : > { %10712 = vmatprep.mubr.f32.mxu1 %v4017_v54  ;;  %v4825_v54 = vld [vmem:[%s16014_s5 + $0x78] sm:$0xff] }
 0x383   : > { %10713 = vmatmul.mubr.f32.gmra.mrb[44].mxu1 %v4018_v13  ;;  %v12075_v13 = vpack.c.bf16 %v4825_v54, %v4824_v22 }
 0x384   : > { %10715 = vmatprep.mubr.f32.mxu1 %v4019_v27  ;;  %v5347_v27 = vld [vmem:[#allocation6 + $0x80] sm:$0xff] }
 0x385   : > { %12076 = vmatprep.subr.bf16.mxu0 %v12075_v13 }
 0x386   : > { %12078 = vmatpush3.bf16.msra.mxu0 %v12075_v13 }
 0x387   : > { %10716 = vmatmul.mubr.f32.gmra.mrb[46].mxu1 %v4020_v0  ;;  %v5348_v0 = vld [vmem:[#allocation6 + $0x88] sm:$0xff] }
 0x388   : > { %10718 = vmatprep.mubr.f32.mxu1 %v4021_v48  ;;  %v12079_v48 = vpack.c.bf16 %v5348_v0, %v5347_v27 }
 0x38a   : > { %12080 = vmatprep.subr.bf16.mxu0 %v12079_v48 }
 0x38b   : > { %10719 = vmatmul.mubr.f32.gmra.mrb[48].mxu1 %v4022_v40  ;;  %v15317_v40 = vld [vmem:[%s16013_s4] ss:$0 sm:$0xff] }
 0x38c   : > { %10721 = vmatprep.mubr.f32.mxu1 %v4023_v43 }
 0x38f   : > { %10722 = vmatmul.mubr.f32.gmra.mrb[50].mxu1 %v4024_v28 }
 0x390   : > { %10724 = vmatprep.mubr.f32.mxu1 %v4025_v61 }
 0x393   : > { %10725 = vmatmul.mubr.f32.gmra.mrb[52].mxu1 %v4026_v36 }
 0x394   : > { %10759 = vmatprep.mubr.f32.mxu1 %v4325_v47 }
 0x397   : > { %10760 = vmatmul.mubr.f32.vlgmr.msra.gmra.mrb[18].mxu1 %v4326_v21  ;;  %v5349_v21 = vld [vmem:[#allocation6 + $0x90] sm:$0xff] }
 0x398   : > { %10762 = vmatprep.mubr.f32.mxu1 %v4327_v7  ;;  %v5350_v7 = vld [vmem:[#allocation6 + $0x98] sm:$0xff] }
 0x39b   : > { %10763 = vmatmul.mubr.f32.gmra.mrb[20].mxu1 %v4328_v44 }
 0x39c   : > { %10765 = vmatprep.mubr.f32.mxu1 %v4329_v23 }
 0x39f   : > { %10766 = vmatmul.mubr.f32.gmra.mrb[22].mxu1 %v4330_v15 }
 0x3a0   : > { %10768 = vmatprep.mubr.f32.mxu1 %v4331_v37 }
 0x3a3   : > { %10769 = vmatmul.mubr.f32.gmra.mrb[24].mxu1 %v4332_v35 }
 0x3a4   : > { %10771 = vmatprep.mubr.f32.mxu1 %v4333_v51 }
 0x3a7   : > { %10772 = vmatmul.mubr.f32.gmra.mrb[26].mxu1 %v4334_v46  ;;  %v12083_v46 = vpack.c.bf16 %v5350_v7, %v5349_v21 }
 0x3a8   : > { %10774 = vmatprep.mubr.f32.mxu1 %v4335_v33 }
 0x3ab   : > { %10775 = vmatmul.mubr.f32.gmra.mrb[28].mxu1 %v4336_v2 }
 0x3ac   : > { %10777 = vmatprep.mubr.f32.mxu1 %v4337_v6  ;;  %v5351_v6 = vld [vmem:[#allocation6 + $0xa0] sm:$0xff] }
 0x3af   : > { %10778 = vmatmul.mubr.f32.gmra.mrb[30].mxu1 %v4338_v30  ;;  %v5352_v30 = vld [vmem:[#allocation6 + $0xa8] sm:$0xff] }
 0x3b0   : > { %10780 = vmatprep.mubr.f32.mxu1 %v4339_v5 }
 0x3b3   : > { %10781 = vmatmul.mubr.f32.gmra.mrb[32].mxu1 %v4340_v8 }
 0x3b4   : > { %10783 = vmatprep.mubr.f32.mxu1 %v4341_v25 }
 0x3b7   : > { %10784 = vmatmul.mubr.f32.gmra.mrb[34].mxu1 %v4342_v10 }
 0x3b8   : > { %10786 = vmatprep.mubr.f32.mxu1 %v4343_v17 }
 0x3bb   : > { %10787 = vmatmul.mubr.f32.gmra.mrb[36].mxu1 %v4344_v62 }
 0x3bc   : > { %10789 = vmatprep.mubr.f32.mxu1 %v4345_v19  ;;  %v12087_v19 = vpack.c.bf16 %v5352_v30, %v5351_v6 }
 0x3bf   : > { %10790 = vmatmul.mubr.f32.gmra.mrb[38].mxu1 %v4346_v58 }
 0x3c0   : > { %10792 = vmatprep.mubr.f32.mxu1 %v4347_v24 }
 0x3c3   : > { %10793 = vmatmul.mubr.f32.gmra.mrb[40].mxu1 %v4348_v41  ;;  %v5353_v41 = vld [vmem:[#allocation6 + $0xb0] sm:$0xff] }
 0x3c4   : > { %10795 = vmatprep.mubr.f32.mxu1 %v4349_v3  ;;  %v5354_v3 = vld [vmem:[#allocation6 + $0xb8] sm:$0xff] }
 0x3c7   : > { %10796 = vmatmul.mubr.f32.gmra.mrb[42].mxu1 %v4350_v56 }
 0x3c8   : > { %10798 = vmatprep.mubr.f32.mxu1 %v4351_v34 }
 0x3cb   : > { %10799 = vmatmul.mubr.f32.gmra.mrb[44].mxu1 %v4352_v1 }
 0x3cc   : > { %10801 = vmatprep.mubr.f32.mxu1 %v4353_v18 }
 0x3cf   : > { %10802 = vmatmul.mubr.f32.gmra.mrb[46].mxu1 %v4354_v53 }
 0x3d0   : > { %10804 = vmatprep.mubr.f32.mxu1 %v4355_v59 }
 0x3d3   : > { %10805 = vmatmul.mubr.f32.gmra.mrb[48].mxu1 %v4356_v32  ;;  %v12091_v32 = vpack.c.bf16 %v5354_v3, %v5353_v41 }
 0x3d4   : > { %10807 = vmatprep.mubr.f32.mxu1 %v4357_v4 }
 0x3d7   : > { %10808 = vmatmul.mubr.f32.gmra.mrb[50].mxu1 %v4358_v55  ;;  %v5355_v55 = vld [vmem:[#allocation6 + $0xc0] sm:$0xff] }
 0x3d8   : > { %10810 = vmatprep.mubr.f32.mxu1 %v4359_v29 }
 0x3db   : > { %10811 = vmatmul.mubr.f32.gmra.mrb[52].mxu1 %v4360_v49  ;;  %v5356_v49 = vld [vmem:[#allocation6 + $0xc8] sm:$0xff] }
 0x46a   : > { %v10761_v43 = vpop.f32.mrb[18].mxu1 }
 0x46b   : > { %v4667_v61 = vadd.f32 %v10761_v43, %v15317_v40  ;;  %v4444_v28 = vpop.f32.mrb[19].mxu1  ;;  %v12095_v43 = vpack.c.bf16 %v5356_v49, %v5355_v55 }
 0x46c   : > { %v4666_v36 = vadd.f32 %v15317_v40, %v4444_v28 }
 0x46d   : > { %v4739_v47 = vmul.f32 0.1, %v4667_v61  ;;  %vm4703_vm3 = vcmp.ge.f32.partialorder %v4667_v61, 0.0 }
 0x46e   : > { %v4738_v44 = vmul.f32 0.1, %v4666_v36  ;;  %v10764_v23 = vpop.f32.mrb[20].mxu1  ;;  %vm4702_vm4 = vcmp.ge.f32.partialorder %v4666_v36, 0.0 }
 0x46f   : > { %v4669_v15 = vadd.f32 %v10764_v23, %v15317_v40  ;;  %v4454_v37 = vpop.f32.mrb[21].mxu1  ;;  %v4775_v33 = vsel %vm4703_vm3, %v4667_v61, %v4739_v47  ;;  %v5358_v47 = vld [vmem:[#allocation6 + $0xd8] sm:$0xff] }
 0x470   : > { %v4668_v35 = vadd.f32 %v15317_v40, %v4454_v37  ;;  %v4774_v51 = vsel %vm4702_vm4, %v4666_v36, %v4738_v44  ;;  %v5357_v36 = vld [vmem:[#allocation6 + $0xd0] sm:$0xff] }
 0x471   : > { %v4741_v2 = vmul.f32 0.1, %v4669_v15  ;;  %10845 = vmatprep.mubr.f32.mxu0 %v4774_v51  ;;  %vm4705_vm9 = vcmp.ge.f32.partialorder %v4669_v15, 0.0 }
 0x472   : > { %v4740_v5 = vmul.f32 0.1, %v4668_v35  ;;  %v10767_v8 = vpop.f32.mrb[22].mxu1  ;;  %10846 = vmatmul.mubr.f32.vlgmr.msra.gmra.mrb[18].mxu0 %v4775_v33  ;;  %vm4704_vm11 = vcmp.ge.f32.partialorder %v4668_v35, 0.0  ;;  %v5359_v33 = vld [vmem:[#allocation6 + $0xe0] sm:$0xff] }
 0x473   : > { %v4671_v25 = vadd.f32 %v10767_v8, %v15317_v40  ;;  %v4464_v10 = vpop.f32.mrb[23].mxu1  ;;  %12082 = vmatpush3.bf16.msra.mxu0 %v12079_v48  ;;  %v4777_v24 = vsel %vm4705_vm9, %v4669_v15, %v4741_v2  ;;  %v5360_v2 = vld [vmem:[#allocation6 + $0xe8] sm:$0xff] }
 0x474   : > { %v4670_v17 = vadd.f32 %v15317_v40, %v4464_v10  ;;  %v4776_v62 = vsel %vm4704_vm11, %v4668_v35, %v4740_v5  ;;  %12084 = vmatprep.subr.bf16.mxu0 %v12083_v46  ;;  %v12099_v35 = vpack.c.bf16 %v5358_v47, %v5357_v36 }
 0x475   : > { %v4743_v58 = vmul.f32 0.1, %v4671_v25  ;;  %10848 = vmatprep.mubr.f32.mxu0 %v4776_v62  ;;  %vm4707_vm3 = vcmp.ge.f32.partialorder %v4671_v25, 0.0 }
 0x476   : > { %v4742_v56 = vmul.f32 0.1, %v4670_v17  ;;  %v10770_v34 = vpop.f32.mrb[24].mxu1  ;;  %10849 = vmatmul.mubr.f32.gmra.mrb[20].mxu0 %v4777_v24  ;;  %vm4706_vm7 = vcmp.ge.f32.partialorder %v4670_v17, 0.0 }
 0x477   : > { %v4673_v1 = vadd.f32 %v10770_v34, %v15317_v40  ;;  %v4474_v18 = vpop.f32.mrb[25].mxu1  ;;  %12086 = vmatpush3.bf16.msra.mxu0 %v12083_v46  ;;  %v4779_v29 = vsel %vm4707_vm3, %v4671_v25, %v4743_v58 }
 0x478   : > { %v4672_v53 = vadd.f32 %v15317_v40, %v4474_v18  ;;  %v4778_v59 = vsel %vm4706_vm7, %v4670_v17, %v4742_v56  ;;  %12088 = vmatprep.subr.bf16.mxu0 %v12087_v19  ;;  %v12103_v17 = vpack.c.bf16 %v5360_v2, %v5359_v33 }
 0x479   : > { %v4745_v4 = vmul.f32 0.1, %v4673_v1  ;;  %10851 = vmatprep.mubr.f32.mxu0 %v4778_v59  ;;  %vm4709_vm11 = vcmp.ge.f32.partialorder %v4673_v1, 0.0 }
 0x47a   : > { %v4744_v22 = vmul.f32 0.1, %v4672_v53  ;;  %v10773_v54 = vpop.f32.mrb[26].mxu1  ;;  %10852 = vmatmul.mubr.f32.gmra.mrb[22].mxu0 %v4779_v29  ;;  %vm4708_vm4 = vcmp.ge.f32.partialorder %v4672_v53, 0.0 }
 0x47b   : > { %v4675_v13 = vadd.f32 %v10773_v54, %v15317_v40  ;;  %v4484_v27 = vpop.f32.mrb[27].mxu1  ;;  %12090 = vmatpush3.bf16.msra.mxu0 %v12087_v19  ;;  %v4781_v28 = vsel %vm4709_vm11, %v4673_v1, %v4745_v4 }
 0x47c   : > { %v4674_v0 = vadd.f32 %v15317_v40, %v4484_v27  ;;  %v4780_v48 = vsel %vm4708_vm4, %v4672_v53, %v4744_v22  ;;  %12092 = vmatprep.subr.bf16.mxu0 %v12091_v32 }
 0x47d   : > { %v4747_v61 = vmul.f32 0.1, %v4675_v13  ;;  %10854 = vmatprep.mubr.f32.mxu0 %v4780_v48  ;;  %vm4711_vm7 = vcmp.ge.f32.partialorder %v4675_v13, 0.0 }
 0x47e   : > { %v4746_v21 = vmul.f32 0.1, %v4674_v0  ;;  %v10776_v7 = vpop.f32.mrb[28].mxu1  ;;  %10855 = vmatmul.mubr.f32.gmra.mrb[24].mxu0 %v4781_v28  ;;  %vm4710_vm9 = vcmp.ge.f32.partialorder %v4674_v0, 0.0 }
 0x47f   : > { %v4677_v44 = vadd.f32 %v10776_v7, %v15317_v40  ;;  %v4494_v23 = vpop.f32.mrb[29].mxu1  ;;  %12094 = vmatpush3.bf16.msra.mxu0 %v12091_v32  ;;  %v4783_v46 = vsel %vm4711_vm7, %v4675_v13, %v4747_v61 }
 0x480   : > { %v4676_v15 = vadd.f32 %v15317_v40, %v4494_v23  ;;  %v4782_v37 = vsel %vm4710_vm9, %v4674_v0, %v4746_v21  ;;  %12096 = vmatprep.subr.bf16.mxu0 %v12095_v43 }
 0x481   : > { %v4749_v51 = vmul.f32 0.1, %v4677_v44  ;;  %10857 = vmatprep.mubr.f32.mxu0 %v4782_v37  ;;  %vm4713_vm4 = vcmp.ge.f32.partialorder %v4677_v44, 0.0 }
 0x482   : > { %v4748_v6 = vmul.f32 0.1, %v4676_v15  ;;  %v10779_v30 = vpop.f32.mrb[30].mxu1  ;;  %10858 = vmatmul.mubr.f32.gmra.mrb[26].mxu0 %v4783_v46  ;;  %vm4712_vm3 = vcmp.ge.f32.partialorder %v4676_v15, 0.0 }
 0x483   : > { %v4679_v5 = vadd.f32 %v10779_v30, %v15317_v40  ;;  %v4504_v8 = vpop.f32.mrb[31].mxu1  ;;  %12098 = vmatpush3.bf16.msra.mxu0 %v12095_v43  ;;  %v4785_v19 = vsel %vm4713_vm4, %v4677_v44, %v4749_v51 }
 0x484   : > { %v4678_v25 = vadd.f32 %v15317_v40, %v4504_v8  ;;  %v4784_v10 = vsel %vm4712_vm3, %v4676_v15, %v4748_v6  ;;  %12100 = vmatprep.subr.bf16.mxu0 %v12099_v35 }
 0x485   : > { %v4751_v62 = vmul.f32 0.1, %v4679_v5  ;;  %10860 = vmatprep.mubr.f32.mxu0 %v4784_v10  ;;  %vm4715_vm9 = vcmp.ge.f32.partialorder %v4679_v5, 0.0 }
 0x486   : > { %v4750_v58 = vmul.f32 0.1, %v4678_v25  ;;  %v10782_v24 = vpop.f32.mrb[32].mxu1  ;;  %10861 = vmatmul.mubr.f32.gmra.mrb[28].mxu0 %v4785_v19  ;;  %vm4714_vm11 = vcmp.ge.f32.partialorder %v4678_v25, 0.0 }
 0x487   : > { %v4681_v41 = vadd.f32 %v10782_v24, %v15317_v40  ;;  %v4514_v3 = vpop.f32.mrb[33].mxu1  ;;  %12102 = vmatpush3.bf16.msra.mxu0 %v12099_v35  ;;  %v4787_v18 = vsel %vm4715_vm9, %v4679_v5, %v4751_v62 }
 0x488   : > { %v4680_v56 = vadd.f32 %v15317_v40, %v4514_v3  ;;  %v4786_v34 = vsel %vm4714_vm11, %v4678_v25, %v4750_v58  ;;  %12104 = vmatprep.subr.bf16.mxu0 %v12103_v17 }
 0x489   : > { %v4753_v1 = vmul.f32 0.1, %v4681_v41  ;;  %10863 = vmatprep.mubr.f32.mxu0 %v4786_v34  ;;  %vm4717_vm3 = vcmp.ge.f32.partialorder %v4681_v41, 0.0 }
 0x48a   : > { %v4752_v53 = vmul.f32 0.1, %v4680_v56  ;;  %v10785_v59 = vpop.f32.mrb[34].mxu1  ;;  %10864 = vmatmul.mubr.f32.gmra.mrb[30].mxu0 %v4787_v18  ;;  %vm4716_vm7 = vcmp.ge.f32.partialorder %v4680_v56, 0.0 }
 0x48b   : > { %v4683_v32 = vadd.f32 %v10785_v59, %v15317_v40  ;;  %v4524_v4 = vpop.f32.mrb[35].mxu1  ;;  %12106 = vmatpush3.bf16.msra.mxu0 %v12103_v17  ;;  %v4789_v22 = vsel %vm4717_vm3, %v4681_v41, %v4753_v1 }
 0x48c   : > { %v4682_v29 = vadd.f32 %v15317_v40, %v4524_v4  ;;  %v4788_v55 = vsel %vm4716_vm7, %v4680_v56, %v4752_v53 }
 0x48d   : > { %v4755_v49 = vmul.f32 0.1, %v4683_v32  ;;  %10866 = vmatprep.mubr.f32.mxu0 %v4788_v55  ;;  %vm4719_vm11 = vcmp.ge.f32.partialorder %v4683_v32, 0.0 }
 0x48e   : > { %v4754_v54 = vmul.f32 0.1, %v4682_v29  ;;  %v10788_v13 = vpop.f32.mrb[36].mxu1  ;;  %10867 = vmatmul.mubr.f32.gmra.mrb[32].mxu0 %v4789_v22  ;;  %vm4718_vm4 = vcmp.ge.f32.partialorder %v4682_v29, 0.0 }
 0x48f   : > { %v4685_v27 = vadd.f32 %v10788_v13, %v15317_v40  ;;  %v4534_v0 = vpop.f32.mrb[37].mxu1  ;;  %v4791_v28 = vsel %vm4719_vm11, %v4683_v32, %v4755_v49 }
 0x490   : > { %v4684_v48 = vadd.f32 %v15317_v40, %v4534_v0  ;;  %v4790_v43 = vsel %vm4718_vm4, %v4682_v29, %v4754_v54 }
 0x491   : > { %v4757_v61 = vmul.f32 0.1, %v4685_v27  ;;  %10869 = vmatprep.mubr.f32.mxu0 %v4790_v43  ;;  %vm4721_vm7 = vcmp.ge.f32.partialorder %v4685_v27, 0.0 }
 0x492   : > { %v4756_v36 = vmul.f32 0.1, %v4684_v48  ;;  %v10791_v47 = vpop.f32.mrb[38].mxu1  ;;  %10870 = vmatmul.mubr.f32.gmra.mrb[34].mxu0 %v4791_v28  ;;  %vm4720_vm9 = vcmp.ge.f32.partialorder %v4684_v48, 0.0 }
 0x493   : > { %v4687_v21 = vadd.f32 %v10791_v47, %v15317_v40  ;;  %v4544_v7 = vpop.f32.mrb[39].mxu1  ;;  %v4793_v37 = vsel %vm4721_vm7, %v4685_v27, %v4757_v61 }
 0x494   : > { %v4686_v44 = vadd.f32 %v15317_v40, %v4544_v7  ;;  %v4792_v23 = vsel %vm4720_vm9, %v4684_v48, %v4756_v36 }
 0x495   : > { %v4759_v15 = vmul.f32 0.1, %v4687_v21  ;;  %10872 = vmatprep.mubr.f32.mxu0 %v4792_v23  ;;  %vm4723_vm4 = vcmp.ge.f32.partialorder %v4687_v21, 0.0 }
 0x496   : > { %v4758_v35 = vmul.f32 0.1, %v4686_v44  ;;  %v10794_v51 = vpop.f32.mrb[40].mxu1  ;;  %10873 = vmatmul.mubr.f32.gmra.mrb[36].mxu0 %v4793_v37  ;;  %vm4722_vm3 = vcmp.ge.f32.partialorder %v4686_v44, 0.0 }
 0x497   : > { %v4689_v46 = vadd.f32 %v10794_v51, %v15317_v40  ;;  %v4554_v33 = vpop.f32.mrb[41].mxu1  ;;  %v4795_v5 = vsel %vm4723_vm4, %v4687_v21, %v4759_v15 }
 0x498   : > { %v4688_v2 = vadd.f32 %v15317_v40, %v4554_v33  ;;  %v4794_v6 = vsel %vm4722_vm3, %v4686_v44, %v4758_v35 }
 0x499   : > { %v4761_v30 = vmul.f32 0.1, %v4689_v46  ;;  %10875 = vmatprep.mubr.f32.mxu0 %v4794_v6  ;;  %vm4725_vm9 = vcmp.ge.f32.partialorder %v4689_v46, 0.0 }
 0x49a   : > { %v4760_v8 = vmul.f32 0.1, %v4688_v2  ;;  %v10797_v25 = vpop.f32.mrb[42].mxu1  ;;  %10876 = vmatmul.mubr.f32.gmra.mrb[38].mxu0 %v4795_v5  ;;  %vm4724_vm11 = vcmp.ge.f32.partialorder %v4688_v2, 0.0 }
 0x49b   : > { %v4691_v10 = vadd.f32 %v10797_v25, %v15317_v40  ;;  %v4564_v17 = vpop.f32.mrb[43].mxu1  ;;  %v4797_v24 = vsel %vm4725_vm9, %v4689_v46, %v4761_v30 }
 0x49c   : > { %v4690_v62 = vadd.f32 %v15317_v40, %v4564_v17  ;;  %v4796_v19 = vsel %vm4724_vm11, %v4688_v2, %v4760_v8 }
 0x49d   : > { %v4763_v58 = vmul.f32 0.1, %v4691_v10  ;;  %10878 = vmatprep.mubr.f32.mxu0 %v4796_v19  ;;  %vm4727_vm3 = vcmp.ge.f32.partialorder %v4691_v10, 0.0  ;;  %v5361_v19 = vld [vmem:[#allocation6 + $0xf0] sm:$0xff] }
 0x49e   : > { %v4762_v41 = vmul.f32 0.1, %v4690_v62  ;;  %v10800_v3 = vpop.f32.mrb[44].mxu1  ;;  %10879 = vmatmul.mubr.f32.gmra.mrb[40].mxu0 %v4797_v24  ;;  %vm4726_vm7 = vcmp.ge.f32.partialorder %v4690_v62, 0.0 }
 0x49f   : > { %v4693_v56 = vadd.f32 %v10800_v3, %v15317_v40  ;;  %v4574_v34 = vpop.f32.mrb[45].mxu1  ;;  %v4799_v59 = vsel %vm4727_vm3, %v4691_v10, %v4763_v58  ;;  %v5362_v58 = vld [vmem:[#allocation6 + $0xf8] sm:$0xff]  ;;  %v5294_v3 = vld [vmem:[#allocation6] sm:$0xff] }
 0x4a0   : > { %v4692_v1 = vadd.f32 %v15317_v40, %v4574_v34  ;;  %v4798_v18 = vsel %vm4726_vm7, %v4690_v62, %v4762_v41  ;;  %v12107_v24 = vpack.c.bf16 %v5362_v58, %v5361_v19  ;;  %v5310_v41 = vld [vmem:[#allocation2 + $0x1] sm:$0xff]  ;;  %v5311_v34 = vld [vmem:[#allocation2 + $0x9] sm:$0xff] }
 0x4a1   : > { %v4765_v53 = vmul.f32 0.1, %v4693_v56  ;;  %10881 = vmatprep.mubr.f32.mxu0 %v4798_v18  ;;  %vm4729_vm11 = vcmp.ge.f32.partialorder %v4693_v56, 0.0  ;;  %v5297_v18 = vld [vmem:[#allocation6 + $0x18] sm:$0xff] }
 0x4a2   : > { %v4764_v32 = vmul.f32 0.1, %v4692_v1  ;;  %v10803_v4 = vpop.f32.mrb[46].mxu1  ;;  %10882 = vmatmul.mubr.f32.gmra.mrb[42].mxu0 %v4799_v59  ;;  %vm4728_vm4 = vcmp.ge.f32.partialorder %v4692_v1, 0.0  ;;  %12108 = vmatprep.subr.bf16.mxu0 %v12107_v24  ;;  %v5298_v59 = vld [vmem:[#allocation6 + $0x20] sm:$0xff] }
 0x4a3   : > { %v4695_v29 = vadd.f32 %v10803_v4, %v15317_v40  ;;  %v4584_v55 = vpop.f32.mrb[47].mxu1  ;;  %v4801_v13 = vsel %vm4729_vm11, %v4693_v56, %v4765_v53  ;;  %12110 = vmatpush3.bf16.msra.mxu0 %v12107_v24 }
 0x4a4   : > { %v4694_v49 = vadd.f32 %v15317_v40, %v4584_v55  ;;  %v4800_v22 = vsel %vm4728_vm4, %v4692_v1, %v4764_v32  ;;  %v5296_v1 = vld [vmem:[#allocation6 + $0x10] sm:$0xff]  ;;  %v5299_v32 = vld [vmem:[#allocation6 + $0x28] sm:$0xff]  ;;  %v5301_v55 = vld [vmem:[#allocation6 + $0x38] sm:$0xff] }
 0x4a5   : > { %v4767_v54 = vmul.f32 0.1, %v4695_v29  ;;  %10884 = vmatprep.mubr.f32.mxu0 %v4800_v22  ;;  %vm4731_vm7 = vcmp.ge.f32.partialorder %v4695_v29, 0.0  ;;  %v12115_v53 = vpack.c.bf16 %v5297_v18, %v5296_v1  ;;  %v12119_v4 = vpack.c.bf16 %v5299_v32, %v5298_v59  ;;  %v5302_v22 = vld [vmem:[#allocation6 + $0x40] sm:$0xff] }
 0x4a6   : > { %v4766_v27 = vmul.f32 0.1, %v4694_v49  ;;  %v10806_v0 = vpop.f32.mrb[48].mxu1  ;;  %10885 = vmatmul.mubr.f32.gmra.mrb[44].mxu0 %v4801_v13  ;;  %vm4730_vm9 = vcmp.ge.f32.partialorder %v4694_v49, 0.0 }
 0x4a7   : > { %v4697_v48 = vadd.f32 %v10806_v0, %v15317_v40  ;;  %v4594_v43 = vpop.f32.mrb[49].mxu1  ;;  %v4803_v47 = vsel %vm4731_vm7, %v4695_v29, %v4767_v54  ;;  %v5300_v29 = vld [vmem:[#allocation6 + $0x30] sm:$0xff]  ;;  %v5303_v54 = vld [vmem:[#allocation6 + $0x48] sm:$0xff]  ;;  %v5305_v0 = vld [vmem:[#allocation6 + $0x58] sm:$0xff] }
 0x4a8   : > { %v4696_v61 = vadd.f32 %v15317_v40, %v4594_v43  ;;  %v4802_v28 = vsel %vm4730_vm9, %v4694_v49, %v4766_v27  ;;  %v12123_v49 = vpack.c.bf16 %v5301_v55, %v5300_v29  ;;  %v12127_v13 = vpack.c.bf16 %v5303_v54, %v5302_v22  ;;  %v5304_v27 = vld [vmem:[#allocation6 + $0x50] sm:$0xff]  ;;  %v5306_v43 = vld [vmem:[#allocation6 + $0x60] sm:$0xff] }
 0x4a9   : > { %v4769_v36 = vmul.f32 0.1, %v4697_v48  ;;  %10887 = vmatprep.mubr.f32.mxu0 %v4802_v28  ;;  %vm4733_vm4 = vcmp.ge.f32.partialorder %v4697_v48, 0.0 }
 0x4aa   : > { %v4768_v21 = vmul.f32 0.1, %v4696_v61  ;;  %v10809_v7 = vpop.f32.mrb[50].mxu1  ;;  %10888 = vmatmul.mubr.f32.gmra.mrb[46].mxu0 %v4803_v47  ;;  %vm4732_vm3 = vcmp.ge.f32.partialorder %v4696_v61, 0.0  ;;  %v5309_v47 = vld [vmem:[#allocation6 + $0x78] sm:$0xff] }
 0x4ab   : > { %v4699_v44 = vadd.f32 %v10809_v7, %v15317_v40  ;;  %v4604_v23 = vpop.f32.mrb[51].mxu1  ;;  %v4805_v51 = vsel %vm4733_vm4, %v4697_v48, %v4769_v36  ;;  %v12131_v48 = vpack.c.bf16 %v5305_v0, %v5304_v27  ;;  %v5308_v36 = vld [vmem:[#allocation6 + $0x70] sm:$0xff]  ;;  %v5890_v7 = vld [vmem:[#allocation6 + $0x100] sm:$0xff] }
 0x4ac   : > { %v4698_v15 = vadd.f32 %v15317_v40, %v4604_v23  ;;  %v4804_v37 = vsel %vm4732_vm3, %v4696_v61, %v4768_v21  ;;  %v5307_v61 = vld [vmem:[#allocation6 + $0x68] sm:$0xff]  ;;  %v12139_v21 = vpack.c.bf16 %v5309_v47, %v5308_v36 }
 0x4ad   : > { %v4771_v35 = vmul.f32 0.1, %v4699_v44  ;;  %10890 = vmatprep.mubr.f32.mxu0 %v4804_v37  ;;  %vm4735_vm9 = vcmp.ge.f32.partialorder %v4699_v44, 0.0  ;;  %v12135_v28 = vpack.c.bf16 %v5307_v61, %v5306_v43 }
 0x4ae   : > { %v4770_v46 = vmul.f32 0.1, %v4698_v15  ;;  %v10812_v33 = vpop.f32.mrb[52].mxu1  ;;  %10891 = vmatmul.mubr.f32.gmra.mrb[48].mxu0 %v4805_v51  ;;  %vm4734_vm11 = vcmp.ge.f32.partialorder %v4698_v15, 0.0 }
 0x4af   : > { %v4701_v2 = vadd.f32 %v10812_v33, %v15317_v40  ;;  %v4614_v6 = vpop.f32.mrb[53].mxu1  ;;  %v4807_v25 = vsel %vm4735_vm9, %v4699_v44, %v4771_v35  ;;  %v5891_v44 = vld [vmem:[#allocation6 + $0x108] sm:$0xff]  ;;  %vm16557_vm9 = vnez %v16299_v11 }
 0x4b0   : > { %v4700_v30 = vadd.f32 %v15317_v40, %v4614_v6  ;;  %v4806_v5 = vsel %vm4734_vm11, %v4698_v15, %v4770_v46  ;;  %v5295_v40 = vld [vmem:[#allocation6 + $0x8] sm:$0xff]  ;;  %v15355_v23 = vpack.c.bf16 %v5891_v44, %v5890_v7 }
 0x4b1   : > { %v4773_v8 = vmul.f32 0.1, %v4701_v2  ;;  %10893 = vmatprep.mubr.f32.mxu0 %v4806_v5  ;;  %vm4737_vm3 = vcmp.ge.f32.partialorder %v4701_v2, 0.0  ;;  %v12111_v56 = vpack.c.bf16 %v5295_v40, %v5294_v3  ;;  %v15361_v15 = vld [vmem:[%s16015_s6] ss:$0 sm:$0xff] }
 0x4b2   : > { %v4772_v10 = vmul.f32 0.1, %v4700_v30  ;;  %10894 = vmatmul.mubr.f32.gmra.mrb[50].mxu0 %v4807_v25  ;;  %vm4736_vm7 = vcmp.ge.f32.partialorder %v4700_v30, 0.0 }
 0x4b3   : > { %v4809_v62 = vsel %vm4737_vm3, %v4701_v2, %v4773_v8  ;;  %12112 = vmatprep.subr.bf16.mxu0 %v12111_v56 }
 0x4b4   : > { %v4808_v17 = vsel %vm4736_vm7, %v4700_v30, %v4772_v10 }
 0x4b5   : > { %10896 = vmatprep.mubr.f32.mxu0 %v4808_v17 }
 0x4b6   : > { %10897 = vmatmul.mubr.f32.gmra.mrb[52].mxu0 %v4809_v62  ;;  %v16558_v62 = vld [vmem:[#allocation61_spill] sm:$0xff] }
 0x4b7   : > { %10931 = vmatprep.mubr.f32.mxu0 %v5310_v41  ;;  %vm16559_vm7 = vnez %v16558_v62 }
 0x4ba   : > { %10932 = vmatmul.mubr.f32.vlgmr.msra.gmra.mrb[54].mxu0 %v5311_v34 }
 0x4bb   : > { %12114 = vmatpush3.bf16.msra.mxu0 %v12111_v56 }
 0x4bc   : > { %12116 = vmatprep.subr.bf16.mxu0 %v12115_v53 }
 0x4bf   : > { %12118 = vmatpush3.bf16.msra.mxu0 %v12115_v53 }
 0x4c0   : > { %12120 = vmatprep.subr.bf16.mxu0 %v12119_v4 }
 0x4c3   : > { %12122 = vmatpush3.bf16.msra.mxu0 %v12119_v4 }
 0x4c4   : > { %12124 = vmatprep.subr.bf16.mxu0 %v12123_v49 }
 0x4c7   : > { %12126 = vmatpush3.bf16.msra.mxu0 %v12123_v49 }
 0x4c8   : > { %12128 = vmatprep.subr.bf16.mxu0 %v12127_v13 }
 0x4cb   : > { %12130 = vmatpush3.bf16.msra.mxu0 %v12127_v13 }
 0x4cc   : > { %12132 = vmatprep.subr.bf16.mxu0 %v12131_v48 }
 0x4cf   : > { %12134 = vmatpush3.bf16.msra.mxu0 %v12131_v48 }
 0x4d0   : > { %12136 = vmatprep.subr.bf16.mxu0 %v12135_v28 }
 0x4d3   : > { %12138 = vmatpush3.bf16.msra.mxu0 %v12135_v28 }
 0x4d4   : > { %12140 = vmatprep.subr.bf16.mxu0 %v12139_v21 }
 0x4d7   : > { %12142 = vmatpush3.bf16.msra.mxu0 %v12139_v21 }
 0x4d8   : > { %12144 = vmatprep.subr.bf16.mxu0 %v15355_v23 }
 0x545   : > { %v10847_v37 = vpop.f32.mrb[18].mxu0 }
 0x546   : > { %v4905_v35 = vadd.f32 %v10847_v37, %v15361_v15  ;;  %v4899_v51 = vpop.f32.mrb[19].mxu0 }
 0x547   : > { %v4900_v46 = vadd.f32 %v15361_v15, %v4899_v51 }
 0x548   : > { %vm5079_vm4 = vcmp.ge.f32.partialorder %v4905_v35, 0.0  ;;  %v5115_v33 = vmul.f32 0.1, %v4905_v35 }
 0x549   : > { %vm5078_vm11 = vcmp.ge.f32.partialorder %v4900_v46, 0.0  ;;  %v5114_v2 = vmul.f32 0.1, %v4900_v46  ;;  %v10850_v6 = vpop.f32.mrb[20].mxu0 }
 0x54a   : > { %v5151_v30 = vsel %vm5079_vm4, %v4905_v35, %v5115_v33  ;;  %v4915_v5 = vadd.f32 %v10850_v6, %v15361_v15  ;;  %v4909_v8 = vpop.f32.mrb[21].mxu0  ;;  %vm16560_vm4 = vnez %v16323_v20 }
 0x54b   : > { %v5187_v25 = vsel %vm16557_vm9, %v5151_v30, 0.0  ;;  %v5150_v10 = vsel %vm5078_vm11, %v4900_v46, %v5114_v2  ;;  %v4910_v17 = vadd.f32 %v15361_v15, %v4909_v8  ;;  %vm16561_vm11 = vnez %v16330_v9 }
 0x54c   : > { %5223 = vst [vmem:[#allocation2 + $0x1b] sm:$0xff] %v5187_v25  ;;  %v5186_v19 = vsel %vm16559_vm7, %v5150_v10, 0.0  ;;  %vm5081_vm3 = vcmp.ge.f32.partialorder %v4915_v5, 0.0  ;;  %v5117_v58 = vmul.f32 0.1, %v4915_v5 }
 0x54d   : > { %5222 = vst [vmem:[#allocation2 + $0x13] sm:$0xff] %v5186_v19  ;;  %vm5080_vm1 = vcmp.ge.f32.partialorder %v4910_v17, 0.0  ;;  %v5116_v24 = vmul.f32 0.1, %v4910_v17  ;;  %v10853_v41 = vpop.f32.mrb[22].mxu0 }
 0x54e   : > { %v5153_v3 = vsel %vm5081_vm3, %v4915_v5, %v5117_v58  ;;  %v4925_v40 = vadd.f32 %v10853_v41, %v15361_v15  ;;  %v4919_v56 = vpop.f32.mrb[23].mxu0  ;;  %vm16562_vm3 = vnez %v16359_v38 }
 0x54f   : > { %v5189_v11 = vsel %vm16560_vm4, %v5153_v3, 0.0  ;;  %v5152_v34 = vsel %vm5080_vm1, %v4910_v17, %v5116_v24  ;;  %v4920_v1 = vadd.f32 %v15361_v15, %v4919_v56  ;;  %vm16563_vm1 = vnez %v16366_v31 }
 0x550   : > { %5225 = vst [vmem:[#allocation2 + $0x2b] sm:$0xff] %v5189_v11  ;;  %v5188_v18 = vsel %vm16561_vm11, %v5152_v34, 0.0  ;;  %vm5083_vm9 = vcmp.ge.f32.partialorder %v4925_v40, 0.0  ;;  %v5119_v53 = vmul.f32 0.1, %v4925_v40 }
 0x551   : > { %5224 = vst [vmem:[#allocation2 + $0x23] sm:$0xff] %v5188_v18  ;;  %vm5082_vm7 = vcmp.ge.f32.partialorder %v4920_v1, 0.0  ;;  %v5118_v59 = vmul.f32 0.1, %v4920_v1  ;;  %v10856_v32 = vpop.f32.mrb[24].mxu0 }
 0x552   : > { %v5155_v4 = vsel %vm5083_vm9, %v4925_v40, %v5119_v53  ;;  %v4935_v29 = vadd.f32 %v10856_v32, %v15361_v15  ;;  %v4929_v55 = vpop.f32.mrb[25].mxu0  ;;  %vm16564_vm9 = vnez %v16377_v60 }
 0x553   : > { %v5191_v20 = vsel %vm16562_vm3, %v5155_v4, 0.0  ;;  %v5154_v49 = vsel %vm5082_vm7, %v4920_v1, %v5118_v59  ;;  %v4930_v22 = vadd.f32 %v15361_v15, %v4929_v55  ;;  %vm16565_vm7 = vnez %v16384_v39 }
 0x554   : > { %5227 = vst [vmem:[#allocation2 + $0x3b] sm:$0xff] %v5191_v20  ;;  %v5190_v9 = vsel %vm16563_vm1, %v5154_v49, 0.0  ;;  %vm5085_vm4 = vcmp.ge.f32.partialorder %v4935_v29, 0.0  ;;  %v5121_v54 = vmul.f32 0.1, %v4935_v29  ;;  %v5312_v13 = vld [vmem:[#allocation2 + $0x11] sm:$0xff] }
 0x555   : > { %v5313_v27 = vld [vmem:[#allocation2 + $0x19] sm:$0xff]  ;;  %5226 = vst [vmem:[#allocation2 + $0x33] sm:$0xff] %v5190_v9  ;;  %vm5084_vm11 = vcmp.ge.f32.partialorder %v4930_v22, 0.0  ;;  %v5120_v0 = vmul.f32 0.1, %v4930_v22  ;;  %v10859_v48 = vpop.f32.mrb[26].mxu0  ;;  %10934 = vmatprep.mubr.f32.mxu0 %v5312_v13 }
 0x556   : > { %v5157_v43 = vsel %vm5085_vm4, %v4935_v29, %v5121_v54  ;;  %v4945_v38 = vadd.f32 %v10859_v48, %v15361_v15  ;;  %v4939_v61 = vpop.f32.mrb[27].mxu0  ;;  %10935 = vmatmul.mubr.f32.gmra.mrb[56].mxu0 %v5313_v27  ;;  %vm16566_vm4 = vnez %v16405_v45  ;;  %v16571_v13 = vld [vmem:[#allocation24_spill] sm:$0xff] }
 0x557   : > { %v5193_v28 = vsel %vm16564_vm9, %v5157_v43, 0.0  ;;  %v5156_v36 = vsel %vm5084_vm11, %v4930_v22, %v5120_v0  ;;  %v4940_v31 = vadd.f32 %v15361_v15, %v4939_v61 }
 0x558   : > { %5229 = vst [vmem:[#allocation2 + $0x4b] sm:$0xff] %v5193_v28  ;;  %v5192_v47 = vsel %vm16565_vm7, %v5156_v36, 0.0  ;;  %vm5087_vm3 = vcmp.ge.f32.partialorder %v4945_v38, 0.0  ;;  %v5123_v21 = vmul.f32 0.1, %v4945_v38  ;;  %v5314_v7 = vld [vmem:[#allocation2 + $0x21] sm:$0xff]  ;;  %vm16568_vm7 = vnez %v16426_v42 }
 0x559   : > { %v5315_v44 = vld [vmem:[#allocation2 + $0x29] sm:$0xff]  ;;  %5228 = vst [vmem:[#allocation2 + $0x43] sm:$0xff] %v5192_v47  ;;  %vm5086_vm1 = vcmp.ge.f32.partialorder %v4940_v31, 0.0  ;;  %v5122_v37 = vmul.f32 0.1, %v4940_v31  ;;  %v10862_v35 = vpop.f32.mrb[28].mxu0  ;;  %10937 = vmatprep.mubr.f32.mxu0 %v5314_v7 }
 0x55a   : > { %v5159_v51 = vsel %vm5087_vm3, %v4945_v38, %v5123_v21  ;;  %v4955_v60 = vadd.f32 %v10862_v35, %v15361_v15  ;;  %v4949_v46 = vpop.f32.mrb[29].mxu0  ;;  %10938 = vmatmul.mubr.f32.gmra.mrb[58].mxu0 %v5315_v44  ;;  %v16575_v44 = vld [vmem:[#allocation26_spill] sm:$0xff] }
 0x55b   : > { %v5195_v33 = vsel %vm14630_vm8, %v5159_v51, 0.0  ;;  %v5158_v2 = vsel %vm5086_vm1, %v4940_v31, %v5122_v37  ;;  %v4950_v39 = vadd.f32 %v15361_v15, %v4949_v46  ;;  %vm16567_vm8 = vnez %v16419_v57  ;;  %v16573_v31 = vld [vmem:[#allocation27_spill] sm:$0xff] }
 0x55c   : > { %5231 = vst [vmem:[#allocation2 + $0x5b] sm:$0xff] %v5195_v33  ;;  %v5194_v6 = vsel %vm16566_vm4, %v5158_v2, 0.0  ;;  %vm5089_vm11 = vcmp.ge.f32.partialorder %v4955_v60, 0.0  ;;  %v5125_v30 = vmul.f32 0.1, %v4955_v60  ;;  %v5316_v5 = vld [vmem:[#allocation2 + $0x31] sm:$0xff]  ;;  %vm16569_vm4 = vnez %v16448_v16 }
 0x55d   : > { %v5317_v8 = vld [vmem:[#allocation2 + $0x39] sm:$0xff]  ;;  %5230 = vst [vmem:[#allocation2 + $0x53] sm:$0xff] %v5194_v6  ;;  %vm5088_vm9 = vcmp.ge.f32.partialorder %v4950_v39, 0.0  ;;  %v5124_v25 = vmul.f32 0.1, %v4950_v39  ;;  %v10865_v10 = vpop.f32.mrb[30].mxu0  ;;  %10940 = vmatprep.mubr.f32.mxu0 %v5316_v5 }
 0x55e   : > { %v5161_v17 = vsel %vm5089_vm11, %v4955_v60, %v5125_v30  ;;  %v4965_v12 = vadd.f32 %v10865_v10, %v15361_v15  ;;  %v4959_v62 = vpop.f32.mrb[31].mxu0  ;;  %10941 = vmatmul.mubr.f32.gmra.mrb[60].mxu0 %v5317_v8  ;;  %v16577_v30 = vld [vmem:[#allocation67_spill] sm:$0xff]  ;;  %v15656_v52 = vld [vmem:[#allocation2 + $0x34] sm:$0xff] }
 0x55f   : > { %v5197_v19 = vsel %vm16567_vm8, %v5161_v17, 0.0  ;;  %v5160_v58 = vsel %vm5088_vm9, %v4950_v39, %v5124_v25  ;;  %v4960_v45 = vadd.f32 %v15361_v15, %v4959_v62  ;;  %vm16572_vm8 = vnez %v16571_v13  ;;  %v16579_v10 = vld [vmem:[#allocation71_spill] sm:$0xff] }
 0x560   : > { %5233 = vst [vmem:[#allocation2 + $0x6b] sm:$0xff] %v5197_v19  ;;  %v5196_v24 = vsel %vm16568_vm7, %v5160_v58, 0.0  ;;  %vm5091_vm3 = vcmp.ge.f32.partialorder %v4965_v12, 0.0  ;;  %v5127_v41 = vmul.f32 0.1, %v4965_v12  ;;  %v5318_v3 = vld [vmem:[#allocation2 + $0x41] sm:$0xff] }
 0x561   : > { %v5319_v40 = vld [vmem:[#allocation2 + $0x49] sm:$0xff]  ;;  %5232 = vst [vmem:[#allocation2 + $0x63] sm:$0xff] %v5196_v24  ;;  %vm5090_vm1 = vcmp.ge.f32.partialorder %v4960_v45, 0.0  ;;  %v5126_v56 = vmul.f32 0.1, %v4960_v45  ;;  %v10868_v11 = vpop.f32.mrb[32].mxu0  ;;  %10943 = vmatprep.mubr.f32.mxu0 %v5318_v3 }
 0x562   : > { %v5163_v34 = vsel %vm5091_vm3, %v4965_v12, %v5127_v41  ;;  %v4975_v57 = vadd.f32 %v10868_v11, %v15361_v15  ;;  %v4969_v1 = vpop.f32.mrb[33].mxu0  ;;  %10944 = vmatmul.mubr.f32.gmra.mrb[62].mxu0 %v5319_v40  ;;  %v16581_v40 = vld [vmem:[#allocation20_spill] sm:$0xff] }
 0x563   : > { %v5199_v18 = vsel %vm14710_vm15, %v5163_v34, 0.0  ;;  %v5162_v53 = vsel %vm5090_vm1, %v4960_v45, %v5126_v56  ;;  %v4970_v42 = vadd.f32 %v15361_v15, %v4969_v1  ;;  %vm16570_vm15 = vnez %v16465_v26 }
 0x564   : > { %5235 = vst [vmem:[#allocation2 + $0x7b] sm:$0xff] %v5199_v18  ;;  %v5198_v59 = vsel %vm16569_vm4, %v5162_v53, 0.0  ;;  %vm5093_vm11 = vcmp.ge.f32.partialorder %v4975_v57, 0.0  ;;  %v5129_v32 = vmul.f32 0.1, %v4975_v57  ;;  %v5320_v4 = vld [vmem:[#allocation2 + $0x51] sm:$0xff]  ;;  %vm16574_vm1 = vnez %v16573_v31 }
 0x565   : > { %v5321_v29 = vld [vmem:[#allocation2 + $0x59] sm:$0xff]  ;;  %5234 = vst [vmem:[#allocation2 + $0x73] sm:$0xff] %v5198_v59  ;;  %vm5092_vm9 = vcmp.ge.f32.partialorder %v4970_v42, 0.0  ;;  %v5128_v55 = vmul.f32 0.1, %v4970_v42  ;;  %v10871_v20 = vpop.f32.mrb[34].mxu0  ;;  %10946 = vmatprep.mubr.f32.mxu0 %v5320_v4  ;;  %vm16576_vm4 = vnez %v16575_v44 }
 0x566   : > { %v5165_v49 = vsel %vm5093_vm11, %v4975_v57, %v5129_v32  ;;  %v4985_v63 = vadd.f32 %v10871_v20, %v15361_v15  ;;  %v4979_v22 = vpop.f32.mrb[35].mxu0  ;;  %10947 = vmatmul.mubr.f32.gmra.mrb[64].mxu0 %v5321_v29  ;;  %v16583_v57 = vld [vmem:[#allocation17_spill] sm:$0xff]  ;;  %v16585_v20 = vld [vmem:[#allocation22_spill] sm:$0xff] }
 0x567   : > { %v5201_v9 = vsel %vm16570_vm15, %v5165_v49, 0.0  ;;  %v5164_v54 = vsel %vm5092_vm9, %v4970_v42, %v5128_v55  ;;  %v4980_v16 = vadd.f32 %v15361_v15, %v4979_v22  ;;  %vm16578_vm15 = vnez %v16577_v30 }
 0x568   : > { %5237 = vst [vmem:[#allocation2 + $0x8b] sm:$0xff] %v5201_v9  ;;  %v5200_v27 = vsel %vm16572_vm8, %v5164_v54, 0.0  ;;  %vm5095_vm7 = vcmp.ge.f32.partialorder %v4985_v63, 0.0  ;;  %v5131_v0 = vmul.f32 0.1, %v4985_v63  ;;  %v5322_v48 = vld [vmem:[#allocation2 + $0x61] sm:$0xff]  ;;  %vm16580_vm8 = vnez %v16579_v10 }
 0x569   : > { %v5323_v43 = vld [vmem:[#allocation2 + $0x69] sm:$0xff]  ;;  %5236 = vst [vmem:[#allocation2 + $0x83] sm:$0xff] %v5200_v27  ;;  %vm5094_vm3 = vcmp.ge.f32.partialorder %v4980_v16, 0.0  ;;  %v5130_v38 = vmul.f32 0.1, %v4980_v16  ;;  %v10874_v61 = vpop.f32.mrb[36].mxu0  ;;  %10949 = vmatprep.mubr.f32.mxu0 %v5322_v48 }
 0x56a   : > { %v5167_v28 = vsel %vm5095_vm7, %v4985_v63, %v5131_v0  ;;  %v4995_v26 = vadd.f32 %v10874_v61, %v15361_v15  ;;  %v4989_v36 = vpop.f32.mrb[37].mxu0  ;;  %10950 = vmatmul.mubr.f32.gmra.mrb[66].mxu0 %v5323_v43  ;;  %v16587_v9 = vld [vmem:[#allocation23_spill] sm:$0xff] }
 0x56b   : > { %v5203_v47 = vsel %vm16574_vm1, %v5167_v28, 0.0  ;;  %v5166_v21 = vsel %vm5094_vm3, %v4980_v16, %v5130_v38  ;;  %v4990_v7 = vadd.f32 %v15361_v15, %v4989_v36  ;;  %vm16582_vm1 = vnez %v16581_v40  ;;  %v16589_v28 = vld [vmem:[#allocation18_spill] sm:$0xff] }
 0x56c   : > { %5239 = vst [vmem:[#allocation2 + $0x9b] sm:$0xff] %v5203_v47  ;;  %v5202_v37 = vsel %vm16576_vm4, %v5166_v21, 0.0  ;;  %vm5097_vm11 = vcmp.ge.f32.partialorder %v4995_v26, 0.0  ;;  %v5133_v35 = vmul.f32 0.1, %v4995_v26  ;;  %v5324_v51 = vld [vmem:[#allocation2 + $0x71] sm:$0xff]  ;;  %vm16584_vm4 = vnez %v16583_v57 }
 0x56d   : > { %v5325_v60 = vld [vmem:[#allocation2 + $0x79] sm:$0xff]  ;;  %5238 = vst [vmem:[#allocation2 + $0x93] sm:$0xff] %v5202_v37  ;;  %vm5096_vm9 = vcmp.ge.f32.partialorder %v4990_v7, 0.0  ;;  %v5132_v46 = vmul.f32 0.1, %v4990_v7  ;;  %v10877_v33 = vpop.f32.mrb[38].mxu0  ;;  %10952 = vmatprep.mubr.f32.mxu0 %v5324_v51 }
 0x56e   : > { %v5169_v2 = vsel %vm5097_vm11, %v4995_v26, %v5133_v35  ;;  %v5005_v39 = vadd.f32 %v10877_v33, %v15361_v15  ;;  %v4999_v6 = vpop.f32.mrb[39].mxu0  ;;  %10953 = vmatmul.mubr.f32.gmra.mrb[68].mxu0 %v5325_v60  ;;  %v16591_v47 = vld [vmem:[#allocation25_spill] sm:$0xff] }
 0x56f   : > { %v5205_v5 = vsel %vm16578_vm15, %v5169_v2, 0.0  ;;  %v5168_v8 = vsel %vm5096_vm9, %v4990_v7, %v5132_v46  ;;  %v5000_v25 = vadd.f32 %v15361_v15, %v4999_v6  ;;  %vm16586_vm15 = vnez %v16585_v20  ;;  %v16593_v2 = vld [vmem:[#allocation19_spill] sm:$0xff] }
 0x570   : > { %5241 = vst [vmem:[#allocation2 + $0xab] sm:$0xff] %v5205_v5  ;;  %v5204_v17 = vsel %vm16580_vm8, %v5168_v8, 0.0  ;;  %vm5099_vm7 = vcmp.ge.f32.partialorder %v5005_v39, 0.0  ;;  %v5135_v12 = vmul.f32 0.1, %v5005_v39  ;;  %v5326_v62 = vld [vmem:[#allocation2 + $0x81] sm:$0xff]  ;;  %vm16588_vm8 = vnez %v16587_v9 }
 0x571   : > { %v5327_v19 = vld [vmem:[#allocation2 + $0x89] sm:$0xff]  ;;  %5240 = vst [vmem:[#allocation2 + $0xa3] sm:$0xff] %v5204_v17  ;;  %vm5098_vm3 = vcmp.ge.f32.partialorder %v5000_v25, 0.0  ;;  %v5134_v58 = vmul.f32 0.1, %v5000_v25  ;;  %v10880_v45 = vpop.f32.mrb[40].mxu0  ;;  %10955 = vmatprep.mubr.f32.mxu0 %v5326_v62 }
 0x572   : > { %v5171_v24 = vsel %vm5099_vm7, %v5005_v39, %v5135_v12  ;;  %v5015_v41 = vadd.f32 %v10880_v45, %v15361_v15  ;;  %v5009_v3 = vpop.f32.mrb[41].mxu0  ;;  %10956 = vmatmul.mubr.f32.gmra.mrb[70].mxu0 %v5327_v19  ;;  %v5895_v5 = vld [vmem:[#allocation6 + $0x128] sm:$0xff] }
 0x573   : > { %v5207_v56 = vsel %vm16582_vm1, %v5171_v24, 0.0  ;;  %v5170_v11 = vsel %vm5098_vm3, %v5000_v25, %v5134_v58  ;;  %v5010_v34 = vadd.f32 %v15361_v15, %v5009_v3  ;;  %vm16590_vm1 = vnez %v16589_v28  ;;  %v5899_v24 = vld [vmem:[#allocation6 + $0x148] sm:$0xff] }
 0x574   : > { %5243 = vst [vmem:[#allocation2 + $0xbb] sm:$0xff] %v5207_v56  ;;  %v5206_v1 = vsel %vm16584_vm4, %v5170_v11, 0.0  ;;  %vm5101_vm11 = vcmp.ge.f32.partialorder %v5015_v41, 0.0  ;;  %v5137_v18 = vmul.f32 0.1, %v5015_v41  ;;  %v5328_v53 = vld [vmem:[#allocation2 + $0x91] sm:$0xff]  ;;  %vm16592_vm4 = vnez %v16591_v47 }
 0x575   : > { %v5329_v42 = vld [vmem:[#allocation2 + $0x99] sm:$0xff]  ;;  %5242 = vst [vmem:[#allocation2 + $0xb3] sm:$0xff] %v5206_v1  ;;  %vm5100_vm9 = vcmp.ge.f32.partialorder %v5010_v34, 0.0  ;;  %v5136_v59 = vmul.f32 0.1, %v5010_v34  ;;  %v10883_v32 = vpop.f32.mrb[42].mxu0  ;;  %10958 = vmatprep.mubr.f32.mxu0 %v5328_v53 }
 0x576   : > { %v5173_v4 = vsel %vm5101_vm11, %v5015_v41, %v5137_v18  ;;  %v5025_v29 = vadd.f32 %v10883_v32, %v15361_v15  ;;  %v5019_v55 = vpop.f32.mrb[43].mxu0  ;;  %10959 = vmatmul.mubr.f32.gmra.mrb[72].mxu0 %v5329_v42  ;;  %v7229_v56 = vld [vmem:[#allocation6 + $0x318] sm:$0xff] }
 0x577   : > { %v5209_v49 = vsel %vm16586_vm15, %v5173_v4, 0.0  ;;  %v5172_v63 = vsel %vm5100_vm9, %v5010_v34, %v5136_v59  ;;  %v5020_v22 = vadd.f32 %v15361_v15, %v5019_v55  ;;  %vm16594_vm15 = vnez %v16593_v2  ;;  %v5893_v2 = vld [vmem:[#allocation6 + $0x118] sm:$0xff] }
 0x578   : > { %5245 = vst [vmem:[#allocation2 + $0xcb] sm:$0xff] %v5209_v49  ;;  %v5208_v54 = vsel %vm16588_vm8, %v5172_v63, 0.0  ;;  %vm5103_vm7 = vcmp.ge.f32.partialorder %v5025_v29, 0.0  ;;  %v5139_v16 = vmul.f32 0.1, %v5025_v29  ;;  %v5330_v13 = vld [vmem:[#allocation2 + $0xa1] sm:$0xff] }
 0x579   : > { %v5331_v27 = vld [vmem:[#allocation2 + $0xa9] sm:$0xff]  ;;  %5244 = vst [vmem:[#allocation2 + $0xc3] sm:$0xff] %v5208_v54  ;;  %vm5102_vm3 = vcmp.ge.f32.partialorder %v5020_v22, 0.0  ;;  %v5138_v0 = vmul.f32 0.1, %v5020_v22  ;;  %v10886_v48 = vpop.f32.mrb[44].mxu0  ;;  %10961 = vmatprep.mubr.f32.mxu0 %v5330_v13 }
 0x57a   : > { %v5175_v43 = vsel %vm5103_vm7, %v5025_v29, %v5139_v16  ;;  %v5035_v38 = vadd.f32 %v10886_v48, %v15361_v15  ;;  %v5029_v61 = vpop.f32.mrb[45].mxu0  ;;  %10962 = vmatmul.mubr.f32.gmra.mrb[74].mxu0 %v5331_v27  ;;  %v6855_v4 = vld [vmem:[#allocation2 + $0x14] sm:$0xff]  ;;  %v7231_v49 = vld [vmem:[#allocation6 + $0x328] sm:$0xff] }
 0x57b   : > { %v5211_v26 = vsel %vm16590_vm1, %v5175_v43, 0.0  ;;  %v5174_v36 = vsel %vm5102_vm3, %v5020_v22, %v5138_v0  ;;  %v5030_v31 = vadd.f32 %v15361_v15, %v5029_v61  ;;  %v7232_v43 = vld [vmem:[#allocation6 + $0x330] sm:$0xff] }
 0x57c   : > { %5247 = vst [vmem:[#allocation2 + $0xdb] sm:$0xff] %v5211_v26  ;;  %v5210_v21 = vsel %vm16592_vm4, %v5174_v36, 0.0  ;;  %vm5105_vm11 = vcmp.ge.f32.partialorder %v5035_v38, 0.0  ;;  %v5141_v7 = vmul.f32 0.1, %v5035_v38  ;;  %v5332_v44 = vld [vmem:[#allocation2 + $0xb1] sm:$0xff] }
 0x57d   : > { %v5333_v37 = vld [vmem:[#allocation2 + $0xb9] sm:$0xff]  ;;  %5246 = vst [vmem:[#allocation2 + $0xd3] sm:$0xff] %v5210_v21  ;;  %vm5104_vm9 = vcmp.ge.f32.partialorder %v5030_v31, 0.0  ;;  %v5140_v35 = vmul.f32 0.1, %v5030_v31  ;;  %v10889_v51 = vpop.f32.mrb[46].mxu0  ;;  %10964 = vmatprep.mubr.f32.mxu0 %v5332_v44 }
 0x57e   : > { %v5177_v60 = vsel %vm5105_vm11, %v5035_v38, %v5141_v7  ;;  %v5045_v46 = vadd.f32 %v10889_v51, %v15361_v15  ;;  %v5039_v33 = vpop.f32.mrb[47].mxu0  ;;  %10965 = vmatmul.mubr.f32.gmra.mrb[76].mxu0 %v5333_v37 }
 0x57f   : > { %v5213_v39 = vsel %vm16594_vm15, %v5177_v60, 0.0  ;;  %v5176_v6 = vsel %vm5104_vm9, %v5030_v31, %v5140_v35  ;;  %v5040_v30 = vadd.f32 %v15361_v15, %v5039_v33  ;;  %vm16601_vm9 = vnez %v16555_v50  ;;  %v5892_v33 = vld [vmem:[#allocation6 + $0x110] sm:$0xff] }
 0x580   : > { %5249 = vst [vmem:[#allocation2 + $0xeb] sm:$0xff] %v5213_v39  ;;  %v5212_v8 = vsel %vm14831_vm6, %v5176_v6, 0.0  ;;  %vm5107_vm8 = vcmp.ge.f32.partialorder %v5045_v46, 0.0  ;;  %v5143_v25 = vmul.f32 0.1, %v5045_v46  ;;  %v5334_v10 = vld [vmem:[#allocation2 + $0xc1] sm:$0xff]  ;;  %v12147_v6 = vpack.c.bf16 %v5893_v2, %v5892_v33 }
 0x581   : > { %v5335_v17 = vld [vmem:[#allocation2 + $0xc9] sm:$0xff]  ;;  %5248 = vst [vmem:[#allocation2 + $0xe3] sm:$0xff] %v5212_v8  ;;  %vm5106_vm7 = vcmp.ge.f32.partialorder %v5040_v30, 0.0  ;;  %v5142_v12 = vmul.f32 0.1, %v5040_v30  ;;  %v10892_v62 = vpop.f32.mrb[48].mxu0  ;;  %10967 = vmatprep.mubr.f32.mxu0 %v5334_v10  ;;  %v12279_v50 = vpack.c.bf16 %v7231_v49, %v7230_v14 }
 0x582   : > { %v5179_v19 = vsel %vm5107_vm8, %v5045_v46, %v5143_v25  ;;  %v5055_v58 = vadd.f32 %v10892_v62, %v15361_v15  ;;  %v5049_v45 = vpop.f32.mrb[49].mxu0  ;;  %10968 = vmatmul.mubr.f32.gmra.mrb[78].mxu0 %v5335_v17  ;;  %v13118_v39 = vld [vmem:[#allocation2] sm:$0xff]  ;;  %v5260_v8 = vld [vmem:[#allocation2 + $0x10] sm:$0xff]  ;;  %v5261_v10 = vld [vmem:[#allocation2 + $0x18] sm:$0xff] }
 0x583   : > { %v5215_v41 = vsel %vm14848_vm5, %v5179_v19, 0.0  ;;  %v15452_v3 = vsel %vm5106_vm7, %v5040_v30, %v5142_v12  ;;  %v5050_v40 = vadd.f32 %v15361_v15, %v5049_v45  ;;  %v5894_v30 = vld [vmem:[#allocation6 + $0x120] sm:$0xff]  ;;  %v5896_v17 = vld [vmem:[#allocation6 + $0x130] sm:$0xff]  ;;  %v5897_v12 = vld [vmem:[#allocation6 + $0x138] sm:$0xff] }
 0x584   : > { %5251 = vst [vmem:[#allocation2 + $0xfb] sm:$0xff] %v5215_v41  ;;  %v5214_v11 = vsel %vm14868_vm0, %v15452_v3, 0.0  ;;  %vm5109_vm6 = vcmp.ge.f32.partialorder %v5055_v58, 0.0  ;;  %v5145_v34 = vmul.f32 0.1, %v5055_v58  ;;  %v5336_v57 = vld [vmem:[#allocation2 + $0xd1] sm:$0xff]  ;;  %v12151_v25 = vpack.c.bf16 %v5895_v5, %v5894_v30 }
 0x585   : > { %v5337_v1 = vld [vmem:[#allocation2 + $0xd9] sm:$0xff]  ;;  %5250 = vst [vmem:[#allocation2 + $0xf3] sm:$0xff] %v5214_v11  ;;  %vm5108_vm3 = vcmp.ge.f32.partialorder %v5050_v40, 0.0  ;;  %v5144_v18 = vmul.f32 0.1, %v5050_v40  ;;  %v10895_v53 = vpop.f32.mrb[50].mxu0  ;;  %10970 = vmatprep.mubr.f32.mxu0 %v5336_v57  ;;  %v12155_v19 = vpack.c.bf16 %v5897_v12, %v5896_v17 }
 0x586   : > { %v15458_v42 = vsel %vm5109_vm6, %v5055_v58, %v5145_v34  ;;  %v5065_v59 = vadd.f32 %v10895_v53, %v15361_v15  ;;  %v5059_v32 = vpop.f32.mrb[51].mxu0  ;;  %10971 = vmatmul.mubr.f32.gmra.mrb[80].mxu0 %v5337_v1  ;;  %v5262_v62 = vld [vmem:[#allocation2 + $0x20] sm:$0xff]  ;;  %v5263_v58 = vld [vmem:[#allocation2 + $0x28] sm:$0xff]  ;;  %v5898_v45 = vld [vmem:[#allocation6 + $0x140] sm:$0xff] }
 0x587   : > { %v5217_v29 = vsel %vm14883_vm10, %v15458_v42, 0.0  ;;  %v15464_v55 = vsel %vm5108_vm3, %v5050_v40, %v5144_v18  ;;  %v5060_v20 = vadd.f32 %v15361_v15, %v5059_v32  ;;  %v5264_v41 = vld [vmem:[#allocation2 + $0x30] sm:$0xff]  ;;  %v5265_v40 = vld [vmem:[#allocation2 + $0x38] sm:$0xff]  ;;  %v5900_v11 = vld [vmem:[#allocation6 + $0x150] sm:$0xff] }
 0x588   : > { %5253 = vst [vmem:[#allocation2 + $0x10b] sm:$0xff] %v5217_v29  ;;  %v5216_v63 = vsel %vm14892_vm2, %v15464_v55, 0.0  ;;  %vm5111_vm5 = vcmp.ge.f32.partialorder %v5065_v59, 0.0  ;;  %v5147_v22 = vmul.f32 0.1, %v5065_v59  ;;  %v5338_v9 = vld [vmem:[#allocation2 + $0xe1] sm:$0xff] }
 0x589   : > { %v5339_v54 = vld [vmem:[#allocation2 + $0xe9] sm:$0xff]  ;;  %5252 = vst [vmem:[#allocation2 + $0x103] sm:$0xff] %v5216_v63  ;;  %vm5110_vm1 = vcmp.ge.f32.partialorder %v5060_v20, 0.0  ;;  %v5146_v16 = vmul.f32 0.1, %v5060_v20  ;;  %v10898_v13 = vpop.f32.mrb[52].mxu0  ;;  %10973 = vmatprep.mubr.f32.mxu0 %v5338_v9 }
 0x58a   : > { %v15470_v27 = vsel %vm5111_vm5, %v5065_v59, %v5147_v22  ;;  %v5075_v0 = vadd.f32 %v10898_v13, %v15361_v15  ;;  %v5069_v48 = vpop.f32.mrb[53].mxu0  ;;  %10974 = vmatmul.mubr.f32.gmra.mrb[82].mxu0 %v5339_v54  ;;  %v5901_v34 = vld [vmem:[#allocation6 + $0x158] sm:$0xff]  ;;  %v5266_v57 = vld [vmem:[#allocation2 + $0x40] sm:$0xff]  ;;  %v5267_v18 = vld [vmem:[#allocation2 + $0x48] sm:$0xff] }
 0x58b   : > { %v5219_v38 = vsel %vm14905_vm13, %v15470_v27, 0.0  ;;  %v15476_v61 = vsel %vm5110_vm1, %v5060_v20, %v5146_v16  ;;  %v5070_v28 = vadd.f32 %v15361_v15, %v5069_v48  ;;  %v12163_v1 = vpack.c.bf16 %v5901_v34, %v5900_v11  ;;  %v5902_v53 = vld [vmem:[#allocation6 + $0x160] sm:$0xff]  ;;  %v5903_v59 = vld [vmem:[#allocation6 + $0x168] sm:$0xff]  ;;  %v5268_v32 = vld [vmem:[#allocation2 + $0x50] sm:$0xff] }
 0x58c   : > { %5255 = vst [vmem:[#allocation2 + $0x11b] sm:$0xff] %v5219_v38  ;;  %v5218_v26 = vsel %vm14921_vm12, %v15476_v61, 0.0  ;;  %vm5113_vm4 = vcmp.ge.f32.partialorder %v5075_v0, 0.0  ;;  %v5149_v36 = vmul.f32 0.1, %v5075_v0  ;;  %v5340_v31 = vld [vmem:[#allocation2 + $0xf1] sm:$0xff]  ;;  %v12167_v29 = vpack.c.bf16 %v5903_v59, %v5902_v53 }
 0x58d   : > { %v5341_v47 = vld [vmem:[#allocation2 + $0xf9] sm:$0xff]  ;;  %5254 = vst [vmem:[#allocation2 + $0x113] sm:$0xff] %v5218_v26  ;;  %vm5112_vm11 = vcmp.ge.f32.partialorder %v5070_v28, 0.0  ;;  %v5148_v21 = vmul.f32 0.1, %v5070_v28  ;;  %10976 = vmatprep.mubr.f32.mxu0 %v5340_v31  ;;  %v5904_v63 = vld [vmem:[#allocation6 + $0x170] sm:$0xff] }
 0x58e   : > { %v15482_v7 = vsel %vm5113_vm4, %v5075_v0, %v5149_v36  ;;  %10977 = vmatmul.mubr.f32.gmra.mrb[84].mxu0 %v5341_v47  ;;  %v5269_v20 = vld [vmem:[#allocation2 + $0x58] sm:$0xff]  ;;  %v5905_v22 = vld [vmem:[#allocation6 + $0x178] sm:$0xff]  ;;  %v5270_v9 = vld [vmem:[#allocation2 + $0x60] sm:$0xff] }
 0x58f   : > { %v5221_v15 = vsel %vm14936_vm14, %v15482_v7, 0.0  ;;  %v15487_v44 = vsel %vm5112_vm11, %v5070_v28, %v5148_v21  ;;  %v12171_v54 = vpack.c.bf16 %v5905_v22, %v5904_v63  ;;  %v5271_v16 = vld [vmem:[#allocation2 + $0x68] sm:$0xff]  ;;  %v6224_v13 = vld [vmem:[#allocation6 + $0x180] sm:$0xff]  ;;  %v6225_v0 = vld [vmem:[#allocation6 + $0x188] sm:$0xff] }
 0x590   : > { %5257 = vst [vmem:[#allocation2 + $0x12b] sm:$0xff] %v5221_v15  ;;  %v5220_v37 = vsel %vm16601_vm9, %v15487_v44, 0.0  ;;  %v5342_v35 = vld [vmem:[#allocation2 + $0x101] sm:$0xff]  ;;  %v5343_v51 = vld [vmem:[#allocation2 + $0x109] sm:$0xff]  ;;  %v12175_v38 = vpack.c.bf16 %v6225_v0, %v6224_v13  ;;  %v5273_v28 = vld [vmem:[#allocation2 + $0x78] sm:$0xff] }
 0x591   : > { %5256 = vst [vmem:[#allocation2 + $0x123] sm:$0xff] %v5220_v37  ;;  %10979 = vmatprep.mubr.f32.mxu0 %v5342_v35  ;;  %v5272_v48 = vld [vmem:[#allocation2 + $0x70] sm:$0xff]  ;;  %v5274_v26 = vld [vmem:[#allocation2 + $0x80] sm:$0xff]  ;;  %v5275_v36 = vld [vmem:[#allocation2 + $0x88] sm:$0xff] }
 0x592   : > { %10980 = vmatmul.mubr.f32.gmra.mrb[86].mxu0 %v5343_v51  ;;  %v5276_v31 = vld [vmem:[#allocation2 + $0x90] sm:$0xff]  ;;  %v5277_v47 = vld [vmem:[#allocation2 + $0x98] sm:$0xff]  ;;  %v5278_v21 = vld [vmem:[#allocation2 + $0xa0] sm:$0xff] }
 0x593   : > { %v5279_v15 = vld [vmem:[#allocation2 + $0xa8] sm:$0xff]  ;;  %v5280_v37 = vld [vmem:[#allocation2 + $0xb0] sm:$0xff]  ;;  %v5281_v35 = vld [vmem:[#allocation2 + $0xb8] sm:$0xff] }
 0x594   : > { %v5344_v60 = vld [vmem:[#allocation2 + $0x111] sm:$0xff]  ;;  %v5345_v46 = vld [vmem:[#allocation2 + $0x119] sm:$0xff]  ;;  %v6226_v12 = vld [vmem:[#allocation6 + $0x190] sm:$0xff] }
 0x595   : > { %10982 = vmatprep.mubr.f32.mxu0 %v5344_v60  ;;  %v5282_v51 = vld [vmem:[#allocation2 + $0xc0] sm:$0xff]  ;;  %v5283_v60 = vld [vmem:[#allocation2 + $0xc8] sm:$0xff]  ;;  %v5285_v33 = vld [vmem:[#allocation2 + $0xd8] sm:$0xff] }
 0x596   : > { %10983 = vmatmul.mubr.f32.gmra.mrb[88].mxu0 %v5345_v46  ;;  %v5284_v46 = vld [vmem:[#allocation2 + $0xd0] sm:$0xff]  ;;  %v5286_v2 = vld [vmem:[#allocation2 + $0xe0] sm:$0xff]  ;;  %v5289_v30 = vld [vmem:[#allocation2 + $0xf8] sm:$0xff] }
 0x597   : > { %11017 = vmatprep.mubr.f32.mxu0 %v13118_v39  ;;  %v5290_v5 = vld [vmem:[#allocation2 + $0x100] sm:$0xff]  ;;  %v5293_v17 = vld [vmem:[#allocation2 + $0x118] sm:$0xff]  ;;  %v6230_v11 = vld [vmem:[#allocation6 + $0x1b0] sm:$0xff] }
 0x598   : > { %v6231_v34 = vld [vmem:[#allocation6 + $0x1b8] sm:$0xff]  ;;  %v6232_v53 = vld [vmem:[#allocation6 + $0x1c0] sm:$0xff]  ;;  %v6233_v59 = vld [vmem:[#allocation6 + $0x1c8] sm:$0xff] }
 0x599   : > { %v6234_v63 = vld [vmem:[#allocation6 + $0x1d0] sm:$0xff]  ;;  %v6235_v22 = vld [vmem:[#allocation6 + $0x1d8] sm:$0xff]  ;;  %v6236_v13 = vld [vmem:[#allocation6 + $0x1e0] sm:$0xff] }
 0x59a   : > { %11018 = vmatmul.mubr.f32.vlgmr.msra.gmra.mrb[54].mxu0 %v13118_v39  ;;  %v5287_v39 = vld [vmem:[#allocation2 + $0xe8] sm:$0xff]  ;;  %v6237_v0 = vld [vmem:[#allocation6 + $0x1e8] sm:$0xff]  ;;  %v7568_v14 = vld [vmem:[#allocation6 + $0x3c0] sm:$0xff] }
 0x59b   : > { %12146 = vmatpush3.bf16.msra.mxu0 %v15355_v23  ;;  %11020 = vmatprep.mubr.f32.mxu0 %v5260_v8  ;;  %v12159_v23 = vpack.c.bf16 %v5899_v24, %v5898_v45  ;;  %v5291_v8 = vld [vmem:[#allocation2 + $0x108] sm:$0xff]  ;;  %v6228_v45 = vld [vmem:[#allocation6 + $0x1a0] sm:$0xff]  ;;  %v6229_v24 = vld [vmem:[#allocation6 + $0x1a8] sm:$0xff] }
 0x59c   : > { %12148 = vmatprep.subr.bf16.mxu0 %v12147_v6  ;;  %v7569_v49 = vld [vmem:[#allocation6 + $0x3c8] sm:$0xff] }
 0x59e   : > { %11021 = vmatmul.mubr.f32.gmra.mrb[56].mxu0 %v5261_v10  ;;  %v5853_v10 = vld [vmem:[#allocation2 + $0x2] sm:$0xff] }
 0x59f   : > { %11023 = vmatprep.mubr.f32.mxu0 %v5262_v62  ;;  %12150 = vmatpush3.bf16.msra.mxu0 %v12147_v6  ;;  %v5288_v6 = vld [vmem:[#allocation2 + $0xf0] sm:$0xff] }
 0x5a0   : > { %12152 = vmatprep.subr.bf16.mxu0 %v12151_v25  ;;  %v6227_v62 = vld [vmem:[#allocation6 + $0x198] sm:$0xff] }
 0x5a2   : > { %11024 = vmatmul.mubr.f32.gmra.mrb[58].mxu0 %v5263_v58  ;;  %v12179_v58 = vpack.c.bf16 %v6227_v62, %v6226_v12  ;;  %v15568_v12 = vld [vmem:[#allocation2 + $0xda] sm:$0xff]  ;;  %v15571_v62 = vld [vmem:[#allocation2 + $0xe2] sm:$0xff] }
 0x5a3   : > { %11026 = vmatprep.mubr.f32.mxu0 %v5264_v41  ;;  %12154 = vmatpush3.bf16.msra.mxu0 %v12151_v25  ;;  %v5292_v25 = vld [vmem:[#allocation2 + $0x110] sm:$0xff] }
 0x5a4   : > { %12156 = vmatprep.subr.bf16.mxu0 %v12155_v19  ;;  %v15493_v41 = vld [vmem:[#allocation2 + $0x12] sm:$0xff] }
 0x5a6   : > { %11027 = vmatmul.mubr.f32.gmra.mrb[60].mxu0 %v5265_v40  ;;  %v15496_v40 = vld [vmem:[#allocation2 + $0x1a] sm:$0xff] }
 0x5a7   : > { %11029 = vmatprep.mubr.f32.mxu0 %v5266_v57  ;;  %12158 = vmatpush3.bf16.msra.mxu0 %v12155_v19  ;;  %v5854_v19 = vld [vmem:[#allocation2 + $0xa] sm:$0xff]  ;;  %v15499_v57 = vld [vmem:[#allocation2 + $0x22] sm:$0xff] }
 0x5a8   : > { %12160 = vmatprep.subr.bf16.mxu0 %v12159_v23 }
 0x5aa   : > { %11030 = vmatmul.mubr.f32.gmra.mrb[62].mxu0 %v5267_v18  ;;  %v15502_v18 = vld [vmem:[#allocation2 + $0x2a] sm:$0xff] }
 0x5ab   : > { %11032 = vmatprep.mubr.f32.mxu0 %v5268_v32  ;;  %12162 = vmatpush3.bf16.msra.mxu0 %v12159_v23  ;;  %v12183_v23 = vpack.c.bf16 %v6229_v24, %v6228_v45  ;;  %v15505_v32 = vld [vmem:[#allocation2 + $0x32] sm:$0xff]  ;;  %v15580_v45 = vld [vmem:[#allocation2 + $0xfa] sm:$0xff]  ;;  %v15583_v24 = vld [vmem:[#allocation2 + $0x102] sm:$0xff] }
 0x5ac   : > { %12164 = vmatprep.subr.bf16.mxu0 %v12163_v1 }
 0x5ae   : > { %11033 = vmatmul.mubr.f32.gmra.mrb[64].mxu0 %v5269_v20  ;;  %v15508_v20 = vld [vmem:[#allocation2 + $0x3a] sm:$0xff] }
 0x5af   : > { %11035 = vmatprep.mubr.f32.mxu0 %v5270_v9  ;;  %12166 = vmatpush3.bf16.msra.mxu0 %v12163_v1  ;;  %v12187_v1 = vpack.c.bf16 %v6231_v34, %v6230_v11  ;;  %v15511_v9 = vld [vmem:[#allocation2 + $0x42] sm:$0xff]  ;;  %v15589_v11 = vld [vmem:[#allocation2 + $0x112] sm:$0xff]  ;;  %v15592_v34 = vld [vmem:[#allocation2 + $0x11a] sm:$0xff] }
 0x5b0   : > { %12168 = vmatprep.subr.bf16.mxu0 %v12167_v29 }
 0x5b2   : > { %11036 = vmatmul.mubr.f32.gmra.mrb[66].mxu0 %v5271_v16  ;;  %v15514_v16 = vld [vmem:[#allocation2 + $0x4a] sm:$0xff] }
 0x5b3   : > { %11038 = vmatprep.mubr.f32.mxu0 %v5272_v48  ;;  %12170 = vmatpush3.bf16.msra.mxu0 %v12167_v29  ;;  %v12191_v29 = vpack.c.bf16 %v6233_v59, %v6232_v53  ;;  %v15517_v48 = vld [vmem:[#allocation2 + $0x52] sm:$0xff] }
 0x5b4   : > { %12172 = vmatprep.subr.bf16.mxu0 %v12171_v54  ;;  %v6561_v53 = vld [vmem:[#allocation6 + $0x218] sm:$0xff] }
 0x5b6   : > { %11039 = vmatmul.mubr.f32.gmra.mrb[68].mxu0 %v5273_v28  ;;  %v15520_v28 = vld [vmem:[#allocation2 + $0x5a] sm:$0xff] }
 0x5b7   : > { %11041 = vmatprep.mubr.f32.mxu0 %v5274_v26  ;;  %12174 = vmatpush3.bf16.msra.mxu0 %v12171_v54  ;;  %v12195_v54 = vpack.c.bf16 %v6235_v22, %v6234_v63  ;;  %v6238_v26 = vld [vmem:[#allocation6 + $0x1f0] sm:$0xff]  ;;  %v6563_v63 = vld [vmem:[#allocation6 + $0x228] sm:$0xff] }
 0x5b8   : > { %12176 = vmatprep.subr.bf16.mxu0 %v12175_v38 }
 0x5ba   : > { %11042 = vmatmul.mubr.f32.gmra.mrb[70].mxu0 %v5275_v36  ;;  %v6239_v36 = vld [vmem:[#allocation6 + $0x1f8] sm:$0xff] }
 0x5bb   : > { %11044 = vmatprep.mubr.f32.mxu0 %v5276_v31  ;;  %v15523_v31 = vld [vmem:[#allocation2 + $0x62] sm:$0xff] }
 0x5be   : > { %11045 = vmatmul.mubr.f32.gmra.mrb[72].mxu0 %v5277_v47  ;;  %v12203_v47 = vpack.c.bf16 %v6239_v36, %v6238_v26  ;;  %v6569_v26 = vld [vmem:[#allocation6 + $0x258] sm:$0xff]  ;;  %v6571_v36 = vld [vmem:[#allocation6 + $0x268] sm:$0xff] }
 0x5bf   : > { %11047 = vmatprep.mubr.f32.mxu0 %v5278_v21  ;;  %v15526_v21 = vld [vmem:[#allocation2 + $0x6a] sm:$0xff] }
 0x5c2   : > { %11048 = vmatmul.mubr.f32.gmra.mrb[74].mxu0 %v5279_v15  ;;  %v6558_v15 = vld [vmem:[#allocation6 + $0x200] sm:$0xff] }
 0x5c3   : > { %11050 = vmatprep.mubr.f32.mxu0 %v5280_v37  ;;  %v6559_v37 = vld [vmem:[#allocation6 + $0x208] sm:$0xff] }
 0x5c6   : > { %11051 = vmatmul.mubr.f32.gmra.mrb[76].mxu0 %v5281_v35  ;;  %v15529_v35 = vld [vmem:[#allocation2 + $0x72] sm:$0xff] }
 0x5c7   : > { %11053 = vmatprep.mubr.f32.mxu0 %v5282_v51  ;;  %v12207_v51 = vpack.c.bf16 %v6559_v37, %v6558_v15  ;;  %v6893_v15 = vld [vmem:[#allocation6 + $0x288] sm:$0xff]  ;;  %v6894_v37 = vld [vmem:[#allocation6 + $0x290] sm:$0xff] }
 0x5ca   : > { %11054 = vmatmul.mubr.f32.gmra.mrb[78].mxu0 %v5283_v60  ;;  %v15532_v60 = vld [vmem:[#allocation2 + $0x7a] sm:$0xff] }
 0x5cb   : > { %11056 = vmatprep.mubr.f32.mxu0 %v5284_v46  ;;  %v15535_v46 = vld [vmem:[#allocation2 + $0x82] sm:$0xff] }
 0x5ce   : > { %11057 = vmatmul.mubr.f32.gmra.mrb[80].mxu0 %v5285_v33  ;;  %v15538_v33 = vld [vmem:[#allocation2 + $0x8a] sm:$0xff] }
 0x5cf   : > { %11059 = vmatprep.mubr.f32.mxu0 %v5286_v2  ;;  %v15541_v2 = vld [vmem:[#allocation2 + $0x92] sm:$0xff] }
 0x5d2   : > { %11060 = vmatmul.mubr.f32.gmra.mrb[82].mxu0 %v5287_v39  ;;  %v15544_v39 = vld [vmem:[#allocation2 + $0x9a] sm:$0xff] }
 0x5d3   : > { %11062 = vmatprep.mubr.f32.mxu0 %v5288_v6  ;;  %v15547_v6 = vld [vmem:[#allocation2 + $0xa2] sm:$0xff] }
 0x5d6   : > { %11063 = vmatmul.mubr.f32.gmra.mrb[84].mxu0 %v5289_v30  ;;  %v15550_v30 = vld [vmem:[#allocation2 + $0xaa] sm:$0xff] }
 0x5d7   : > { %11065 = vmatprep.mubr.f32.mxu0 %v5290_v5  ;;  %v15553_v5 = vld [vmem:[#allocation2 + $0xb2] sm:$0xff] }
 0x5da   : > { %11066 = vmatmul.mubr.f32.gmra.mrb[86].mxu0 %v5291_v8  ;;  %v15556_v8 = vld [vmem:[#allocation2 + $0xba] sm:$0xff] }
 0x5db   : > { %11068 = vmatprep.mubr.f32.mxu0 %v5292_v25  ;;  %v15559_v25 = vld [vmem:[#allocation2 + $0xc2] sm:$0xff] }
 0x5de   : > { %11069 = vmatmul.mubr.f32.gmra.mrb[88].mxu0 %v5293_v17  ;;  %v15565_v17 = vld [vmem:[#allocation2 + $0xd2] sm:$0xff] }
 0x5df   : > { %11103 = vmatprep.mubr.f32.mxu0 %v5853_v10  ;;  %v15562_v10 = vld [vmem:[#allocation2 + $0xca] sm:$0xff] }
 0x5e2   : > { %11104 = vmatmul.mubr.f32.vlgmr.msra.gmra.mrb[54].mxu0 %v5854_v19  ;;  %v15574_v19 = vld [vmem:[#allocation2 + $0xea] sm:$0xff] }
 0x5e3   : > { %12178 = vmatpush3.bf16.msra.mxu0 %v12175_v38  ;;  %11106 = vmatprep.mubr.f32.mxu0 %v15493_v41  ;;  %v12199_v38 = vpack.c.bf16 %v6237_v0, %v6236_v13  ;;  %v6565_v13 = vld [vmem:[#allocation6 + $0x238] sm:$0xff] }
 0x5e4   : > { %12180 = vmatprep.subr.bf16.mxu0 %v12179_v58 }
 0x5e6   : > { %11107 = vmatmul.mubr.f32.gmra.mrb[56].mxu0 %v15496_v40 }
 0x5e7   : > { %11109 = vmatprep.mubr.f32.mxu0 %v15499_v57  ;;  %12182 = vmatpush3.bf16.msra.mxu0 %v12179_v58  ;;  %v15577_v58 = vld [vmem:[#allocation2 + $0xf2] sm:$0xff] }
 0x5e8   : > { %12184 = vmatprep.subr.bf16.mxu0 %v12183_v23 }
 0x5ea   : > { %11110 = vmatmul.mubr.f32.gmra.mrb[58].mxu0 %v15502_v18 }
 0x5eb   : > { %11112 = vmatprep.mubr.f32.mxu0 %v15505_v32  ;;  %12186 = vmatpush3.bf16.msra.mxu0 %v12183_v23  ;;  %v15586_v23 = vld [vmem:[#allocation2 + $0x10a] sm:$0xff] }
 0x5ec   : > { %12188 = vmatprep.subr.bf16.mxu0 %v12187_v1 }
 0x5ee   : > { %11113 = vmatmul.mubr.f32.gmra.mrb[60].mxu0 %v15508_v20 }
 0x5ef   : > { %11115 = vmatprep.mubr.f32.mxu0 %v15511_v9  ;;  %12190 = vmatpush3.bf16.msra.mxu0 %v12187_v1  ;;  %v6560_v1 = vld [vmem:[#allocation6 + $0x210] sm:$0xff] }
 0x5f0   : > { %12192 = vmatprep.subr.bf16.mxu0 %v12191_v29  ;;  %v12211_v59 = vpack.c.bf16 %v6561_v53, %v6560_v1  ;;  %v6530_v1 = vld [vmem:[#allocation2 + $0x5b] sm:$0xff] }
 0x5f1   : > { %v6904_v53 = vld [vmem:[#allocation6 + $0x2e0] sm:$0xff] }
 0x5f2   : > { %11116 = vmatmul.mubr.f32.gmra.mrb[62].mxu0 %v15514_v16 }
 0x5f3   : > { %11118 = vmatprep.mubr.f32.mxu0 %v15517_v48  ;;  %12194 = vmatpush3.bf16.msra.mxu0 %v12191_v29  ;;  %v6562_v29 = vld [vmem:[#allocation6 + $0x220] sm:$0xff] }
 0x5f4   : > { %12196 = vmatprep.subr.bf16.mxu0 %v12195_v54  ;;  %v12215_v22 = vpack.c.bf16 %v6563_v63, %v6562_v29  ;;  %v6531_v29 = vld [vmem:[#allocation2 + $0x63] sm:$0xff] }
 0x5f6   : > { %11119 = vmatmul.mubr.f32.gmra.mrb[64].mxu0 %v15520_v28 }
 0x5f7   : > { %11121 = vmatprep.mubr.f32.mxu0 %v15523_v31  ;;  %12198 = vmatpush3.bf16.msra.mxu0 %v12195_v54  ;;  %v6564_v54 = vld [vmem:[#allocation6 + $0x230] sm:$0xff] }
 0x5f8   : > { %12200 = vmatprep.subr.bf16.mxu0 %v12199_v38  ;;  %v12219_v0 = vpack.c.bf16 %v6565_v13, %v6564_v54  ;;  %v6906_v54 = vld [vmem:[#allocation6 + $0x2f0] sm:$0xff]  ;;  %v6907_v13 = vld [vmem:[#allocation6 + $0x2f8] sm:$0xff] }
 0x5fa   : > { %11122 = vmatmul.mubr.f32.gmra.mrb[66].mxu0 %v15526_v21 }
 0x5fb   : > { %11124 = vmatprep.mubr.f32.mxu0 %v15529_v35  ;;  %12202 = vmatpush3.bf16.msra.mxu0 %v12199_v38  ;;  %v6567_v38 = vld [vmem:[#allocation6 + $0x248] sm:$0xff] }
 0x5fc   : > { %12204 = vmatprep.subr.bf16.mxu0 %v12203_v47 }
 0x5fe   : > { %11125 = vmatmul.mubr.f32.gmra.mrb[68].mxu0 %v15532_v60 }
 0x5ff   : > { %11127 = vmatprep.mubr.f32.mxu0 %v15535_v46  ;;  %12206 = vmatpush3.bf16.msra.mxu0 %v12203_v47  ;;  %v6573_v47 = vld [vmem:[#allocation6 + $0x278] sm:$0xff] }
 0x600   : > { %12208 = vmatprep.subr.bf16.mxu0 %v12207_v51 }
 0x602   : > { %11128 = vmatmul.mubr.f32.gmra.mrb[70].mxu0 %v15538_v33 }
 0x603   : > { %11130 = vmatprep.mubr.f32.mxu0 %v15541_v2 }
 0x606   : > { %11131 = vmatmul.mubr.f32.gmra.mrb[72].mxu0 %v15544_v39 }
 0x607   : > { %11133 = vmatprep.mubr.f32.mxu0 %v15547_v6 }
 0x60a   : > { %11134 = vmatmul.mubr.f32.gmra.mrb[74].mxu0 %v15550_v30 }
 0x60b   : > { %11136 = vmatprep.mubr.f32.mxu0 %v15553_v5 }
 0x60e   : > { %11137 = vmatmul.mubr.f32.gmra.mrb[76].mxu0 %v15556_v8 }
 0x60f   : > { %11139 = vmatprep.mubr.f32.mxu0 %v15559_v25 }
 0x612   : > { %11140 = vmatmul.mubr.f32.gmra.mrb[78].mxu0 %v15562_v10 }
 0x613   : > { %11142 = vmatprep.mubr.f32.mxu0 %v15565_v17 }
 0x616   : > { %11143 = vmatmul.mubr.f32.gmra.mrb[80].mxu0 %v15568_v12 }
 0x617   : > { %11145 = vmatprep.mubr.f32.mxu0 %v15571_v62 }
 0x61a   : > { %11146 = vmatmul.mubr.f32.gmra.mrb[82].mxu0 %v15574_v19 }
 0x61b   : > { %11148 = vmatprep.mubr.f32.mxu0 %v15577_v58 }
 0x61e   : > { %11149 = vmatmul.mubr.f32.gmra.mrb[84].mxu0 %v15580_v45 }
 0x61f   : > { %11151 = vmatprep.mubr.f32.mxu0 %v15583_v24 }
 0x622   : > { %11152 = vmatmul.mubr.f32.gmra.mrb[86].mxu0 %v15586_v23 }
 0x623   : > { %11154 = vmatprep.mubr.f32.mxu0 %v15589_v11 }
 0x626   : > { %11155 = vmatmul.mubr.f32.gmra.mrb[88].mxu0 %v15592_v34 }
 0x627   : > { %11189 = vmatprep.mubr.f32.mxu0 %v15493_v41  ;;  %v6566_v41 = vld [vmem:[#allocation6 + $0x240] sm:$0xff] }
 0x62a   : > { %11190 = vmatmul.mubr.f32.vlgmr.msra.gmra.mrb[54].mxu0 %v15496_v40  ;;  %v12223_v40 = vpack.c.bf16 %v6567_v38, %v6566_v41  ;;  %v12267_v41 = vpack.c.bf16 %v6907_v13, %v6906_v54  ;;  %v6534_v38 = vld [vmem:[#allocation2 + $0x7b] sm:$0xff]  ;;  %v15698_v13 = vld [vmem:[#allocation2 + $0xa4] sm:$0xff] }
 0x62b   : > { %12210 = vmatpush3.bf16.msra.mxu0 %v12207_v51  ;;  %11192 = vmatprep.mubr.f32.mxu0 %v15499_v57  ;;  %v6568_v57 = vld [vmem:[#allocation6 + $0x250] sm:$0xff]  ;;  %v6521_v51 = vld [vmem:[#allocation2 + $0x13] sm:$0xff]  ;;  %v15695_v54 = vld [vmem:[#allocation2 + $0x9c] sm:$0xff] }
 0x62c   : > { %12212 = vmatprep.subr.bf16.mxu0 %v12211_v59 }
 0x62e   : > { %11193 = vmatmul.mubr.f32.gmra.mrb[56].mxu0 %v15502_v18  ;;  %v12227_v18 = vpack.c.bf16 %v6569_v26, %v6568_v57  ;;  %v7227_v57 = vld [vmem:[#allocation6 + $0x308] sm:$0xff] }
 0x62f   : > { %11195 = vmatprep.mubr.f32.mxu0 %v15505_v32  ;;  %12214 = vmatpush3.bf16.msra.mxu0 %v12211_v59  ;;  %v6570_v32 = vld [vmem:[#allocation6 + $0x260] sm:$0xff]  ;;  %v6905_v59 = vld [vmem:[#allocation6 + $0x2e8] sm:$0xff] }
 0x630   : > { %12216 = vmatprep.subr.bf16.mxu0 %v12215_v22  ;;  %v12263_v63 = vpack.c.bf16 %v6905_v59, %v6904_v53  ;;  %v6535_v26 = vld [vmem:[#allocation2 + $0x83] sm:$0xff] }
 0x631   : > { %v7561_v53 = vld [vmem:[#allocation6 + $0x388] sm:$0xff] }
 0x632   : > { %11196 = vmatmul.mubr.f32.gmra.mrb[58].mxu0 %v15508_v20  ;;  %v12231_v20 = vpack.c.bf16 %v6571_v36, %v6570_v32  ;;  %v6536_v32 = vld [vmem:[#allocation2 + $0x8b] sm:$0xff]  ;;  %v6537_v36 = vld [vmem:[#allocation2 + $0x93] sm:$0xff] }
 0x633   : > { %11198 = vmatprep.mubr.f32.mxu0 %v15511_v9  ;;  %12218 = vmatpush3.bf16.msra.mxu0 %v12215_v22  ;;  %v6572_v9 = vld [vmem:[#allocation6 + $0x270] sm:$0xff] }
 0x634   : > { %12220 = vmatprep.subr.bf16.mxu0 %v12219_v0  ;;  %v6532_v22 = vld [vmem:[#allocation2 + $0x6b] sm:$0xff] }
 0x635   : > { %v15686_v59 = vld [vmem:[#allocation2 + $0x84] sm:$0xff] }
 0x636   : > { %11199 = vmatmul.mubr.f32.gmra.mrb[60].mxu0 %v15514_v16  ;;  %v12235_v16 = vpack.c.bf16 %v6573_v47, %v6572_v9  ;;  %v6539_v9 = vld [vmem:[#allocation2 + $0xa3] sm:$0xff]  ;;  %v6540_v47 = vld [vmem:[#allocation2 + $0xab] sm:$0xff] }
 0x637   : > { %11201 = vmatprep.mubr.f32.mxu0 %v15517_v48  ;;  %12222 = vmatpush3.bf16.msra.mxu0 %v12219_v0  ;;  %v6892_v48 = vld [vmem:[#allocation6 + $0x280] sm:$0xff] }
 0x638   : > { %12224 = vmatprep.subr.bf16.mxu0 %v12223_v40  ;;  %v6533_v0 = vld [vmem:[#allocation2 + $0x73] sm:$0xff] }
 0x63a   : > { %11202 = vmatmul.mubr.f32.gmra.mrb[62].mxu0 %v15520_v28  ;;  %v12239_v28 = vpack.c.bf16 %v6893_v15, %v6892_v48  ;;  %v6542_v48 = vld [vmem:[#allocation2 + $0xbb] sm:$0xff]  ;;  %v6543_v15 = vld [vmem:[#allocation2 + $0xc3] sm:$0xff] }
 0x63b   : > { %11204 = vmatprep.mubr.f32.mxu0 %v15523_v31  ;;  %12226 = vmatpush3.bf16.msra.mxu0 %v12223_v40  ;;  %v6221_v31 = vld [vmem:[#allocation2 + $0x122] sm:$0xff]  ;;  %v7226_v40 = vld [vmem:[#allocation6 + $0x300] sm:$0xff] }
 0x63c   : > { %12228 = vmatprep.subr.bf16.mxu0 %v12227_v18 }
 0x63e   : > { %11205 = vmatmul.mubr.f32.gmra.mrb[64].mxu0 %v15526_v21  ;;  %v6222_v21 = vld [vmem:[#allocation2 + $0x12a] sm:$0xff] }
 0x63f   : > { %11207 = vmatprep.mubr.f32.mxu0 %v15529_v35  ;;  %12230 = vmatpush3.bf16.msra.mxu0 %v12227_v18  ;;  %v6895_v35 = vld [vmem:[#allocation6 + $0x298] sm:$0xff]  ;;  %v12271_v18 = vpack.c.bf16 %v7227_v57, %v7226_v40  ;;  %v15710_v40 = vld [vmem:[#allocation2 + $0xc4] sm:$0xff] }
 0x640   : > { %12232 = vmatprep.subr.bf16.mxu0 %v12231_v20  ;;  %v15713_v57 = vld [vmem:[#allocation2 + $0xcc] sm:$0xff] }
 0x642   : > { %11208 = vmatmul.mubr.f32.gmra.mrb[66].mxu0 %v15532_v60  ;;  %v12243_v60 = vpack.c.bf16 %v6895_v35, %v6894_v37  ;;  %v6547_v37 = vld [vmem:[#allocation2 + $0xe3] sm:$0xff]  ;;  %v6548_v35 = vld [vmem:[#allocation2 + $0xeb] sm:$0xff] }
 0x643   : > { %11210 = vmatprep.mubr.f32.mxu0 %v15535_v46  ;;  %12234 = vmatpush3.bf16.msra.mxu0 %v12231_v20  ;;  %v6522_v46 = vld [vmem:[#allocation2 + $0x1b] sm:$0xff] }
 0x644   : > { %12236 = vmatprep.subr.bf16.mxu0 %v12235_v16  ;;  %v6538_v20 = vld [vmem:[#allocation2 + $0x9b] sm:$0xff] }
 0x646   : > { %11211 = vmatmul.mubr.f32.gmra.mrb[68].mxu0 %v15538_v33  ;;  %v6896_v33 = vld [vmem:[#allocation6 + $0x2a0] sm:$0xff] }
 0x647   : > { %11213 = vmatprep.mubr.f32.mxu0 %v15541_v2  ;;  %12238 = vmatpush3.bf16.msra.mxu0 %v12235_v16  ;;  %v6897_v2 = vld [vmem:[#allocation6 + $0x2a8] sm:$0xff]  ;;  %v6541_v16 = vld [vmem:[#allocation2 + $0xb3] sm:$0xff] }
 0x648   : > { %12240 = vmatprep.subr.bf16.mxu0 %v12239_v28 }
 0x64a   : > { %11214 = vmatmul.mubr.f32.gmra.mrb[70].mxu0 %v15544_v39  ;;  %v6523_v39 = vld [vmem:[#allocation2 + $0x23] sm:$0xff] }
 0x64b   : > { %11216 = vmatprep.mubr.f32.mxu0 %v15547_v6  ;;  %v12247_v6 = vpack.c.bf16 %v6897_v2, %v6896_v33  ;;  %v7235_v33 = vld [vmem:[#allocation6 + $0x348] sm:$0xff] }
 0x64c   : > { %v15662_v2 = vld [vmem:[#allocation2 + $0x44] sm:$0xff] }
 0x64e   : > { %11217 = vmatmul.mubr.f32.gmra.mrb[72].mxu0 %v15550_v30  ;;  %v6524_v30 = vld [vmem:[#allocation2 + $0x2b] sm:$0xff] }
 0x64f   : > { %11219 = vmatprep.mubr.f32.mxu0 %v15553_v5  ;;  %v6898_v5 = vld [vmem:[#allocation6 + $0x2b0] sm:$0xff] }
 0x652   : > { %11220 = vmatmul.mubr.f32.gmra.mrb[74].mxu0 %v15556_v8  ;;  %v6899_v8 = vld [vmem:[#allocation6 + $0x2b8] sm:$0xff] }
 0x653   : > { %11222 = vmatprep.mubr.f32.mxu0 %v15559_v25  ;;  %v6525_v25 = vld [vmem:[#allocation2 + $0x33] sm:$0xff] }
 0x656   : > { %11223 = vmatmul.mubr.f32.gmra.mrb[76].mxu0 %v15562_v10  ;;  %v12251_v10 = vpack.c.bf16 %v6899_v8, %v6898_v5  ;;  %v7237_v5 = vld [vmem:[#allocation6 + $0x358] sm:$0xff] }
 0x657   : > { %11225 = vmatprep.mubr.f32.mxu0 %v15565_v17  ;;  %v6526_v17 = vld [vmem:[#allocation2 + $0x3b] sm:$0xff] }
 0x658   : > { %v15668_v8 = vld [vmem:[#allocation2 + $0x54] sm:$0xff] }
 0x65a   : > { %11226 = vmatmul.mubr.f32.gmra.mrb[78].mxu0 %v15568_v12  ;;  %v6900_v12 = vld [vmem:[#allocation6 + $0x2c0] sm:$0xff] }
 0x65b   : > { %11228 = vmatprep.mubr.f32.mxu0 %v15571_v62  ;;  %v6901_v62 = vld [vmem:[#allocation6 + $0x2c8] sm:$0xff] }
 0x65e   : > { %11229 = vmatmul.mubr.f32.gmra.mrb[80].mxu0 %v15574_v19  ;;  %v6527_v19 = vld [vmem:[#allocation2 + $0x43] sm:$0xff] }
 0x65f   : > { %11231 = vmatprep.mubr.f32.mxu0 %v15577_v58  ;;  %v12255_v58 = vpack.c.bf16 %v6901_v62, %v6900_v12  ;;  %v7239_v12 = vld [vmem:[#allocation6 + $0x368] sm:$0xff] }
 0x660   : > { %v15674_v62 = vld [vmem:[#allocation2 + $0x64] sm:$0xff] }
 0x662   : > { %11232 = vmatmul.mubr.f32.gmra.mrb[82].mxu0 %v15580_v45  ;;  %v6528_v45 = vld [vmem:[#allocation2 + $0x4b] sm:$0xff] }
 0x663   : > { %11234 = vmatprep.mubr.f32.mxu0 %v15583_v24  ;;  %v6902_v24 = vld [vmem:[#allocation6 + $0x2d0] sm:$0xff] }
 0x666   : > { %11235 = vmatmul.mubr.f32.gmra.mrb[84].mxu0 %v15586_v23  ;;  %v6903_v23 = vld [vmem:[#allocation6 + $0x2d8] sm:$0xff] }
 0x667   : > { %11237 = vmatprep.mubr.f32.mxu0 %v15589_v11  ;;  %v6529_v11 = vld [vmem:[#allocation2 + $0x53] sm:$0xff] }
 0x66a   : > { %11238 = vmatmul.mubr.f32.gmra.mrb[86].mxu0 %v15592_v34  ;;  %v12259_v34 = vpack.c.bf16 %v6903_v23, %v6902_v24  ;;  %v7241_v24 = vld [vmem:[#allocation6 + $0x378] sm:$0xff] }
 0x66b   : > { %11240 = vmatprep.mubr.f32.mxu0 %v6221_v31  ;;  %v6545_v31 = vld [vmem:[#allocation2 + $0xd3] sm:$0xff] }
 0x66c   : > { %v15680_v23 = vld [vmem:[#allocation2 + $0x74] sm:$0xff] }
 0x66e   : > { %11241 = vmatmul.mubr.f32.gmra.mrb[88].mxu0 %v6222_v21  ;;  %v6546_v21 = vld [vmem:[#allocation2 + $0xdb] sm:$0xff] }
 0x66f   : > { %11275 = vmatprep.mubr.f32.mxu0 %v6521_v51  ;;  %v6550_v51 = vld [vmem:[#allocation2 + $0xfb] sm:$0xff] }
 0x672   : > { %11276 = vmatmul.mubr.f32.vlgmr.msra.gmra.mrb[54].mxu0 %v6522_v46  ;;  %v7234_v46 = vld [vmem:[#allocation6 + $0x340] sm:$0xff] }
 0x673   : > { %12242 = vmatpush3.bf16.msra.mxu0 %v12239_v28  ;;  %11278 = vmatprep.mubr.f32.mxu0 %v6523_v39  ;;  %v6544_v28 = vld [vmem:[#allocation2 + $0xcb] sm:$0xff]  ;;  %v12287_v39 = vpack.c.bf16 %v7235_v33, %v7234_v46 }
 0x674   : > { %12244 = vmatprep.subr.bf16.mxu0 %v12243_v60  ;;  %v7575_v46 = vld [vmem:[#allocation6 + $0x3f8] sm:$0xff] }
 0x676   : > { %11279 = vmatmul.mubr.f32.gmra.mrb[56].mxu0 %v6524_v30  ;;  %v7236_v30 = vld [vmem:[#allocation6 + $0x350] sm:$0xff] }
 0x677   : > { %11281 = vmatprep.mubr.f32.mxu0 %v6525_v25  ;;  %12246 = vmatpush3.bf16.msra.mxu0 %v12243_v60  ;;  %v15659_v60 = vld [vmem:[#allocation2 + $0x3c] sm:$0xff]  ;;  %v12291_v25 = vpack.c.bf16 %v7237_v5, %v7236_v30  ;;  %v7223_v30 = vld [vmem:[#allocation2 + $0x134] sm:$0xff] }
 0x678   : > { %12248 = vmatprep.subr.bf16.mxu0 %v12247_v6  ;;  %v7224_v5 = vld [vmem:[#allocation2 + $0x13c] sm:$0xff] }
 0x67a   : > { %11282 = vmatmul.mubr.f32.gmra.mrb[58].mxu0 %v6526_v17  ;;  %v7238_v17 = vld [vmem:[#allocation6 + $0x360] sm:$0xff] }
 0x67b   : > { %11284 = vmatprep.mubr.f32.mxu0 %v6527_v19  ;;  %12250 = vmatpush3.bf16.msra.mxu0 %v12247_v6  ;;  %v15665_v6 = vld [vmem:[#allocation2 + $0x4c] sm:$0xff]  ;;  %v12295_v19 = vpack.c.bf16 %v7239_v12, %v7238_v17 }
 0x67c   : > { %12252 = vmatprep.subr.bf16.mxu0 %v12251_v10  ;;  %v7524_v12 = vld [vmem:[#allocation2 + $0x2d] sm:$0xff] }
 0x67e   : > { %11285 = vmatmul.mubr.f32.gmra.mrb[60].mxu0 %v6528_v45  ;;  %v7240_v45 = vld [vmem:[#allocation6 + $0x370] sm:$0xff] }
 0x67f   : > { %11287 = vmatprep.mubr.f32.mxu0 %v6529_v11  ;;  %12254 = vmatpush3.bf16.msra.mxu0 %v12251_v10  ;;  %v15671_v10 = vld [vmem:[#allocation2 + $0x5c] sm:$0xff]  ;;  %v12299_v11 = vpack.c.bf16 %v7241_v24, %v7240_v45 }
 0x680   : > { %12256 = vmatprep.subr.bf16.mxu0 %v12255_v58  ;;  %v7526_v24 = vld [vmem:[#allocation2 + $0x3d] sm:$0xff] }
 0x682   : > { %11288 = vmatmul.mubr.f32.gmra.mrb[62].mxu0 %v6530_v1  ;;  %v7560_v1 = vld [vmem:[#allocation6 + $0x380] sm:$0xff] }
 0x683   : > { %11290 = vmatprep.mubr.f32.mxu0 %v6531_v29  ;;  %12258 = vmatpush3.bf16.msra.mxu0 %v12255_v58  ;;  %v15677_v58 = vld [vmem:[#allocation2 + $0x6c] sm:$0xff]  ;;  %v12303_v29 = vpack.c.bf16 %v7561_v53, %v7560_v1 }
 0x684   : > { %12260 = vmatprep.subr.bf16.mxu0 %v12259_v34  ;;  %v7528_v53 = vld [vmem:[#allocation2 + $0x4d] sm:$0xff] }
 0x686   : > { %11291 = vmatmul.mubr.f32.gmra.mrb[64].mxu0 %v6532_v22  ;;  %v15692_v22 = vld [vmem:[#allocation2 + $0x94] sm:$0xff] }
 0x687   : > { %11293 = vmatprep.mubr.f32.mxu0 %v6533_v0  ;;  %12262 = vmatpush3.bf16.msra.mxu0 %v12259_v34  ;;  %v15683_v34 = vld [vmem:[#allocation2 + $0x7c] sm:$0xff]  ;;  %v15701_v0 = vld [vmem:[#allocation2 + $0xac] sm:$0xff] }
 0x688   : > { %12264 = vmatprep.subr.bf16.mxu0 %v12263_v63 }
 0x68a   : > { %11294 = vmatmul.mubr.f32.gmra.mrb[66].mxu0 %v6534_v38  ;;  %v15707_v38 = vld [vmem:[#allocation2 + $0xbc] sm:$0xff] }
 0x68b   : > { %11296 = vmatprep.mubr.f32.mxu0 %v6535_v26  ;;  %12266 = vmatpush3.bf16.msra.mxu0 %v12263_v63  ;;  %v15689_v63 = vld [vmem:[#allocation2 + $0x8c] sm:$0xff]  ;;  %v15716_v26 = vld [vmem:[#allocation2 + $0xd4] sm:$0xff] }
 0x68c   : > { %12268 = vmatprep.subr.bf16.mxu0 %v12267_v41 }
 0x68e   : > { %11297 = vmatmul.mubr.f32.gmra.mrb[68].mxu0 %v6536_v32  ;;  %v15722_v32 = vld [vmem:[#allocation2 + $0xe4] sm:$0xff] }
 0x68f   : > { %11299 = vmatprep.mubr.f32.mxu0 %v6537_v36  ;;  %12270 = vmatpush3.bf16.msra.mxu0 %v12267_v41  ;;  %v15704_v41 = vld [vmem:[#allocation2 + $0xb4] sm:$0xff]  ;;  %v15725_v36 = vld [vmem:[#allocation2 + $0xec] sm:$0xff] }
 0x690   : > { %12272 = vmatprep.subr.bf16.mxu0 %v12271_v18 }
 0x692   : > { %11300 = vmatmul.mubr.f32.gmra.mrb[70].mxu0 %v6538_v20  ;;  %v15728_v20 = vld [vmem:[#allocation2 + $0xf4] sm:$0xff] }
 0x693   : > { %11302 = vmatprep.mubr.f32.mxu0 %v6539_v9  ;;  %v15731_v9 = vld [vmem:[#allocation2 + $0xfc] sm:$0xff] }
 0x696   : > { %11303 = vmatmul.mubr.f32.gmra.mrb[72].mxu0 %v6540_v47  ;;  %v15734_v47 = vld [vmem:[#allocation2 + $0x104] sm:$0xff] }
 0x697   : > { %11305 = vmatprep.mubr.f32.mxu0 %v6541_v16  ;;  %v15737_v16 = vld [vmem:[#allocation2 + $0x10c] sm:$0xff] }
 0x69a   : > { %11306 = vmatmul.mubr.f32.gmra.mrb[74].mxu0 %v6542_v48  ;;  %v15740_v48 = vld [vmem:[#allocation2 + $0x114] sm:$0xff] }
 0x69b   : > { %11308 = vmatprep.mubr.f32.mxu0 %v6543_v15  ;;  %v15743_v15 = vld [vmem:[#allocation2 + $0x11c] sm:$0xff] }
 0x69e   : > { %11309 = vmatmul.mubr.f32.gmra.mrb[76].mxu0 %v6544_v28  ;;  %v15746_v28 = vld [vmem:[#allocation2 + $0x124] sm:$0xff] }
 0x69f   : > { %11311 = vmatprep.mubr.f32.mxu0 %v6545_v31  ;;  %v15749_v31 = vld [vmem:[#allocation2 + $0x12c] sm:$0xff] }
 0x6a2   : > { %11312 = vmatmul.mubr.f32.gmra.mrb[78].mxu0 %v6546_v21  ;;  %v7562_v21 = vld [vmem:[#allocation6 + $0x390] sm:$0xff] }
 0x6a3   : > { %11314 = vmatprep.mubr.f32.mxu0 %v6547_v37  ;;  %v7563_v37 = vld [vmem:[#allocation6 + $0x398] sm:$0xff] }
 0x6a6   : > { %11315 = vmatmul.mubr.f32.gmra.mrb[80].mxu0 %v6548_v35  ;;  %v12307_v35 = vpack.c.bf16 %v7563_v37, %v7562_v21  ;;  %v7908_v21 = vld [vmem:[#allocation6 + $0x470] sm:$0xff] }
 0x6a7   : > { %13122 = vmatprep.mubr.msk.f32.mxu0 %vm14868_vm0, %v15452_v3  ;;  %v7228_v3 = vld [vmem:[#allocation6 + $0x310] sm:$0xff] }
 0x6aa   : > { %11318 = vmatmul.mubr.f32.gmra.mrb[82].mxu0 %v6550_v51  ;;  %v7564_v51 = vld [vmem:[#allocation6 + $0x3a0] sm:$0xff] }
 0x6ab   : > { %13123 = vmatprep.mubr.msk.f32.mxu0 %vm14892_vm2, %v15464_v55  ;;  %v6856_v55 = vld [vmem:[#allocation2 + $0x1c] sm:$0xff] }
 0x6ae   : > { %13124 = vmatmul.mubr.msk.f32.gmra.mrb[84].mxu0 %vm14883_vm10, %v15458_v42  ;;  %v12275_v42 = vpack.c.bf16 %v7229_v56, %v7228_v3  ;;  %v7565_v3 = vld [vmem:[#allocation6 + $0x3a8] sm:$0xff] }
 0x6af   : > { %13125 = vmatprep.mubr.msk.f32.mxu0 %vm14921_vm12, %v15476_v61  ;;  %v15650_v61 = vld [vmem:[#allocation2 + $0x24] sm:$0xff]  ;;  %v12311_v56 = vpack.c.bf16 %v7565_v3, %v7564_v51  ;;  %v8348_v51 = vld [vmem:[%s16018_s9 + $0x30] sm:$0xff]  ;;  %v8349_v3 = vld [vmem:[%s16018_s9 + $0x38] sm:$0xff] }
 0x6b2   : > { %13126 = vmatmul.mubr.msk.f32.gmra.mrb[86].mxu0 %vm14905_vm13, %v15470_v27  ;;  %v15653_v27 = vld [vmem:[#allocation2 + $0x2c] sm:$0xff] }
 0x6b3   : > { %13127 = vmatprep.mubr.msk.f32.mxu0 %vm16601_vm9, %v15487_v44  ;;  %v7233_v44 = vld [vmem:[#allocation6 + $0x338] sm:$0xff] }
 0x6b6   : > { %13128 = vmatmul.mubr.msk.f32.gmra.mrb[88].mxu0 %vm14936_vm14, %v15482_v7  ;;  %v12283_v7 = vpack.c.bf16 %v7233_v44, %v7232_v43  ;;  %v7572_v44 = vld [vmem:[#allocation6 + $0x3e0] sm:$0xff] }
 0x6b7   : > { %11361 = vmatprep.mubr.f32.mxu0 %v6855_v4  ;;  %v7566_v4 = vld [vmem:[#allocation6 + $0x3b0] sm:$0xff] }
 0x6ba   : > { %11362 = vmatmul.mubr.f32.vlgmr.msra.gmra.mrb[54].mxu0 %v6856_v55 }
 0x6bb   : > { %12274 = vmatpush3.bf16.msra.mxu0 %v12271_v18  ;;  %11364 = vmatprep.mubr.f32.mxu0 %v15650_v61  ;;  %v15719_v18 = vld [vmem:[#allocation2 + $0xdc] sm:$0xff] }
 0x6bc   : > { %12276 = vmatprep.subr.bf16.mxu0 %v12275_v42 }
 0x6be   : > { %11365 = vmatmul.mubr.f32.gmra.mrb[56].mxu0 %v15653_v27 }
 0x6bf   : > { %11367 = vmatprep.mubr.f32.mxu0 %v15656_v52  ;;  %12278 = vmatpush3.bf16.msra.mxu0 %v12275_v42  ;;  %v7567_v42 = vld [vmem:[#allocation6 + $0x3b8] sm:$0xff] }
 0x6c0   : > { %12280 = vmatprep.subr.bf16.mxu0 %v12279_v50  ;;  %v12315_v55 = vpack.c.bf16 %v7567_v42, %v7566_v4  ;;  %v12379_v42 = vpack.c.bf16 %v8349_v3, %v8348_v51  ;;  %v7881_v51 = vld [vmem:[#allocation2 + $0xe6] sm:$0xff]  ;;  %v7882_v3 = vld [vmem:[#allocation2 + $0xee] sm:$0xff] }
 0x6c2   : > { %11368 = vmatmul.mubr.f32.gmra.mrb[58].mxu0 %v15659_v60 }
 0x6c3   : > { %11370 = vmatprep.mubr.f32.mxu0 %v15662_v2  ;;  %12282 = vmatpush3.bf16.msra.mxu0 %v12279_v50  ;;  %v7570_v50 = vld [vmem:[#allocation6 + $0x3d0] sm:$0xff] }
 0x6c4   : > { %12284 = vmatprep.subr.bf16.mxu0 %v12283_v7 }
 0x6c6   : > { %11371 = vmatmul.mubr.f32.gmra.mrb[60].mxu0 %v15665_v6 }
 0x6c7   : > { %11373 = vmatprep.mubr.f32.mxu0 %v15668_v8  ;;  %12286 = vmatpush3.bf16.msra.mxu0 %v12283_v7 }
 0x6c8   : > { %12288 = vmatprep.subr.bf16.mxu0 %v12287_v39 }
 0x6ca   : > { %11374 = vmatmul.mubr.f32.gmra.mrb[62].mxu0 %v15671_v10 }
 0x6cb   : > { %11376 = vmatprep.mubr.f32.mxu0 %v15674_v62  ;;  %12290 = vmatpush3.bf16.msra.mxu0 %v12287_v39  ;;  %v7895_v39 = vld [vmem:[#allocation6 + $0x408] sm:$0xff] }
 0x6cc   : > { %12292 = vmatprep.subr.bf16.mxu0 %v12291_v25 }
 0x6ce   : > { %11377 = vmatmul.mubr.f32.gmra.mrb[64].mxu0 %v15677_v58 }
 0x6cf   : > { %11379 = vmatprep.mubr.f32.mxu0 %v15680_v23  ;;  %12294 = vmatpush3.bf16.msra.mxu0 %v12291_v25  ;;  %v7897_v25 = vld [vmem:[#allocation6 + $0x418] sm:$0xff] }
 0x6d0   : > { %12296 = vmatprep.subr.bf16.mxu0 %v12295_v19 }
 0x6d2   : > { %11380 = vmatmul.mubr.f32.gmra.mrb[66].mxu0 %v15683_v34 }
 0x6d3   : > { %11382 = vmatprep.mubr.f32.mxu0 %v15686_v59  ;;  %12298 = vmatpush3.bf16.msra.mxu0 %v12295_v19  ;;  %v7899_v19 = vld [vmem:[#allocation6 + $0x428] sm:$0xff] }
 0x6d4   : > { %12300 = vmatprep.subr.bf16.mxu0 %v12299_v11 }
 0x6d6   : > { %11383 = vmatmul.mubr.f32.gmra.mrb[68].mxu0 %v15689_v63 }
 0x6d7   : > { %11385 = vmatprep.mubr.f32.mxu0 %v15692_v22  ;;  %12302 = vmatpush3.bf16.msra.mxu0 %v12299_v11  ;;  %v7901_v11 = vld [vmem:[#allocation6 + $0x438] sm:$0xff] }
 0x6d8   : > { %12304 = vmatprep.subr.bf16.mxu0 %v12303_v29 }
 0x6da   : > { %11386 = vmatmul.mubr.f32.gmra.mrb[70].mxu0 %v15695_v54 }
 0x6db   : > { %11388 = vmatprep.mubr.f32.mxu0 %v15698_v13 }
 0x6de   : > { %11389 = vmatmul.mubr.f32.gmra.mrb[72].mxu0 %v15701_v0 }
 0x6df   : > { %11391 = vmatprep.mubr.f32.mxu0 %v15704_v41 }
 0x6e2   : > { %11392 = vmatmul.mubr.f32.gmra.mrb[74].mxu0 %v15707_v38 }
 0x6e3   : > { %11394 = vmatprep.mubr.f32.mxu0 %v15710_v40 }
 0x6e6   : > { %11395 = vmatmul.mubr.f32.gmra.mrb[76].mxu0 %v15713_v57 }
 0x6e7   : > { %11397 = vmatprep.mubr.f32.mxu0 %v15716_v26 }
 0x6ea   : > { %11398 = vmatmul.mubr.f32.gmra.mrb[78].mxu0 %v15719_v18 }
 0x6eb   : > { %11400 = vmatprep.mubr.f32.mxu0 %v15722_v32 }
 0x6ee   : > { %11401 = vmatmul.mubr.f32.gmra.mrb[80].mxu0 %v15725_v36 }
 0x6ef   : > { %11403 = vmatprep.mubr.f32.mxu0 %v15728_v20 }
 0x6f2   : > { %11404 = vmatmul.mubr.f32.gmra.mrb[82].mxu0 %v15731_v9 }
 0x6f3   : > { %11406 = vmatprep.mubr.f32.mxu0 %v15734_v47 }
 0x6f6   : > { %11407 = vmatmul.mubr.f32.gmra.mrb[84].mxu0 %v15737_v16 }
 0x6f7   : > { %11409 = vmatprep.mubr.f32.mxu0 %v15740_v48 }
 0x6fa   : > { %11410 = vmatmul.mubr.f32.gmra.mrb[86].mxu0 %v15743_v15 }
 0x6fb   : > { %11412 = vmatprep.mubr.f32.mxu0 %v15746_v28 }
 0x6fe   : > { %11413 = vmatmul.mubr.f32.gmra.mrb[88].mxu0 %v15749_v31 }
 0x6ff   : > { %11447 = vmatprep.mubr.f32.mxu0 %v15650_v61  ;;  %v12319_v61 = vpack.c.bf16 %v7569_v49, %v7568_v14  ;;  %v8350_v14 = vld [vmem:[%s16018_s9 + $0x40] sm:$0xff]  ;;  %v8351_v49 = vld [vmem:[%s16018_s9 + $0x48] sm:$0xff] }
 0x702   : > { %11448 = vmatmul.mubr.f32.vlgmr.msra.gmra.mrb[54].mxu0 %v15653_v27  ;;  %v7571_v27 = vld [vmem:[#allocation6 + $0x3d8] sm:$0xff] }
 0x703   : > { %12306 = vmatpush3.bf16.msra.mxu0 %v12303_v29  ;;  %11450 = vmatprep.mubr.f32.mxu0 %v15656_v52  ;;  %v12323_v43 = vpack.c.bf16 %v7571_v27, %v7570_v50  ;;  %v7573_v52 = vld [vmem:[#allocation6 + $0x3e8] sm:$0xff]  ;;  %v12383_v50 = vpack.c.bf16 %v8351_v49, %v8350_v14  ;;  %v8352_v27 = vld [vmem:[%s16018_s9 + $0x50] sm:$0xff] }
 0x704   : > { %12308 = vmatprep.subr.bf16.mxu0 %v12307_v35  ;;  %v12327_v7 = vpack.c.bf16 %v7573_v52, %v7572_v44  ;;  %v7903_v29 = vld [vmem:[#allocation6 + $0x448] sm:$0xff]  ;;  %v7887_v14 = vld [vmem:[#allocation2 + $0x116] sm:$0xff] }
 0x705   : > { %v7538_v44 = vld [vmem:[#allocation2 + $0x9d] sm:$0xff]  ;;  %v7539_v52 = vld [vmem:[#allocation2 + $0xa5] sm:$0xff] }
 0x706   : > { %11451 = vmatmul.mubr.f32.gmra.mrb[56].mxu0 %v15659_v60  ;;  %v7574_v60 = vld [vmem:[#allocation6 + $0x3f0] sm:$0xff]  ;;  %v7888_v49 = vld [vmem:[#allocation2 + $0x11e] sm:$0xff] }
 0x707   : > { %11453 = vmatprep.mubr.f32.mxu0 %v15662_v2  ;;  %12310 = vmatpush3.bf16.msra.mxu0 %v12307_v35  ;;  %v12331_v33 = vpack.c.bf16 %v7575_v46, %v7574_v60  ;;  %v7894_v2 = vld [vmem:[#allocation6 + $0x400] sm:$0xff]  ;;  %v7909_v35 = vld [vmem:[#allocation6 + $0x478] sm:$0xff]  ;;  %v8354_v60 = vld [vmem:[%s16018_s9 + $0x60] sm:$0xff] }
 0x708   : > { %12312 = vmatprep.subr.bf16.mxu0 %v12311_v56  ;;  %v12363_v4 = vpack.c.bf16 %v7909_v35, %v7908_v21  ;;  %v8355_v46 = vld [vmem:[%s16018_s9 + $0x68] sm:$0xff]  ;;  %v7880_v35 = vld [vmem:[#allocation2 + $0xde] sm:$0xff] }
 0x709   : > { %v7878_v21 = vld [vmem:[#allocation2 + $0xce] sm:$0xff] }
 0x70a   : > { %11454 = vmatmul.mubr.f32.gmra.mrb[58].mxu0 %v15665_v6  ;;  %v12335_v6 = vpack.c.bf16 %v7895_v39, %v7894_v2  ;;  %v7541_v2 = vld [vmem:[#allocation2 + $0xb5] sm:$0xff]  ;;  %v12391_v39 = vpack.c.bf16 %v8355_v46, %v8354_v60 }
 0x70b   : > { %11456 = vmatprep.mubr.f32.mxu0 %v15668_v8  ;;  %12314 = vmatpush3.bf16.msra.mxu0 %v12311_v56  ;;  %v7896_v8 = vld [vmem:[#allocation6 + $0x410] sm:$0xff] }
 0x70c   : > { %12316 = vmatprep.subr.bf16.mxu0 %v12315_v55  ;;  %v12339_v17 = vpack.c.bf16 %v7897_v25, %v7896_v8  ;;  %v7535_v56 = vld [vmem:[#allocation2 + $0x85] sm:$0xff] }
 0x70d   : > { %v7543_v8 = vld [vmem:[#allocation2 + $0xc5] sm:$0xff] }
 0x70e   : > { %11457 = vmatmul.mubr.f32.gmra.mrb[60].mxu0 %v15671_v10  ;;  %v7523_v10 = vld [vmem:[#allocation2 + $0x25] sm:$0xff] }
 0x70f   : > { %11459 = vmatprep.mubr.f32.mxu0 %v15674_v62  ;;  %12318 = vmatpush3.bf16.msra.mxu0 %v12315_v55  ;;  %v7898_v62 = vld [vmem:[#allocation6 + $0x420] sm:$0xff]  ;;  %v7536_v55 = vld [vmem:[#allocation2 + $0x8d] sm:$0xff] }
 0x710   : > { %12320 = vmatprep.subr.bf16.mxu0 %v12319_v61  ;;  %v12343_v45 = vpack.c.bf16 %v7899_v19, %v7898_v62  ;;  %v7547_v62 = vld [vmem:[#allocation2 + $0xe5] sm:$0xff]  ;;  %v7548_v19 = vld [vmem:[#allocation2 + $0xed] sm:$0xff] }
 0x712   : > { %11460 = vmatmul.mubr.f32.gmra.mrb[62].mxu0 %v15677_v58  ;;  %v7525_v58 = vld [vmem:[#allocation2 + $0x35] sm:$0xff] }
 0x713   : > { %11462 = vmatprep.mubr.f32.mxu0 %v15680_v23  ;;  %12322 = vmatpush3.bf16.msra.mxu0 %v12319_v61  ;;  %v7900_v23 = vld [vmem:[#allocation6 + $0x430] sm:$0xff]  ;;  %v7537_v61 = vld [vmem:[#allocation2 + $0x95] sm:$0xff] }
 0x714   : > { %12324 = vmatprep.subr.bf16.mxu0 %v12323_v43  ;;  %v12347_v1 = vpack.c.bf16 %v7901_v11, %v7900_v23  ;;  %v7552_v23 = vld [vmem:[#allocation2 + $0x10d] sm:$0xff]  ;;  %v7553_v11 = vld [vmem:[#allocation2 + $0x115] sm:$0xff] }
 0x716   : > { %11463 = vmatmul.mubr.f32.gmra.mrb[64].mxu0 %v15683_v34  ;;  %v7527_v34 = vld [vmem:[#allocation2 + $0x45] sm:$0xff] }
 0x717   : > { %11465 = vmatprep.mubr.f32.mxu0 %v15686_v59  ;;  %12326 = vmatpush3.bf16.msra.mxu0 %v12323_v43  ;;  %v7902_v59 = vld [vmem:[#allocation6 + $0x440] sm:$0xff] }
 0x718   : > { %12328 = vmatprep.subr.bf16.mxu0 %v12327_v7  ;;  %v8353_v43 = vld [vmem:[%s16018_s9 + $0x58] sm:$0xff] }
 0x71a   : > { %11466 = vmatmul.mubr.f32.gmra.mrb[66].mxu0 %v15689_v63  ;;  %v7529_v63 = vld [vmem:[#allocation2 + $0x55] sm:$0xff] }
 0x71b   : > { %11468 = vmatprep.mubr.f32.mxu0 %v15692_v22  ;;  %12330 = vmatpush3.bf16.msra.mxu0 %v12327_v7  ;;  %v7530_v22 = vld [vmem:[#allocation2 + $0x5d] sm:$0xff]  ;;  %v12387_v7 = vpack.c.bf16 %v8353_v43, %v8352_v27  ;;  %v7890_v27 = vld [vmem:[#allocation2 + $0x12e] sm:$0xff] }
 0x71c   : > { %12332 = vmatprep.subr.bf16.mxu0 %v12331_v33  ;;  %v7892_v43 = vld [vmem:[#allocation2 + $0x13e] sm:$0xff] }
 0x71e   : > { %11469 = vmatmul.mubr.f32.gmra.mrb[68].mxu0 %v15695_v54  ;;  %v12351_v54 = vpack.c.bf16 %v7903_v29, %v7902_v59  ;;  %v7556_v59 = vld [vmem:[#allocation2 + $0x12d] sm:$0xff]  ;;  %v7558_v29 = vld [vmem:[#allocation2 + $0x13d] sm:$0xff] }
 0x71f   : > { %11471 = vmatprep.mubr.f32.mxu0 %v15698_v13  ;;  %12334 = vmatpush3.bf16.msra.mxu0 %v12331_v33  ;;  %v7531_v13 = vld [vmem:[#allocation2 + $0x65] sm:$0xff]  ;;  %v7540_v33 = vld [vmem:[#allocation2 + $0xad] sm:$0xff] }
 0x720   : > { %12336 = vmatprep.subr.bf16.mxu0 %v12335_v6 }
 0x722   : > { %11472 = vmatmul.mubr.f32.gmra.mrb[70].mxu0 %v15701_v0  ;;  %v7904_v0 = vld [vmem:[#allocation6 + $0x450] sm:$0xff] }
 0x723   : > { %11474 = vmatprep.mubr.f32.mxu0 %v15704_v41  ;;  %v7905_v41 = vld [vmem:[#allocation6 + $0x458] sm:$0xff] }
 0x726   : > { %11475 = vmatmul.mubr.f32.gmra.mrb[72].mxu0 %v15707_v38  ;;  %v8342_v38 = vld [vmem:[%s16018_s9] sm:$0xff] }
 0x727   : > { %11477 = vmatprep.mubr.f32.mxu0 %v15710_v40  ;;  %v8343_v40 = vld [vmem:[%s16018_s9 + $0x8] sm:$0xff] }
 0x72a   : > { %11478 = vmatmul.mubr.f32.gmra.mrb[74].mxu0 %v15713_v57  ;;  %v8344_v57 = vld [vmem:[%s16018_s9 + $0x10] sm:$0xff] }
 0x72b   : > { %11480 = vmatprep.mubr.f32.mxu0 %v15716_v26  ;;  %v12367_v26 = vpack.c.bf16 %v8343_v40, %v8342_v38  ;;  %v7863_v38 = vld [vmem:[#allocation2 + $0x56] sm:$0xff]  ;;  %v7864_v40 = vld [vmem:[#allocation2 + $0x5e] sm:$0xff] }
 0x72d   : > { %12368 = vmatprep.subr.bf16.mxu1 %v12367_v26 }
 0x72e   : > { %11481 = vmatmul.mubr.f32.gmra.mrb[76].mxu0 %v15719_v18  ;;  %v8345_v18 = vld [vmem:[%s16018_s9 + $0x18] sm:$0xff]  ;;  %12370 = vmatpush3.bf16.msra.mxu1 %v12367_v26  ;;  %v7866_v26 = vld [vmem:[#allocation2 + $0x6e] sm:$0xff] }
 0x72f   : > { %11483 = vmatprep.mubr.f32.mxu0 %v15722_v32  ;;  %v7532_v32 = vld [vmem:[#allocation2 + $0x6d] sm:$0xff] }
 0x732   : > { %11484 = vmatmul.mubr.f32.gmra.mrb[78].mxu0 %v15725_v36  ;;  %v12355_v36 = vpack.c.bf16 %v7905_v41, %v7904_v0  ;;  %v7861_v0 = vld [vmem:[#allocation2 + $0x46] sm:$0xff]  ;;  %v7862_v41 = vld [vmem:[#allocation2 + $0x4e] sm:$0xff] }
 0x733   : > { %11486 = vmatprep.mubr.f32.mxu0 %v15728_v20  ;;  %v7906_v20 = vld [vmem:[#allocation6 + $0x460] sm:$0xff] }
 0x736   : > { %11487 = vmatmul.mubr.f32.gmra.mrb[80].mxu0 %v15731_v9  ;;  %v12371_v9 = vpack.c.bf16 %v8345_v18, %v8344_v57  ;;  %v7865_v57 = vld [vmem:[#allocation2 + $0x66] sm:$0xff]  ;;  %v7867_v18 = vld [vmem:[#allocation2 + $0x76] sm:$0xff] }
 0x737   : > { %11489 = vmatprep.mubr.f32.mxu0 %v15734_v47  ;;  %v7907_v47 = vld [vmem:[#allocation6 + $0x468] sm:$0xff] }
 0x738   : > { %12372 = vmatprep.subr.bf16.mxu1 %v12371_v9 }
 0x739   : > { %12374 = vmatpush3.bf16.msra.mxu1 %v12371_v9  ;;  %v7871_v9 = vld [vmem:[#allocation2 + $0x96] sm:$0xff] }
 0x73a   : > { %11490 = vmatmul.mubr.f32.gmra.mrb[82].mxu0 %v15737_v16  ;;  %v8346_v16 = vld [vmem:[%s16018_s9 + $0x20] sm:$0xff] }
 0x73b   : > { %11492 = vmatprep.mubr.f32.mxu0 %v15740_v48  ;;  %v8347_v48 = vld [vmem:[%s16018_s9 + $0x28] sm:$0xff] }
 0x73c   : > { %v12375_v37 = vpack.c.bf16 %v8347_v48, %v8346_v16  ;;  %v7873_v16 = vld [vmem:[#allocation2 + $0xa6] sm:$0xff]  ;;  %v7874_v48 = vld [vmem:[#allocation2 + $0xae] sm:$0xff] }
 0x73e   : > { %11493 = vmatmul.mubr.f32.gmra.mrb[84].mxu0 %v15743_v15  ;;  %v7533_v15 = vld [vmem:[#allocation2 + $0x75] sm:$0xff]  ;;  %12376 = vmatprep.subr.bf16.mxu1 %v12375_v37 }
 0x73f   : > { %11495 = vmatprep.mubr.f32.mxu0 %v15746_v28  ;;  %v7534_v28 = vld [vmem:[#allocation2 + $0x7d] sm:$0xff]  ;;  %12378 = vmatpush3.bf16.msra.mxu1 %v12375_v37 }
 0x740   : > { %12380 = vmatprep.subr.bf16.mxu1 %v12379_v42  ;;  %v7879_v37 = vld [vmem:[#allocation2 + $0xd6] sm:$0xff] }
 0x742   : > { %11496 = vmatmul.mubr.f32.gmra.mrb[86].mxu0 %v15749_v31  ;;  %v12359_v31 = vpack.c.bf16 %v7907_v47, %v7906_v20  ;;  %v7870_v20 = vld [vmem:[#allocation2 + $0x8e] sm:$0xff]  ;;  %v7872_v47 = vld [vmem:[#allocation2 + $0x9e] sm:$0xff] }
 0x743   : > { %11498 = vmatprep.mubr.f32.mxu0 %v7223_v30  ;;  %12382 = vmatpush3.bf16.msra.mxu1 %v12379_v42  ;;  %v8357_v30 = vld [vmem:[%s16018_s9 + $0x78] sm:$0xff]  ;;  %v7885_v42 = vld [vmem:[#allocation2 + $0x106] sm:$0xff] }
 0x744   : > { %12384 = vmatprep.subr.bf16.mxu1 %v12383_v50 }
 0x746   : > { %11499 = vmatmul.mubr.f32.gmra.mrb[88].mxu0 %v7224_v5  ;;  %v7542_v5 = vld [vmem:[#allocation2 + $0xbd] sm:$0xff] }
 0x747   : > { %11533 = vmatprep.mubr.f32.mxu0 %v7523_v10  ;;  %12386 = vmatpush3.bf16.msra.mxu1 %v12383_v50  ;;  %v7544_v10 = vld [vmem:[#allocation2 + $0xcd] sm:$0xff]  ;;  %v7891_v50 = vld [vmem:[#allocation2 + $0x136] sm:$0xff] }
 0x748   : > { %12388 = vmatprep.subr.bf16.mxu1 %v12387_v7 }
 0x74a   : > { %11534 = vmatmul.mubr.f32.vlgmr.msra.gmra.mrb[54].mxu0 %v7524_v12  ;;  %v7546_v12 = vld [vmem:[#allocation2 + $0xdd] sm:$0xff] }
 0x74b   : > { %12338 = vmatpush3.bf16.msra.mxu0 %v12335_v6  ;;  %11536 = vmatprep.mubr.f32.mxu0 %v7525_v58  ;;  %v8356_v6 = vld [vmem:[%s16018_s9 + $0x70] sm:$0xff] }
 0x74c   : > { %12340 = vmatprep.subr.bf16.mxu0 %v12339_v17  ;;  %12390 = vmatpush3.bf16.msra.mxu1 %v12387_v7  ;;  %v12395_v25 = vpack.c.bf16 %v8357_v30, %v8356_v6  ;;  %v7549_v58 = vld [vmem:[#allocation2 + $0xf5] sm:$0xff] }
 0x74d   : > { %12392 = vmatprep.subr.bf16.mxu1 %v12391_v39 }
 0x74e   : > { %11537 = vmatmul.mubr.f32.gmra.mrb[56].mxu0 %v7526_v24  ;;  %v7551_v24 = vld [vmem:[#allocation2 + $0x105] sm:$0xff] }
 0x74f   : > { %11539 = vmatprep.mubr.f32.mxu0 %v7527_v34  ;;  %12342 = vmatpush3.bf16.msra.mxu0 %v12339_v17  ;;  %v7545_v17 = vld [vmem:[#allocation2 + $0xd5] sm:$0xff]  ;;  %v7554_v34 = vld [vmem:[#allocation2 + $0x11d] sm:$0xff] }
 0x750   : > { %12344 = vmatprep.subr.bf16.mxu0 %v12343_v45  ;;  %12394 = vmatpush3.bf16.msra.mxu1 %v12391_v39 }
 0x751   : > { %12396 = vmatprep.subr.bf16.mxu1 %v12395_v25 }
 0x752   : > { %11540 = vmatmul.mubr.f32.gmra.mrb[58].mxu0 %v7528_v53  ;;  %v7557_v53 = vld [vmem:[#allocation2 + $0x135] sm:$0xff] }
 0x753   : > { %11542 = vmatprep.mubr.f32.mxu0 %v7529_v63  ;;  %12346 = vmatpush3.bf16.msra.mxu0 %v12343_v45  ;;  %v7550_v45 = vld [vmem:[#allocation2 + $0xfd] sm:$0xff]  ;;  %v7857_v63 = vld [vmem:[#allocation2 + $0x26] sm:$0xff] }
 0x754   : > { %12348 = vmatprep.subr.bf16.mxu0 %v12347_v1  ;;  %12398 = vmatpush3.bf16.msra.mxu1 %v12395_v25 }
 0x756   : > { %11543 = vmatmul.mubr.f32.gmra.mrb[60].mxu0 %v7530_v22  ;;  %v7858_v22 = vld [vmem:[#allocation2 + $0x2e] sm:$0xff] }
 0x757   : > { %11545 = vmatprep.mubr.f32.mxu0 %v7531_v13  ;;  %12350 = vmatpush3.bf16.msra.mxu0 %v12347_v1  ;;  %v7555_v1 = vld [vmem:[#allocation2 + $0x125] sm:$0xff] }
 0x758   : > { %12352 = vmatprep.subr.bf16.mxu0 %v12351_v54  ;;  %v7860_v13 = vld [vmem:[#allocation2 + $0x3e] sm:$0xff] }
 0x75a   : > { %11546 = vmatmul.mubr.f32.gmra.mrb[62].mxu0 %v7532_v32  ;;  %v7868_v32 = vld [vmem:[#allocation2 + $0x7e] sm:$0xff] }
 0x75b   : > { %11548 = vmatprep.mubr.f32.mxu0 %v7533_v15  ;;  %12354 = vmatpush3.bf16.msra.mxu0 %v12351_v54  ;;  %v7859_v54 = vld [vmem:[#allocation2 + $0x36] sm:$0xff] }
 0x75c   : > { %12356 = vmatprep.subr.bf16.mxu0 %v12355_v36  ;;  %v7875_v15 = vld [vmem:[#allocation2 + $0xb6] sm:$0xff] }
 0x75e   : > { %11549 = vmatmul.mubr.f32.gmra.mrb[64].mxu0 %v7534_v28  ;;  %v7876_v28 = vld [vmem:[#allocation2 + $0xbe] sm:$0xff] }
 0x75f   : > { %11551 = vmatprep.mubr.f32.mxu0 %v7535_v56  ;;  %12358 = vmatpush3.bf16.msra.mxu0 %v12355_v36  ;;  %v7869_v36 = vld [vmem:[#allocation2 + $0x86] sm:$0xff]  ;;  %v7883_v56 = vld [vmem:[#allocation2 + $0xf6] sm:$0xff] }
 0x760   : > { %12360 = vmatprep.subr.bf16.mxu0 %v12359_v31 }
 0x762   : > { %11552 = vmatmul.mubr.f32.gmra.mrb[66].mxu0 %v7536_v55  ;;  %v7886_v55 = vld [vmem:[#allocation2 + $0x10e] sm:$0xff] }
 0x763   : > { %11554 = vmatprep.mubr.f32.mxu0 %v7537_v61  ;;  %12362 = vmatpush3.bf16.msra.mxu0 %v12359_v31  ;;  %v7877_v31 = vld [vmem:[#allocation2 + $0xc6] sm:$0xff] }
 0x764   : > { %12364 = vmatprep.subr.bf16.mxu0 %v12363_v4  ;;  %v7889_v61 = vld [vmem:[#allocation2 + $0x126] sm:$0xff] }
 0x766   : > { %11555 = vmatmul.mubr.f32.gmra.mrb[68].mxu0 %v7538_v44  ;;  %v15837_v44 = vld [vmem:[%s16017_s8] ss:$0 sm:$0xff] }
 0x767   : > { %11557 = vmatprep.mubr.f32.mxu0 %v7539_v52  ;;  %12366 = vmatpush3.bf16.msra.mxu0 %v12363_v4  ;;  %v7884_v4 = vld [vmem:[#allocation2 + $0xfe] sm:$0xff] }
 0x76a   : > { %11558 = vmatmul.mubr.f32.gmra.mrb[70].mxu0 %v7540_v33 }
 0x76b   : > { %11560 = vmatprep.mubr.f32.mxu0 %v7541_v2 }
 0x76e   : > { %11561 = vmatmul.mubr.f32.gmra.mrb[72].mxu0 %v7542_v5 }
 0x76f   : > { %11563 = vmatprep.mubr.f32.mxu0 %v7543_v8 }
 0x772   : > { %11564 = vmatmul.mubr.f32.gmra.mrb[74].mxu0 %v7544_v10 }
 0x773   : > { %11566 = vmatprep.mubr.f32.mxu0 %v7545_v17 }
 0x776   : > { %11567 = vmatmul.mubr.f32.gmra.mrb[76].mxu0 %v7546_v12 }
 0x777   : > { %11569 = vmatprep.mubr.f32.mxu0 %v7547_v62 }
 0x77a   : > { %11570 = vmatmul.mubr.f32.gmra.mrb[78].mxu0 %v7548_v19 }
 0x77b   : > { %11572 = vmatprep.mubr.f32.mxu0 %v7549_v58 }
 0x77e   : > { %11573 = vmatmul.mubr.f32.gmra.mrb[80].mxu0 %v7550_v45 }
 0x77f   : > { %11575 = vmatprep.mubr.f32.mxu0 %v7551_v24 }
 0x782   : > { %11576 = vmatmul.mubr.f32.gmra.mrb[82].mxu0 %v7552_v23 }
 0x783   : > { %11578 = vmatprep.mubr.f32.mxu0 %v7553_v11 }
 0x786   : > { %11579 = vmatmul.mubr.f32.gmra.mrb[84].mxu0 %v7554_v34 }
 0x787   : > { %11581 = vmatprep.mubr.f32.mxu0 %v7555_v1 }
 0x78a   : > { %11582 = vmatmul.mubr.f32.gmra.mrb[86].mxu0 %v7556_v59 }
 0x78b   : > { %11584 = vmatprep.mubr.f32.mxu0 %v7557_v53 }
 0x78e   : > { %11585 = vmatmul.mubr.f32.gmra.mrb[88].mxu0 %v7558_v29 }
 0x78f   : > { %11619 = vmatprep.mubr.f32.mxu0 %v7857_v63 }
 0x792   : > { %11620 = vmatmul.mubr.f32.vlgmr.msra.gmra.mrb[54].mxu0 %v7858_v22 }
 0x793   : > { %11622 = vmatprep.mubr.f32.mxu0 %v7859_v54 }
 0x796   : > { %11623 = vmatmul.mubr.f32.gmra.mrb[56].mxu0 %v7860_v13 }
 0x797   : > { %11625 = vmatprep.mubr.f32.mxu0 %v7861_v0 }
 0x79a   : > { %11626 = vmatmul.mubr.f32.gmra.mrb[58].mxu0 %v7862_v41 }
 0x79b   : > { %11628 = vmatprep.mubr.f32.mxu0 %v7863_v38 }
 0x79e   : > { %11629 = vmatmul.mubr.f32.gmra.mrb[60].mxu0 %v7864_v40 }
 0x79f   : > { %11631 = vmatprep.mubr.f32.mxu0 %v7865_v57 }
 0x7a2   : > { %11632 = vmatmul.mubr.f32.gmra.mrb[62].mxu0 %v7866_v26 }
 0x7a3   : > { %11634 = vmatprep.mubr.f32.mxu0 %v7867_v18 }
 0x7a6   : > { %11635 = vmatmul.mubr.f32.gmra.mrb[64].mxu0 %v7868_v32 }
 0x7a7   : > { %11637 = vmatprep.mubr.f32.mxu0 %v7869_v36 }
 0x7aa   : > { %11638 = vmatmul.mubr.f32.gmra.mrb[66].mxu0 %v7870_v20 }
 0x7ab   : > { %11640 = vmatprep.mubr.f32.mxu0 %v7871_v9 }
 0x7ae   : > { %11641 = vmatmul.mubr.f32.gmra.mrb[68].mxu0 %v7872_v47 }
 0x7af   : > { %11643 = vmatprep.mubr.f32.mxu0 %v7873_v16 }
 0x7b2   : > { %11644 = vmatmul.mubr.f32.gmra.mrb[70].mxu0 %v7874_v48 }
 0x7b3   : > { %11646 = vmatprep.mubr.f32.mxu0 %v7875_v15 }
 0x7b6   : > { %11647 = vmatmul.mubr.f32.gmra.mrb[72].mxu0 %v7876_v28 }
 0x7b7   : > { %11649 = vmatprep.mubr.f32.mxu0 %v7877_v31 }
 0x7ba   : > { %11650 = vmatmul.mubr.f32.gmra.mrb[74].mxu0 %v7878_v21 }
 0x7bb   : > { %11652 = vmatprep.mubr.f32.mxu0 %v7879_v37 }
 0x7be   : > { %11653 = vmatmul.mubr.f32.gmra.mrb[76].mxu0 %v7880_v35 }
 0x7bf   : > { %11655 = vmatprep.mubr.f32.mxu0 %v7881_v51 }
 0x7c2   : > { %11656 = vmatmul.mubr.f32.gmra.mrb[78].mxu0 %v7882_v3 }
 0x7c3   : > { %11658 = vmatprep.mubr.f32.mxu0 %v7883_v56 }
 0x7c6   : > { %11659 = vmatmul.mubr.f32.gmra.mrb[80].mxu0 %v7884_v4 }
 0x7c7   : > { %11661 = vmatprep.mubr.f32.mxu0 %v7885_v42 }
 0x7ca   : > { %11662 = vmatmul.mubr.f32.gmra.mrb[82].mxu0 %v7886_v55 }
 0x7cb   : > { %11664 = vmatprep.mubr.f32.mxu0 %v7887_v14 }
 0x7ce   : > { %11665 = vmatmul.mubr.f32.gmra.mrb[84].mxu0 %v7888_v49 }
 0x7cf   : > { %11667 = vmatprep.mubr.f32.mxu0 %v7889_v61 }
 0x7d2   : > { %11668 = vmatmul.mubr.f32.gmra.mrb[86].mxu0 %v7890_v27 }
 0x7d3   : > { %11670 = vmatprep.mubr.f32.mxu0 %v7891_v50 }
 0x7d6   : > { %11671 = vmatmul.mubr.f32.gmra.mrb[88].mxu0 %v7892_v43 }
 0x865   : > { %v11621_v52 = vpop.f32.mrb[54].mxu0 }
 0x866   : > { %v8199_v7 = vadd.f32 %v11621_v52, %v15837_v44  ;;  %v7976_v60 = vpop.f32.mrb[55].mxu0 }
 0x867   : > { %v8198_v46 = vadd.f32 %v15837_v44, %v7976_v60 }
 0x868   : > { %v8271_v33 = vmul.f32 0.1, %v8199_v7  ;;  %vm8235_vm0 = vcmp.ge.f32.partialorder %v8199_v7, 0.0 }
 0x869   : > { %v8270_v2 = vmul.f32 0.1, %v8198_v46  ;;  %v11624_v39 = vpop.f32.mrb[56].mxu0  ;;  %vm8234_vm2 = vcmp.ge.f32.partialorder %v8198_v46, 0.0 }
 0x86a   : > { %v8201_v6 = vadd.f32 %v11624_v39, %v15837_v44  ;;  %v7986_v30 = vpop.f32.mrb[57].mxu0  ;;  %v8307_v25 = vsel %vm8235_vm0, %v8199_v7, %v8271_v33 }
 0x86b   : > { %v8200_v5 = vadd.f32 %v15837_v44, %v7986_v30  ;;  %v8306_v8 = vsel %vm8234_vm2, %v8198_v46, %v8270_v2 }
 0x86c   : > { %v8273_v10 = vmul.f32 0.1, %v8201_v6  ;;  %11705 = vmatprep.mubr.f32.mxu1 %v8306_v8  ;;  %vm8237_vm13 = vcmp.ge.f32.partialorder %v8201_v6, 0.0 }
 0x86d   : > { %v8272_v17 = vmul.f32 0.1, %v8200_v5  ;;  %v11627_v12 = vpop.f32.mrb[58].mxu0  ;;  %11706 = vmatmul.mubr.f32.vlgmr.msra.gmra.mrb[54].mxu1 %v8307_v25  ;;  %vm8236_vm10 = vcmp.ge.f32.partialorder %v8200_v5, 0.0 }
 0x86e   : > { %v8203_v62 = vadd.f32 %v11627_v12, %v15837_v44  ;;  %v7996_v19 = vpop.f32.mrb[59].mxu0  ;;  %v8309_v23 = vsel %vm8237_vm13, %v8201_v6, %v8273_v10 }
 0x86f   : > { %v8202_v58 = vadd.f32 %v15837_v44, %v7996_v19  ;;  %v8308_v45 = vsel %vm8236_vm10, %v8200_v5, %v8272_v17 }
 0x870   : > { %v8275_v24 = vmul.f32 0.1, %v8203_v62  ;;  %11708 = vmatprep.mubr.f32.mxu1 %v8308_v45  ;;  %vm8239_vm14 = vcmp.ge.f32.partialorder %v8203_v62, 0.0 }
 0x871   : > { %v8274_v11 = vmul.f32 0.1, %v8202_v58  ;;  %v11630_v34 = vpop.f32.mrb[60].mxu0  ;;  %11709 = vmatmul.mubr.f32.gmra.mrb[56].mxu1 %v8309_v23  ;;  %vm8238_vm12 = vcmp.ge.f32.partialorder %v8202_v58, 0.0 }
 0x872   : > { %v8205_v1 = vadd.f32 %v11630_v34, %v15837_v44  ;;  %v8006_v53 = vpop.f32.mrb[61].mxu0  ;;  %v8311_v22 = vsel %vm8239_vm14, %v8203_v62, %v8275_v24 }
 0x873   : > { %v8204_v59 = vadd.f32 %v15837_v44, %v8006_v53  ;;  %v8310_v29 = vsel %vm8238_vm12, %v8202_v58, %v8274_v11 }
 0x874   : > { %v8277_v63 = vmul.f32 0.1, %v8205_v1  ;;  %11711 = vmatprep.mubr.f32.mxu1 %v8310_v29  ;;  %vm8241_vm8 = vcmp.ge.f32.partialorder %v8205_v1, 0.0 }
 0x875   : > { %v8276_v54 = vmul.f32 0.1, %v8204_v59  ;;  %v11633_v13 = vpop.f32.mrb[62].mxu0  ;;  %11712 = vmatmul.mubr.f32.gmra.mrb[58].mxu1 %v8311_v22  ;;  %vm8240_vm15 = vcmp.ge.f32.partialorder %v8204_v59, 0.0 }
 0x876   : > { %v8207_v0 = vadd.f32 %v11633_v13, %v15837_v44  ;;  %v8016_v41 = vpop.f32.mrb[63].mxu0  ;;  %v8313_v26 = vsel %vm8241_vm8, %v8205_v1, %v8277_v63 }
 0x877   : > { %v8206_v38 = vadd.f32 %v15837_v44, %v8016_v41  ;;  %v8312_v40 = vsel %vm8240_vm15, %v8204_v59, %v8276_v54 }
 0x878   : > { %v8279_v57 = vmul.f32 0.1, %v8207_v0  ;;  %11714 = vmatprep.mubr.f32.mxu1 %v8312_v40  ;;  %vm8243_vm6 = vcmp.ge.f32.partialorder %v8207_v0, 0.0 }
 0x879   : > { %v8278_v18 = vmul.f32 0.1, %v8206_v38  ;;  %v11636_v32 = vpop.f32.mrb[64].mxu0  ;;  %11715 = vmatmul.mubr.f32.gmra.mrb[60].mxu1 %v8313_v26  ;;  %vm8242_vm7 = vcmp.ge.f32.partialorder %v8206_v38, 0.0 }
 0x87a   : > { %v8209_v36 = vadd.f32 %v11636_v32, %v15837_v44  ;;  %v8026_v20 = vpop.f32.mrb[65].mxu0  ;;  %v8315_v48 = vsel %vm8243_vm6, %v8207_v0, %v8279_v57 }
 0x87b   : > { %v8208_v9 = vadd.f32 %v15837_v44, %v8026_v20  ;;  %v8314_v47 = vsel %vm8242_vm7, %v8206_v38, %v8278_v18 }
 0x87c   : > { %v8281_v16 = vmul.f32 0.1, %v8209_v36  ;;  %11717 = vmatprep.mubr.f32.mxu1 %v8314_v47  ;;  %vm8245_vm5 = vcmp.ge.f32.partialorder %v8209_v36, 0.0 }
 0x87d   : > { %v8280_v15 = vmul.f32 0.1, %v8208_v9  ;;  %v11639_v28 = vpop.f32.mrb[66].mxu0  ;;  %11718 = vmatmul.mubr.f32.gmra.mrb[62].mxu1 %v8315_v48  ;;  %vm8244_vm3 = vcmp.ge.f32.partialorder %v8208_v9, 0.0 }
 0x87e   : > { %v8211_v31 = vadd.f32 %v11639_v28, %v15837_v44  ;;  %v8036_v21 = vpop.f32.mrb[67].mxu0  ;;  %v8317_v3 = vsel %vm8245_vm5, %v8209_v36, %v8281_v16 }
 0x87f   : > { %v8210_v37 = vadd.f32 %v15837_v44, %v8036_v21  ;;  %v8316_v35 = vsel %vm8244_vm3, %v8208_v9, %v8280_v15 }
 0x880   : > { %v8283_v51 = vmul.f32 0.1, %v8211_v31  ;;  %11720 = vmatprep.mubr.f32.mxu1 %v8316_v35  ;;  %vm8247_vm4 = vcmp.ge.f32.partialorder %v8211_v31, 0.0 }
 0x881   : > { %v8282_v56 = vmul.f32 0.1, %v8210_v37  ;;  %v11642_v4 = vpop.f32.mrb[68].mxu0  ;;  %11721 = vmatmul.mubr.f32.gmra.mrb[64].mxu1 %v8317_v3  ;;  %vm8246_vm1 = vcmp.ge.f32.partialorder %v8210_v37, 0.0 }
 0x882   : > { %v8213_v42 = vadd.f32 %v11642_v4, %v15837_v44  ;;  %v8046_v55 = vpop.f32.mrb[69].mxu0  ;;  %v8319_v50 = vsel %vm8247_vm4, %v8211_v31, %v8283_v51 }
 0x883   : > { %v8212_v14 = vadd.f32 %v15837_v44, %v8046_v55  ;;  %v8318_v49 = vsel %vm8246_vm1, %v8210_v37, %v8282_v56 }
 0x884   : > { %v8285_v61 = vmul.f32 0.1, %v8213_v42  ;;  %11723 = vmatprep.mubr.f32.mxu1 %v8318_v49  ;;  %vm8249_vm9 = vcmp.ge.f32.partialorder %v8213_v42, 0.0 }
 0x885   : > { %v8284_v27 = vmul.f32 0.1, %v8212_v14  ;;  %v11645_v43 = vpop.f32.mrb[70].mxu0  ;;  %11724 = vmatmul.mubr.f32.gmra.mrb[66].mxu1 %v8319_v50  ;;  %vm8248_vm11 = vcmp.ge.f32.partialorder %v8212_v14, 0.0 }
 0x886   : > { %v8215_v52 = vadd.f32 %v11645_v43, %v15837_v44  ;;  %v8056_v7 = vpop.f32.mrb[71].mxu0  ;;  %v8321_v2 = vsel %vm8249_vm9, %v8213_v42, %v8285_v61 }
 0x887   : > { %v8214_v60 = vadd.f32 %v15837_v44, %v8056_v7  ;;  %v8320_v46 = vsel %vm8248_vm11, %v8212_v14, %v8284_v27 }
 0x888   : > { %v8287_v33 = vmul.f32 0.1, %v8215_v52  ;;  %11726 = vmatprep.mubr.f32.mxu1 %v8320_v46  ;;  %vm8251_vm2 = vcmp.ge.f32.partialorder %v8215_v52, 0.0 }
 0x889   : > { %v8286_v39 = vmul.f32 0.1, %v8214_v60  ;;  %v11648_v6 = vpop.f32.mrb[72].mxu0  ;;  %11727 = vmatmul.mubr.f32.gmra.mrb[68].mxu1 %v8321_v2  ;;  %vm8250_vm0 = vcmp.ge.f32.partialorder %v8214_v60, 0.0 }
 0x88a   : > { %v8217_v30 = vadd.f32 %v11648_v6, %v15837_v44  ;;  %v8066_v5 = vpop.f32.mrb[73].mxu0  ;;  %v8323_v17 = vsel %vm8251_vm2, %v8215_v52, %v8287_v33 }
 0x88b   : > { %v8216_v8 = vadd.f32 %v15837_v44, %v8066_v5  ;;  %v8322_v25 = vsel %vm8250_vm0, %v8214_v60, %v8286_v39 }
 0x88c   : > { %v8289_v10 = vmul.f32 0.1, %v8217_v30  ;;  %11729 = vmatprep.mubr.f32.mxu1 %v8322_v25  ;;  %vm8253_vm13 = vcmp.ge.f32.partialorder %v8217_v30, 0.0 }
 0x88d   : > { %v8288_v12 = vmul.f32 0.1, %v8216_v8  ;;  %v11651_v62 = vpop.f32.mrb[74].mxu0  ;;  %11730 = vmatmul.mubr.f32.gmra.mrb[70].mxu1 %v8323_v17  ;;  %vm8252_vm10 = vcmp.ge.f32.partialorder %v8216_v8, 0.0 }
 0x88e   : > { %v8219_v19 = vadd.f32 %v11651_v62, %v15837_v44  ;;  %v8076_v58 = vpop.f32.mrb[75].mxu0  ;;  %v8325_v11 = vsel %vm8253_vm13, %v8217_v30, %v8289_v10 }
 0x88f   : > { %v8218_v45 = vadd.f32 %v15837_v44, %v8076_v58  ;;  %v8324_v24 = vsel %vm8252_vm10, %v8216_v8, %v8288_v12 }
 0x890   : > { %v8291_v23 = vmul.f32 0.1, %v8219_v19  ;;  %11732 = vmatprep.mubr.f32.mxu1 %v8324_v24  ;;  %vm8255_vm14 = vcmp.ge.f32.partialorder %v8219_v19, 0.0 }
 0x891   : > { %v8290_v34 = vmul.f32 0.1, %v8218_v45  ;;  %v11654_v1 = vpop.f32.mrb[76].mxu0  ;;  %11733 = vmatmul.mubr.f32.gmra.mrb[72].mxu1 %v8325_v11  ;;  %vm8254_vm12 = vcmp.ge.f32.partialorder %v8218_v45, 0.0 }
 0x892   : > { %v8221_v53 = vadd.f32 %v11654_v1, %v15837_v44  ;;  %v8086_v59 = vpop.f32.mrb[77].mxu0  ;;  %v8327_v54 = vsel %vm8255_vm14, %v8219_v19, %v8291_v23 }
 0x893   : > { %v8220_v29 = vadd.f32 %v15837_v44, %v8086_v59  ;;  %v8326_v63 = vsel %vm8254_vm12, %v8218_v45, %v8290_v34  ;;  %v15879_v45 = vld [vmem:[%s16019_s10] ss:$0 sm:$0xff] }
 0x894   : > { %v8293_v22 = vmul.f32 0.1, %v8221_v53  ;;  %11735 = vmatprep.mubr.f32.mxu1 %v8326_v63  ;;  %vm8257_vm8 = vcmp.ge.f32.partialorder %v8221_v53, 0.0 }
 0x895   : > { %v8292_v13 = vmul.f32 0.1, %v8220_v29  ;;  %v11657_v0 = vpop.f32.mrb[78].mxu0  ;;  %11736 = vmatmul.mubr.f32.gmra.mrb[74].mxu1 %v8327_v54  ;;  %vm8256_vm15 = vcmp.ge.f32.partialorder %v8220_v29, 0.0 }
 0x896   : > { %v8223_v41 = vadd.f32 %v11657_v0, %v15837_v44  ;;  %v8096_v38 = vpop.f32.mrb[79].mxu0  ;;  %v8329_v18 = vsel %vm8257_vm8, %v8221_v53, %v8293_v22 }
 0x897   : > { %v8222_v40 = vadd.f32 %v15837_v44, %v8096_v38  ;;  %v8328_v57 = vsel %vm8256_vm15, %v8220_v29, %v8292_v13 }
 0x898   : > { %v8295_v26 = vmul.f32 0.1, %v8223_v41  ;;  %11738 = vmatprep.mubr.f32.mxu1 %v8328_v57  ;;  %vm8259_vm6 = vcmp.ge.f32.partialorder %v8223_v41, 0.0 }
 0x899   : > { %v8294_v32 = vmul.f32 0.1, %v8222_v40  ;;  %v11660_v36 = vpop.f32.mrb[80].mxu0  ;;  %11739 = vmatmul.mubr.f32.gmra.mrb[76].mxu1 %v8329_v18  ;;  %vm8258_vm7 = vcmp.ge.f32.partialorder %v8222_v40, 0.0 }
 0x89a   : > { %v8225_v20 = vadd.f32 %v11660_v36, %v15837_v44  ;;  %v8106_v9 = vpop.f32.mrb[81].mxu0  ;;  %v8331_v15 = vsel %vm8259_vm6, %v8223_v41, %v8295_v26 }
 0x89b   : > { %v8224_v47 = vadd.f32 %v15837_v44, %v8106_v9  ;;  %v8330_v16 = vsel %vm8258_vm7, %v8222_v40, %v8294_v32 }
 0x89c   : > { %v8297_v48 = vmul.f32 0.1, %v8225_v20  ;;  %11741 = vmatprep.mubr.f32.mxu1 %v8330_v16  ;;  %vm8261_vm5 = vcmp.ge.f32.partialorder %v8225_v20, 0.0 }
 0x89d   : > { %v8296_v28 = vmul.f32 0.1, %v8224_v47  ;;  %v11663_v31 = vpop.f32.mrb[82].mxu0  ;;  %11742 = vmatmul.mubr.f32.gmra.mrb[78].mxu1 %v8331_v15  ;;  %vm8260_vm3 = vcmp.ge.f32.partialorder %v8224_v47, 0.0 }
 0x89e   : > { %v8227_v21 = vadd.f32 %v11663_v31, %v15837_v44  ;;  %v8116_v37 = vpop.f32.mrb[83].mxu0  ;;  %v8333_v56 = vsel %vm8261_vm5, %v8225_v20, %v8297_v48 }
 0x89f   : > { %v8226_v35 = vadd.f32 %v15837_v44, %v8116_v37  ;;  %v8332_v51 = vsel %vm8260_vm3, %v8224_v47, %v8296_v28 }
 0x8a0   : > { %v8299_v3 = vmul.f32 0.1, %v8227_v21  ;;  %11744 = vmatprep.mubr.f32.mxu1 %v8332_v51  ;;  %vm8263_vm4 = vcmp.ge.f32.partialorder %v8227_v21, 0.0 }
 0x8a1   : > { %v8298_v4 = vmul.f32 0.1, %v8226_v35  ;;  %v11666_v42 = vpop.f32.mrb[84].mxu0  ;;  %11745 = vmatmul.mubr.f32.gmra.mrb[80].mxu1 %v8333_v56  ;;  %vm8262_vm1 = vcmp.ge.f32.partialorder %v8226_v35, 0.0 }
 0x8a2   : > { %v8229_v55 = vadd.f32 %v11666_v42, %v15837_v44  ;;  %v8126_v14 = vpop.f32.mrb[85].mxu0  ;;  %v8335_v27 = vsel %vm8263_vm4, %v8227_v21, %v8299_v3 }
 0x8a3   : > { %v8228_v49 = vadd.f32 %v15837_v44, %v8126_v14  ;;  %v8334_v61 = vsel %vm8262_vm1, %v8226_v35, %v8298_v4 }
 0x8a4   : > { %v8301_v50 = vmul.f32 0.1, %v8229_v55  ;;  %11747 = vmatprep.mubr.f32.mxu1 %v8334_v61  ;;  %vm8265_vm9 = vcmp.ge.f32.partialorder %v8229_v55, 0.0 }
 0x8a5   : > { %v8300_v43 = vmul.f32 0.1, %v8228_v49  ;;  %v11669_v52 = vpop.f32.mrb[86].mxu0  ;;  %11748 = vmatmul.mubr.f32.gmra.mrb[82].mxu1 %v8335_v27  ;;  %vm8264_vm11 = vcmp.ge.f32.partialorder %v8228_v49, 0.0 }
 0x8a6   : > { %v8231_v7 = vadd.f32 %v11669_v52, %v15837_v44  ;;  %v8136_v60 = vpop.f32.mrb[87].mxu0  ;;  %v8337_v39 = vsel %vm8265_vm9, %v8229_v55, %v8301_v50 }
 0x8a7   : > { %v8230_v46 = vadd.f32 %v15837_v44, %v8136_v60  ;;  %v8336_v33 = vsel %vm8264_vm11, %v8228_v49, %v8300_v43 }
 0x8a8   : > { %v8303_v2 = vmul.f32 0.1, %v8231_v7  ;;  %11750 = vmatprep.mubr.f32.mxu1 %v8336_v33  ;;  %vm8267_vm2 = vcmp.ge.f32.partialorder %v8231_v7, 0.0 }
 0x8a9   : > { %v8302_v6 = vmul.f32 0.1, %v8230_v46  ;;  %v11672_v30 = vpop.f32.mrb[88].mxu0  ;;  %11751 = vmatmul.mubr.f32.gmra.mrb[84].mxu1 %v8337_v39  ;;  %vm8266_vm0 = vcmp.ge.f32.partialorder %v8230_v46, 0.0 }
 0x8aa   : > { %v8233_v5 = vadd.f32 %v11672_v30, %v15837_v44  ;;  %v8146_v8 = vpop.f32.mrb[89].mxu0  ;;  %v8339_v12 = vsel %vm8267_vm2, %v8231_v7, %v8303_v2 }
 0x8ab   : > { %v8232_v25 = vadd.f32 %v15837_v44, %v8146_v8  ;;  %v8338_v10 = vsel %vm8266_vm0, %v8230_v46, %v8302_v6 }
 0x8ac   : > { %v8305_v17 = vmul.f32 0.1, %v8233_v5  ;;  %11753 = vmatprep.mubr.f32.mxu1 %v8338_v10  ;;  %vm8269_vm13 = vcmp.ge.f32.partialorder %v8233_v5, 0.0 }
 0x8ad   : > { %v8304_v62 = vmul.f32 0.1, %v8232_v25  ;;  %11754 = vmatmul.mubr.f32.gmra.mrb[86].mxu1 %v8339_v12  ;;  %vm8268_vm10 = vcmp.ge.f32.partialorder %v8232_v25, 0.0 }
 0x8ae   : > { %v8341_v58 = vsel %vm8269_vm13, %v8233_v5, %v8305_v17 }
 0x8af   : > { %v8340_v19 = vsel %vm8268_vm10, %v8232_v25, %v8304_v62 }
 0x8b0   : > { %11756 = vmatprep.mubr.f32.mxu1 %v8340_v19 }
 0x8b1   : > { %11757 = vmatmul.mubr.f32.gmra.mrb[88].mxu1 %v8341_v58 }
 0x940   : > { %v11707_v44 = vpop.f32.mrb[54].mxu1 }
 0x941   : > { %v8437_v24 = vadd.f32 %v11707_v44, %v15879_v45  ;;  %v8431_v23 = vpop.f32.mrb[55].mxu1 }
 0x942   : > { %v8432_v11 = vadd.f32 %v15879_v45, %v8431_v23 }
 0x943   : > { %vm8611_vm12 = vcmp.ge.f32.partialorder %v8437_v24, 0.0  ;;  %v8647_v34 = vmul.f32 0.1, %v8437_v24 }
 0x944   : > { %vm8610_vm14 = vcmp.ge.f32.partialorder %v8432_v11, 0.0  ;;  %v8646_v1 = vmul.f32 0.1, %v8432_v11  ;;  %v11710_v53 = vpop.f32.mrb[56].mxu1 }
 0x945   : > { %v8683_v59 = vsel %vm8611_vm12, %v8437_v24, %v8647_v34  ;;  %v8447_v29 = vadd.f32 %v11710_v53, %v15879_v45  ;;  %v8441_v63 = vpop.f32.mrb[57].mxu1 }
 0x946   : > { %8719 = vst [vmem:[%s15886_s24 + $0x8] sm:$0xff] %v8683_v59  ;;  %v8682_v22 = vsel %vm8610_vm14, %v8432_v11, %v8646_v1  ;;  %v8442_v54 = vadd.f32 %v15879_v45, %v8441_v63 }
 0x947   : > { %8718 = vst [vmem:[%s15886_s24] sm:$0xff] %v8682_v22  ;;  %vm8613_vm15 = vcmp.ge.f32.partialorder %v8447_v29, 0.0  ;;  %v8649_v13 = vmul.f32 0.1, %v8447_v29 }
 0x948   : > { %vm8612_vm8 = vcmp.ge.f32.partialorder %v8442_v54, 0.0  ;;  %v8648_v0 = vmul.f32 0.1, %v8442_v54  ;;  %v11713_v41 = vpop.f32.mrb[58].mxu1 }
 0x949   : > { %v8685_v38 = vsel %vm8613_vm15, %v8447_v29, %v8649_v13  ;;  %v8457_v40 = vadd.f32 %v11713_v41, %v15879_v45  ;;  %v8451_v57 = vpop.f32.mrb[59].mxu1 }
 0x94a   : > { %8721 = vst [vmem:[%s15886_s24 + $0x18] sm:$0xff] %v8685_v38  ;;  %v8684_v26 = vsel %vm8612_vm8, %v8442_v54, %v8648_v0  ;;  %v8452_v18 = vadd.f32 %v15879_v45, %v8451_v57 }
 0x94b   : > { %8720 = vst [vmem:[%s15886_s24 + $0x10] sm:$0xff] %v8684_v26  ;;  %vm8615_vm7 = vcmp.ge.f32.partialorder %v8457_v40, 0.0  ;;  %v8651_v32 = vmul.f32 0.1, %v8457_v40 }
 0x94c   : > { %vm8614_vm6 = vcmp.ge.f32.partialorder %v8452_v18, 0.0  ;;  %v8650_v36 = vmul.f32 0.1, %v8452_v18  ;;  %v11716_v20 = vpop.f32.mrb[60].mxu1 }
 0x94d   : > { %v8687_v9 = vsel %vm8615_vm7, %v8457_v40, %v8651_v32  ;;  %v8467_v47 = vadd.f32 %v11716_v20, %v15879_v45  ;;  %v8461_v16 = vpop.f32.mrb[61].mxu1 }
 0x94e   : > { %8723 = vst [vmem:[%s15886_s24 + $0x28] sm:$0xff] %v8687_v9  ;;  %v8686_v48 = vsel %vm8614_vm6, %v8452_v18, %v8650_v36  ;;  %v8462_v15 = vadd.f32 %v15879_v45, %v8461_v16 }
 0x94f   : > { %8722 = vst [vmem:[%s15886_s24 + $0x20] sm:$0xff] %v8686_v48  ;;  %vm8617_vm3 = vcmp.ge.f32.partialorder %v8467_v47, 0.0  ;;  %v8653_v28 = vmul.f32 0.1, %v8467_v47 }
 0x950   : > { %vm8616_vm5 = vcmp.ge.f32.partialorder %v8462_v15, 0.0  ;;  %v8652_v31 = vmul.f32 0.1, %v8462_v15  ;;  %v11719_v21 = vpop.f32.mrb[62].mxu1 }
 0x951   : > { %v8689_v37 = vsel %vm8617_vm3, %v8467_v47, %v8653_v28  ;;  %v8477_v35 = vadd.f32 %v11719_v21, %v15879_v45  ;;  %v8471_v51 = vpop.f32.mrb[63].mxu1 }
 0x952   : > { %8725 = vst [vmem:[%s15886_s24 + $0x38] sm:$0xff] %v8689_v37  ;;  %v8688_v3 = vsel %vm8616_vm5, %v8462_v15, %v8652_v31  ;;  %v8472_v56 = vadd.f32 %v15879_v45, %v8471_v51 }
 0x953   : > { %8724 = vst [vmem:[%s15886_s24 + $0x30] sm:$0xff] %v8688_v3  ;;  %vm8619_vm1 = vcmp.ge.f32.partialorder %v8477_v35, 0.0  ;;  %v8655_v4 = vmul.f32 0.1, %v8477_v35 }
 0x954   : > { %vm8618_vm4 = vcmp.ge.f32.partialorder %v8472_v56, 0.0  ;;  %v8654_v42 = vmul.f32 0.1, %v8472_v56  ;;  %v11722_v55 = vpop.f32.mrb[64].mxu1 }
 0x955   : > { %v8691_v14 = vsel %vm8619_vm1, %v8477_v35, %v8655_v4  ;;  %v8487_v49 = vadd.f32 %v11722_v55, %v15879_v45  ;;  %v8481_v61 = vpop.f32.mrb[65].mxu1 }
 0x956   : > { %8727 = vst [vmem:[%s15886_s24 + $0x48] sm:$0xff] %v8691_v14  ;;  %v8690_v50 = vsel %vm8618_vm4, %v8472_v56, %v8654_v42  ;;  %v8482_v27 = vadd.f32 %v15879_v45, %v8481_v61 }
 0x957   : > { %8726 = vst [vmem:[%s15886_s24 + $0x40] sm:$0xff] %v8690_v50  ;;  %vm8621_vm11 = vcmp.ge.f32.partialorder %v8487_v49, 0.0  ;;  %v8657_v43 = vmul.f32 0.1, %v8487_v49 }
 0x958   : > { %vm8620_vm9 = vcmp.ge.f32.partialorder %v8482_v27, 0.0  ;;  %v8656_v52 = vmul.f32 0.1, %v8482_v27  ;;  %v11725_v7 = vpop.f32.mrb[66].mxu1 }
 0x959   : > { %v8693_v60 = vsel %vm8621_vm11, %v8487_v49, %v8657_v43  ;;  %v8497_v46 = vadd.f32 %v11725_v7, %v15879_v45  ;;  %v8491_v33 = vpop.f32.mrb[67].mxu1 }
 0x95a   : > { %8729 = vst [vmem:[%s15886_s24 + $0x58] sm:$0xff] %v8693_v60  ;;  %v8692_v2 = vsel %vm8620_vm9, %v8482_v27, %v8656_v52  ;;  %v8492_v39 = vadd.f32 %v15879_v45, %v8491_v33 }
 0x95b   : > { %8728 = vst [vmem:[%s15886_s24 + $0x50] sm:$0xff] %v8692_v2  ;;  %vm8623_vm0 = vcmp.ge.f32.partialorder %v8497_v46, 0.0  ;;  %v8659_v6 = vmul.f32 0.1, %v8497_v46 }
 0x95c   : > { %vm8622_vm2 = vcmp.ge.f32.partialorder %v8492_v39, 0.0  ;;  %v8658_v30 = vmul.f32 0.1, %v8492_v39  ;;  %v11728_v5 = vpop.f32.mrb[68].mxu1 }
 0x95d   : > { %v8695_v8 = vsel %vm8623_vm0, %v8497_v46, %v8659_v6  ;;  %v8507_v25 = vadd.f32 %v11728_v5, %v15879_v45  ;;  %v8501_v10 = vpop.f32.mrb[69].mxu1 }
 0x95e   : > { %8731 = vst [vmem:[%s15886_s24 + $0x68] sm:$0xff] %v8695_v8  ;;  %v8694_v17 = vsel %vm8622_vm2, %v8492_v39, %v8658_v30  ;;  %v8502_v12 = vadd.f32 %v15879_v45, %v8501_v10 }
 0x95f   : > { %8730 = vst [vmem:[%s15886_s24 + $0x60] sm:$0xff] %v8694_v17  ;;  %vm8625_vm10 = vcmp.ge.f32.partialorder %v8507_v25, 0.0  ;;  %v8661_v62 = vmul.f32 0.1, %v8507_v25 }
 0x960   : > { %vm8624_vm13 = vcmp.ge.f32.partialorder %v8502_v12, 0.0  ;;  %v8660_v19 = vmul.f32 0.1, %v8502_v12  ;;  %v11731_v58 = vpop.f32.mrb[70].mxu1 }
 0x961   : > { %v8697_v44 = vsel %vm8625_vm10, %v8507_v25, %v8661_v62  ;;  %v8517_v24 = vadd.f32 %v11731_v58, %v15879_v45  ;;  %v8511_v23 = vpop.f32.mrb[71].mxu1 }
 0x962   : > { %8733 = vst [vmem:[%s15886_s24 + $0x78] sm:$0xff] %v8697_v44  ;;  %v8696_v11 = vsel %vm8624_vm13, %v8502_v12, %v8660_v19  ;;  %v8512_v34 = vadd.f32 %v15879_v45, %v8511_v23 }
 0x963   : > { %8732 = vst [vmem:[%s15886_s24 + $0x70] sm:$0xff] %v8696_v11  ;;  %vm8627_vm12 = vcmp.ge.f32.partialorder %v8517_v24, 0.0  ;;  %v8663_v1 = vmul.f32 0.1, %v8517_v24 }
 0x964   : > { %vm8626_vm14 = vcmp.ge.f32.partialorder %v8512_v34, 0.0  ;;  %v8662_v53 = vmul.f32 0.1, %v8512_v34  ;;  %v11734_v59 = vpop.f32.mrb[72].mxu1 }
 0x965   : > { %v8699_v29 = vsel %vm8627_vm12, %v8517_v24, %v8663_v1  ;;  %v8527_v63 = vadd.f32 %v11734_v59, %v15879_v45  ;;  %v8521_v22 = vpop.f32.mrb[73].mxu1 }
 0x966   : > { %8735 = vst [vmem:[%s15886_s24 + $0x88] sm:$0xff] %v8699_v29  ;;  %v8698_v54 = vsel %vm8626_vm14, %v8512_v34, %v8662_v53  ;;  %v8522_v13 = vadd.f32 %v15879_v45, %v8521_v22 }
 0x967   : > { %8734 = vst [vmem:[%s15886_s24 + $0x80] sm:$0xff] %v8698_v54  ;;  %vm8629_vm15 = vcmp.ge.f32.partialorder %v8527_v63, 0.0  ;;  %v8665_v0 = vmul.f32 0.1, %v8527_v63 }
 0x968   : > { %vm8628_vm8 = vcmp.ge.f32.partialorder %v8522_v13, 0.0  ;;  %v8664_v41 = vmul.f32 0.1, %v8522_v13  ;;  %v11737_v38 = vpop.f32.mrb[74].mxu1 }
 0x969   : > { %v8701_v40 = vsel %vm8629_vm15, %v8527_v63, %v8665_v0  ;;  %v8537_v57 = vadd.f32 %v11737_v38, %v15879_v45  ;;  %v8531_v26 = vpop.f32.mrb[75].mxu1 }
 0x96a   : > { %8737 = vst [vmem:[%s15886_s24 + $0x98] sm:$0xff] %v8701_v40  ;;  %v8700_v18 = vsel %vm8628_vm8, %v8522_v13, %v8664_v41  ;;  %v8532_v32 = vadd.f32 %v15879_v45, %v8531_v26 }
 0x96b   : > { %8736 = vst [vmem:[%s15886_s24 + $0x90] sm:$0xff] %v8700_v18  ;;  %vm8631_vm7 = vcmp.ge.f32.partialorder %v8537_v57, 0.0  ;;  %v8667_v36 = vmul.f32 0.1, %v8537_v57 }
 0x96c   : > { %vm8630_vm6 = vcmp.ge.f32.partialorder %v8532_v32, 0.0  ;;  %v8666_v20 = vmul.f32 0.1, %v8532_v32  ;;  %v11740_v9 = vpop.f32.mrb[76].mxu1 }
 0x96d   : > { %v8703_v47 = vsel %vm8631_vm7, %v8537_v57, %v8667_v36  ;;  %v8547_v16 = vadd.f32 %v11740_v9, %v15879_v45  ;;  %v8541_v48 = vpop.f32.mrb[77].mxu1 }
 0x96e   : > { %8739 = vst [vmem:[%s15886_s24 + $0xa8] sm:$0xff] %v8703_v47  ;;  %v8702_v15 = vsel %vm8630_vm6, %v8532_v32, %v8666_v20  ;;  %v8542_v28 = vadd.f32 %v15879_v45, %v8541_v48 }
 0x96f   : > { %8738 = vst [vmem:[%s15886_s24 + $0xa0] sm:$0xff] %v8702_v15  ;;  %vm8633_vm3 = vcmp.ge.f32.partialorder %v8547_v16, 0.0  ;;  %v8669_v31 = vmul.f32 0.1, %v8547_v16 }
 0x970   : > { %vm8632_vm5 = vcmp.ge.f32.partialorder %v8542_v28, 0.0  ;;  %v8668_v21 = vmul.f32 0.1, %v8542_v28  ;;  %v11743_v37 = vpop.f32.mrb[78].mxu1 }
 0x971   : > { %v8705_v35 = vsel %vm8633_vm3, %v8547_v16, %v8669_v31  ;;  %v8557_v51 = vadd.f32 %v11743_v37, %v15879_v45  ;;  %v8551_v3 = vpop.f32.mrb[79].mxu1 }
 0x972   : > { %8741 = vst [vmem:[%s15886_s24 + $0xb8] sm:$0xff] %v8705_v35  ;;  %v8704_v56 = vsel %vm8632_vm5, %v8542_v28, %v8668_v21  ;;  %v8552_v4 = vadd.f32 %v15879_v45, %v8551_v3 }
 0x973   : > { %8740 = vst [vmem:[%s15886_s24 + $0xb0] sm:$0xff] %v8704_v56  ;;  %vm8635_vm1 = vcmp.ge.f32.partialorder %v8557_v51, 0.0  ;;  %v8671_v42 = vmul.f32 0.1, %v8557_v51 }
 0x974   : > { %vm8634_vm4 = vcmp.ge.f32.partialorder %v8552_v4, 0.0  ;;  %v8670_v55 = vmul.f32 0.1, %v8552_v4  ;;  %v11746_v14 = vpop.f32.mrb[80].mxu1 }
 0x975   : > { %v8707_v49 = vsel %vm8635_vm1, %v8557_v51, %v8671_v42  ;;  %v8567_v61 = vadd.f32 %v11746_v14, %v15879_v45  ;;  %v8561_v50 = vpop.f32.mrb[81].mxu1 }
 0x976   : > { %8743 = vst [vmem:[%s15886_s24 + $0xc8] sm:$0xff] %v8707_v49  ;;  %v8706_v27 = vsel %vm8634_vm4, %v8552_v4, %v8670_v55  ;;  %v8562_v43 = vadd.f32 %v15879_v45, %v8561_v50 }
 0x977   : > { %8742 = vst [vmem:[%s15886_s24 + $0xc0] sm:$0xff] %v8706_v27  ;;  %vm8637_vm11 = vcmp.ge.f32.partialorder %v8567_v61, 0.0  ;;  %v8673_v52 = vmul.f32 0.1, %v8567_v61 }
 0x978   : > { %vm8636_vm9 = vcmp.ge.f32.partialorder %v8562_v43, 0.0  ;;  %v8672_v7 = vmul.f32 0.1, %v8562_v43  ;;  %v11749_v60 = vpop.f32.mrb[82].mxu1 }
 0x979   : > { %v8709_v46 = vsel %vm8637_vm11, %v8567_v61, %v8673_v52  ;;  %v8577_v33 = vadd.f32 %v11749_v60, %v15879_v45  ;;  %v8571_v2 = vpop.f32.mrb[83].mxu1 }
 0x97a   : > { %8745 = vst [vmem:[%s15886_s24 + $0xd8] sm:$0xff] %v8709_v46  ;;  %v8708_v39 = vsel %vm8636_vm9, %v8562_v43, %v8672_v7  ;;  %v8572_v6 = vadd.f32 %v15879_v45, %v8571_v2 }
 0x97b   : > { %8744 = vst [vmem:[%s15886_s24 + $0xd0] sm:$0xff] %v8708_v39  ;;  %vm8639_vm0 = vcmp.ge.f32.partialorder %v8577_v33, 0.0  ;;  %v8675_v30 = vmul.f32 0.1, %v8577_v33 }
 0x97c   : > { %vm8638_vm2 = vcmp.ge.f32.partialorder %v8572_v6, 0.0  ;;  %v8674_v5 = vmul.f32 0.1, %v8572_v6  ;;  %v11752_v8 = vpop.f32.mrb[84].mxu1 }
 0x97d   : > { %v8711_v25 = vsel %vm8639_vm0, %v8577_v33, %v8675_v30  ;;  %v8587_v10 = vadd.f32 %v11752_v8, %v15879_v45  ;;  %v8581_v17 = vpop.f32.mrb[85].mxu1 }
 0x97e   : > { %8747 = vst [vmem:[%s15886_s24 + $0xe8] sm:$0xff] %v8711_v25  ;;  %v8710_v12 = vsel %vm8638_vm2, %v8572_v6, %v8674_v5  ;;  %v8582_v62 = vadd.f32 %v15879_v45, %v8581_v17 }
 0x97f   : > { %8746 = vst [vmem:[%s15886_s24 + $0xe0] sm:$0xff] %v8710_v12  ;;  %vm8641_vm10 = vcmp.ge.f32.partialorder %v8587_v10, 0.0  ;;  %v8677_v19 = vmul.f32 0.1, %v8587_v10 }
 0x980   : > { %vm8640_vm13 = vcmp.ge.f32.partialorder %v8582_v62, 0.0  ;;  %v8676_v58 = vmul.f32 0.1, %v8582_v62  ;;  %v11755_v44 = vpop.f32.mrb[86].mxu1 }
 0x981   : > { %v8713_v24 = vsel %vm8641_vm10, %v8587_v10, %v8677_v19  ;;  %v8597_v23 = vadd.f32 %v11755_v44, %v15879_v45  ;;  %v8591_v11 = vpop.f32.mrb[87].mxu1 }
 0x982   : > { %8749 = vst [vmem:[%s15886_s24 + $0xf8] sm:$0xff] %v8713_v24  ;;  %v8712_v34 = vsel %vm8640_vm13, %v8582_v62, %v8676_v58  ;;  %v8592_v1 = vadd.f32 %v15879_v45, %v8591_v11 }
 0x983   : > { %8748 = vst [vmem:[%s15886_s24 + $0xf0] sm:$0xff] %v8712_v34  ;;  %vm8643_vm12 = vcmp.ge.f32.partialorder %v8597_v23, 0.0  ;;  %v8679_v53 = vmul.f32 0.1, %v8597_v23 }
 0x984   : > { %vm8642_vm14 = vcmp.ge.f32.partialorder %v8592_v1, 0.0  ;;  %v8678_v59 = vmul.f32 0.1, %v8592_v1  ;;  %v11758_v29 = vpop.f32.mrb[88].mxu1 }
 0x985   : > { %v8715_v63 = vsel %vm8643_vm12, %v8597_v23, %v8679_v53  ;;  %v8607_v22 = vadd.f32 %v11758_v29, %v15879_v45  ;;  %v8601_v54 = vpop.f32.mrb[89].mxu1 }
 0x986   : > { %8751 = vst [vmem:[%s15886_s24 + $0x108] sm:$0xff] %v8715_v63  ;;  %v8714_v13 = vsel %vm8642_vm14, %v8592_v1, %v8678_v59  ;;  %v8602_v0 = vadd.f32 %v15879_v45, %v8601_v54 }
 0x987   : > { %8750 = vst [vmem:[%s15886_s24 + $0x100] sm:$0xff] %v8714_v13  ;;  %vm8645_vm15 = vcmp.ge.f32.partialorder %v8607_v22, 0.0  ;;  %v8681_v41 = vmul.f32 0.1, %v8607_v22 }
 0x988   : > { %vm8644_vm8 = vcmp.ge.f32.partialorder %v8602_v0, 0.0  ;;  %v8680_v38 = vmul.f32 0.1, %v8602_v0 }
 0x989   : > { %v8717_v40 = vsel %vm8645_vm15, %v8607_v22, %v8681_v41 }
 0x98a   : > { %8753 = vst [vmem:[%s15886_s24 + $0x118] sm:$0xff] %v8717_v40  ;;  %v8716_v45 = vsel %vm8644_vm8, %v8602_v0, %v8680_v38 }
 0x98b   : > { %8752 = vst [vmem:[%s15886_s24 + $0x110] sm:$0xff] %v8716_v45 }
 0x98c   : > { %13198 = shalt.err (!%p13195_p11)
}
 0x98d   : > { %s13199_s15 = scalar_lea.hbm %s15960_s12, 4608  ;;  %s13203_s19 = scalar_lea.hbm %s16020_s11, 9216 }
 0x98e   : > { %p13200_p13 = scmp.ne.s32.totalorder %s15960_s12, %s13199_s15  ;;  %p13204_p6 = scmp.lt.u32.totalorder %s15960_s12, %s16020_s11 }
 0x98f   : > { %p13205_p9 = scmp.lt.u32.totalorder %s13203_s19, %s13199_s15  ;;  %p13207_p12 = scmp.lt.u32.totalorder %s13199_s15, %s15960_s12 }
 0x990   : > { %p13201_p5 = pnand %p13200_p13, %p16602_p1 }
 0x991   : > { %p13206_p10 = por %p13205_p9, %p13204_p6 }
 0x992   : > { %p13202_p0 = pneg %p13201_p5 }
 0x993   : > { %p13208_p2 = por %p13207_p12, %p13206_p10 }
 0x995   : > { %p13209_p3 = pnand %p13208_p2, %p13202_p0 }
 0x997   : > { %13212 = shalt.err (!%p13209_p3)
}
 0x998   : > { %s13263_s25 = smov 128   ;;  %s13264_s14 = smov 8  }
 0x999   : > { %13060 = dma.vmem_to_hbm [thread:$0]  (%p16602_p1), %s15962_s30, 4608, %s15960_s12, %s15968_s17, %s13263_s25, %s13263_s25, %s13264_s14  }
 0x99a PF: > { %s16603_s21 = sld [smem:[#allocation12_spill]]  ;;  %s16604_s23 = sld [smem:[#allocation16_spill]] }
 0x99b   : > { %p13077_p4 = scmp.ge.s32.totalorder %s13255_s20, 2 }
 0x9a0   : > { %s8783_s28 = sand.u32 1, %s16603_s21   ;;  %p16605_p7 = scmp.ne.s32.totalorder %s16604_s23, 0 }
 0x9a1   : > { %s8784_s13 = scalar_lea.sflag [#allocation5], %s8783_s28 }
 0x9a2   : > { %p13070_p8 = pnand %p13077_p4, %p16605_p7 }
 0x9a4   : > { %13238 = dma.done.wait (!%p13070_p8), %s8784_s13, 4608  }
 0x9a5   : > { %13240 = vsyncadd (!%p13070_p8), %s8784_s13, 4294962688  ;;  %s16606_s20 = sld [smem:[#allocation14_spill]]  ;;  %s16607_s29 = sld [smem:[#allocation13_spill]] }
 0x9a6   : > { %s16608_s19 = sld [smem:[#allocation15_spill]]  ;;  %s16609_s17 = smov %s13247_s18 }
 0x9ab   : > { %p23_p11 = scmp.ge.s32.totalorder %s16606_s20, 4   ;;  %s16610_s18 = smov %s16607_s29 }
 0x9ad   :  { %25 = sbr.rel (!%p23_p11) target bundleno = 5 (0x5), region = 124 }
 0x9b4   :  { %8789 = vsyncpa [#allocation4], 1 }
 0x9b5   :  { %8791 = vsyncpa [#allocation4 + $0x1], 1 }
 0x9b6   :  { %8792 = vsyncpa [#allocation7], 1 }
 0x9b7   :  { %8793 = vsyncpa [#allocation5], 1 }
 0x9b8   :  { %8795 = vsyncpa [#allocation5 + $0x1], 1 }

</bundles_post_ra>
